<compile_context>
chip_gen: v5e
topology: v5e:2x2
jax: 0.10.0
libtpu: 0.0.40
codegen_flags: <defaults>
</compile_context>

<pallas_src>
import jax
import jax.numpy as jnp
from jax import lax
from jax.experimental import pallas as pl
from jax.experimental.pallas import tpu as pltpu

EPS = 1e-5

# real / lane-padded channel widths
C1, C2, C3 = 95, 190, 380
C1P, C2P, C3P = 128, 256, 384

# all-resident VMEM guard: fits v7x's 64 MiB physical with headroom (v5e/v6e
# could legitimately go higher, but past this the tiled variant is needed anyway)
_VMEM_CAP = 48 << 20


# ---------------------------------------------------------------- kernel ----
def _bn_relu(h, gamma, beta, ones_rows, inv_m):
    """Training-mode BatchNorm2d (batch stats, biased var) + ReLU, fused bf16 cast.

    Row sums / sums-of-squares are computed on the (otherwise idle) MXU via
    ones(8, M) @ h_bf16 matmuls with f32 accumulation, so the VALU/XLU slots
    only carry the single normalize sweep.  gamma*rsqrt(var+eps) is folded into
    one scale.  Pad lanes have gamma=beta=0 and h==0, so they stay exactly 0.
    """
    hb = h.astype(jnp.bfloat16)
    s1 = jnp.dot(ones_rows, hb, preferred_element_type=jnp.float32)[0:1]       # (1, C)
    s2 = jnp.dot(ones_rows, hb * hb, preferred_element_type=jnp.float32)[0:1]  # (1, C)
    mean = s1 * inv_m
    var = jnp.maximum(s2 * inv_m - mean * mean, 0.0)
    scale = gamma * lax.rsqrt(var + EPS)
    shift = beta - mean * scale
    # normalize + ReLU + bf16-cast fused into one sweep (bf16 feeds next matmul)
    return jnp.maximum(h * scale + shift, 0.0).astype(jnp.bfloat16)


def _double_conv(xb, w1, g1, b1, w2, g2, b2):
    # (1x1 conv -> BN -> ReLU) * 2 on (M, C) rows.  MXU operands bf16, f32 acc.
    # Conv bias omitted: exactly cancelled by the BN batch-mean subtraction.
    m = xb.shape[0]
    inv_m = jnp.float32(1.0 / m)
    ones_rows = jnp.ones((8, m), jnp.bfloat16)
    h = jnp.dot(xb, w1, preferred_element_type=jnp.float32)
    hb = _bn_relu(h, g1, b1, ones_rows, inv_m)
    y = jnp.dot(hb, w2, preferred_element_type=jnp.float32)
    return _bn_relu(y, g2, b2, ones_rows, inv_m)


def _pool4(a):
    # 2x2 MaxPool: rows are pre-ordered so the 4 pooling phases are the 4
    # contiguous quarters of the row axis -> pure VPU max, no strided loads.
    m = a.shape[0] // 4
    return jnp.maximum(jnp.maximum(a[0 * m:1 * m], a[1 * m:2 * m]),
                       jnp.maximum(a[2 * m:3 * m], a[3 * m:4 * m]))


def _encoder_kernel(x_ref,
                    w1a_ref, g1a_ref, b1a_ref, w1b_ref, g1b_ref, b1b_ref,
                    w2a_ref, g2a_ref, b2a_ref, w2b_ref, g2b_ref, b2b_ref,
                    w3a_ref, g3a_ref, b3a_ref, w3b_ref, g3b_ref, b3b_ref,
                    o1_ref, o2_ref, o3_ref,
                    x1_scr, x2_scr, sem):
    # ---- stage 1 (inc) -------------------------------------------------------
    # NOTE: the (M, 4) LHS is lane-sparse and K=4 underutilizes the MXU; accepted
    # for cin=4 (per review) -- do not carry this pattern to larger-cin variants.
    x1 = _double_conv(x_ref[...],
                      w1a_ref[...], g1a_ref[...], b1a_ref[...],
                      w1b_ref[...], g1b_ref[...], b1b_ref[...])
    x1_scr[...] = x1
    cp1 = pltpu.make_async_copy(x1_scr, o1_ref, sem.at[0])
    cp1.start()                  # overlap o1 (largest output) writeback with stage 2/3

    # ---- stage 2 (down1 = maxpool + double conv) -----------------------------
    x2 = _double_conv(_pool4(x1),
                      w2a_ref[...], g2a_ref[...], b2a_ref[...],
                      w2b_ref[...], g2b_ref[...], b2b_ref[...])
    x2_scr[...] = x2
    cp2 = pltpu.make_async_copy(x2_scr, o2_ref, sem.at[1])
    cp2.start()                  # overlap o2 writeback with stage 3

    # ---- stage 3 (down2) -----------------------------------------------------
    x3 = _double_conv(_pool4(x2),
                      w3a_ref[...], g3a_ref[...], b3a_ref[...],
                      w3b_ref[...], g3b_ref[...], b3b_ref[...])
    o3_ref[...] = x3

    cp1.wait()
    cp2.wait()


# ---------------------------------------------------------------- wrapper ---
def _full_spec(shape):
    # whole-array block (block dims equal full array dims -> always legal).
    return pl.BlockSpec(shape, lambda i: (0,) * len(shape))


def _pad_w(w, rows, cols):
    # zero-pad a conv weight to lane-aligned (rows, cols), cast to bf16.
    out = jnp.zeros((rows, cols), jnp.bfloat16)
    return out.at[: w.shape[0], : w.shape[1]].set(w.astype(jnp.bfloat16))


def _pad_v(v, cols):
    # zero-pad gamma/beta to (1, cols); pad lanes get gamma=0 / beta=0 so padded
    # channels stay exactly 0 through BN (scale = 0*rsqrt(0+eps)) and ReLU.
    # Invariant: EPS > 0 and pad gamma/beta == 0 (do not change).
    out = jnp.zeros((1, cols), jnp.float32)
    return out.at[:, : v.shape[1]].set(v.astype(jnp.float32))


def _pad_stage(p, cin_p, cout_p):
    # conv biases (_b1/_b2) are dropped: exactly cancelled by batch-stat BN.
    w1, _b1, g1, be1, w2, _b2, g2, be2 = p
    return [_pad_w(w1, cin_p, cout_p), _pad_v(g1, cout_p), _pad_v(be1, cout_p),
            _pad_w(w2, cout_p, cout_p), _pad_v(g2, cout_p), _pad_v(be2, cout_p)]


def encoder_small_1x1(x_nchw, params):
    n, cin, h, w = x_nchw.shape
    assert h % 4 == 0 and w % 4 == 0, "two 2x2 maxpools need H, W divisible by 4"
    h4, w4 = h // 4, w // 4
    m1 = n * h * w
    m2, m3 = m1 // 4, m1 // 16

    # Explicit VMEM budget for the all-resident fused design (stage-1 activations
    # dominate: ~8 KB/row at C1P=128 incl. f32/bf16 temps) + ~2 MiB weights/slack.
    est_bytes = m1 * 8 * 1024 + (2 << 20)
    if est_bytes > _VMEM_CAP:
        # TODO(synk): M-tiled two-pass-BN variant for large N*H*W inputs.
        raise ValueError(
            f"N*H*W={m1} rows exceeds the all-resident VMEM budget "
            f"({est_bytes} > {_VMEM_CAP} bytes); needs the tiled variant")
    vmem_limit = int(max(est_bytes, 32 << 20))

    # glue: order rows by the two-level pooling-phase key so that both maxpools
    # inside the kernel are maxima of 4 contiguous row blocks.
    # key = (h%2, w%2, (h//2)%2, (w//2)%2, n, h//4, w//4)
    xt = jnp.transpose(x_nchw, (0, 2, 3, 1))                 # NCHW -> NHWC
    xt = xt.reshape(n, h4, 2, 2, w4, 2, 2, cin)              # n,h4,hb,hp,w4,wb,wp,c
    xt = jnp.transpose(xt, (3, 6, 2, 5, 0, 1, 4, 7))         # hp,wp,hb,wb,n,h4,w4,c
    x_flat = xt.reshape(m1, cin).astype(jnp.bfloat16)

    args = ([x_flat]
            + _pad_stage(params["inc"], cin, C1P)
            + _pad_stage(params["down1"], C1P, C2P)
            + _pad_stage(params["down2"], C2P, C3P))

    o1, o2, o3 = pl.pallas_call(
        _encoder_kernel,
        out_shape=(jax.ShapeDtypeStruct((m1, C1P), jnp.bfloat16),
                   jax.ShapeDtypeStruct((m2, C2P), jnp.bfloat16),
                   jax.ShapeDtypeStruct((m3, C3P), jnp.bfloat16)),
        grid=(1,),
        in_specs=[_full_spec(a.shape) for a in args],
        out_specs=(pl.BlockSpec(memory_space=pl.ANY),        # o1: manual overlapped DMA
                   pl.BlockSpec(memory_space=pl.ANY),        # o2: manual overlapped DMA
                   _full_spec((m3, C3P))),                   # o3: tiny, last, auto DMA
        scratch_shapes=[pltpu.VMEM((m1, C1P), jnp.bfloat16),
                        pltpu.VMEM((m2, C2P), jnp.bfloat16),
                        pltpu.SemaphoreType.DMA((2,))],
        compiler_params=pltpu.CompilerParams(
            dimension_semantics=("arbitrary",),
            vmem_limit_bytes=vmem_limit),
    )(*args)

    # glue: slice real channels, undo the phase ordering -> NCHW, cast to f32.
    # (bf16 HBM outputs halve this re-read; the NHWC->NCHW transpose itself is
    #  unavoidable given the module's channel-major output contract.)
    x1 = o1[:, :C1].reshape(2, 2, 2, 2, n, h4, w4, C1)       # hp,wp,hb,wb,n,h4,w4,c
    x1 = jnp.transpose(x1, (4, 7, 5, 2, 0, 6, 3, 1)).reshape(n, C1, h, w)
    x2 = o2[:, :C2].reshape(2, 2, n, h4, w4, C2)             # hb,wb,n,h4,w4,c
    x2 = jnp.transpose(x2, (2, 5, 3, 0, 4, 1)).reshape(n, C2, h // 2, w // 2)
    x3 = o3[:, :C3].reshape(n, h4, w4, C3)                   # n,h4,w4,c
    x3 = jnp.transpose(x3, (0, 3, 1, 2))
    return (x1.astype(jnp.float32), x2.astype(jnp.float32), x3.astype(jnp.float32))


# ---------------------------------------------------------------- params ----
def _init_double_conv(key, cin, cout):
    # Synthetic params, shapes match the PyTorch module: conv weight
    # (cout,cin,1,1) stored transposed as (cin,cout), conv bias (cout,),
    # BN gamma=1 / beta=0 (PyTorch defaults).
    k0, k1, k2, k3 = jax.random.split(key, 4)
    w1 = jax.random.normal(k0, (cin, cout), jnp.float32) / jnp.sqrt(float(cin))
    b1 = 0.1 * jax.random.normal(k1, (1, cout), jnp.float32)
    w2 = jax.random.normal(k2, (cout, cout), jnp.float32) / jnp.sqrt(float(cout))
    b2 = 0.1 * jax.random.normal(k3, (1, cout), jnp.float32)
    g1 = jnp.ones((1, cout), jnp.float32)
    be1 = jnp.zeros((1, cout), jnp.float32)
    g2 = jnp.ones((1, cout), jnp.float32)
    be2 = jnp.zeros((1, cout), jnp.float32)
    return (w1, b1, g1, be1, w2, b2, g2, be2)


# ------------------------------------------------------------- reference ----
def _ref_double_conv(x_flat, p):
    # plain-JAX f32 reference (includes conv bias; BN batch stats, biased var)
    w1, b1, g1, be1, w2, b2, g2, be2 = p

    def bn_relu(hh, g, be):
        mu = hh.mean(0, keepdims=True)
        var = ((hh - mu) ** 2).mean(0, keepdims=True)
        return jnp.maximum((hh - mu) / jnp.sqrt(var + EPS) * g + be, 0.0)

    hh = bn_relu(x_flat @ w1 + b1, g1, be1)
    return bn_relu(hh @ w2 + b2, g2, be2)


def _ref_encoder(x_nchw, params):
    n, cin, h, w = x_nchw.shape
    xh = jnp.transpose(x_nchw, (0, 2, 3, 1))

    def pool(a):
        nn_, hh, ww, cc = a.shape
        return a.reshape(nn_, hh // 2, 2, ww // 2, 2, cc).max(axis=(2, 4))

    y1 = _ref_double_conv(xh.reshape(-1, cin), params["inc"]).reshape(n, h, w, C1)
    p1 = pool(y1)
    y2 = _ref_double_conv(p1.reshape(-1, C1), params["down1"]).reshape(n, h // 2, w // 2, C2)
    p2 = pool(y2)
    y3 = _ref_double_conv(p2.reshape(-1, C2), params["down2"]).reshape(n, h // 4, w // 4, C3)
    tc = lambda a: jnp.transpose(a, (0, 3, 1, 2))
    return tc(y1), tc(y2), tc(y3)


# ---------------------------------------------------------------- main ------
if __name__ == "__main__":
    key = jax.random.PRNGKey(0)
    kx, ki, kd1, kd2 = jax.random.split(key, 4)

    # small shapes consistent with the module: N=2, C_in=4, 16x16 spatial
    x = jax.random.normal(kx, (2, 4, 16, 16), jnp.float32)     # NCHW

    params = {
        "inc":   _init_double_conv(ki, 4, C1),
        "down1": _init_double_conv(kd1, C1, C2),
        "down2": _init_double_conv(kd2, C2, C3),
    }

    x1, x2, x3 = jax.jit(encoder_small_1x1)(x, params)
    jax.block_until_ready((x1, x2, x3))

    assert x1.shape == (2, 95, 16, 16) and x1.dtype == jnp.float32
    assert x2.shape == (2, 190, 8, 8) and x2.dtype == jnp.float32
    assert x3.shape == (2, 380, 4, 4) and x3.dtype == jnp.float32
    assert bool(jnp.all(x1 >= 0)) and bool(jnp.all(x2 >= 0)) and bool(jnp.all(x3 >= 0))

    # numeric check vs pure-JAX f32 reference.  The kernel's accuracy contract is
    # bf16 MXU operands + bf16 outputs + MXU (bf16) BN statistics, so a loose
    # norm-relative tolerance is the real contract here.
    r1, r2, r3 = jax.jit(_ref_encoder)(x, params)
    for got, ref in ((x1, r1), (x2, r2), (x3, r3)):
        rel = jnp.linalg.norm(got - ref) / (jnp.linalg.norm(ref) + 1e-6)
        assert float(rel) < 4e-2, f"relative error too large: {float(rel)}"

    print("KERNEL_OK")
</pallas_src>

<mosaic_0001>
module attributes {stable_mosaic.version = 11 : i64} {
  func.func @_encoder_kernel(%arg0: i32, %arg1: memref<512x4xbf16, #tpu.memory_space<vmem>>, %arg2: memref<4x128xbf16, #tpu.memory_space<vmem>>, %arg3: memref<1x128xf32, #tpu.memory_space<vmem>>, %arg4: memref<1x128xf32, #tpu.memory_space<vmem>>, %arg5: memref<128x128xbf16, #tpu.memory_space<vmem>>, %arg6: memref<1x128xf32, #tpu.memory_space<vmem>>, %arg7: memref<1x128xf32, #tpu.memory_space<vmem>>, %arg8: memref<128x256xbf16, #tpu.memory_space<vmem>>, %arg9: memref<1x256xf32, #tpu.memory_space<vmem>>, %arg10: memref<1x256xf32, #tpu.memory_space<vmem>>, %arg11: memref<256x256xbf16, #tpu.memory_space<vmem>>, %arg12: memref<1x256xf32, #tpu.memory_space<vmem>>, %arg13: memref<1x256xf32, #tpu.memory_space<vmem>>, %arg14: memref<256x384xbf16, #tpu.memory_space<vmem>>, %arg15: memref<1x384xf32, #tpu.memory_space<vmem>>, %arg16: memref<1x384xf32, #tpu.memory_space<vmem>>, %arg17: memref<384x384xbf16, #tpu.memory_space<vmem>>, %arg18: memref<1x384xf32, #tpu.memory_space<vmem>>, %arg19: memref<1x384xf32, #tpu.memory_space<vmem>>, %arg20: memref<512x128xbf16, #tpu.memory_space<any>>, %arg21: memref<128x256xbf16, #tpu.memory_space<any>>, %arg22: memref<32x384xbf16, #tpu.memory_space<vmem>>, %arg23: memref<512x128xbf16, #tpu.memory_space<vmem>>, %arg24: memref<128x256xbf16, #tpu.memory_space<vmem>>, %arg25: memref<2x!tpu.dma_semaphore, #tpu.memory_space<semaphore_mem>>) attributes {dimension_semantics = [#tpu.dimension_semantics<arbitrary>], iteration_bounds = array<i64: 1>, scalar_prefetch = 0 : i64, scratch_operands = 3 : i64, tpu.core_type = #tpu.core_type<tc>, window_params = [{pipeline_mode = #tpu.pipeline_mode<synchronous>, transform_indices = @transform_0, window_bounds = array<i64: 512, 4>}, {pipeline_mode = #tpu.pipeline_mode<synchronous>, transform_indices = @transform_1, window_bounds = array<i64: 4, 128>}, {pipeline_mode = #tpu.pipeline_mode<synchronous>, transform_indices = @transform_2, window_bounds = array<i64: 1, 128>}, {pipeline_mode = #tpu.pipeline_mode<synchronous>, transform_indices = @transform_3, window_bounds = array<i64: 1, 128>}, {pipeline_mode = #tpu.pipeline_mode<synchronous>, transform_indices = @transform_4, window_bounds = array<i64: 128, 128>}, {pipeline_mode = #tpu.pipeline_mode<synchronous>, transform_indices = @transform_5, window_bounds = array<i64: 1, 128>}, {pipeline_mode = #tpu.pipeline_mode<synchronous>, transform_indices = @transform_6, window_bounds = array<i64: 1, 128>}, {pipeline_mode = #tpu.pipeline_mode<synchronous>, transform_indices = @transform_7, window_bounds = array<i64: 128, 256>}, {pipeline_mode = #tpu.pipeline_mode<synchronous>, transform_indices = @transform_8, window_bounds = array<i64: 1, 256>}, {pipeline_mode = #tpu.pipeline_mode<synchronous>, transform_indices = @transform_9, window_bounds = array<i64: 1, 256>}, {pipeline_mode = #tpu.pipeline_mode<synchronous>, transform_indices = @transform_10, window_bounds = array<i64: 256, 256>}, {pipeline_mode = #tpu.pipeline_mode<synchronous>, transform_indices = @transform_11, window_bounds = array<i64: 1, 256>}, {pipeline_mode = #tpu.pipeline_mode<synchronous>, transform_indices = @transform_12, window_bounds = array<i64: 1, 256>}, {pipeline_mode = #tpu.pipeline_mode<synchronous>, transform_indices = @transform_13, window_bounds = array<i64: 256, 384>}, {pipeline_mode = #tpu.pipeline_mode<synchronous>, transform_indices = @transform_14, window_bounds = array<i64: 1, 384>}, {pipeline_mode = #tpu.pipeline_mode<synchronous>, transform_indices = @transform_15, window_bounds = array<i64: 1, 384>}, {pipeline_mode = #tpu.pipeline_mode<synchronous>, transform_indices = @transform_16, window_bounds = array<i64: 384, 384>}, {pipeline_mode = #tpu.pipeline_mode<synchronous>, transform_indices = @transform_17, window_bounds = array<i64: 1, 384>}, {pipeline_mode = #tpu.pipeline_mode<synchronous>, transform_indices = @transform_18, window_bounds = array<i64: 1, 384>}, {}, {}, {pipeline_mode = #tpu.pipeline_mode<synchronous>, transform_indices = @transform_21, window_bounds = array<i64: 32, 384>}]} {
    %c0 = arith.constant 0 : index
    %c0_0 = arith.constant 0 : index
    %0 = vector.load %arg1[%c0, %c0_0] : memref<512x4xbf16, #tpu.memory_space<vmem>>, vector<512x4xbf16>
    %c0_1 = arith.constant 0 : index
    %c0_2 = arith.constant 0 : index
    %1 = vector.load %arg2[%c0_1, %c0_2] : memref<4x128xbf16, #tpu.memory_space<vmem>>, vector<4x128xbf16>
    %c0_3 = arith.constant 0 : index
    %c0_4 = arith.constant 0 : index
    %2 = vector.load %arg3[%c0_3, %c0_4] : memref<1x128xf32, #tpu.memory_space<vmem>>, vector<1x128xf32>
    %c0_5 = arith.constant 0 : index
    %c0_6 = arith.constant 0 : index
    %3 = vector.load %arg4[%c0_5, %c0_6] : memref<1x128xf32, #tpu.memory_space<vmem>>, vector<1x128xf32>
    %c0_7 = arith.constant 0 : index
    %c0_8 = arith.constant 0 : index
    %4 = vector.load %arg5[%c0_7, %c0_8] : memref<128x128xbf16, #tpu.memory_space<vmem>>, vector<128x128xbf16>
    %c0_9 = arith.constant 0 : index
    %c0_10 = arith.constant 0 : index
    %5 = vector.load %arg6[%c0_9, %c0_10] : memref<1x128xf32, #tpu.memory_space<vmem>>, vector<1x128xf32>
    %c0_11 = arith.constant 0 : index
    %c0_12 = arith.constant 0 : index
    %6 = vector.load %arg7[%c0_11, %c0_12] : memref<1x128xf32, #tpu.memory_space<vmem>>, vector<1x128xf32>
    %cst = arith.constant 1.000000e+00 : bf16
    %7 = vector.broadcast %cst : bf16 to vector<8x512xbf16>
    %cst_13 = arith.constant dense<0.000000e+00> : vector<512x128xf32>
    %8 = tpu.matmul %0, %1, %cst_13 {dimension_numbers = #tpu.dot_dimension_numbers<[1], [0], [0], [1], [0, 0, 1, 1], [], []>} : vector<512x4xbf16>, vector<4x128xbf16>, vector<512x128xf32> -> vector<512x128xf32>
    %9 = arith.truncf %8 : vector<512x128xf32> to vector<512x128xbf16>
    %cst_14 = arith.constant dense<0.000000e+00> : vector<8x128xf32>
    %10 = tpu.matmul %7, %9, %cst_14 {dimension_numbers = #tpu.dot_dimension_numbers<[1], [0], [0], [1], [0, 0, 1, 1], [], []>} : vector<8x512xbf16>, vector<512x128xbf16>, vector<8x128xf32> -> vector<8x128xf32>
    %11 = vector.extract_strided_slice %10 {offsets = [0, 0], sizes = [1, 128], strides = [1, 1]} : vector<8x128xf32> to vector<1x128xf32>
    %12 = arith.mulf %9, %9 : vector<512x128xbf16>
    %cst_15 = arith.constant dense<0.000000e+00> : vector<8x128xf32>
    %13 = tpu.matmul %7, %12, %cst_15 {dimension_numbers = #tpu.dot_dimension_numbers<[1], [0], [0], [1], [0, 0, 1, 1], [], []>} : vector<8x512xbf16>, vector<512x128xbf16>, vector<8x128xf32> -> vector<8x128xf32>
    %14 = vector.extract_strided_slice %13 {offsets = [0, 0], sizes = [1, 128], strides = [1, 1]} : vector<8x128xf32> to vector<1x128xf32>
    %cst_16 = arith.constant 0.001953125 : f32
    %15 = vector.broadcast %cst_16 : f32 to vector<1x128xf32>
    %16 = arith.mulf %11, %15 : vector<1x128xf32>
    %cst_17 = arith.constant 0.001953125 : f32
    %17 = vector.broadcast %cst_17 : f32 to vector<1x128xf32>
    %18 = arith.mulf %14, %17 : vector<1x128xf32>
    %19 = arith.mulf %16, %16 : vector<1x128xf32>
    %20 = arith.subf %18, %19 : vector<1x128xf32>
    %cst_18 = arith.constant 0.000000e+00 : f32
    %21 = vector.broadcast %cst_18 : f32 to vector<1x128xf32>
    %22 = arith.maximumf %20, %21 : vector<1x128xf32>
    %cst_19 = arith.constant 9.99999974E-6 : f32
    %23 = vector.broadcast %cst_19 : f32 to vector<1x128xf32>
    %24 = arith.addf %22, %23 : vector<1x128xf32>
    %25 = math.rsqrt %24 : vector<1x128xf32>
    %26 = arith.mulf %2, %25 : vector<1x128xf32>
    %27 = arith.mulf %16, %26 : vector<1x128xf32>
    %28 = arith.subf %3, %27 : vector<1x128xf32>
    %29 = vector.broadcast %26 : vector<1x128xf32> to vector<512x128xf32>
    %30 = arith.mulf %8, %29 : vector<512x128xf32>
    %31 = vector.broadcast %28 : vector<1x128xf32> to vector<512x128xf32>
    %32 = arith.addf %30, %31 : vector<512x128xf32>
    %cst_20 = arith.constant 0.000000e+00 : f32
    %33 = vector.broadcast %cst_20 : f32 to vector<512x128xf32>
    %34 = arith.maximumf %32, %33 : vector<512x128xf32>
    %35 = arith.truncf %34 : vector<512x128xf32> to vector<512x128xbf16>
    %cst_21 = arith.constant dense<0.000000e+00> : vector<512x128xf32>
    %36 = tpu.matmul %35, %4, %cst_21 {dimension_numbers = #tpu.dot_dimension_numbers<[1], [0], [0], [1], [0, 0, 1, 1], [], []>} : vector<512x128xbf16>, vector<128x128xbf16>, vector<512x128xf32> -> vector<512x128xf32>
    %37 = arith.truncf %36 : vector<512x128xf32> to vector<512x128xbf16>
    %cst_22 = arith.constant dense<0.000000e+00> : vector<8x128xf32>
    %38 = tpu.matmul %7, %37, %cst_22 {dimension_numbers = #tpu.dot_dimension_numbers<[1], [0], [0], [1], [0, 0, 1, 1], [], []>} : vector<8x512xbf16>, vector<512x128xbf16>, vector<8x128xf32> -> vector<8x128xf32>
    %39 = vector.extract_strided_slice %38 {offsets = [0, 0], sizes = [1, 128], strides = [1, 1]} : vector<8x128xf32> to vector<1x128xf32>
    %40 = arith.mulf %37, %37 : vector<512x128xbf16>
    %cst_23 = arith.constant dense<0.000000e+00> : vector<8x128xf32>
    %41 = tpu.matmul %7, %40, %cst_23 {dimension_numbers = #tpu.dot_dimension_numbers<[1], [0], [0], [1], [0, 0, 1, 1], [], []>} : vector<8x512xbf16>, vector<512x128xbf16>, vector<8x128xf32> -> vector<8x128xf32>
    %42 = vector.extract_strided_slice %41 {offsets = [0, 0], sizes = [1, 128], strides = [1, 1]} : vector<8x128xf32> to vector<1x128xf32>
    %cst_24 = arith.constant 0.001953125 : f32
    %43 = vector.broadcast %cst_24 : f32 to vector<1x128xf32>
    %44 = arith.mulf %39, %43 : vector<1x128xf32>
    %cst_25 = arith.constant 0.001953125 : f32
    %45 = vector.broadcast %cst_25 : f32 to vector<1x128xf32>
    %46 = arith.mulf %42, %45 : vector<1x128xf32>
    %47 = arith.mulf %44, %44 : vector<1x128xf32>
    %48 = arith.subf %46, %47 : vector<1x128xf32>
    %cst_26 = arith.constant 0.000000e+00 : f32
    %49 = vector.broadcast %cst_26 : f32 to vector<1x128xf32>
    %50 = arith.maximumf %48, %49 : vector<1x128xf32>
    %cst_27 = arith.constant 9.99999974E-6 : f32
    %51 = vector.broadcast %cst_27 : f32 to vector<1x128xf32>
    %52 = arith.addf %50, %51 : vector<1x128xf32>
    %53 = math.rsqrt %52 : vector<1x128xf32>
    %54 = arith.mulf %5, %53 : vector<1x128xf32>
    %55 = arith.mulf %44, %54 : vector<1x128xf32>
    %56 = arith.subf %6, %55 : vector<1x128xf32>
    %57 = vector.broadcast %54 : vector<1x128xf32> to vector<512x128xf32>
    %58 = arith.mulf %36, %57 : vector<512x128xf32>
    %59 = vector.broadcast %56 : vector<1x128xf32> to vector<512x128xf32>
    %60 = arith.addf %58, %59 : vector<512x128xf32>
    %cst_28 = arith.constant 0.000000e+00 : f32
    %61 = vector.broadcast %cst_28 : f32 to vector<512x128xf32>
    %62 = arith.maximumf %60, %61 : vector<512x128xf32>
    %63 = arith.truncf %62 : vector<512x128xf32> to vector<512x128xbf16>
    %c0_29 = arith.constant 0 : index
    %c0_30 = arith.constant 0 : index
    %64 = vector.load %arg23[%c0_29, %c0_30] : memref<512x128xbf16, #tpu.memory_space<vmem>>, vector<512x128xbf16>
    tpu.vector_store %arg23[%c0_29, %c0_30], %63 {strides = array<i32>} : memref<512x128xbf16, #tpu.memory_space<vmem>>, vector<512x128xbf16>,
    %c0_i32 = arith.constant 0 : i32
    %65 = tpu.memref_slice %arg25[%c0_i32] : memref<2x!tpu.dma_semaphore, #tpu.memory_space<semaphore_mem>> -> memref<1x!tpu.dma_semaphore, #tpu.memory_space<semaphore_mem>>
    %66 = tpu.memref_squeeze %65 : memref<1x!tpu.dma_semaphore, #tpu.memory_space<semaphore_mem>> -> memref<!tpu.dma_semaphore, #tpu.memory_space<semaphore_mem>>
    tpu.enqueue_dma source(%arg23 : memref<512x128xbf16, #tpu.memory_space<vmem>>) target(%arg20 : memref<512x128xbf16, #tpu.memory_space<any>>) target_semaphore(%66 : memref<!tpu.dma_semaphore, #tpu.memory_space<semaphore_mem>>)
    %67 = vector.extract_strided_slice %63 {offsets = [0, 0], sizes = [128, 128], strides = [1, 1]} : vector<512x128xbf16> to vector<128x128xbf16>
    %68 = vector.extract_strided_slice %63 {offsets = [128, 0], sizes = [128, 128], strides = [1, 1]} : vector<512x128xbf16> to vector<128x128xbf16>
    %69 = arith.maximumf %67, %68 : vector<128x128xbf16>
    %70 = vector.extract_strided_slice %63 {offsets = [256, 0], sizes = [128, 128], strides = [1, 1]} : vector<512x128xbf16> to vector<128x128xbf16>
    %71 = vector.extract_strided_slice %63 {offsets = [384, 0], sizes = [128, 128], strides = [1, 1]} : vector<512x128xbf16> to vector<128x128xbf16>
    %72 = arith.maximumf %70, %71 : vector<128x128xbf16>
    %73 = arith.maximumf %69, %72 : vector<128x128xbf16>
    %c0_31 = arith.constant 0 : index
    %c0_32 = arith.constant 0 : index
    %74 = vector.load %arg8[%c0_31, %c0_32] : memref<128x256xbf16, #tpu.memory_space<vmem>>, vector<128x256xbf16>
    %c0_33 = arith.constant 0 : index
    %c0_34 = arith.constant 0 : index
    %75 = vector.load %arg9[%c0_33, %c0_34] : memref<1x256xf32, #tpu.memory_space<vmem>>, vector<1x256xf32>
    %c0_35 = arith.constant 0 : index
    %c0_36 = arith.constant 0 : index
    %76 = vector.load %arg10[%c0_35, %c0_36] : memref<1x256xf32, #tpu.memory_space<vmem>>, vector<1x256xf32>
    %c0_37 = arith.constant 0 : index
    %c0_38 = arith.constant 0 : index
    %77 = vector.load %arg11[%c0_37, %c0_38] : memref<256x256xbf16, #tpu.memory_space<vmem>>, vector<256x256xbf16>
    %c0_39 = arith.constant 0 : index
    %c0_40 = arith.constant 0 : index
    %78 = vector.load %arg12[%c0_39, %c0_40] : memref<1x256xf32, #tpu.memory_space<vmem>>, vector<1x256xf32>
    %c0_41 = arith.constant 0 : index
    %c0_42 = arith.constant 0 : index
    %79 = vector.load %arg13[%c0_41, %c0_42] : memref<1x256xf32, #tpu.memory_space<vmem>>, vector<1x256xf32>
    %cst_43 = arith.constant 1.000000e+00 : bf16
    %80 = vector.broadcast %cst_43 : bf16 to vector<8x128xbf16>
    %cst_44 = arith.constant dense<0.000000e+00> : vector<128x256xf32>
    %81 = tpu.matmul %73, %74, %cst_44 {dimension_numbers = #tpu.dot_dimension_numbers<[1], [0], [0], [1], [0, 0, 1, 1], [], []>} : vector<128x128xbf16>, vector<128x256xbf16>, vector<128x256xf32> -> vector<128x256xf32>
    %82 = arith.truncf %81 : vector<128x256xf32> to vector<128x256xbf16>
    %cst_45 = arith.constant dense<0.000000e+00> : vector<8x256xf32>
    %83 = tpu.matmul %80, %82, %cst_45 {dimension_numbers = #tpu.dot_dimension_numbers<[1], [0], [0], [1], [0, 0, 1, 1], [], []>} : vector<8x128xbf16>, vector<128x256xbf16>, vector<8x256xf32> -> vector<8x256xf32>
    %84 = vector.extract_strided_slice %83 {offsets = [0, 0], sizes = [1, 256], strides = [1, 1]} : vector<8x256xf32> to vector<1x256xf32>
    %85 = arith.mulf %82, %82 : vector<128x256xbf16>
    %cst_46 = arith.constant dense<0.000000e+00> : vector<8x256xf32>
    %86 = tpu.matmul %80, %85, %cst_46 {dimension_numbers = #tpu.dot_dimension_numbers<[1], [0], [0], [1], [0, 0, 1, 1], [], []>} : vector<8x128xbf16>, vector<128x256xbf16>, vector<8x256xf32> -> vector<8x256xf32>
    %87 = vector.extract_strided_slice %86 {offsets = [0, 0], sizes = [1, 256], strides = [1, 1]} : vector<8x256xf32> to vector<1x256xf32>
    %cst_47 = arith.constant 7.812500e-03 : f32
    %88 = vector.broadcast %cst_47 : f32 to vector<1x256xf32>
    %89 = arith.mulf %84, %88 : vector<1x256xf32>
    %cst_48 = arith.constant 7.812500e-03 : f32
    %90 = vector.broadcast %cst_48 : f32 to vector<1x256xf32>
    %91 = arith.mulf %87, %90 : vector<1x256xf32>
    %92 = arith.mulf %89, %89 : vector<1x256xf32>
    %93 = arith.subf %91, %92 : vector<1x256xf32>
    %cst_49 = arith.constant 0.000000e+00 : f32
    %94 = vector.broadcast %cst_49 : f32 to vector<1x256xf32>
    %95 = arith.maximumf %93, %94 : vector<1x256xf32>
    %cst_50 = arith.constant 9.99999974E-6 : f32
    %96 = vector.broadcast %cst_50 : f32 to vector<1x256xf32>
    %97 = arith.addf %95, %96 : vector<1x256xf32>
    %98 = math.rsqrt %97 : vector<1x256xf32>
    %99 = arith.mulf %75, %98 : vector<1x256xf32>
    %100 = arith.mulf %89, %99 : vector<1x256xf32>
    %101 = arith.subf %76, %100 : vector<1x256xf32>
    %102 = vector.broadcast %99 : vector<1x256xf32> to vector<128x256xf32>
    %103 = arith.mulf %81, %102 : vector<128x256xf32>
    %104 = vector.broadcast %101 : vector<1x256xf32> to vector<128x256xf32>
    %105 = arith.addf %103, %104 : vector<128x256xf32>
    %cst_51 = arith.constant 0.000000e+00 : f32
    %106 = vector.broadcast %cst_51 : f32 to vector<128x256xf32>
    %107 = arith.maximumf %105, %106 : vector<128x256xf32>
    %108 = arith.truncf %107 : vector<128x256xf32> to vector<128x256xbf16>
    %cst_52 = arith.constant dense<0.000000e+00> : vector<128x256xf32>
    %109 = tpu.matmul %108, %77, %cst_52 {dimension_numbers = #tpu.dot_dimension_numbers<[1], [0], [0], [1], [0, 0, 1, 1], [], []>} : vector<128x256xbf16>, vector<256x256xbf16>, vector<128x256xf32> -> vector<128x256xf32>
    %110 = arith.truncf %109 : vector<128x256xf32> to vector<128x256xbf16>
    %cst_53 = arith.constant dense<0.000000e+00> : vector<8x256xf32>
    %111 = tpu.matmul %80, %110, %cst_53 {dimension_numbers = #tpu.dot_dimension_numbers<[1], [0], [0], [1], [0, 0, 1, 1], [], []>} : vector<8x128xbf16>, vector<128x256xbf16>, vector<8x256xf32> -> vector<8x256xf32>
    %112 = vector.extract_strided_slice %111 {offsets = [0, 0], sizes = [1, 256], strides = [1, 1]} : vector<8x256xf32> to vector<1x256xf32>
    %113 = arith.mulf %110, %110 : vector<128x256xbf16>
    %cst_54 = arith.constant dense<0.000000e+00> : vector<8x256xf32>
    %114 = tpu.matmul %80, %113, %cst_54 {dimension_numbers = #tpu.dot_dimension_numbers<[1], [0], [0], [1], [0, 0, 1, 1], [], []>} : vector<8x128xbf16>, vector<128x256xbf16>, vector<8x256xf32> -> vector<8x256xf32>
    %115 = vector.extract_strided_slice %114 {offsets = [0, 0], sizes = [1, 256], strides = [1, 1]} : vector<8x256xf32> to vector<1x256xf32>
    %cst_55 = arith.constant 7.812500e-03 : f32
    %116 = vector.broadcast %cst_55 : f32 to vector<1x256xf32>
    %117 = arith.mulf %112, %116 : vector<1x256xf32>
    %cst_56 = arith.constant 7.812500e-03 : f32
    %118 = vector.broadcast %cst_56 : f32 to vector<1x256xf32>
    %119 = arith.mulf %115, %118 : vector<1x256xf32>
    %120 = arith.mulf %117, %117 : vector<1x256xf32>
    %121 = arith.subf %119, %120 : vector<1x256xf32>
    %cst_57 = arith.constant 0.000000e+00 : f32
    %122 = vector.broadcast %cst_57 : f32 to vector<1x256xf32>
    %123 = arith.maximumf %121, %122 : vector<1x256xf32>
    %cst_58 = arith.constant 9.99999974E-6 : f32
    %124 = vector.broadcast %cst_58 : f32 to vector<1x256xf32>
    %125 = arith.addf %123, %124 : vector<1x256xf32>
    %126 = math.rsqrt %125 : vector<1x256xf32>
    %127 = arith.mulf %78, %126 : vector<1x256xf32>
    %128 = arith.mulf %117, %127 : vector<1x256xf32>
    %129 = arith.subf %79, %128 : vector<1x256xf32>
    %130 = vector.broadcast %127 : vector<1x256xf32> to vector<128x256xf32>
    %131 = arith.mulf %109, %130 : vector<128x256xf32>
    %132 = vector.broadcast %129 : vector<1x256xf32> to vector<128x256xf32>
    %133 = arith.addf %131, %132 : vector<128x256xf32>
    %cst_59 = arith.constant 0.000000e+00 : f32
    %134 = vector.broadcast %cst_59 : f32 to vector<128x256xf32>
    %135 = arith.maximumf %133, %134 : vector<128x256xf32>
    %136 = arith.truncf %135 : vector<128x256xf32> to vector<128x256xbf16>
    %c0_60 = arith.constant 0 : index
    %c0_61 = arith.constant 0 : index
    %137 = vector.load %arg24[%c0_60, %c0_61] : memref<128x256xbf16, #tpu.memory_space<vmem>>, vector<128x256xbf16>
    tpu.vector_store %arg24[%c0_60, %c0_61], %136 {strides = array<i32>} : memref<128x256xbf16, #tpu.memory_space<vmem>>, vector<128x256xbf16>,
    %c1_i32 = arith.constant 1 : i32
    %138 = tpu.memref_slice %arg25[%c1_i32] : memref<2x!tpu.dma_semaphore, #tpu.memory_space<semaphore_mem>> -> memref<1x!tpu.dma_semaphore, #tpu.memory_space<semaphore_mem>>
    %139 = tpu.memref_squeeze %138 : memref<1x!tpu.dma_semaphore, #tpu.memory_space<semaphore_mem>> -> memref<!tpu.dma_semaphore, #tpu.memory_space<semaphore_mem>>
    tpu.enqueue_dma source(%arg24 : memref<128x256xbf16, #tpu.memory_space<vmem>>) target(%arg21 : memref<128x256xbf16, #tpu.memory_space<any>>) target_semaphore(%139 : memref<!tpu.dma_semaphore, #tpu.memory_space<semaphore_mem>>)
    %140 = vector.extract_strided_slice %136 {offsets = [0, 0], sizes = [32, 256], strides = [1, 1]} : vector<128x256xbf16> to vector<32x256xbf16>
    %141 = vector.extract_strided_slice %136 {offsets = [32, 0], sizes = [32, 256], strides = [1, 1]} : vector<128x256xbf16> to vector<32x256xbf16>
    %142 = arith.maximumf %140, %141 : vector<32x256xbf16>
    %143 = vector.extract_strided_slice %136 {offsets = [64, 0], sizes = [32, 256], strides = [1, 1]} : vector<128x256xbf16> to vector<32x256xbf16>
    %144 = vector.extract_strided_slice %136 {offsets = [96, 0], sizes = [32, 256], strides = [1, 1]} : vector<128x256xbf16> to vector<32x256xbf16>
    %145 = arith.maximumf %143, %144 : vector<32x256xbf16>
    %146 = arith.maximumf %142, %145 : vector<32x256xbf16>
    %c0_62 = arith.constant 0 : index
    %c0_63 = arith.constant 0 : index
    %147 = vector.load %arg14[%c0_62, %c0_63] : memref<256x384xbf16, #tpu.memory_space<vmem>>, vector<256x384xbf16>
    %c0_64 = arith.constant 0 : index
    %c0_65 = arith.constant 0 : index
    %148 = vector.load %arg15[%c0_64, %c0_65] : memref<1x384xf32, #tpu.memory_space<vmem>>, vector<1x384xf32>
    %c0_66 = arith.constant 0 : index
    %c0_67 = arith.constant 0 : index
    %149 = vector.load %arg16[%c0_66, %c0_67] : memref<1x384xf32, #tpu.memory_space<vmem>>, vector<1x384xf32>
    %c0_68 = arith.constant 0 : index
    %c0_69 = arith.constant 0 : index
    %150 = vector.load %arg17[%c0_68, %c0_69] : memref<384x384xbf16, #tpu.memory_space<vmem>>, vector<384x384xbf16>
    %c0_70 = arith.constant 0 : index
    %c0_71 = arith.constant 0 : index
    %151 = vector.load %arg18[%c0_70, %c0_71] : memref<1x384xf32, #tpu.memory_space<vmem>>, vector<1x384xf32>
    %c0_72 = arith.constant 0 : index
    %c0_73 = arith.constant 0 : index
    %152 = vector.load %arg19[%c0_72, %c0_73] : memref<1x384xf32, #tpu.memory_space<vmem>>, vector<1x384xf32>
    %cst_74 = arith.constant 1.000000e+00 : bf16
    %153 = vector.broadcast %cst_74 : bf16 to vector<8x32xbf16>
    %cst_75 = arith.constant dense<0.000000e+00> : vector<32x384xf32>
    %154 = tpu.matmul %146, %147, %cst_75 {dimension_numbers = #tpu.dot_dimension_numbers<[1], [0], [0], [1], [0, 0, 1, 1], [], []>} : vector<32x256xbf16>, vector<256x384xbf16>, vector<32x384xf32> -> vector<32x384xf32>
    %155 = arith.truncf %154 : vector<32x384xf32> to vector<32x384xbf16>
    %cst_76 = arith.constant dense<0.000000e+00> : vector<8x384xf32>
    %156 = tpu.matmul %153, %155, %cst_76 {dimension_numbers = #tpu.dot_dimension_numbers<[1], [0], [0], [1], [0, 0, 1, 1], [], []>} : vector<8x32xbf16>, vector<32x384xbf16>, vector<8x384xf32> -> vector<8x384xf32>
    %157 = vector.extract_strided_slice %156 {offsets = [0, 0], sizes = [1, 384], strides = [1, 1]} : vector<8x384xf32> to vector<1x384xf32>
    %158 = arith.mulf %155, %155 : vector<32x384xbf16>
    %cst_77 = arith.constant dense<0.000000e+00> : vector<8x384xf32>
    %159 = tpu.matmul %153, %158, %cst_77 {dimension_numbers = #tpu.dot_dimension_numbers<[1], [0], [0], [1], [0, 0, 1, 1], [], []>} : vector<8x32xbf16>, vector<32x384xbf16>, vector<8x384xf32> -> vector<8x384xf32>
    %160 = vector.extract_strided_slice %159 {offsets = [0, 0], sizes = [1, 384], strides = [1, 1]} : vector<8x384xf32> to vector<1x384xf32>
    %cst_78 = arith.constant 3.125000e-02 : f32
    %161 = vector.broadcast %cst_78 : f32 to vector<1x384xf32>
    %162 = arith.mulf %157, %161 : vector<1x384xf32>
    %cst_79 = arith.constant 3.125000e-02 : f32
    %163 = vector.broadcast %cst_79 : f32 to vector<1x384xf32>
    %164 = arith.mulf %160, %163 : vector<1x384xf32>
    %165 = arith.mulf %162, %162 : vector<1x384xf32>
    %166 = arith.subf %164, %165 : vector<1x384xf32>
    %cst_80 = arith.constant 0.000000e+00 : f32
    %167 = vector.broadcast %cst_80 : f32 to vector<1x384xf32>
    %168 = arith.maximumf %166, %167 : vector<1x384xf32>
    %cst_81 = arith.constant 9.99999974E-6 : f32
    %169 = vector.broadcast %cst_81 : f32 to vector<1x384xf32>
    %170 = arith.addf %168, %169 : vector<1x384xf32>
    %171 = math.rsqrt %170 : vector<1x384xf32>
    %172 = arith.mulf %148, %171 : vector<1x384xf32>
    %173 = arith.mulf %162, %172 : vector<1x384xf32>
    %174 = arith.subf %149, %173 : vector<1x384xf32>
    %175 = vector.broadcast %172 : vector<1x384xf32> to vector<32x384xf32>
    %176 = arith.mulf %154, %175 : vector<32x384xf32>
    %177 = vector.broadcast %174 : vector<1x384xf32> to vector<32x384xf32>
    %178 = arith.addf %176, %177 : vector<32x384xf32>
    %cst_82 = arith.constant 0.000000e+00 : f32
    %179 = vector.broadcast %cst_82 : f32 to vector<32x384xf32>
    %180 = arith.maximumf %178, %179 : vector<32x384xf32>
    %181 = arith.truncf %180 : vector<32x384xf32> to vector<32x384xbf16>
    %cst_83 = arith.constant dense<0.000000e+00> : vector<32x384xf32>
    %182 = tpu.matmul %181, %150, %cst_83 {dimension_numbers = #tpu.dot_dimension_numbers<[1], [0], [0], [1], [0, 0, 1, 1], [], []>} : vector<32x384xbf16>, vector<384x384xbf16>, vector<32x384xf32> -> vector<32x384xf32>
    %183 = arith.truncf %182 : vector<32x384xf32> to vector<32x384xbf16>
    %cst_84 = arith.constant dense<0.000000e+00> : vector<8x384xf32>
    %184 = tpu.matmul %153, %183, %cst_84 {dimension_numbers = #tpu.dot_dimension_numbers<[1], [0], [0], [1], [0, 0, 1, 1], [], []>} : vector<8x32xbf16>, vector<32x384xbf16>, vector<8x384xf32> -> vector<8x384xf32>
    %185 = vector.extract_strided_slice %184 {offsets = [0, 0], sizes = [1, 384], strides = [1, 1]} : vector<8x384xf32> to vector<1x384xf32>
    %186 = arith.mulf %183, %183 : vector<32x384xbf16>
    %cst_85 = arith.constant dense<0.000000e+00> : vector<8x384xf32>
    %187 = tpu.matmul %153, %186, %cst_85 {dimension_numbers = #tpu.dot_dimension_numbers<[1], [0], [0], [1], [0, 0, 1, 1], [], []>} : vector<8x32xbf16>, vector<32x384xbf16>, vector<8x384xf32> -> vector<8x384xf32>
    %188 = vector.extract_strided_slice %187 {offsets = [0, 0], sizes = [1, 384], strides = [1, 1]} : vector<8x384xf32> to vector<1x384xf32>
    %cst_86 = arith.constant 3.125000e-02 : f32
    %189 = vector.broadcast %cst_86 : f32 to vector<1x384xf32>
    %190 = arith.mulf %185, %189 : vector<1x384xf32>
    %cst_87 = arith.constant 3.125000e-02 : f32
    %191 = vector.broadcast %cst_87 : f32 to vector<1x384xf32>
    %192 = arith.mulf %188, %191 : vector<1x384xf32>
    %193 = arith.mulf %190, %190 : vector<1x384xf32>
    %194 = arith.subf %192, %193 : vector<1x384xf32>
    %cst_88 = arith.constant 0.000000e+00 : f32
    %195 = vector.broadcast %cst_88 : f32 to vector<1x384xf32>
    %196 = arith.maximumf %194, %195 : vector<1x384xf32>
    %cst_89 = arith.constant 9.99999974E-6 : f32
    %197 = vector.broadcast %cst_89 : f32 to vector<1x384xf32>
    %198 = arith.addf %196, %197 : vector<1x384xf32>
    %199 = math.rsqrt %198 : vector<1x384xf32>
    %200 = arith.mulf %151, %199 : vector<1x384xf32>
    %201 = arith.mulf %190, %200 : vector<1x384xf32>
    %202 = arith.subf %152, %201 : vector<1x384xf32>
    %203 = vector.broadcast %200 : vector<1x384xf32> to vector<32x384xf32>
    %204 = arith.mulf %182, %203 : vector<32x384xf32>
    %205 = vector.broadcast %202 : vector<1x384xf32> to vector<32x384xf32>
    %206 = arith.addf %204, %205 : vector<32x384xf32>
    %cst_90 = arith.constant 0.000000e+00 : f32
    %207 = vector.broadcast %cst_90 : f32 to vector<32x384xf32>
    %208 = arith.maximumf %206, %207 : vector<32x384xf32>
    %209 = arith.truncf %208 : vector<32x384xf32> to vector<32x384xbf16>
    %c0_91 = arith.constant 0 : index
    %c0_92 = arith.constant 0 : index
    %210 = vector.load %arg22[%c0_91, %c0_92] : memref<32x384xbf16, #tpu.memory_space<vmem>>, vector<32x384xbf16>
    tpu.vector_store %arg22[%c0_91, %c0_92], %209 {strides = array<i32>} : memref<32x384xbf16, #tpu.memory_space<vmem>>, vector<32x384xbf16>,
    %c0_i32_93 = arith.constant 0 : i32
    %211 = tpu.memref_slice %arg25[%c0_i32_93] : memref<2x!tpu.dma_semaphore, #tpu.memory_space<semaphore_mem>> -> memref<1x!tpu.dma_semaphore, #tpu.memory_space<semaphore_mem>>
    %212 = tpu.memref_squeeze %211 : memref<1x!tpu.dma_semaphore, #tpu.memory_space<semaphore_mem>> -> memref<!tpu.dma_semaphore, #tpu.memory_space<semaphore_mem>>
    tpu.wait_dma2 semaphore(%212 : memref<!tpu.dma_semaphore, #tpu.memory_space<semaphore_mem>>) src(%arg23 : memref<512x128xbf16, #tpu.memory_space<vmem>>) dst(%arg20 : memref<512x128xbf16, #tpu.memory_space<any>>)
    %c1_i32_94 = arith.constant 1 : i32
    %213 = tpu.memref_slice %arg25[%c1_i32_94] : memref<2x!tpu.dma_semaphore, #tpu.memory_space<semaphore_mem>> -> memref<1x!tpu.dma_semaphore, #tpu.memory_space<semaphore_mem>>
    %214 = tpu.memref_squeeze %213 : memref<1x!tpu.dma_semaphore, #tpu.memory_space<semaphore_mem>> -> memref<!tpu.dma_semaphore, #tpu.memory_space<semaphore_mem>>
    tpu.wait_dma2 semaphore(%214 : memref<!tpu.dma_semaphore, #tpu.memory_space<semaphore_mem>>) src(%arg24 : memref<128x256xbf16, #tpu.memory_space<vmem>>) dst(%arg21 : memref<128x256xbf16, #tpu.memory_space<any>>)
    return
  }
  func.func @transform_0(%arg0: i32) -> (i32, i32) {
    %c0_i32 = arith.constant 0 : i32
    %c0_i32_0 = arith.constant 0 : i32
    %c0_i32_1 = arith.constant 0 : i32
    return %c0_i32, %c0_i32_0 : i32, i32
  }
  func.func @transform_1(%arg0: i32) -> (i32, i32) {
    %c0_i32 = arith.constant 0 : i32
    %c0_i32_0 = arith.constant 0 : i32
    %c0_i32_1 = arith.constant 0 : i32
    return %c0_i32, %c0_i32_0 : i32, i32
  }
  func.func @transform_2(%arg0: i32) -> (i32, i32) {
    %c0_i32 = arith.constant 0 : i32
    %c0_i32_0 = arith.constant 0 : i32
    %c0_i32_1 = arith.constant 0 : i32
    return %c0_i32, %c0_i32_0 : i32, i32
  }
  func.func @transform_3(%arg0: i32) -> (i32, i32) {
    %c0_i32 = arith.constant 0 : i32
    %c0_i32_0 = arith.constant 0 : i32
    %c0_i32_1 = arith.constant 0 : i32
    return %c0_i32, %c0_i32_0 : i32, i32
  }
  func.func @transform_4(%arg0: i32) -> (i32, i32) {
    %c0_i32 = arith.constant 0 : i32
    %c0_i32_0 = arith.constant 0 : i32
    %c0_i32_1 = arith.constant 0 : i32
    return %c0_i32, %c0_i32_0 : i32, i32
  }
  func.func @transform_5(%arg0: i32) -> (i32, i32) {
    %c0_i32 = arith.constant 0 : i32
    %c0_i32_0 = arith.constant 0 : i32
    %c0_i32_1 = arith.constant 0 : i32
    return %c0_i32, %c0_i32_0 : i32, i32
  }
  func.func @transform_6(%arg0: i32) -> (i32, i32) {
    %c0_i32 = arith.constant 0 : i32
    %c0_i32_0 = arith.constant 0 : i32
    %c0_i32_1 = arith.constant 0 : i32
    return %c0_i32, %c0_i32_0 : i32, i32
  }
  func.func @transform_7(%arg0: i32) -> (i32, i32) {
    %c0_i32 = arith.constant 0 : i32
    %c0_i32_0 = arith.constant 0 : i32
    %c0_i32_1 = arith.constant 0 : i32
    return %c0_i32, %c0_i32_0 : i32, i32
  }
  func.func @transform_8(%arg0: i32) -> (i32, i32) {
    %c0_i32 = arith.constant 0 : i32
    %c0_i32_0 = arith.constant 0 : i32
    %c0_i32_1 = arith.constant 0 : i32
    return %c0_i32, %c0_i32_0 : i32, i32
  }
  func.func @transform_9(%arg0: i32) -> (i32, i32) {
    %c0_i32 = arith.constant 0 : i32
    %c0_i32_0 = arith.constant 0 : i32
    %c0_i32_1 = arith.constant 0 : i32
    return %c0_i32, %c0_i32_0 : i32, i32
  }
  func.func @transform_10(%arg0: i32) -> (i32, i32) {
    %c0_i32 = arith.constant 0 : i32
    %c0_i32_0 = arith.constant 0 : i32
    %c0_i32_1 = arith.constant 0 : i32
    return %c0_i32, %c0_i32_0 : i32, i32
  }
  func.func @transform_11(%arg0: i32) -> (i32, i32) {
    %c0_i32 = arith.constant 0 : i32
    %c0_i32_0 = arith.constant 0 : i32
    %c0_i32_1 = arith.constant 0 : i32
    return %c0_i32, %c0_i32_0 : i32, i32
  }
  func.func @transform_12(%arg0: i32) -> (i32, i32) {
    %c0_i32 = arith.constant 0 : i32
    %c0_i32_0 = arith.constant 0 : i32
    %c0_i32_1 = arith.constant 0 : i32
    return %c0_i32, %c0_i32_0 : i32, i32
  }
  func.func @transform_13(%arg0: i32) -> (i32, i32) {
    %c0_i32 = arith.constant 0 : i32
    %c0_i32_0 = arith.constant 0 : i32
    %c0_i32_1 = arith.constant 0 : i32
    return %c0_i32, %c0_i32_0 : i32, i32
  }
  func.func @transform_14(%arg0: i32) -> (i32, i32) {
    %c0_i32 = arith.constant 0 : i32
    %c0_i32_0 = arith.constant 0 : i32
    %c0_i32_1 = arith.constant 0 : i32
    return %c0_i32, %c0_i32_0 : i32, i32
  }
  func.func @transform_15(%arg0: i32) -> (i32, i32) {
    %c0_i32 = arith.constant 0 : i32
    %c0_i32_0 = arith.constant 0 : i32
    %c0_i32_1 = arith.constant 0 : i32
    return %c0_i32, %c0_i32_0 : i32, i32
  }
  func.func @transform_16(%arg0: i32) -> (i32, i32) {
    %c0_i32 = arith.constant 0 : i32
    %c0_i32_0 = arith.constant 0 : i32
    %c0_i32_1 = arith.constant 0 : i32
    return %c0_i32, %c0_i32_0 : i32, i32
  }
  func.func @transform_17(%arg0: i32) -> (i32, i32) {
    %c0_i32 = arith.constant 0 : i32
    %c0_i32_0 = arith.constant 0 : i32
    %c0_i32_1 = arith.constant 0 : i32
    return %c0_i32, %c0_i32_0 : i32, i32
  }
  func.func @transform_18(%arg0: i32) -> (i32, i32) {
    %c0_i32 = arith.constant 0 : i32
    %c0_i32_0 = arith.constant 0 : i32
    %c0_i32_1 = arith.constant 0 : i32
    return %c0_i32, %c0_i32_0 : i32, i32
  }
  func.func @transform_21(%arg0: i32) -> (i32, i32) {
    %c0_i32 = arith.constant 0 : i32
    %c0_i32_0 = arith.constant 0 : i32
    %c0_i32_1 = arith.constant 0 : i32
    return %c0_i32, %c0_i32_0 : i32, i32
  }
}

</mosaic_0001>

<bundles_post_ra>
// kernel: encoder_small_1x1.1
= control target key start
LH: loop header
LB: loop body
LE: loop exit
PB: predicated region body
PF: predicated region fallthrough
CT: control target
= control target key end

     0   :  { %vm409_vm0 = vcmask 1041408   ;;  %vm312_vm1 = vcmask 31744   ;;  %s12406_s1 = inlined_call_operand.vmem [shape: bf16[4,128], index: 1, kind: input, shape index: {}]   ;;  %s12407_s7 = inlined_call_operand.vmem [shape: bf16[128,256], index: 7, kind: input, shape index: {}]   ;;  %s12408_s8 = inlined_call_operand.vmem [shape: f32[1,256], index: 8, kind: input, shape index: {}]   ;;  %s12409_s9 = inlined_call_operand.vmem [shape: f32[1,256], index: 9, kind: input, shape index: {}]   ;;  %s12410_s10 = inlined_call_operand.vmem [shape: bf16[256,256], index: 10, kind: input, shape index: {}]   ;;  %s12411_s11 = inlined_call_operand.vmem [shape: f32[1,256], index: 11, kind: input, shape index: {}]   ;;  %s12412_s12 = inlined_call_operand.vmem [shape: f32[1,256], index: 12, kind: input, shape index: {}]   ;;  %s12413_s13 = inlined_call_operand.vmem [shape: bf16[256,384], index: 13, kind: input, shape index: {}]   ;;  %s12414_s14 = inlined_call_operand.vmem [shape: f32[1,384], index: 14, kind: input, shape index: {}]   ;;  %s12415_s15 = inlined_call_operand.vmem [shape: f32[1,384], index: 15, kind: input, shape index: {}]   ;;  %s12416_s16 = inlined_call_operand.vmem [shape: bf16[384,384], index: 16, kind: input, shape index: {}]   ;;  %s12417_s17 = inlined_call_operand.vmem [shape: f32[1,384], index: 17, kind: input, shape index: {}]   ;;  %s12418_s18 = inlined_call_operand.vmem [shape: f32[1,384], index: 18, kind: input, shape index: {}]   ;;  %s12419_s20 = inlined_call_operand.vmem [shape: bf16[128,256], index: 20, kind: output, shape index: {1}]   ;;  %s12420_s21 = inlined_call_operand.vmem [shape: bf16[32,384], index: 21, kind: output, shape index: {2}]   ;;  %s12421_s0 = inlined_call_operand.vmem [shape: bf16[512,4], index: 0, kind: input, shape index: {}]   ;;  %s12422_s4 = inlined_call_operand.vmem [shape: bf16[128,128], index: 4, kind: input, shape index: {}]   ;;  %s12423_s2 = inlined_call_operand.vmem [shape: f32[1,128], index: 2, kind: input, shape index: {}]   ;;  %s12424_s3 = inlined_call_operand.vmem [shape: f32[1,128], index: 3, kind: input, shape index: {}]   ;;  %s12425_s5 = inlined_call_operand.vmem [shape: f32[1,128], index: 5, kind: input, shape index: {}]   ;;  %s12426_s6 = inlined_call_operand.vmem [shape: f32[1,128], index: 6, kind: input, shape index: {}]   ;;  %s12427_s19 = inlined_call_operand.vmem [shape: bf16[512,128], index: 19, kind: output, shape index: {0}]  }
   0x1   :  { %12617 = sst [smem:[#allocation60_spill]] %s12406_s1  ;;  %v6785_v2 = vld [vmem:[%s12421_s0] sm:$0xff]  ;;  %v6786_v3 = vld [vmem:[%s12421_s0 + $0x8] sm:$0xff]  ;;  %v6787_v4 = vld [vmem:[%s12421_s0 + $0x10] sm:$0xff] }
   0x2   :  { %12618 = sst [smem:[#allocation61_spill]] %s12407_s7  ;;  %v6788_v5 = vld [vmem:[%s12421_s0 + $0x18] sm:$0xff]  ;;  %v6789_v6 = vld [vmem:[%s12421_s0 + $0x20] sm:$0xff]  ;;  %v6790_v7 = vld [vmem:[%s12421_s0 + $0x28] sm:$0xff] }
   0x3   :  { %12619 = sst [smem:[#allocation62_spill]] %s12408_s8  ;;  %v6791_v8 = vld [vmem:[%s12421_s0 + $0x30] sm:$0xff]  ;;  %v6792_v9 = vld [vmem:[%s12421_s0 + $0x38] sm:$0xff]  ;;  %v6793_v10 = vld [vmem:[%s12421_s0 + $0x40] sm:$0xff] }
   0x4   :  { %12620 = sst [smem:[#allocation63_spill]] %s12409_s9  ;;  %v6794_v19 = vld [vmem:[%s12421_s0 + $0x48] sm:$0xff]  ;;  %v6795_v29 = vld [vmem:[%s12421_s0 + $0x50] sm:$0xff]  ;;  %v6796_v39 = vld [vmem:[%s12421_s0 + $0x58] sm:$0xff] }
   0x5   :  { %12621 = sst [smem:[#allocation64_spill]] %s12410_s10  ;;  %v6797_v49 = vld [vmem:[%s12421_s0 + $0x60] sm:$0xff]  ;;  %v6798_v59 = vld [vmem:[%s12421_s0 + $0x68] sm:$0xff]  ;;  %v6807_v50 = vld [vmem:[%s12421_s0 + $0xb0] sm:$0xff] }
   0x6   :  { %12622 = sst [smem:[#allocation65_spill]] %s12411_s11 }
   0x7   :  { %s12623_s26 = sld [smem:[#allocation60_spill]] }
   0xd   :  { %v131_v0 = vld [vmem:[%s12623_s26] sm:$0x3] }
   0xe   :  { %v411_v1 = vsel %vm409_vm0, %v131_v0, 0 }
   0xf   :  { %420 = vmatpush.bf16.msra.mxu0 %v411_v1 }
  0x12   :  { %6035 = vmatmul.msk.bf16.vlgmr.msra.gmra.mxu0 %vm312_vm1, %v6785_v2 }
  0x22   :  { %6036 = vmatmul.msk.bf16.gmra.mxu0 %vm312_vm1, %v6786_v3 }
  0x32   :  { %6037 = vmatmul.msk.bf16.gmra.mxu0 %vm312_vm1, %v6787_v4 }
  0x42   :  { %6038 = vmatmul.msk.bf16.gmra.mxu0 %vm312_vm1, %v6788_v5  ;;  %v6799_v5 = vld [vmem:[%s12421_s0 + $0x70] sm:$0xff] }
  0x52   :  { %6039 = vmatmul.msk.bf16.gmra.mxu0 %vm312_vm1, %v6789_v6 }
  0x62   :  { %6040 = vmatmul.msk.bf16.gmra.mxu0 %vm312_vm1, %v6790_v7 }
  0x72   :  { %6041 = vmatmul.msk.bf16.gmra.mxu0 %vm312_vm1, %v6791_v8 }
  0x82   :  { %6042 = vmatmul.msk.bf16.gmra.mxu0 %vm312_vm1, %v6792_v9 }
  0x8f   :  { %v7363_v11 = vpop.f32.mrf.mxu0 }
  0x90   :  { %v7368_v12 = vpack.c.bf16 %v7363_v11, %v7363_v11 }
  0x92   :  { %6043 = vmatmul.msk.bf16.gmra.mxu0 %vm312_vm1, %v6793_v10  ;;  %v890_v14 = vunpack.c.l.bf16 %v7368_v12 }
  0x94   :  { %v7378_v17 = vmul.f32 %v890_v14, %v890_v14 }
  0x97   :  { %v7370_v13 = vpop.f32.mrf.mxu0 }
  0x98   :  { %v7375_v15 = vpack.c.bf16 %v7370_v13, %v7370_v13 }
  0x9a   :  { %v891_v16 = vunpack.c.l.bf16 %v7375_v15 }
  0x9c   :  { %v7380_v18 = vmul.f32 %v891_v16, %v891_v16 }
  0x9f   :  { %v7387_v21 = vpop.f32.mrf.mxu0 }
  0xa0   :  { %v7392_v22 = vpack.c.bf16 %v7387_v21, %v7387_v21 }
  0xa2   :  { %6044 = vmatmul.msk.bf16.gmra.mxu0 %vm312_vm1, %v6794_v19  ;;  %v892_v24 = vunpack.c.l.bf16 %v7392_v22 }
  0xa4   :  { %v7402_v27 = vmul.f32 %v892_v24, %v892_v24 }
  0xa7   :  { %v7394_v23 = vpop.f32.mrf.mxu0 }
  0xa8   :  { %12624 = vst [vmem:[#allocation9_spill] sm:$0xff] %v7394_v23  ;;  %v7399_v25 = vpack.c.bf16 %v7394_v23, %v7394_v23 }
  0xaa   :  { %v893_v26 = vunpack.c.l.bf16 %v7399_v25 }
  0xac   :  { %v7404_v28 = vmul.f32 %v893_v26, %v893_v26  ;;  %v6800_v26 = vld [vmem:[%s12421_s0 + $0x78] sm:$0xff] }
  0xaf   :  { %v7411_v31 = vpop.f32.mrf.mxu0 }
  0xb0   :  { %12625 = vst [vmem:[#allocation10_spill] sm:$0xff] %v7411_v31  ;;  %v7416_v32 = vpack.c.bf16 %v7411_v31, %v7411_v31 }
  0xb2   :  { %6045 = vmatmul.msk.bf16.gmra.mxu0 %vm312_vm1, %v6795_v29  ;;  %v894_v34 = vunpack.c.l.bf16 %v7416_v32 }
  0xb4   :  { %v7426_v37 = vmul.f32 %v894_v34, %v894_v34 }
  0xb7   :  { %v7418_v33 = vpop.f32.mrf.mxu0 }
  0xb8   :  { %12626 = vst [vmem:[#allocation11_spill] sm:$0xff] %v7418_v33  ;;  %v7423_v35 = vpack.c.bf16 %v7418_v33, %v7418_v33 }
  0xba   :  { %v895_v36 = vunpack.c.l.bf16 %v7423_v35 }
  0xbc   :  { %v7428_v38 = vmul.f32 %v895_v36, %v895_v36 }
  0xbf   :  { %v7435_v41 = vpop.f32.mrf.mxu0 }
  0xc0   :  { %12627 = vst [vmem:[#allocation12_spill] sm:$0xff] %v7435_v41  ;;  %v7440_v42 = vpack.c.bf16 %v7435_v41, %v7435_v41 }
  0xc2   :  { %6046 = vmatmul.msk.bf16.gmra.mxu0 %vm312_vm1, %v6796_v39  ;;  %v896_v44 = vunpack.c.l.bf16 %v7440_v42 }
  0xc4   :  { %v7450_v47 = vmul.f32 %v896_v44, %v896_v44 }
  0xc7   :  { %v7442_v43 = vpop.f32.mrf.mxu0 }
  0xc8   :  { %12628 = vst [vmem:[#allocation13_spill] sm:$0xff] %v7442_v43  ;;  %v7447_v45 = vpack.c.bf16 %v7442_v43, %v7442_v43 }
  0xca   :  { %v897_v46 = vunpack.c.l.bf16 %v7447_v45 }
  0xcc   :  { %v7452_v48 = vmul.f32 %v897_v46, %v897_v46 }
  0xcf   :  { %v7459_v51 = vpop.f32.mrf.mxu0 }
  0xd0   :  { %12629 = vst [vmem:[#allocation14_spill] sm:$0xff] %v7459_v51  ;;  %v7464_v52 = vpack.c.bf16 %v7459_v51, %v7459_v51 }
  0xd2   :  { %6047 = vmatmul.msk.bf16.gmra.mxu0 %vm312_vm1, %v6797_v49  ;;  %v898_v54 = vunpack.c.l.bf16 %v7464_v52 }
  0xd4   :  { %v7471_v57 = vmul.f32 %v898_v54, %v898_v54 }
  0xd7   :  { %v7466_v53 = vpop.f32.mrf.mxu0 }
  0xd8   :  { %12630 = vst [vmem:[#allocation15_spill] sm:$0xff] %v7466_v53  ;;  %v591_v55 = vpack.c.bf16 %v7466_v53, %v7466_v53 }
  0xda   :  { %v899_v56 = vunpack.c.l.bf16 %v591_v55 }
  0xdc   :  { %v7473_v58 = vmul.f32 %v899_v56, %v899_v56 }
  0xdf   :  { %v7480_v61 = vpop.f32.mrf.mxu0 }
  0xe0   :  { %12631 = vst [vmem:[#allocation16_spill] sm:$0xff] %v7480_v61  ;;  %v592_v62 = vpack.c.bf16 %v7480_v61, %v7480_v61 }
  0xe2   :  { %6048 = vmatmul.msk.bf16.gmra.mxu0 %vm312_vm1, %v6798_v59  ;;  %v900_v0 = vunpack.c.l.bf16 %v592_v62 }
  0xe4   :  { %v7489_v3 = vmul.f32 %v900_v0, %v900_v0 }
  0xe7   :  { %v7485_v63 = vpop.f32.mrf.mxu0 }
  0xe8   :  { %12632 = vst [vmem:[#allocation17_spill] sm:$0xff] %v7485_v63  ;;  %v593_v1 = vpack.c.bf16 %v7485_v63, %v7485_v63 }
  0xea   :  { %v901_v2 = vunpack.c.l.bf16 %v593_v1  ;;  %v721_v30 = vunpack.c.l.b16 %v593_v1 }
  0xec   :  { %v7491_v4 = vmul.f32 %v901_v2, %v901_v2 }
  0xef   :  { %v7498_v7 = vpop.f32.mrf.mxu0 }
  0xf0   :  { %12633 = vst [vmem:[#allocation18_spill] sm:$0xff] %v7498_v7  ;;  %v594_v8 = vpack.c.bf16 %v7498_v7, %v7498_v7 }
  0xf2   :  { %6049 = vmatmul.msk.bf16.gmra.mxu0 %vm312_vm1, %v6799_v5  ;;  %v902_v10 = vunpack.c.l.bf16 %v594_v8 }
  0xf4   :  { %v7507_v19 = vmul.f32 %v902_v10, %v902_v10  ;;  %v6801_v10 = vld [vmem:[%s12421_s0 + $0x80] sm:$0xff] }
  0xf7   :  { %v7503_v9 = vpop.f32.mrf.mxu0 }
  0xf8   :  { %12634 = vst [vmem:[#allocation19_spill] sm:$0xff] %v7503_v9  ;;  %v595_v14 = vpack.c.bf16 %v7503_v9, %v7503_v9 }
  0xfa   :  { %v903_v16 = vunpack.c.l.bf16 %v595_v14  ;;  %v723_v0 = vunpack.c.l.b16 %v595_v14  ;;  %v720_v14 = vunpack.c.l.b16 %v592_v62  ;;  %v717_v62 = vunpack.c.l.b16 %v7447_v45 }
  0xfc   :  { %v7509_v24 = vmul.f32 %v903_v16, %v903_v16  ;;  %v722_v16 = vunpack.c.l.b16 %v594_v8  ;;  %v718_v8 = vunpack.c.l.b16 %v7464_v52 }
  0xff   :  { %v7516_v34 = vpop.f32.mrf.mxu0 }
 0x100   :  { %12635 = vst [vmem:[#allocation20_spill] sm:$0xff] %v7516_v34  ;;  %v596_v36 = vpack.c.bf16 %v7516_v34, %v7516_v34 }
 0x102   :  { %6050 = vmatmul.msk.bf16.gmra.mxu0 %vm312_vm1, %v6800_v26  ;;  %v904_v44 = vunpack.c.l.bf16 %v596_v36  ;;  %v724_v49 = vunpack.c.l.b16 %v596_v36  ;;  %v780_v36 = vpack.c.b16 %v723_v0, %v722_v16  ;;  %v716_v0 = vunpack.c.l.b16 %v7440_v42 }
 0x104   :  { %v7525_v2 = vmul.f32 %v904_v44, %v904_v44 }
 0x107   :  { %v7521_v39 = vpop.f32.mrf.mxu0 }
 0x108   :  { %12636 = vst [vmem:[#allocation21_spill] sm:$0xff] %v7521_v39  ;;  %v597_v46 = vpack.c.bf16 %v7521_v39, %v7521_v39 }
 0x10a   :  { %v725_v54 = vunpack.c.l.b16 %v597_v46  ;;  %v905_v56 = vunpack.c.l.bf16 %v597_v46  ;;  %v779_v46 = vpack.c.b16 %v721_v30, %v720_v14  ;;  %v714_v14 = vunpack.c.l.b16 %v7416_v32 }
 0x10b   :  { %v711_v32 = vunpack.c.l.b16 %v7375_v15 }
 0x10c   :  { %v781_v59 = vpack.c.b16 %v725_v54, %v724_v49  ;;  %v7527_v5 = vmul.f32 %v905_v56, %v905_v56  ;;  %v719_v49 = vunpack.c.l.b16 %v591_v55  ;;  %v777_v55 = vpack.c.b16 %v717_v62, %v716_v0 }
 0x10e   :  { %838 = vmatpush.bf16.msra.mxu1 %v781_v59  ;;  %v778_v59 = vpack.c.b16 %v719_v49, %v718_v8  ;;  %v713_v49 = vunpack.c.l.b16 %v7399_v25 }
 0x10f   :  { %v7534_v20 = vpop.f32.mrf.mxu0 }
 0x110   :  { %12637 = vst [vmem:[#allocation22_spill] sm:$0xff] %v7534_v20  ;;  %v7539_v44 = vpack.c.bf16 %v7534_v20, %v7534_v20 }
 0x112   :  { %6051 = vmatmul.msk.bf16.gmra.mxu0 %vm312_vm1, %v6801_v10  ;;  %839 = vmatpush.bf16.msra.mxu1 %v780_v36  ;;  %v906_v56 = vunpack.c.l.bf16 %v7539_v44  ;;  %v715_v10 = vunpack.c.l.b16 %v7423_v35  ;;  %v6802_v36 = vld [vmem:[%s12421_s0 + $0x88] sm:$0xff]  ;;  %v712_v35 = vunpack.c.l.b16 %v7392_v22 }
 0x114   :  { %v7553_v52 = vmul.f32 %v906_v56, %v906_v56  ;;  %v775_v56 = vpack.c.b16 %v713_v49, %v712_v35 }
 0x116   :  { %840 = vmatpush.bf16.msra.mxu1 %v779_v46  ;;  %v776_v46 = vpack.c.b16 %v715_v10, %v714_v14 }
 0x117   :  { %v7542_v54 = vpop.f32.mrf.mxu0 }
 0x118   :  { %12638 = vst [vmem:[#allocation23_spill] sm:$0xff] %v7542_v54  ;;  %v7547_v1 = vpack.c.bf16 %v7542_v54, %v7542_v54 }
 0x11a   :  { %841 = vmatpush.bf16.msra.mxu1 %v778_v59  ;;  %v907_v30 = vunpack.c.l.bf16 %v7547_v1  ;;  %v710_v59 = vunpack.c.l.b16 %v7368_v12  ;;  %v6803_v12 = vld [vmem:[%s12421_s0 + $0x90] sm:$0xff] }
 0x11c   :  { %v7555_v16 = vmul.f32 %v907_v30, %v907_v30  ;;  %v774_v30 = vpack.c.b16 %v711_v32, %v710_v59 }
 0x11e   :  { %842 = vmatpush.bf16.msra.mxu1 %v777_v55 }
 0x11f   :  { %v7563_v42 = vpop.f32.mrf.mxu0 }
 0x120   :  { %12639 = vst [vmem:[#allocation24_spill] sm:$0xff] %v7563_v42  ;;  %v7570_v8 = vpack.c.bf16 %v7563_v42, %v7563_v42 }
 0x122   :  { %6052 = vmatmul.msk.bf16.gmra.mxu0 %vm312_vm1, %v6802_v36  ;;  %843 = vmatpush.bf16.msra.mxu1 %v776_v46  ;;  %v908_v0 = vunpack.c.l.bf16 %v7570_v8 }
 0x124   :  { %v7582_v55 = vmul.f32 %v908_v0, %v908_v0  ;;  %v6804_v0 = vld [vmem:[%s12421_s0 + $0x98] sm:$0xff] }
 0x126   :  { %844 = vmatpush.bf16.msra.mxu1 %v775_v56 }
 0x127   :  { %v7574_v62 = vpop.f32.mrf.mxu0 }
 0x128   :  { %12640 = vst [vmem:[#allocation25_spill] sm:$0xff] %v7574_v62  ;;  %v7579_v25 = vpack.c.bf16 %v7574_v62, %v7574_v62 }
 0x12a   :  { %845 = vmatpush.bf16.msra.mxu1 %v774_v30  ;;  %v909_v22 = vunpack.c.l.bf16 %v7579_v25 }
 0x12c   :  { %v7584_v10 = vmul.f32 %v909_v22, %v909_v22 }
 0x12f   :  { %v7591_v36 = vpop.f32.mrf.mxu0 }
 0x130   :  { %12641 = vst [vmem:[#allocation26_spill] sm:$0xff] %v7591_v36  ;;  %v7596_v14 = vpack.c.bf16 %v7591_v36, %v7591_v36 }
 0x132   :  { %6053 = vmatmul.msk.bf16.gmra.mxu0 %vm312_vm1, %v6803_v12  ;;  %v910_v49 = vunpack.c.l.bf16 %v7596_v14 }
 0x134   :  { %v7606_v32 = vmul.f32 %v910_v49, %v910_v49 }
 0x137   :  { %v7598_v46 = vpop.f32.mrf.mxu0 }
 0x138   :  { %12642 = vst [vmem:[#allocation27_spill] sm:$0xff] %v7598_v46  ;;  %v7603_v35 = vpack.c.bf16 %v7598_v46, %v7598_v46 }
 0x13a   :  { %v911_v56 = vunpack.c.l.bf16 %v7603_v35 }
 0x13c   :  { %v7608_v59 = vmul.f32 %v911_v56, %v911_v56 }
 0x13f   :  { %v7615_v22 = vpop.f32.mrf.mxu0 }
 0x140   :  { %12643 = vst [vmem:[#allocation28_spill] sm:$0xff] %v7615_v22  ;;  %v7620_v12 = vpack.c.bf16 %v7615_v22, %v7615_v22 }
 0x142   :  { %6054 = vmatmul.msk.bf16.gmra.mxu0 %vm312_vm1, %v6804_v0  ;;  %v912_v49 = vunpack.c.l.bf16 %v7620_v12  ;;  %v6805_v0 = vld [vmem:[%s12421_s0 + $0xa0] sm:$0xff] }
 0x144   :  { %v7630_v40 = vmul.f32 %v912_v49, %v912_v49 }
 0x147   :  { %v7622_v45 = vpop.f32.mrf.mxu0 }
 0x148   :  { %12644 = vst [vmem:[#allocation29_spill] sm:$0xff] %v7622_v45  ;;  %v7627_v56 = vpack.c.bf16 %v7622_v45, %v7622_v45 }
 0x14a   :  { %v913_v15 = vunpack.c.l.bf16 %v7627_v56 }
 0x14c   :  { %v7632_v30 = vmul.f32 %v913_v15, %v913_v15 }
 0x14f   :  { %v7639_v60 = vpop.f32.mrf.mxu0 }
 0x150   :  { %12645 = vst [vmem:[#allocation30_spill] sm:$0xff] %v7639_v60  ;;  %v7644_v6 = vpack.c.bf16 %v7639_v60, %v7639_v60 }
 0x152   :  { %6055 = vmatmul.msk.bf16.gmra.mxu0 %vm312_vm1, %v6805_v0  ;;  %v914_v15 = vunpack.c.l.bf16 %v7644_v6  ;;  %v6806_v0 = vld [vmem:[%s12421_s0 + $0xa8] sm:$0xff] }
 0x154   :  { %v7651_v45 = vmul.f32 %v914_v15, %v914_v15 }
 0x157   :  { %v7646_v29 = vpop.f32.mrf.mxu0 }
 0x158   :  { %12646 = vst [vmem:[#allocation31_spill] sm:$0xff] %v7646_v29  ;;  %v607_v49 = vpack.c.bf16 %v7646_v29, %v7646_v29 }
 0x15a   :  { %v915_v26 = vunpack.c.l.bf16 %v607_v49 }
 0x15c   :  { %v7653_v22 = vmul.f32 %v915_v26, %v915_v26 }
 0x15f   :  { %v7660_v60 = vpop.f32.mrf.mxu0 }
 0x160   :  { %12647 = vst [vmem:[#allocation32_spill] sm:$0xff] %v7660_v60  ;;  %v608_v46 = vpack.c.bf16 %v7660_v60, %v7660_v60 }
 0x162   :  { %6056 = vmatmul.msk.bf16.gmra.mxu0 %vm312_vm1, %v6806_v0  ;;  %v916_v15 = vunpack.c.l.bf16 %v608_v46  ;;  %v6808_v0 = vld [vmem:[%s12421_s0 + $0xb8] sm:$0xff] }
 0x164   :  { %v7669_v62 = vmul.f32 %v916_v15, %v916_v15 }
 0x167   :  { %v7665_v29 = vpop.f32.mrf.mxu0 }
 0x168   :  { %12648 = vst [vmem:[#allocation33_spill] sm:$0xff] %v7665_v29  ;;  %v609_v26 = vpack.c.bf16 %v7665_v29, %v7665_v29 }
 0x16a   :  { %v917_v36 = vunpack.c.l.bf16 %v609_v26 }
 0x16c   :  { %v7671_v42 = vmul.f32 %v917_v36, %v917_v36 }
 0x16f   :  { %v7678_v54 = vpop.f32.mrf.mxu0 }
 0x170   :  { %12649 = vst [vmem:[#allocation34_spill] sm:$0xff] %v7678_v54  ;;  %v610_v60 = vpack.c.bf16 %v7678_v54, %v7678_v54 }
 0x172   :  { %6057 = vmatmul.msk.bf16.gmra.mxu0 %vm312_vm1, %v6807_v50  ;;  %v918_v15 = vunpack.c.l.bf16 %v610_v60 }
 0x174   :  { %v7687_v39 = vmul.f32 %v918_v15, %v918_v15 }
 0x177   :  { %v7683_v29 = vpop.f32.mrf.mxu0 }
 0x178   :  { %12650 = vst [vmem:[#allocation35_spill] sm:$0xff] %v7683_v29  ;;  %v611_v36 = vpack.c.bf16 %v7683_v29, %v7683_v29 }
 0x17a   :  { %v919_v20 = vunpack.c.l.bf16 %v611_v36  ;;  %v739_v51 = vunpack.c.l.b16 %v611_v36 }
 0x17c   :  { %v7689_v34 = vmul.f32 %v919_v20, %v919_v20 }
 0x17f   :  { %v7696_v9 = vpop.f32.mrf.mxu0 }
 0x180   :  { %12651 = vst [vmem:[#allocation36_spill] sm:$0xff] %v7696_v9  ;;  %v612_v54 = vpack.c.bf16 %v7696_v9, %v7696_v9  ;;  %v738_v9 = vunpack.c.l.b16 %v610_v60  ;;  %v734_v60 = vunpack.c.l.b16 %v7644_v6  ;;  %v731_v6 = vunpack.c.l.b16 %v7603_v35 }
 0x181   :  { %v728_v35 = vunpack.c.l.b16 %v7570_v8 }
 0x182   :  { %6058 = vmatmul.msk.bf16.gmra.mxu0 %vm312_vm1, %v6808_v0  ;;  %v920_v15 = vunpack.c.l.bf16 %v612_v54  ;;  %v740_v7 = vunpack.c.l.b16 %v612_v54  ;;  %v6809_v0 = vld [vmem:[%s12421_s0 + $0xc0] sm:$0xff]  ;;  %v788_v54 = vpack.c.b16 %v739_v51, %v738_v9 }
 0x184   :  { %v7705_v43 = vmul.f32 %v920_v15, %v920_v15 }
 0x187   :  { %v7701_v29 = vpop.f32.mrf.mxu0 }
 0x188   :  { %12652 = vst [vmem:[#allocation37_spill] sm:$0xff] %v7701_v29  ;;  %v613_v20 = vpack.c.bf16 %v7701_v29, %v7701_v29  ;;  %v737_v29 = vunpack.c.l.b16 %v609_v26 }
 0x18a   :  { %v741_v63 = vunpack.c.l.b16 %v613_v20  ;;  %v921_v61 = vunpack.c.l.bf16 %v613_v20 }
 0x18c   :  { %v789_v53 = vpack.c.b16 %v741_v63, %v740_v7  ;;  %v7707_v50 = vmul.f32 %v921_v61, %v921_v61  ;;  %v736_v63 = vunpack.c.l.b16 %v608_v46  ;;  %v735_v7 = vunpack.c.l.b16 %v607_v49 }
 0x18d   :  { %v733_v46 = vunpack.c.l.b16 %v7627_v56 }
 0x18e   :  { %851 = vmatpush.bf16.msra.mxu2 %v789_v53  ;;  %v787_v53 = vpack.c.b16 %v737_v29, %v736_v63  ;;  %v786_v9 = vpack.c.b16 %v735_v7, %v734_v60  ;;  %v732_v29 = vunpack.c.l.b16 %v7620_v12  ;;  %v730_v63 = vunpack.c.l.b16 %v7596_v14 }
 0x18f   :  { %v7714_v33 = vpop.f32.mrf.mxu0  ;;  %v729_v7 = vunpack.c.l.b16 %v7579_v25  ;;  %v727_v14 = vunpack.c.l.b16 %v7547_v1 }
 0x190   :  { %12653 = vst [vmem:[#allocation38_spill] sm:$0xff] %v7714_v33  ;;  %v7719_v61 = vpack.c.bf16 %v7714_v33, %v7714_v33  ;;  %v785_v20 = vpack.c.b16 %v733_v46, %v732_v29  ;;  %v784_v12 = vpack.c.b16 %v731_v6, %v730_v63 }
 0x192   :  { %6059 = vmatmul.msk.bf16.gmra.mxu0 %vm312_vm1, %v6809_v0  ;;  %852 = vmatpush.bf16.msra.mxu2 %v788_v54  ;;  %v922_v15 = vunpack.c.l.bf16 %v7719_v61  ;;  %v6810_v54 = vld [vmem:[%s12421_s0 + $0xc8] sm:$0xff] }
 0x194   :  { %v7732_v49 = vmul.f32 %v922_v15, %v922_v15  ;;  %v783_v15 = vpack.c.b16 %v729_v7, %v728_v35  ;;  %v12662_v35 = vpack.c.bf16 %v7473_v58, %v7471_v57  ;;  %v6812_v57 = vld [vmem:[%s12421_s0 + $0xd8] sm:$0xff]  ;;  %v6815_v58 = vld [vmem:[%s12421_s0 + $0xf0] sm:$0xff] }
 0x196   :  { %853 = vmatpush.bf16.msra.mxu2 %v787_v53 }
 0x197   :  { %v7722_v36 = vpop.f32.mrf.mxu0 }
 0x198   :  { %12654 = vst [vmem:[#allocation39_spill] sm:$0xff] %v7722_v36  ;;  %v7727_v51 = vpack.c.bf16 %v7722_v36, %v7722_v36 }
 0x19a   :  { %v923_v26 = vunpack.c.l.bf16 %v7727_v51  ;;  %854 = vmatpush.bf16.msra.mxu2 %v786_v9  ;;  %v726_v9 = vunpack.c.l.b16 %v7539_v44  ;;  %v6811_v44 = vld [vmem:[%s12421_s0 + $0xd0] sm:$0xff] }
 0x19c   :  { %v7735_v0 = vmul.f32 %v923_v26, %v923_v26  ;;  %v782_v29 = vpack.c.b16 %v727_v14, %v726_v9 }
 0x19e   :  { %855 = vmatpush.bf16.msra.mxu2 %v785_v20  ;;  %v12657_v20 = vpack.c.bf16 %v7527_v5, %v7525_v2  ;;  %v12660_v2 = vpack.c.bf16 %v7491_v4, %v7489_v3  ;;  %v12663_v3 = vpack.c.bf16 %v7452_v48, %v7450_v47  ;;  %v12666_v47 = vpack.c.bf16 %v7404_v28, %v7402_v27 }
 0x19f   :  { %v7743_v53 = vpop.f32.mrf.mxu0 }
 0x1a0   :  { %12655 = vst [vmem:[#allocation40_spill] sm:$0xff] %v7743_v53  ;;  %v7750_v60 = vpack.c.bf16 %v7743_v53, %v7743_v53 }
 0x1a2   :  { %6060 = vmatmul.msk.bf16.gmra.mxu0 %vm312_vm1, %v6810_v54  ;;  %856 = vmatpush.bf16.msra.mxu2 %v784_v12  ;;  %v924_v26 = vunpack.c.l.bf16 %v7750_v60  ;;  %v12659_v12 = vpack.c.bf16 %v7509_v24, %v7507_v19 }
 0x1a4   :  { %v7765_v1 = vmul.f32 %v924_v26, %v924_v26  ;;  %v12665_v26 = vpack.c.bf16 %v7428_v38, %v7426_v37 }
 0x1a6   :  { %857 = vmatpush.bf16.msra.mxu2 %v783_v15 }
 0x1a7   :  { %v7754_v46 = vpop.f32.mrf.mxu0 }
 0x1a8   :  { %12656 = vst [vmem:[#allocation41_spill] sm:$0xff] %v7754_v46  ;;  %v7759_v25 = vpack.c.bf16 %v7754_v46, %v7754_v46 }
 0x1aa   :  { %v925_v8 = vunpack.c.l.bf16 %v7759_v25  ;;  %858 = vmatpush.bf16.msra.mxu2 %v782_v29 }
 0x1ac   :  { %v7767_v6 = vmul.f32 %v925_v8, %v925_v8  ;;  %v12668_v8 = vpack.c.bf16 %v7380_v18, %v7378_v17 }
 0x1ae   :  { %1050 = vmatpush.bf16.msrb.mxu2 %v12657_v20 }
 0x1af   :  { %v7774_v63 = vpop.f32.mrf.mxu0 }
 0x1b0   :  { %12658 = vst [vmem:[#allocation42_spill] sm:$0xff] %v7774_v63  ;;  %v7785_v5 = vpack.c.bf16 %v7774_v63, %v7774_v63 }
 0x1b2   :  { %1051 = vmatpush.bf16.msrb.mxu2 %v12659_v12  ;;  %6061 = vmatmul.msk.bf16.gmra.mxu0 %vm312_vm1, %v6811_v44  ;;  %v926_v15 = vunpack.c.l.bf16 %v7785_v5  ;;  %v6813_v44 = vld [vmem:[%s12421_s0 + $0xe0] sm:$0xff] }
 0x1b4   :  { %v7801_v4 = vmul.f32 %v926_v15, %v926_v15 }
 0x1b6   :  { %1052 = vmatpush.bf16.msrb.mxu2 %v12660_v2 }
 0x1b7   :  { %v7787_v7 = vpop.f32.mrf.mxu0 }
 0x1b8   :  { %12661 = vst [vmem:[#allocation43_spill] sm:$0xff] %v7787_v7  ;;  %v7795_v19 = vpack.c.bf16 %v7787_v7, %v7787_v7 }
 0x1ba   :  { %1053 = vmatpush.bf16.msrb.mxu2 %v12662_v35  ;;  %v927_v24 = vunpack.c.l.bf16 %v7795_v19 }
 0x1bc   :  { %v7803_v14 = vmul.f32 %v927_v24, %v927_v24 }
 0x1be   :  { %1054 = vmatpush.bf16.msrb.mxu2 %v12663_v3 }
 0x1bf   :  { %v7810_v9 = vpop.f32.mrf.mxu0 }
 0x1c0   :  { %12664 = vst [vmem:[#allocation44_spill] sm:$0xff] %v7810_v9  ;;  %v7821_v48 = vpack.c.bf16 %v7810_v9, %v7810_v9 }
 0x1c2   :  { %1055 = vmatpush.bf16.msrb.mxu2 %v12665_v26  ;;  %6062 = vmatmul.msk.bf16.gmra.mxu0 %vm312_vm1, %v6812_v57  ;;  %v928_v20 = vunpack.c.l.bf16 %v7821_v48  ;;  %v6814_v26 = vld [vmem:[%s12421_s0 + $0xe8] sm:$0xff] }
 0x1c4   :  { %v7834_v27 = vmul.f32 %v928_v20, %v928_v20 }
 0x1c6   :  { %1056 = vmatpush.bf16.msrb.mxu2 %v12666_v47 }
 0x1c7   :  { %v7823_v29 = vpop.f32.mrf.mxu0 }
 0x1c8   :  { %12667 = vst [vmem:[#allocation45_spill] sm:$0xff] %v7823_v29  ;;  %v7831_v37 = vpack.c.bf16 %v7823_v29, %v7823_v29 }
 0x1ca   :  { %1057 = vmatpush.bf16.msrb.mxu2 %v12668_v8  ;;  %v929_v38 = vunpack.c.l.bf16 %v7831_v37 }
 0x1cc   :  { %v7836_v28 = vmul.f32 %v929_v38, %v929_v38 }
 0x1cf   :  { %v7843_v18 = vpop.f32.mrf.mxu0 }
 0x1d0   :  { %12669 = vst [vmem:[#allocation46_spill] sm:$0xff] %v7843_v18  ;;  %v622_v12 = vpack.c.bf16 %v7843_v18, %v7843_v18 }
 0x1d2   :  { %6063 = vmatmul.msk.bf16.gmra.mxu0 %vm312_vm1, %v6813_v44  ;;  %v930_v35 = vunpack.c.l.bf16 %v622_v12 }
 0x1d4   :  { %v7852_v3 = vmul.f32 %v930_v35, %v930_v35 }
 0x1d7   :  { %v7848_v2 = vpop.f32.mrf.mxu0 }
 0x1d8   :  { %12670 = vst [vmem:[#allocation47_spill] sm:$0xff] %v7848_v2  ;;  %v623_v15 = vpack.c.bf16 %v7848_v2, %v7848_v2 }
 0x1da   :  { %v931_v24 = vunpack.c.l.bf16 %v623_v15 }
 0x1dc   :  { %v7854_v57 = vmul.f32 %v931_v24, %v931_v24 }
 0x1df   :  { %v7861_v8 = vpop.f32.mrf.mxu0 }
 0x1e0   :  { %12671 = vst [vmem:[#allocation48_spill] sm:$0xff] %v7861_v8  ;;  %v624_v20 = vpack.c.bf16 %v7861_v8, %v7861_v8 }
 0x1e2   :  { %6064 = vmatmul.msk.bf16.gmra.mxu0 %vm312_vm1, %v6814_v26  ;;  %v932_v44 = vunpack.c.l.bf16 %v624_v20  ;;  %v6816_v26 = vld [vmem:[%s12421_s0 + $0xf8] sm:$0xff] }
 0x1e4   :  { %v7870_v56 = vmul.f32 %v932_v44, %v932_v44 }
 0x1e7   :  { %v7866_v38 = vpop.f32.mrf.mxu0 }
 0x1e8   :  { %12672 = vst [vmem:[#allocation49_spill] sm:$0xff] %v7866_v38  ;;  %v625_v35 = vpack.c.bf16 %v7866_v38, %v7866_v38 }
 0x1ea   :  { %v933_v24 = vunpack.c.l.bf16 %v625_v35  ;;  %v753_v31 = vunpack.c.l.b16 %v625_v35 }
 0x1ec   :  { %v7872_v54 = vmul.f32 %v933_v24, %v933_v24 }
 0x1ef   :  { %v7879_v17 = vpop.f32.mrf.mxu0 }
 0x1f0   :  { %12673 = vst [vmem:[#allocation50_spill] sm:$0xff] %v7879_v17  ;;  %v626_v47 = vpack.c.bf16 %v7879_v17, %v7879_v17 }
 0x1f2   :  { %6065 = vmatmul.msk.bf16.gmra.mxu0 %vm312_vm1, %v6815_v58  ;;  %v934_v44 = vunpack.c.l.bf16 %v626_v47 }
 0x1f4   :  { %v7888_v8 = vmul.f32 %v934_v44, %v934_v44 }
 0x1f7   :  { %v7884_v41 = vpop.f32.mrf.mxu0 }
 0x1f8   :  { %12674 = vst [vmem:[#allocation51_spill] sm:$0xff] %v7884_v41  ;;  %v627_v24 = vpack.c.bf16 %v7884_v41, %v7884_v41 }
 0x1fa   :  { %v935_v38 = vunpack.c.l.bf16 %v627_v24  ;;  %v755_v53 = vunpack.c.l.b16 %v627_v24 }
 0x1fc   :  { %v7890_v2 = vmul.f32 %v935_v38, %v935_v38 }
 0x1ff   :  { %v7897_v18 = vpop.f32.mrf.mxu0 }
 0x200   :  { %12675 = vst [vmem:[#allocation52_spill] sm:$0xff] %v7897_v18  ;;  %v628_v17 = vpack.c.bf16 %v7897_v18, %v7897_v18  ;;  %v754_v18 = vunpack.c.l.b16 %v626_v47  ;;  %v747_v47 = vunpack.c.l.b16 %v7795_v19 }
 0x202   :  { %6066 = vmatmul.msk.bf16.gmra.mxu0 %vm312_vm1, %v6816_v26  ;;  %v936_v44 = vunpack.c.l.bf16 %v628_v17  ;;  %v756_v9 = vunpack.c.l.b16 %v628_v17  ;;  %v796_v33 = vpack.c.b16 %v755_v53, %v754_v18  ;;  %v751_v17 = vunpack.c.l.b16 %v623_v15 }
 0x203   :  { %v746_v53 = vunpack.c.l.b16 %v7785_v5  ;;  %v12677_v5 = vpack.c.bf16 %v7707_v50, %v7705_v43  ;;  %v12681_v43 = vpack.c.bf16 %v7632_v30, %v7630_v40 }
 0x204   :  { %v7906_v63 = vmul.f32 %v936_v44, %v936_v44  ;;  %v750_v44 = vunpack.c.l.b16 %v622_v12 }
 0x207   :  { %v7902_v41 = vpop.f32.mrf.mxu0 }
 0x208   :  { %12676 = vst [vmem:[#allocation53_spill] sm:$0xff] %v7902_v41  ;;  %v629_v38 = vpack.c.bf16 %v7902_v41, %v7902_v41  ;;  %v752_v41 = vunpack.c.l.b16 %v624_v20 }
 0x20a   :  { %v937_v29 = vunpack.c.l.bf16 %v629_v38  ;;  %v757_v7 = vunpack.c.l.b16 %v629_v38  ;;  %v795_v23 = vpack.c.b16 %v753_v31, %v752_v41  ;;  %v792_v31 = vpack.c.b16 %v747_v47, %v746_v53 }
 0x20b   :  { %v744_v41 = vunpack.c.l.b16 %v7750_v60 }
 0x20c   :  { %v7908_v46 = vmul.f32 %v937_v29, %v937_v29  ;;  %v797_v58 = vpack.c.b16 %v757_v7, %v756_v9  ;;  %v794_v29 = vpack.c.b16 %v751_v17, %v750_v44  ;;  %v749_v7 = vunpack.c.l.b16 %v7831_v37 }
 0x20d   :  { %v748_v9 = vunpack.c.l.b16 %v7821_v48  ;;  %v743_v37 = vunpack.c.l.b16 %v7727_v51  ;;  %v742_v48 = vunpack.c.l.b16 %v7719_v61  ;;  %v12679_v51 = vpack.c.bf16 %v7671_v42, %v7669_v62 }
 0x20e   :  { %v1041_v26 = vpack.c.bf16 %v7908_v46, %v7906_v63  ;;  %864 = vmatpush.bf16.msra.mxu3 %v797_v58  ;;  %v12680_v61 = vpack.c.bf16 %v7653_v22, %v7651_v45  ;;  %v12684_v45 = vpack.c.bf16 %v7555_v16, %v7553_v52  ;;  %v12688_v46 = vpack.c.bf16 %v7836_v28, %v7834_v27 }
 0x20f   :  { %v7912_v36 = vpop.f32.mrf.mxu0  ;;  %v793_v24 = vpack.c.b16 %v749_v7, %v748_v9  ;;  %v790_v19 = vpack.c.b16 %v743_v37, %v742_v48  ;;  %v12689_v63 = vpack.c.bf16 %v7803_v14, %v7801_v4 }
 0x212   :  { %865 = vmatpush.bf16.msra.mxu3 %v796_v33 }
 0x216   :  { %866 = vmatpush.bf16.msra.mxu3 %v795_v23  ;;  %v745_v23 = vunpack.c.l.b16 %v7759_v25  ;;  %v12678_v25 = vpack.c.bf16 %v7689_v34, %v7687_v39  ;;  %v12682_v34 = vpack.c.bf16 %v7608_v59, %v7606_v32  ;;  %v12683_v39 = vpack.c.bf16 %v7584_v10, %v7582_v55 }
 0x217   :  { %v7914_v38 = vpop.f32.mrf.mxu0  ;;  %v12475_v59 = vmov 1065369472  }
 0x218   :  { %v791_v18 = vpack.c.b16 %v745_v23, %v744_v41  ;;  %859 = vmatmul.bf16.vlgmr.msra.gmra.mxu2 %v12475_v59  ;;  %846 = vmatmul.bf16.vlgmr.msra.gmra.mxu1 %v12475_v59 }
 0x21a   :  { %867 = vmatpush.bf16.msra.mxu3 %v794_v29 }
 0x21e   :  { %868 = vmatpush.bf16.msra.mxu3 %v793_v24 }
 0x21f   :  { %v7920_v33 = vpop.f32.mrf.mxu0 }
 0x222   :  { %869 = vmatpush.bf16.msra.mxu3 %v792_v31 }
 0x226   :  { %870 = vmatpush.bf16.msra.mxu3 %v791_v18 }
 0x227   :  { %v7926_v12 = vpop.f32.mrf.mxu0 }
 0x228   :  { %1058 = vmatmul.bf16.vlgmr.msrb.gmra.mxu2 %v12475_v59 }
 0x22a   :  { %871 = vmatpush.bf16.msra.mxu3 %v790_v19 }
 0x22d   :  { %872 = vmatmul.bf16.vlgmr.msra.gmra.mxu3 %v12475_v59 }
 0x22e   :  { %1063 = vmatpush.bf16.msrb.mxu3 %v12677_v5 }
 0x22f   :  { %v7931_v15 = vpop.f32.mrf.mxu0 }
 0x232   :  { %1064 = vmatpush.bf16.msrb.mxu3 %v12678_v25 }
 0x236   :  { %1065 = vmatpush.bf16.msrb.mxu3 %v12679_v51 }
 0x237   :  { %v7939_v60 = vpop.f32.mrf.mxu0 }
 0x23a   :  { %1066 = vmatpush.bf16.msrb.mxu3 %v12680_v61 }
 0x23e   :  { %1067 = vmatpush.bf16.msrb.mxu3 %v12681_v43 }
 0x23f   :  { %v7947_v50 = vpop.f32.mrf.mxu0 }
 0x242   :  { %1068 = vmatpush.bf16.msrb.mxu3 %v12682_v34 }
 0x246   :  { %1069 = vmatpush.bf16.msrb.mxu3 %v12683_v39 }
 0x247   :  { %v7955_v42 = vpop.f32.mrf.mxu0 }
 0x24a   :  { %1070 = vmatpush.bf16.msrb.mxu3 %v12684_v45  ;;  %v637_v45 = vpack.c.bf16 %v7955_v42, %v7955_v42 }
 0x24d   :  { %1071 = vmatmul.bf16.vlgmr.msrb.gmra.mxu3 %v12475_v59 }
 0x24f   :  { %v7960_v62 = vpop.f32.mrf.mxu0 }
 0x250   :  { %v638_v51 = vpack.c.bf16 %v7960_v62, %v7960_v62 }
 0x257   :  { %v7962_v40 = vpop.f32.mrf.mxu0 }
 0x258   :  { %v639_v37 = vpack.c.bf16 %v7962_v40, %v7962_v40 }
 0x25f   :  { %v7964_v30 = vpop.f32.mrf.mxu0 }
 0x260   :  { %v640_v47 = vpack.c.bf16 %v7964_v30, %v7964_v30 }
 0x262   :  { %v948_v61 = vunpack.c.l.bf16 %v640_v47 }
 0x267   :  { %v7966_v22 = vpop.f32.mrf.mxu0 }
 0x268   :  { %v641_v44 = vpack.c.bf16 %v7966_v22, %v7966_v22 }
 0x26a   :  { %v949_v48 = vunpack.c.l.bf16 %v641_v44  ;;  %v769_v39 = vunpack.c.l.b16 %v641_v44  ;;  %v945_v44 = vunpack.c.l.bf16 %v637_v45 }
 0x26f   :  { %v7968_v32 = vpop.f32.mrf.mxu0 }
 0x270   :  { %v642_v20 = vpack.c.bf16 %v7968_v32, %v7968_v32 }
 0x272   :  { %v950_v53 = vunpack.c.l.bf16 %v642_v20  ;;  %v770_v25 = vunpack.c.l.b16 %v642_v20  ;;  %v946_v20 = vunpack.c.l.bf16 %v638_v51 }
 0x274   :  { %v1014_v43 = vmul.f32 %v950_v53, %v950_v53  ;;  %v635_v53 = vpack.c.bf16 %v7939_v60, %v7939_v60 }
 0x277   :  { %v7973_v55 = vpop.f32.mrf.mxu0 }
 0x278   :  { %v643_v10 = vpack.c.bf16 %v7973_v55, %v7973_v55 }
 0x27a   :  { %v951_v29 = vunpack.c.l.bf16 %v643_v10  ;;  %v771_v18 = vunpack.c.l.b16 %v643_v10  ;;  %v1013_v10 = vmul.f32 %v949_v48, %v949_v48  ;;  %v1010_v48 = vmul.f32 %v946_v20, %v946_v20 }
 0x27c   :  { %v1015_v19 = vmul.f32 %v951_v29, %v951_v29  ;;  %v804_v34 = vpack.c.b16 %v771_v18, %v770_v25  ;;  %v636_v29 = vpack.c.bf16 %v7947_v50, %v7947_v50  ;;  %v634_v18 = vpack.c.bf16 %v7931_v15, %v7931_v15 }
 0x27d   :  { %v633_v25 = vpack.c.bf16 %v7926_v12, %v7926_v12 }
 0x27f   :  { %v7975_v52 = vpop.f32.mrf.mxu0 }
 0x280   :  { %v644_v16 = vpack.c.bf16 %v7975_v52, %v7975_v52 }
 0x282   :  { %v952_v58 = vunpack.c.l.bf16 %v644_v16  ;;  %v772_v24 = vunpack.c.l.b16 %v644_v16  ;;  %v947_v16 = vunpack.c.l.bf16 %v639_v37 }
 0x284   :  { %v1016_v31 = vmul.f32 %v952_v58, %v952_v58  ;;  %v1048_v58 = vpack.c.bf16 %v1015_v19, %v1014_v43 }
 0x287   :  { %v7985_v35 = vpop.f32.mrf.mxu0 }
 0x288   :  { %v645_v17 = vpack.c.bf16 %v7985_v35, %v7985_v35 }
 0x28a   :  { %v773_v7 = vunpack.c.l.b16 %v645_v17  ;;  %v953_v9 = vunpack.c.l.bf16 %v645_v17  ;;  %v768_v17 = vunpack.c.l.b16 %v640_v47  ;;  %v944_v47 = vunpack.c.l.bf16 %v636_v29 }
 0x28c   :  { %v1017_v23 = vmul.f32 %v953_v9, %v953_v9  ;;  %v805_v41 = vpack.c.b16 %v773_v7, %v772_v24  ;;  %v1012_v7 = vmul.f32 %v948_v61, %v948_v61  ;;  %v803_v9 = vpack.c.b16 %v769_v39, %v768_v17 }
 0x28d   :  { %v767_v24 = vunpack.c.l.b16 %v639_v37  ;;  %v943_v37 = vunpack.c.l.bf16 %v635_v53  ;;  %v1009_v61 = vmul.f32 %v945_v44, %v945_v44  ;;  %v632_v39 = vpack.c.bf16 %v7920_v33, %v7920_v33 }
 0x28e   :  { %v1049_v5 = vpack.c.bf16 %v1017_v23, %v1016_v31  ;;  %877 = vmatpush.bf16.msrb.mxu1 %v805_v41  ;;  %v1011_v31 = vmul.f32 %v947_v16, %v947_v16  ;;  %v1047_v23 = vpack.c.bf16 %v1013_v10, %v1012_v7  ;;  %v766_v41 = vunpack.c.l.b16 %v638_v51 }
 0x28f   :  { %v942_v51 = vunpack.c.l.bf16 %v634_v18  ;;  %v1008_v16 = vmul.f32 %v944_v47, %v944_v47  ;;  %v631_v17 = vpack.c.bf16 %v7914_v38, %v7914_v38  ;;  %v1007_v20 = vmul.f32 %v943_v37, %v943_v37 }
 0x290   :  { %1089 = vmatpush.bf16.msra.mxu2 %v1049_v5  ;;  %v802_v19 = vpack.c.b16 %v767_v24, %v766_v41  ;;  %v765_v5 = vunpack.c.l.b16 %v637_v45  ;;  %v1046_v43 = vpack.c.bf16 %v1011_v31, %v1010_v48  ;;  %v941_v45 = vunpack.c.l.bf16 %v633_v25 }
 0x291   :  { %v1045_v7 = vpack.c.bf16 %v1009_v61, %v1008_v16  ;;  %v630_v24 = vpack.c.bf16 %v7912_v36, %v7912_v36  ;;  %v1006_v44 = vmul.f32 %v942_v51, %v942_v51  ;;  %v939_v41 = vunpack.c.l.bf16 %v631_v17 }
 0x292   :  { %878 = vmatpush.bf16.msrb.mxu1 %v804_v34  ;;  %v764_v34 = vunpack.c.l.b16 %v636_v29  ;;  %v940_v29 = vunpack.c.l.bf16 %v632_v39  ;;  %v1005_v47 = vmul.f32 %v941_v45, %v941_v45  ;;  %v760_v48 = vunpack.c.l.b16 %v632_v39 }
 0x293   :  { %v1003_v61 = vmul.f32 %v939_v41, %v939_v41  ;;  %v12686_v39 = vpack.c.bf16 %v7872_v54, %v7870_v56  ;;  %v12691_v56 = vpack.c.bf16 %v7735_v0, %v7732_v49 }
 0x294   :  { %1090 = vmatpush.bf16.msra.mxu2 %v1048_v58  ;;  %v801_v10 = vpack.c.b16 %v765_v5, %v764_v34  ;;  %v763_v58 = vunpack.c.l.b16 %v635_v53  ;;  %v1044_v53 = vpack.c.bf16 %v1007_v20, %v1006_v44  ;;  %v1004_v5 = vmul.f32 %v940_v29, %v940_v29 }
 0x295   :  { %v758_v34 = vunpack.c.l.b16 %v630_v24  ;;  %v847_v54 = vpop.f32.mrf.mxu1 }
 0x296   :  { %879 = vmatpush.bf16.msrb.mxu1 %v803_v9  ;;  %v762_v9 = vunpack.c.l.b16 %v634_v18  ;;  %v1043_v18 = vpack.c.bf16 %v1005_v47, %v1004_v5  ;;  %v6824_v5 = vld [vmem:[%s12422_s4 + $0x38] sm:$0xff] }
 0x297   :  { %1399 = vmatpush.bf16.msra.mxu3 %v6824_v5 }
 0x298   :  { %1091 = vmatpush.bf16.msra.mxu2 %v1047_v23  ;;  %v800_v31 = vpack.c.b16 %v763_v58, %v762_v9  ;;  %v761_v23 = vunpack.c.l.b16 %v633_v25  ;;  %v12685_v25 = vpack.c.bf16 %v7890_v2, %v7888_v8  ;;  %v12687_v58 = vpack.c.bf16 %v7854_v57, %v7852_v3 }
 0x299   :  { %v12690_v2 = vpack.c.bf16 %v7767_v6, %v7765_v1 }
 0x29a   :  { %880 = vmatpush.bf16.msrb.mxu1 %v802_v19  ;;  %v938_v19 = vunpack.c.l.bf16 %v630_v24  ;;  %v799_v37 = vpack.c.b16 %v761_v23, %v760_v48 }
 0x29b   :  { %v860_v3 = vpop.f32.mrf.mxu2 }
 0x29c   :  { %1092 = vmatpush.bf16.msra.mxu2 %v1046_v43  ;;  %v759_v43 = vunpack.c.l.b16 %v631_v17  ;;  %v1002_v16 = vmul.f32 %v938_v19, %v938_v19  ;;  %v861_v57 = vadd.f32 %v860_v3, %v847_v54  ;;  %v6819_v3 = vld [vmem:[%s12422_s4 + $0x10] sm:$0xff] }
 0x29d   :  { %v849_v27 = vpop.f32.mrf.mxu1 }
 0x29e   :  { %881 = vmatpush.bf16.msrb.mxu1 %v801_v10  ;;  %v798_v51 = vpack.c.b16 %v759_v43, %v758_v34  ;;  %v1042_v10 = vpack.c.bf16 %v1003_v61, %v1002_v16 }
 0x2a0   :  { %1093 = vmatpush.bf16.msra.mxu2 %v1045_v7 }
 0x2a2   :  { %882 = vmatpush.bf16.msrb.mxu1 %v800_v31 }
 0x2a4   :  { %1094 = vmatpush.bf16.msra.mxu2 %v1044_v53 }
 0x2a6   :  { %883 = vmatpush.bf16.msrb.mxu1 %v799_v37  ;;  %v6823_v37 = vld [vmem:[%s12422_s4 + $0x30] sm:$0xff] }
 0x2a7   :  { %1400 = vmatpush.bf16.msra.mxu3 %v6823_v37  ;;  %v12710_v37 = vld [vmem:[#allocation21_spill] sm:$0xff] }
 0x2a8   :  { %1095 = vmatpush.bf16.msra.mxu2 %v1043_v18  ;;  %v6822_v18 = vld [vmem:[%s12422_s4 + $0x28] sm:$0xff] }
 0x2aa   :  { %884 = vmatpush.bf16.msrb.mxu1 %v798_v51  ;;  %v6821_v51 = vld [vmem:[%s12422_s4 + $0x20] sm:$0xff] }
 0x2ab   :  { %1401 = vmatpush.bf16.msra.mxu3 %v6822_v18 }
 0x2ac   :  { %1096 = vmatpush.bf16.msra.mxu2 %v1042_v10 }
 0x2ad   :  { %885 = vmatmul.bf16.vlgmr.msrb.gmra.mxu1 %v12475_v59 }
 0x2ae   :  { %1076 = vmatpush.bf16.msra.mxu1 %v1041_v26  ;;  %v862_v26 = vpop.f32.mrf.mxu2 }
 0x2af   :  { %1097 = vmatmul.bf16.vlgmr.msra.gmra.mxu2 %v12475_v59  ;;  %1402 = vmatpush.bf16.msra.mxu3 %v6821_v51  ;;  %v12692_v26 = vld [vmem:[#allocation9_spill] sm:$0xff]  ;;  %v12715_v51 = vld [vmem:[#allocation24_spill] sm:$0xff] }
 0x2b0   :  { %v873_v8 = vpop.f32.mrf.mxu3 }
 0x2b1   :  { %v874_v28 = vadd.f32 %v873_v8, %v861_v57 }
 0x2b2   :  { %1077 = vmatpush.bf16.msra.mxu1 %v12685_v25  ;;  %v132_v25 = vld [vmem:[%s12423_s2] sm:$0x1] }
 0x2b6   :  { %1078 = vmatpush.bf16.msra.mxu1 %v12686_v39  ;;  %v1059_v4 = vpop.f32.mrf.mxu2 }
 0x2b8   :  { %v875_v17 = vpop.f32.mrf.mxu3 }
 0x2ba   :  { %1079 = vmatpush.bf16.msra.mxu1 %v12687_v58  ;;  %v6820_v58 = vld [vmem:[%s12422_s4 + $0x18] sm:$0xff] }
 0x2bb   :  { %1403 = vmatpush.bf16.msra.mxu3 %v6820_v58  ;;  %v12718_v58 = vld [vmem:[#allocation26_spill] sm:$0xff] }
 0x2be   :  { %1080 = vmatpush.bf16.msra.mxu1 %v12688_v46  ;;  %v1061_v20 = vpop.f32.mrf.mxu2 }
 0x2bf   :  { %1404 = vmatpush.bf16.msra.mxu3 %v6819_v3  ;;  %v12697_v20 = vld [vmem:[#allocation12_spill] sm:$0xff] }
 0x2c2   :  { %1081 = vmatpush.bf16.msra.mxu1 %v12689_v63 }
 0x2c6   :  { %1082 = vmatpush.bf16.msra.mxu1 %v12690_v2  ;;  %v133_v2 = vld [vmem:[%s12424_s3] sm:$0x1] }
 0x2ca   :  { %1083 = vmatpush.bf16.msra.mxu1 %v12691_v56 }
 0x2cd   :  { %1084 = vmatmul.bf16.vlgmr.msra.gmra.mxu1 %v12475_v59 }
 0x2d0   :  { %v1072_v14 = vpop.f32.mrf.mxu3 }
 0x2d1   :  { %v1073_v45 = vadd.f32 %v1072_v14, %v1059_v4  ;;  %v12694_v4 = vld [vmem:[#allocation10_spill] sm:$0xff] }
 0x2d8   :  { %v1074_v1 = vpop.f32.mrf.mxu3 }
 0x32a   :  { %v886_v6 = vpop.f32.mrf.mxu1 }
 0x32b   :  { %v887_v0 = vadd.f32 %v886_v6, %v874_v28 }
 0x32d   :  { %v1102_v29 = vmul.f32 0.001953125, %v887_v0 }
 0x32f   :  { %v1104_v23 = vmul.f32 %v1102_v29, %v1102_v29 }
 0x332   :  { %v888_v7 = vpop.f32.mrf.mxu1  ;;  %v1098_v9 = vpop.f32.mrf.mxu2 }
 0x333   :  { %v12700_v7 = vld [vmem:[#allocation14_spill] sm:$0xff] }
 0x33a   :  { %v1100_v49 = vpop.f32.mrf.mxu2 }
 0x33b   :  { %v12701_v49 = vld [vmem:[#allocation15_spill] sm:$0xff] }
 0x34a   :  { %v1085_v24 = vpop.f32.mrf.mxu1 }
 0x34b   :  { %v1086_v44 = vadd.f32 %v1085_v24, %v1073_v45  ;;  %v12695_v45 = vld [vmem:[#allocation11_spill] sm:$0xff]  ;;  %v6818_v24 = vld [vmem:[%s12422_s4 + $0x8] sm:$0xff] }
 0x34c   :  { %1405 = vmatpush.bf16.msra.mxu3 %v6818_v24 }
 0x34d   :  { %v1099_v31 = vadd.f32 %v1098_v9, %v1086_v44 }
 0x34f   :  { %v1103_v41 = vmul.f32 0.001953125, %v1099_v31  ;;  %v12704_v31 = vld [vmem:[#allocation17_spill] sm:$0xff] }
 0x351   :  { %v1105_v47 = vsub.f32 %v1103_v41, %v1104_v23  ;;  %v12706_v41 = vld [vmem:[#allocation18_spill] sm:$0xff] }
 0x352   :  { %v1087_v53 = vpop.f32.mrf.mxu1 }
 0x353   :  { %v1106_v48 = vmax.f32 %v1105_v47, 0.0  ;;  %v12707_v53 = vld [vmem:[#allocation19_spill] sm:$0xff] }
 0x355   :  { %v1107_v19 = vadd.f32 1e-05, %v1106_v48 }
 0x357   :  { %7185 = vrsqrt.f32 %v1107_v19  ;;  %vm1114_vm3 = vweird.f32 %v1107_v19 }
 0x35d   :  { %v7186_v43 = vpop.eup %7185 }
 0x35e   :  { %v1109_v61 = vmul.f32 %v7186_v43, %v1107_v19  ;;  %vm1115_vm2 = vweird.f32 %v7186_v43  ;;  %v12709_v19 = vld [vmem:[#allocation20_spill] sm:$0xff] }
 0x35f   :  { %vm1116_vm4 = vmor %vm1114_vm3, %vm1115_vm2 }
 0x360   :  { %v1110_v34 = vmul.f32 %v7186_v43, %v1109_v61  ;;  %v12712_v61 = vld [vmem:[#allocation22_spill] sm:$0xff] }
 0x362   :  { %v1111_v16 = vmul.f32 0.5, %v1110_v34  ;;  %v12713_v34 = vld [vmem:[#allocation23_spill] sm:$0xff] }
 0x364   :  { %v1112_v10 = vsub.f32 1.5, %v1111_v16 }
 0x366   :  { %v1113_v39 = vmul.f32 %v7186_v43, %v1112_v10 }
 0x368   :  { %v1117_v46 = vsel %vm1116_vm4, %v7186_v43, %v1113_v39 }
 0x369   :  { %v1118_v63 = vmul.f32 %v1117_v46, %v132_v25  ;;  %v12716_v25 = vld [vmem:[#allocation25_spill] sm:$0xff] }
 0x36b   :  { %v1119_v56 = vmul.f32 %v1118_v63, %v1102_v29  ;;  %v8061_v54 = vperm.slane %v1118_v63, 0  ;;  %v12703_v29 = vld [vmem:[#allocation16_spill] sm:$0xff]  ;;  %v12719_v63 = vld [vmem:[#allocation27_spill] sm:$0xff] }
 0x36d   :  { %v1120_v57 = vsub.f32 %v133_v2, %v1119_v56  ;;  %v8068_v8 = vmul.f32 %v8061_v54, %v7363_v11  ;;  %v8072_v27 = vmul.f32 %v8061_v54, %v7370_v13  ;;  %v8076_v28 = vmul.f32 %v8061_v54, %v7387_v21  ;;  %v12698_v21 = vld [vmem:[#allocation13_spill] sm:$0xff]  ;;  %v12720_v56 = vld [vmem:[#allocation28_spill] sm:$0xff] }
 0x36e   :  { %v8080_v17 = vmul.f32 %v8061_v54, %v12692_v26  ;;  %v8084_v14 = vmul.f32 %v8061_v54, %v12694_v4  ;;  %v8088_v11 = vmul.f32 %v8061_v54, %v12695_v45  ;;  %v8092_v13 = vmul.f32 %v8061_v54, %v12697_v20  ;;  %v12722_v4 = vld [vmem:[#allocation30_spill] sm:$0xff]  ;;  %v12723_v20 = vld [vmem:[#allocation31_spill] sm:$0xff] }
 0x36f   :  { %v8094_v1 = vperm.slane %v1120_v57, 0  ;;  %v8098_v6 = vmul.f32 %v8061_v54, %v12698_v21  ;;  %v8102_v9 = vmul.f32 %v8061_v54, %v12700_v7  ;;  %v8106_v0 = vmul.f32 %v8061_v54, %v12701_v49  ;;  %v12721_v57 = vld [vmem:[#allocation29_spill] sm:$0xff]  ;;  %v12724_v49 = vld [vmem:[#allocation32_spill] sm:$0xff] }
 0x370   :  { %12693 = vst [vmem:[#allocation9_spill] sm:$0xff] %v8080_v17  ;;  %v8113_v44 = vmul.f32 %v8061_v54, %v12703_v29  ;;  %v8117_v23 = vmul.f32 %v8061_v54, %v12704_v31  ;;  %v1136_v47 = vmul.f32 %v8061_v54, %v12706_v41  ;;  %v8123_v48 = vmul.f32 %v8061_v54, %v12707_v53  ;;  %v6817_v7 = vld [vmem:[%s12422_s4] sm:$0xff]  ;;  %v12726_v41 = vld [vmem:[#allocation34_spill] sm:$0xff] }
 0x371   :  { %12696 = vst [vmem:[#allocation10_spill] sm:$0xff] %v8088_v11  ;;  %v1138_v5 = vmul.f32 %v8061_v54, %v12709_v19  ;;  %v8129_v43 = vmul.f32 %v8061_v54, %v12710_v37  ;;  %v1140_v18 = vmul.f32 %v8061_v54, %v12712_v61  ;;  %v8135_v16 = vmul.f32 %v8061_v54, %v12713_v34  ;;  %v12725_v29 = vld [vmem:[#allocation33_spill] sm:$0xff]  ;;  %v12727_v19 = vld [vmem:[#allocation35_spill] sm:$0xff]  ;;  %v12728_v61 = vld [vmem:[#allocation36_spill] sm:$0xff] }
 0x372   :  { %12699 = vst [vmem:[#allocation11_spill] sm:$0xff] %v8098_v6  ;;  %v1142_v10 = vmul.f32 %v8061_v54, %v12715_v51  ;;  %v8141_v39 = vmul.f32 %v8061_v54, %v12716_v25  ;;  %v1144_v46 = vmul.f32 %v8061_v54, %v12718_v58  ;;  %v1145_v2 = vmul.f32 %v8061_v54, %v12719_v63  ;;  %v12729_v51 = vld [vmem:[#allocation37_spill] sm:$0xff]  ;;  %v12730_v58 = vld [vmem:[#allocation38_spill] sm:$0xff]  ;;  %v12743_v6 = vld [vmem:[#allocation51_spill] sm:$0xff] }
 0x373   :  { %12702 = vst [vmem:[#allocation12_spill] sm:$0xff] %v8106_v0  ;;  %v1146_v3 = vmul.f32 %v8061_v54, %v12720_v56  ;;  %v1147_v26 = vmul.f32 %v8061_v54, %v12721_v57  ;;  %v1148_v45 = vmul.f32 %v8061_v54, %v12722_v4  ;;  %v1149_v21 = vmul.f32 %v8061_v54, %v12723_v20  ;;  %v12731_v56 = vld [vmem:[#allocation39_spill] sm:$0xff]  ;;  %v12732_v4 = vld [vmem:[#allocation40_spill] sm:$0xff]  ;;  %v12742_v0 = vld [vmem:[#allocation50_spill] sm:$0xff] }
 0x374   :  { %12705 = vst [vmem:[#allocation13_spill] sm:$0xff] %v8117_v23  ;;  %v1150_v24 = vmul.f32 %v8061_v54, %v12724_v49  ;;  %v1151_v31 = vmul.f32 %v8061_v54, %v12725_v29  ;;  %v1152_v53 = vmul.f32 %v8061_v54, %v12726_v41  ;;  %v1153_v37 = vmul.f32 %v8061_v54, %v12727_v19  ;;  %v12733_v49 = vld [vmem:[#allocation41_spill] sm:$0xff]  ;;  %v12734_v41 = vld [vmem:[#allocation42_spill] sm:$0xff]  ;;  %v12744_v11 = vld [vmem:[#allocation52_spill] sm:$0xff] }
 0x375   :  { %12708 = vst [vmem:[#allocation14_spill] sm:$0xff] %v8123_v48  ;;  %v1154_v34 = vmul.f32 %v8061_v54, %v12728_v61  ;;  %v1155_v25 = vmul.f32 %v8061_v54, %v12729_v51  ;;  %v1156_v63 = vmul.f32 %v8061_v54, %v12730_v58  ;;  %v1157_v57 = vmul.f32 %v8061_v54, %v12731_v56  ;;  %v12735_v61 = vld [vmem:[#allocation43_spill] sm:$0xff]  ;;  %v12736_v51 = vld [vmem:[#allocation44_spill] sm:$0xff]  ;;  %v12737_v58 = vld [vmem:[#allocation45_spill] sm:$0xff] }
 0x376   :  { %12711 = vst [vmem:[#allocation15_spill] sm:$0xff] %v8129_v43  ;;  %1406 = vmatpush.bf16.msra.mxu3 %v6817_v7  ;;  %v1158_v20 = vmul.f32 %v8061_v54, %v12732_v4  ;;  %v1159_v29 = vmul.f32 %v8061_v54, %v12733_v49  ;;  %v1160_v19 = vmul.f32 %v8061_v54, %v12734_v41  ;;  %v12738_v56 = vld [vmem:[#allocation46_spill] sm:$0xff]  ;;  %v12739_v43 = vld [vmem:[#allocation47_spill] sm:$0xff]  ;;  %v12740_v48 = vld [vmem:[#allocation48_spill] sm:$0xff] }
 0x377   :  { %12714 = vst [vmem:[#allocation16_spill] sm:$0xff] %v8135_v16  ;;  %v1161_v59 = vmul.f32 %v8061_v54, %v12735_v61  ;;  %v1163_v16 = vmul.f32 %v8061_v54, %v12737_v58  ;;  %v1164_v7 = vmul.f32 %v8061_v54, %v12738_v56  ;;  %v1165_v4 = vmul.f32 %v8061_v54, %v12739_v43  ;;  %v12741_v23 = vld [vmem:[#allocation49_spill] sm:$0xff] }
 0x378   :  { %12717 = vst [vmem:[#allocation17_spill] sm:$0xff] %v8141_v39  ;;  %v1162_v39 = vmul.f32 %v8061_v54, %v12736_v51  ;;  %v1166_v49 = vmul.f32 %v8061_v54, %v12740_v48  ;;  %v1167_v41 = vmul.f32 %v8061_v54, %v12741_v23  ;;  %v1168_v61 = vmul.f32 %v8061_v54, %v12742_v0  ;;  %v12745_v17 = vld [vmem:[#allocation53_spill] sm:$0xff] }
 0x379   :  { %v1169_v51 = vmul.f32 %v8061_v54, %v12743_v6  ;;  %v1170_v58 = vmul.f32 %v8061_v54, %v12744_v11  ;;  %v1171_v56 = vmul.f32 %v8061_v54, %v12745_v17  ;;  %v1172_v43 = vmul.f32 %v8061_v54, %v7912_v36 }
 0x37a   :  { %v1173_v48 = vmul.f32 %v8061_v54, %v7914_v38  ;;  %v1174_v23 = vmul.f32 %v8061_v54, %v7920_v33  ;;  %v1175_v0 = vmul.f32 %v8061_v54, %v7926_v12  ;;  %v1176_v6 = vmul.f32 %v8061_v54, %v7931_v15 }
 0x37b   :  { %v1177_v11 = vmul.f32 %v8061_v54, %v7939_v60  ;;  %v1178_v17 = vmul.f32 %v8061_v54, %v7947_v50  ;;  %v1179_v36 = vmul.f32 %v8061_v54, %v7955_v42  ;;  %v1180_v38 = vmul.f32 %v8061_v54, %v7960_v62 }
 0x37c   :  { %v1181_v33 = vmul.f32 %v8061_v54, %v7962_v40  ;;  %v1182_v12 = vmul.f32 %v8061_v54, %v7964_v30  ;;  %v1183_v15 = vmul.f32 %v8061_v54, %v7966_v22  ;;  %v1184_v60 = vmul.f32 %v8061_v54, %v7968_v32 }
 0x37d   :  { %v1185_v50 = vmul.f32 %v8061_v54, %v7973_v55  ;;  %v1186_v42 = vmul.f32 %v8061_v54, %v7975_v52  ;;  %v1187_v62 = vmul.f32 %v8061_v54, %v7985_v35  ;;  %v8236_v40 = vadd.f32 %v8094_v1, %v8068_v8 }
 0x37e   :  { %v8240_v30 = vadd.f32 %v8094_v1, %v8072_v27  ;;  %v8244_v22 = vadd.f32 %v8094_v1, %v8076_v28  ;;  %v8248_v32 = vadd.f32 %v8094_v1, %v8084_v14  ;;  %v8252_v55 = vadd.f32 %v8094_v1, %v8092_v13 }
 0x37f   :  { %v8256_v52 = vadd.f32 %v8094_v1, %v8102_v9  ;;  %v8260_v35 = vadd.f32 %v8094_v1, %v8113_v44  ;;  %v8263_v54 = vadd.f32 %v8094_v1, %v1136_v47  ;;  %v8266_v8 = vadd.f32 %v8094_v1, %v1138_v5 }
 0x380   :  { %v8269_v27 = vadd.f32 %v8094_v1, %v1140_v18  ;;  %v8272_v28 = vadd.f32 %v8094_v1, %v1142_v10  ;;  %v8275_v14 = vadd.f32 %v8094_v1, %v1144_v46  ;;  %v8278_v13 = vadd.f32 %v8094_v1, %v1145_v2 }
 0x381   :  { %v8281_v9 = vadd.f32 %v8094_v1, %v1146_v3  ;;  %v8284_v44 = vadd.f32 %v8094_v1, %v1147_v26  ;;  %v8287_v47 = vadd.f32 %v8094_v1, %v1148_v45  ;;  %v8290_v5 = vadd.f32 %v8094_v1, %v1149_v21 }
 0x382   :  { %v8293_v18 = vadd.f32 %v8094_v1, %v1150_v24  ;;  %v8296_v10 = vadd.f32 %v8094_v1, %v1151_v31  ;;  %v8299_v46 = vadd.f32 %v8094_v1, %v1152_v53  ;;  %v8302_v2 = vadd.f32 %v8094_v1, %v1153_v37 }
 0x383   :  { %v8305_v3 = vadd.f32 %v8094_v1, %v1154_v34  ;;  %v8308_v26 = vadd.f32 %v8094_v1, %v1155_v25  ;;  %v8311_v45 = vadd.f32 %v8094_v1, %v1156_v63  ;;  %v8314_v21 = vadd.f32 %v8094_v1, %v1157_v57 }
 0x384   :  { %v8317_v24 = vadd.f32 %v8094_v1, %v1158_v20  ;;  %v8320_v31 = vadd.f32 %v8094_v1, %v1159_v29  ;;  %v8323_v53 = vadd.f32 %v8094_v1, %v1160_v19  ;;  %v8326_v37 = vadd.f32 %v8094_v1, %v1161_v59 }
 0x385   :  { %v8329_v34 = vadd.f32 %v8094_v1, %v1162_v39  ;;  %v8332_v25 = vadd.f32 %v8094_v1, %v1163_v16  ;;  %v8335_v63 = vadd.f32 %v8094_v1, %v1164_v7  ;;  %v8338_v57 = vadd.f32 %v8094_v1, %v1165_v4 }
 0x386   :  { %12746 = vst [vmem:[#allocation18_spill] sm:$0xff] %v8326_v37  ;;  %v8341_v20 = vadd.f32 %v8094_v1, %v1166_v49  ;;  %v8344_v29 = vadd.f32 %v8094_v1, %v1167_v41  ;;  %v8347_v59 = vadd.f32 %v8094_v1, %v1168_v61  ;;  %v8350_v39 = vadd.f32 %v8094_v1, %v1169_v51 }
 0x387   :  { %12747 = vst [vmem:[#allocation19_spill] sm:$0xff] %v8332_v25  ;;  %v8353_v16 = vadd.f32 %v8094_v1, %v1170_v58  ;;  %v8356_v19 = vadd.f32 %v8094_v1, %v1171_v56  ;;  %v8359_v7 = vadd.f32 %v8094_v1, %v1172_v43  ;;  %v8362_v4 = vadd.f32 %v8094_v1, %v1173_v48 }
 0x388   :  { %v8365_v49 = vadd.f32 %v8094_v1, %v1174_v23  ;;  %v8368_v41 = vadd.f32 %v8094_v1, %v1175_v0  ;;  %v8371_v61 = vadd.f32 %v8094_v1, %v1176_v6  ;;  %v8374_v51 = vadd.f32 %v8094_v1, %v1177_v11 }
 0x389   :  { %v8377_v58 = vadd.f32 %v8094_v1, %v1178_v17  ;;  %v8380_v56 = vadd.f32 %v8094_v1, %v1179_v36  ;;  %v8383_v43 = vadd.f32 %v8094_v1, %v1180_v38  ;;  %v8386_v48 = vadd.f32 %v8094_v1, %v1181_v33 }
 0x38a   :  { %12748 = vst [vmem:[#allocation20_spill] sm:$0xff] %v8374_v51  ;;  %v8389_v23 = vadd.f32 %v8094_v1, %v1182_v12  ;;  %v8392_v0 = vadd.f32 %v8094_v1, %v1183_v15  ;;  %v8395_v6 = vadd.f32 %v8094_v1, %v1184_v60  ;;  %v8398_v11 = vadd.f32 %v8094_v1, %v1185_v50  ;;  %v12758_v50 = vld [vmem:[#allocation9_spill] sm:$0xff] }
 0x38b   :  { %12749 = vst [vmem:[#allocation21_spill] sm:$0xff] %v8380_v56  ;;  %v8401_v17 = vadd.f32 %v8094_v1, %v1186_v42  ;;  %v8404_v36 = vadd.f32 %v8094_v1, %v1187_v62  ;;  %v1255_v38 = vmax.f32 %v8236_v40, 0.0  ;;  %v1256_v33 = vmax.f32 %v8240_v30, 0.0  ;;  %v12760_v30 = vld [vmem:[#allocation11_spill] sm:$0xff] }
 0x38c   :  { %12750 = vst [vmem:[#allocation22_spill] sm:$0xff] %v8383_v43  ;;  %v1194_v42 = vadd.f32 %v8094_v1, %v12758_v50  ;;  %v1257_v37 = vmax.f32 %v8244_v22, 0.0  ;;  %v12759_v43 = vld [vmem:[#allocation10_spill] sm:$0xff]  ;;  %v1259_v40 = vmax.f32 %v8248_v32, 0.0  ;;  %v1198_v12 = vadd.f32 %v8094_v1, %v12760_v30  ;;  %v12762_v50 = vld [vmem:[#allocation13_spill] sm:$0xff] }
 0x38d   :  { %12751 = vst [vmem:[#allocation23_spill] sm:$0xff] %v8386_v48  ;;  %v1319_v51 = vpack.c.bf16 %v1256_v33, %v1255_v38  ;;  %v1196_v62 = vadd.f32 %v8094_v1, %v12759_v43  ;;  %v1261_v15 = vmax.f32 %v8252_v55, 0.0  ;;  %v1263_v33 = vmax.f32 %v8256_v52, 0.0  ;;  %v12763_v32 = vld [vmem:[#allocation14_spill] sm:$0xff] }
 0x38e   :  { %12752 = vst [vmem:[#allocation24_spill] sm:$0xff] %v8389_v23  ;;  %v1258_v60 = vmax.f32 %v1194_v42, 0.0  ;;  %v1202_v22 = vadd.f32 %v8094_v1, %v12762_v50  ;;  %v1265_v43 = vmax.f32 %v8260_v35, 0.0  ;;  %v12764_v23 = vld [vmem:[#allocation15_spill] sm:$0xff] }
 0x38f   :  { %12753 = vst [vmem:[#allocation25_spill] sm:$0xff] %v8392_v0  ;;  %1407 = vmatmul.bf16.vlgmr.msra.gmra.mxu3 %v1319_v51  ;;  %v1260_v25 = vmax.f32 %v1196_v62, 0.0  ;;  %v1267_v51 = vmax.f32 %v8263_v54, 0.0  ;;  %v1206_v52 = vadd.f32 %v8094_v1, %v12764_v23  ;;  %v12765_v62 = vld [vmem:[#allocation16_spill] sm:$0xff]  ;;  %v1278_v23 = vmax.f32 %v8284_v44, 0.0 }
 0x390   :  { %12754 = vst [vmem:[#allocation26_spill] sm:$0xff] %v8395_v6  ;;  %v1320_v30 = vpack.c.bf16 %v1258_v60, %v1257_v37  ;;  %v1266_v55 = vmax.f32 %v1202_v22, 0.0  ;;  %v1208_v35 = vadd.f32 %v8094_v1, %v12765_v62  ;;  %v1271_v37 = vmax.f32 %v8269_v27, 0.0  ;;  %v12766_v60 = vld [vmem:[#allocation17_spill] sm:$0xff]  ;;  %v12774_v62 = vld [vmem:[#allocation19_spill] sm:$0xff] }
 0x391   :  { %12755 = vst [vmem:[#allocation27_spill] sm:$0xff] %v8398_v11  ;;  %v1204_v11 = vadd.f32 %v8094_v1, %v12763_v32  ;;  %v1321_v42 = vpack.c.bf16 %v1260_v25, %v1259_v40  ;;  %v1270_v32 = vmax.f32 %v1206_v52, 0.0  ;;  %v1210_v54 = vadd.f32 %v8094_v1, %v12766_v60 }
 0x392   :  { %12756 = vst [vmem:[#allocation28_spill] sm:$0xff] %v8401_v17  ;;  %v12761_v17 = vld [vmem:[#allocation12_spill] sm:$0xff]  ;;  %v1324_v50 = vpack.c.bf16 %v1266_v55, %v1265_v43  ;;  %v1272_v25 = vmax.f32 %v1208_v35, 0.0  ;;  %v1282_v40 = vmax.f32 %v8296_v10, 0.0  ;;  %v12768_v22 = vmax.f32 %v8281_v9, 0.0 }
 0x393   :  { %12757 = vst [vmem:[#allocation29_spill] sm:$0xff] %v8404_v36  ;;  %v1200_v38 = vadd.f32 %v8094_v1, %v12761_v17  ;;  %v1262_v36 = vmax.f32 %v1198_v12, 0.0  ;;  %v1268_v17 = vmax.f32 %v1204_v11, 0.0  ;;  %v1269_v12 = vmax.f32 %v8266_v8, 0.0 }
 0x394   :  { %v1273_v11 = vmax.f32 %v8272_v28, 0.0  ;;  %v1280_v8 = vmax.f32 %v8290_v5, 0.0  ;;  %v8477_v1 = vpack.c.bf16 %v1278_v23, %v12768_v22  ;;  %v1284_v28 = vmax.f32 %v8302_v2, 0.0  ;;  %v12772_v2 = vld [vmem:[#allocation18_spill] sm:$0xff] }
 0x395   :  { %v1264_v6 = vmax.f32 %v1200_v38, 0.0  ;;  %v1322_v0 = vpack.c.bf16 %v1262_v36, %v1261_v15  ;;  %v1325_v56 = vpack.c.bf16 %v1268_v17, %v1267_v51  ;;  %v1276_v36 = vmax.f32 %v8278_v13, 0.0 }
 0x396   :  { %v1274_v15 = vmax.f32 %v1210_v54, 0.0  ;;  %v1327_v38 = vpack.c.bf16 %v1272_v25, %v1271_v37  ;;  %v12769_v13 = vmax.f32 %v8287_v47, 0.0  ;;  %v12770_v55 = vmax.f32 %v8293_v18, 0.0 }
 0x397   :  { %v1323_v48 = vpack.c.bf16 %v1264_v6, %v1263_v33  ;;  %v1326_v6 = vpack.c.bf16 %v1270_v32, %v1269_v12  ;;  %v12767_v33 = vmax.f32 %v8275_v14, 0.0  ;;  %v1286_v10 = vmax.f32 %v8308_v26, 0.0 }
 0x398   :  { %v1328_v43 = vpack.c.bf16 %v1274_v15, %v1273_v11  ;;  %v8482_v44 = vpack.c.bf16 %v1280_v8, %v12769_v13  ;;  %v8486_v5 = vpack.c.bf16 %v1282_v40, %v12770_v55  ;;  %v12771_v14 = vmax.f32 %v8299_v46, 0.0 }
 0x399   :  { %v1329_v27 = vpack.c.bf16 %v1276_v36, %v12767_v33  ;;  %v1288_v9 = vmax.f32 %v8314_v21, 0.0  ;;  %v1290_v17 = vmax.f32 %v8320_v31, 0.0  ;;  %v1292_v52 = vmax.f32 %v12772_v2, 0.0  ;;  %v12792_v33 = vld [vmem:[#allocation20_spill] sm:$0xff] }
 0x39a   :  { %v8491_v51 = vpack.c.bf16 %v1284_v28, %v12771_v14  ;;  %v12773_v47 = vmax.f32 %v8305_v3, 0.0  ;;  %v1294_v18 = vmax.f32 %v12774_v62, 0.0  ;;  %v12775_v35 = vmax.f32 %v8335_v63, 0.0  ;;  %v12795_v28 = vld [vmem:[#allocation21_spill] sm:$0xff]  ;;  %v12807_v62 = vld [vmem:[#allocation27_spill] sm:$0xff] }
 0x39b   :  { %v12776_v26 = vmax.f32 %v8338_v57, 0.0  ;;  %v12777_v46 = vmax.f32 %v8341_v20, 0.0  ;;  %v12778_v21 = vmax.f32 %v8344_v29, 0.0  ;;  %v12779_v31 = vmax.f32 %v8311_v45, 0.0 }
 0x39c   :  { %v8498_v12 = vpack.c.bf16 %v1286_v10, %v12773_v47  ;;  %v12780_v3 = vmax.f32 %v8317_v24, 0.0  ;;  %v12781_v63 = vmax.f32 %v8323_v53, 0.0  ;;  %v12782_v57 = vmax.f32 %v8347_v59, 0.0  ;;  %v12799_v10 = vld [vmem:[#allocation23_spill] sm:$0xff] }
 0x39d   :  { %v8505_v32 = vpack.c.bf16 %v12776_v26, %v12775_v35  ;;  %v8511_v37 = vpack.c.bf16 %v12778_v21, %v12777_v46  ;;  %v8515_v60 = vpack.c.bf16 %v1288_v9, %v12779_v31  ;;  %v12783_v20 = vmax.f32 %v8350_v39, 0.0  ;;  %v12809_v35 = vld [vmem:[#allocation28_spill] sm:$0xff]  ;;  %v12811_v46 = vld [vmem:[#allocation29_spill] sm:$0xff] }
 0x39e   :  { %v8519_v54 = vpack.c.bf16 %v1290_v17, %v12780_v3  ;;  %v8523_v25 = vpack.c.bf16 %v1292_v52, %v12781_v63  ;;  %v12784_v29 = vmax.f32 %v8329_v34, 0.0  ;;  %v12785_v45 = vmax.f32 %v8353_v16, 0.0  ;;  %v12803_v17 = vld [vmem:[#allocation25_spill] sm:$0xff]  ;;  %v12805_v52 = vld [vmem:[#allocation26_spill] sm:$0xff] }
 0x39f   :  { %v8529_v11 = vpack.c.bf16 %v12783_v20, %v12782_v57  ;;  %v12786_v24 = vmax.f32 %v8356_v19, 0.0  ;;  %v12787_v53 = vmax.f32 %v8359_v7, 0.0  ;;  %v12788_v15 = vmax.f32 %v8362_v4, 0.0  ;;  %v12797_v4 = vld [vmem:[#allocation22_spill] sm:$0xff]  ;;  %1412 = vmatmul.bf16.gmra.mxu3 %v1320_v30 }
 0x3a0   :  { %v8533_v36 = vpack.c.bf16 %v1294_v18, %v12784_v29  ;;  %v12789_v59 = vmax.f32 %v8365_v49, 0.0  ;;  %v12790_v39 = vmax.f32 %v8368_v41, 0.0  ;;  %v12791_v34 = vmax.f32 %v8371_v61, 0.0  ;;  %v12801_v41 = vld [vmem:[#allocation24_spill] sm:$0xff] }
 0x3a1   :  { %v8539_v23 = vpack.c.bf16 %v12786_v24, %v12785_v45  ;;  %v8545_v8 = vpack.c.bf16 %v12788_v15, %v12787_v53  ;;  %v12793_v16 = vmax.f32 %v12792_v33, 0.0  ;;  %v12794_v19 = vmax.f32 %v8377_v58, 0.0 }
 0x3a2   :  { %v8551_v40 = vpack.c.bf16 %v12790_v39, %v12789_v59  ;;  %v12796_v7 = vmax.f32 %v12795_v28, 0.0  ;;  %v12798_v55 = vmax.f32 %v12797_v4, 0.0  ;;  %v12800_v49 = vmax.f32 %v12799_v10, 0.0 }
 0x3a3   :  { %v8557_v22 = vpack.c.bf16 %v12793_v16, %v12791_v34  ;;  %v12802_v9 = vmax.f32 %v12801_v41, 0.0  ;;  %v12804_v61 = vmax.f32 %v12803_v17, 0.0  ;;  %v12806_v47 = vmax.f32 %v12805_v52, 0.0 }
 0x3a4   :  { %v8563_v13 = vpack.c.bf16 %v12796_v7, %v12794_v19  ;;  %v8569_v14 = vpack.c.bf16 %v12800_v49, %v12798_v55  ;;  %v12808_v58 = vmax.f32 %v12807_v62, 0.0  ;;  %v12810_v26 = vmax.f32 %v12809_v35, 0.0 }
 0x3a5   :  { %v8575_v2 = vpack.c.bf16 %v12804_v61, %v12802_v9  ;;  %v12812_v21 = vmax.f32 %v12811_v46, 0.0 }
 0x3a6   :  { %v8581_v18 = vpack.c.bf16 %v12808_v58, %v12806_v47 }
 0x3a7   :  { %v8587_v31 = vpack.c.bf16 %v12812_v21, %v12810_v26 }
 0x3af   :  { %1417 = vmatmul.bf16.gmra.mxu3 %v1321_v42 }
 0x3bf   :  { %1422 = vmatmul.bf16.gmra.mxu3 %v1322_v0 }
 0x3cf   :  { %1427 = vmatmul.bf16.gmra.mxu3 %v1323_v48 }
 0x3df   :  { %1432 = vmatmul.bf16.gmra.mxu3 %v1324_v50 }
 0x3ef   :  { %1437 = vmatmul.bf16.gmra.mxu3 %v1325_v56 }
 0x3ff   :  { %1442 = vmatmul.bf16.gmra.mxu3 %v1326_v6 }
 0x40f   :  { %1447 = vmatmul.bf16.gmra.mxu3 %v1327_v38 }
 0x412   :  { %v8589_v3 = vpop.f32.mrf.mxu3 }
 0x413   :  { %12813 = vst [vmem:[#allocation30_spill] sm:$0xff] %v8589_v3  ;;  %v8593_v63 = vpack.c.bf16 %v8589_v3, %v8589_v3 }
 0x415   :  { %v1876_v20 = vunpack.c.l.bf16 %v8593_v63 }
 0x417   :  { %v8603_v0 = vmul.f32 %v1876_v20, %v1876_v20 }
 0x41a   :  { %v8595_v57 = vpop.f32.mrf.mxu3 }
 0x41b   :  { %12814 = vst [vmem:[#allocation31_spill] sm:$0xff] %v8595_v57  ;;  %v8600_v30 = vpack.c.bf16 %v8595_v57, %v8595_v57 }
 0x41d   :  { %v1877_v48 = vunpack.c.l.bf16 %v8600_v30 }
 0x41f   :  { %1452 = vmatmul.bf16.gmra.mxu3 %v1328_v43  ;;  %v8605_v56 = vmul.f32 %v1877_v48, %v1877_v48 }
 0x422   :  { %v8609_v50 = vpop.f32.mrf.mxu3 }
 0x423   :  { %12815 = vst [vmem:[#allocation32_spill] sm:$0xff] %v8609_v50  ;;  %v8613_v6 = vpack.c.bf16 %v8609_v50, %v8609_v50 }
 0x425   :  { %v1878_v29 = vunpack.c.l.bf16 %v8613_v6 }
 0x427   :  { %v8623_v24 = vmul.f32 %v1878_v29, %v1878_v29 }
 0x42a   :  { %v8615_v38 = vpop.f32.mrf.mxu3 }
 0x42b   :  { %12816 = vst [vmem:[#allocation33_spill] sm:$0xff] %v8615_v38  ;;  %v8620_v45 = vpack.c.bf16 %v8615_v38, %v8615_v38 }
 0x42d   :  { %v1879_v43 = vunpack.c.l.bf16 %v8620_v45 }
 0x42f   :  { %1457 = vmatmul.bf16.gmra.mxu3 %v1329_v27  ;;  %v8625_v53 = vmul.f32 %v1879_v43, %v1879_v43 }
 0x432   :  { %v8629_v59 = vpop.f32.mrf.mxu3 }
 0x433   :  { %12817 = vst [vmem:[#allocation34_spill] sm:$0xff] %v8629_v59  ;;  %v8633_v39 = vpack.c.bf16 %v8629_v59, %v8629_v59 }
 0x435   :  { %v1880_v33 = vunpack.c.l.bf16 %v8633_v39 }
 0x437   :  { %v8643_v19 = vmul.f32 %v1880_v33, %v1880_v33 }
 0x43a   :  { %v8635_v34 = vpop.f32.mrf.mxu3 }
 0x43b   :  { %12818 = vst [vmem:[#allocation35_spill] sm:$0xff] %v8635_v34  ;;  %v8640_v16 = vpack.c.bf16 %v8635_v34, %v8635_v34 }
 0x43d   :  { %v1881_v27 = vunpack.c.l.bf16 %v8640_v16 }
 0x43f   :  { %1462 = vmatmul.bf16.gmra.mxu3 %v8477_v1  ;;  %v8646_v28 = vmul.f32 %v1881_v27, %v1881_v27 }
 0x442   :  { %v8650_v4 = vpop.f32.mrf.mxu3 }
 0x443   :  { %12819 = vst [vmem:[#allocation36_spill] sm:$0xff] %v8650_v4  ;;  %v8654_v55 = vpack.c.bf16 %v8650_v4, %v8650_v4 }
 0x445   :  { %v1882_v49 = vunpack.c.l.bf16 %v8654_v55 }
 0x447   :  { %v8664_v9 = vmul.f32 %v1882_v49, %v1882_v49 }
 0x44a   :  { %v8656_v10 = vpop.f32.mrf.mxu3 }
 0x44b   :  { %12820 = vst [vmem:[#allocation37_spill] sm:$0xff] %v8656_v10  ;;  %v8661_v41 = vpack.c.bf16 %v8656_v10, %v8656_v10 }
 0x44d   :  { %v1883_v1 = vunpack.c.l.bf16 %v8661_v41 }
 0x44f   :  { %1467 = vmatmul.bf16.gmra.mxu3 %v8482_v44  ;;  %v8667_v17 = vmul.f32 %v1883_v1, %v1883_v1 }
 0x452   :  { %v8671_v52 = vpop.f32.mrf.mxu3 }
 0x453   :  { %12821 = vst [vmem:[#allocation38_spill] sm:$0xff] %v8671_v52  ;;  %v1576_v47 = vpack.c.bf16 %v8671_v52, %v8671_v52 }
 0x455   :  { %v1884_v58 = vunpack.c.l.bf16 %v1576_v47 }
 0x457   :  { %v8679_v46 = vmul.f32 %v1884_v58, %v1884_v58 }
 0x45a   :  { %v8675_v62 = vpop.f32.mrf.mxu3 }
 0x45b   :  { %12822 = vst [vmem:[#allocation39_spill] sm:$0xff] %v8675_v62  ;;  %v1577_v35 = vpack.c.bf16 %v8675_v62, %v8675_v62 }
 0x45d   :  { %v1885_v26 = vunpack.c.l.bf16 %v1577_v35 }
 0x45f   :  { %1472 = vmatmul.bf16.gmra.mxu3 %v8486_v5  ;;  %v8682_v44 = vmul.f32 %v1885_v26, %v1885_v26 }
 0x462   :  { %v8686_v20 = vpop.f32.mrf.mxu3 }
 0x463   :  { %12823 = vst [vmem:[#allocation40_spill] sm:$0xff] %v8686_v20  ;;  %v1578_v48 = vpack.c.bf16 %v8686_v20, %v8686_v20 }
 0x465   :  { %v1886_v43 = vunpack.c.l.bf16 %v1578_v48 }
 0x467   :  { %v8694_v49 = vmul.f32 %v1886_v43, %v1886_v43 }
 0x46a   :  { %v8690_v29 = vpop.f32.mrf.mxu3 }
 0x46b   :  { %12824 = vst [vmem:[#allocation41_spill] sm:$0xff] %v8690_v29  ;;  %v1579_v33 = vpack.c.bf16 %v8690_v29, %v8690_v29 }
 0x46d   :  { %v1887_v27 = vunpack.c.l.bf16 %v1579_v33  ;;  %v1707_v34 = vunpack.c.l.b16 %v1579_v33 }
 0x46f   :  { %1477 = vmatmul.bf16.gmra.mxu3 %v8491_v51  ;;  %v8697_v5 = vmul.f32 %v1887_v27, %v1887_v27 }
 0x472   :  { %v8701_v58 = vpop.f32.mrf.mxu3 }
 0x473   :  { %12825 = vst [vmem:[#allocation42_spill] sm:$0xff] %v8701_v58  ;;  %v1580_v26 = vpack.c.bf16 %v8701_v58, %v8701_v58 }
 0x475   :  { %v1888_v15 = vunpack.c.l.bf16 %v1580_v26  ;;  %v1708_v10 = vunpack.c.l.b16 %v1580_v26 }
 0x477   :  { %v8709_v61 = vmul.f32 %v1888_v15, %v1888_v15 }
 0x47a   :  { %v8705_v42 = vpop.f32.mrf.mxu3 }
 0x47b   :  { %12826 = vst [vmem:[#allocation43_spill] sm:$0xff] %v8705_v42  ;;  %v1581_v7 = vpack.c.bf16 %v8705_v42, %v8705_v42 }
 0x47d   :  { %v1889_v43 = vunpack.c.l.bf16 %v1581_v7 }
 0x47f   :  { %1482 = vmatmul.bf16.gmra.mxu3 %v8498_v12  ;;  %v8712_v51 = vmul.f32 %v1889_v43, %v1889_v43  ;;  %v1709_v12 = vunpack.c.l.b16 %v1581_v7 }
 0x482   :  { %v8716_v21 = vpop.f32.mrf.mxu3 }
 0x483   :  { %12827 = vst [vmem:[#allocation44_spill] sm:$0xff] %v8716_v21  ;;  %v1582_v1 = vpack.c.bf16 %v8716_v21, %v8716_v21 }
 0x485   :  { %v1890_v29 = vunpack.c.l.bf16 %v1582_v1  ;;  %v1710_v15 = vunpack.c.l.b16 %v1582_v1  ;;  %v1706_v1 = vunpack.c.l.b16 %v1578_v48 }
 0x487   :  { %v8724_v43 = vmul.f32 %v1890_v29, %v1890_v29  ;;  %v1704_v29 = vunpack.c.l.b16 %v1576_v47 }
 0x48a   :  { %v8720_v58 = vpop.f32.mrf.mxu3 }
 0x48b   :  { %12828 = vst [vmem:[#allocation45_spill] sm:$0xff] %v8720_v58  ;;  %v1583_v42 = vpack.c.bf16 %v8720_v58, %v8720_v58  ;;  %v1766_v58 = vpack.c.b16 %v1709_v12, %v1708_v10 }
 0x48d   :  { %v1711_v20 = vunpack.c.l.b16 %v1583_v42  ;;  %v1891_v62 = vunpack.c.l.bf16 %v1583_v42  ;;  %v1705_v42 = vunpack.c.l.b16 %v1577_v35  ;;  %v1702_v35 = vunpack.c.l.b16 %v8654_v55 }
 0x48e   :  { %v1699_v55 = vunpack.c.l.b16 %v8620_v45 }
 0x48f   :  { %v8726_v52 = vmul.f32 %v1891_v62, %v1891_v62  ;;  %1487 = vmatmul.bf16.gmra.mxu3 %v8515_v60  ;;  %v1767_v27 = vpack.c.b16 %v1711_v20, %v1710_v15  ;;  %v1765_v62 = vpack.c.b16 %v1707_v34, %v1706_v1  ;;  %v1703_v20 = vunpack.c.l.b16 %v8661_v41 }
 0x490   :  { %v1764_v10 = vpack.c.b16 %v1705_v42, %v1704_v29  ;;  %v1701_v34 = vunpack.c.l.b16 %v8640_v16  ;;  %v1698_v16 = vunpack.c.l.b16 %v8613_v6  ;;  %v1697_v42 = vunpack.c.l.b16 %v8600_v30 }
 0x491   :  { %1824 = vmatpush.bf16.msrb.mxu1 %v1767_v27  ;;  %v1700_v27 = vunpack.c.l.b16 %v8633_v39  ;;  %v1696_v39 = vunpack.c.l.b16 %v8593_v63  ;;  %v12837_v63 = vmov 1065369472  }
 0x492   :  { %v8731_v4 = vpop.f32.mrf.mxu3 }
 0x493   :  { %12829 = vst [vmem:[#allocation46_spill] sm:$0xff] %v8731_v4  ;;  %v8735_v7 = vpack.c.bf16 %v8731_v4, %v8731_v4  ;;  %v1762_v1 = vpack.c.b16 %v1701_v34, %v1700_v27  ;;  %v1760_v6 = vpack.c.b16 %v1697_v42, %v1696_v39 }
 0x495   :  { %1825 = vmatpush.bf16.msrb.mxu1 %v1766_v58  ;;  %v1892_v26 = vunpack.c.l.bf16 %v8735_v7  ;;  %v1763_v58 = vpack.c.b16 %v1703_v20, %v1702_v35 }
 0x497   :  { %v8748_v47 = vmul.f32 %v1892_v26, %v1892_v26 }
 0x499   :  { %1826 = vmatpush.bf16.msrb.mxu1 %v1765_v62  ;;  %12831 = vst [vmem:[#allocation48_spill] sm:$0xff] %v8748_v47  ;;  %v1761_v62 = vpack.c.b16 %v1699_v55, %v1698_v16 }
 0x49a   :  { %v8737_v60 = vpop.f32.mrf.mxu3 }
 0x49b   :  { %12830 = vst [vmem:[#allocation47_spill] sm:$0xff] %v8737_v60  ;;  %v8743_v33 = vpack.c.bf16 %v8737_v60, %v8737_v60 }
 0x49d   :  { %v1893_v48 = vunpack.c.l.bf16 %v8743_v33  ;;  %1827 = vmatpush.bf16.msrb.mxu1 %v1764_v10 }
 0x49f   :  { %1492 = vmatmul.bf16.gmra.mxu3 %v8519_v54  ;;  %v8751_v41 = vmul.f32 %v1893_v48, %v1893_v48 }
 0x4a1   :  { %12832 = vst [vmem:[#allocation49_spill] sm:$0xff] %v8751_v41  ;;  %1828 = vmatpush.bf16.msrb.mxu1 %v1763_v58 }
 0x4a2   :  { %v8756_v12 = vpop.f32.mrf.mxu3 }
 0x4a3   :  { %12833 = vst [vmem:[#allocation50_spill] sm:$0xff] %v8756_v12  ;;  %v8763_v54 = vpack.c.bf16 %v8756_v12, %v8756_v12 }
 0x4a5   :  { %1829 = vmatpush.bf16.msrb.mxu1 %v1762_v1  ;;  %v1894_v20 = vunpack.c.l.bf16 %v8763_v54 }
 0x4a7   :  { %v8774_v30 = vmul.f32 %v1894_v20, %v1894_v20 }
 0x4a9   :  { %1830 = vmatpush.bf16.msrb.mxu1 %v1761_v62  ;;  %12835 = vst [vmem:[#allocation52_spill] sm:$0xff] %v8774_v30 }
 0x4aa   :  { %v8766_v29 = vpop.f32.mrf.mxu3 }
 0x4ab   :  { %12834 = vst [vmem:[#allocation51_spill] sm:$0xff] %v8766_v29  ;;  %v8771_v45 = vpack.c.bf16 %v8766_v29, %v8766_v29 }
 0x4ad   :  { %v1895_v26 = vunpack.c.l.bf16 %v8771_v45  ;;  %1831 = vmatpush.bf16.msrb.mxu1 %v1760_v6 }
 0x4af   :  { %1497 = vmatmul.bf16.gmra.mxu3 %v8523_v25  ;;  %v8777_v10 = vmul.f32 %v1895_v26, %v1895_v26 }
 0x4b0   :  { %1832 = vmatmul.bf16.vlgmr.msrb.gmra.mxu1 %v12837_v63 }
 0x4b1   :  { %12836 = vst [vmem:[#allocation53_spill] sm:$0xff] %v8777_v10 }
 0x4b2   :  { %v8782_v48 = vpop.f32.mrf.mxu3 }
 0x4b3   :  { %12838 = vst [vmem:[#allocation9_spill] sm:$0xff] %v8782_v48  ;;  %v8786_v34 = vpack.c.bf16 %v8782_v48, %v8782_v48 }
 0x4b5   :  { %v1896_v27 = vunpack.c.l.bf16 %v8786_v34 }
 0x4b7   :  { %v8796_v1 = vmul.f32 %v1896_v27, %v1896_v27 }
 0x4ba   :  { %v8788_v58 = vpop.f32.mrf.mxu3 }
 0x4bb   :  { %12839 = vst [vmem:[#allocation10_spill] sm:$0xff] %v8788_v58  ;;  %v8793_v25 = vpack.c.bf16 %v8788_v58, %v8788_v58 }
 0x4bd   :  { %v1897_v55 = vunpack.c.l.bf16 %v8793_v25 }
 0x4bf   :  { %1502 = vmatmul.bf16.gmra.mxu3 %v8533_v36  ;;  %v8799_v16 = vmul.f32 %v1897_v55, %v1897_v55 }
 0x4c2   :  { %v8803_v62 = vpop.f32.mrf.mxu3 }
 0x4c3   :  { %12840 = vst [vmem:[#allocation11_spill] sm:$0xff] %v8803_v62  ;;  %v8807_v39 = vpack.c.bf16 %v8803_v62, %v8803_v62 }
 0x4c5   :  { %v1898_v6 = vunpack.c.l.bf16 %v8807_v39 }
 0x4c7   :  { %v8817_v27 = vmul.f32 %v1898_v6, %v1898_v6 }
 0x4ca   :  { %v8809_v20 = vpop.f32.mrf.mxu3 }
 0x4cb   :  { %12841 = vst [vmem:[#allocation12_spill] sm:$0xff] %v8809_v20  ;;  %v8814_v26 = vpack.c.bf16 %v8809_v20, %v8809_v20 }
 0x4cd   :  { %v1899_v36 = vunpack.c.l.bf16 %v8814_v26 }
 0x4cf   :  { %1507 = vmatmul.bf16.gmra.mxu3 %v8505_v32  ;;  %v8820_v55 = vmul.f32 %v1899_v36, %v1899_v36 }
 0x4d2   :  { %v8824_v35 = vpop.f32.mrf.mxu3 }
 0x4d3   :  { %12842 = vst [vmem:[#allocation13_spill] sm:$0xff] %v8824_v35  ;;  %v1592_v42 = vpack.c.bf16 %v8824_v35, %v8824_v35 }
 0x4d5   :  { %v1900_v20 = vunpack.c.l.bf16 %v1592_v42 }
 0x4d7   :  { %v8832_v58 = vmul.f32 %v1900_v20, %v1900_v20 }
 0x4da   :  { %v8828_v21 = vpop.f32.mrf.mxu3 }
 0x4db   :  { %12843 = vst [vmem:[#allocation14_spill] sm:$0xff] %v8828_v21  ;;  %v1593_v62 = vpack.c.bf16 %v8828_v21, %v8828_v21 }
 0x4dd   :  { %v1901_v6 = vunpack.c.l.bf16 %v1593_v62 }
 0x4df   :  { %1512 = vmatmul.bf16.gmra.mxu3 %v8511_v37  ;;  %v8835_v32 = vmul.f32 %v1901_v6, %v1901_v6 }
 0x4e2   :  { %v8839_v15 = vpop.f32.mrf.mxu3 }
 0x4e3   :  { %12844 = vst [vmem:[#allocation15_spill] sm:$0xff] %v8839_v15  ;;  %v1594_v35 = vpack.c.bf16 %v8839_v15, %v8839_v15 }
 0x4e5   :  { %v1902_v29 = vunpack.c.l.bf16 %v1594_v35 }
 0x4e7   :  { %v8847_v12 = vmul.f32 %v1902_v29, %v1902_v29 }
 0x4ea   :  { %v8843_v48 = vpop.f32.mrf.mxu3 }
 0x4eb   :  { %12845 = vst [vmem:[#allocation16_spill] sm:$0xff] %v8843_v48  ;;  %v1595_v21 = vpack.c.bf16 %v8843_v48, %v8843_v48 }
 0x4ed   :  { %v1903_v20 = vunpack.c.l.bf16 %v1595_v21  ;;  %v1723_v10 = vunpack.c.l.b16 %v1595_v21 }
 0x4ef   :  { %1517 = vmatmul.bf16.gmra.mxu3 %v8529_v11  ;;  %v8850_v37 = vmul.f32 %v1903_v20, %v1903_v20 }
 0x4f2   :  { %v8854_v36 = vpop.f32.mrf.mxu3 }
 0x4f3   :  { %12846 = vst [vmem:[#allocation17_spill] sm:$0xff] %v8854_v36  ;;  %v1596_v15 = vpack.c.bf16 %v8854_v36, %v8854_v36 }
 0x4f5   :  { %v1904_v4 = vunpack.c.l.bf16 %v1596_v15  ;;  %v1724_v41 = vunpack.c.l.b16 %v1596_v15  ;;  %v1718_v15 = vunpack.c.l.b16 %v8807_v39 }
 0x4f7   :  { %v8862_v59 = vmul.f32 %v1904_v4, %v1904_v4 }
 0x4fa   :  { %v8858_v60 = vpop.f32.mrf.mxu3 }
 0x4fb   :  { %12847 = vst [vmem:[#allocation18_spill] sm:$0xff] %v8858_v60  ;;  %v1597_v48 = vpack.c.bf16 %v8858_v60, %v8858_v60 }
 0x4fd   :  { %v1905_v29 = vunpack.c.l.bf16 %v1597_v48 }
 0x4ff   :  { %1522 = vmatmul.bf16.gmra.mxu3 %v8539_v23  ;;  %v8865_v11 = vmul.f32 %v1905_v29, %v1905_v29  ;;  %v1725_v23 = vunpack.c.l.b16 %v1597_v48 }
 0x502   :  { %v8869_v6 = vpop.f32.mrf.mxu3 }
 0x503   :  { %12848 = vst [vmem:[#allocation19_spill] sm:$0xff] %v8869_v6  ;;  %v1598_v36 = vpack.c.bf16 %v8869_v6, %v8869_v6 }
 0x505   :  { %v1906_v50 = vunpack.c.l.bf16 %v1598_v36  ;;  %v1726_v4 = vunpack.c.l.b16 %v1598_v36  ;;  %v1722_v36 = vunpack.c.l.b16 %v1594_v35 }
 0x507   :  { %v8877_v29 = vmul.f32 %v1906_v50, %v1906_v50  ;;  %v1773_v48 = vpack.c.b16 %v1723_v10, %v1722_v36  ;;  %v1720_v50 = vunpack.c.l.b16 %v1592_v42  ;;  %v1715_v10 = vunpack.c.l.b16 %v8771_v45 }
 0x508   :  { %v1714_v42 = vunpack.c.l.b16 %v8763_v54 }
 0x50a   :  { %v8873_v38 = vpop.f32.mrf.mxu3  ;;  %v1769_v39 = vpack.c.b16 %v1715_v10, %v1714_v42 }
 0x50b   :  { %12849 = vst [vmem:[#allocation20_spill] sm:$0xff] %v8873_v38  ;;  %v1599_v60 = vpack.c.bf16 %v8873_v38, %v8873_v38  ;;  %v1774_v38 = vpack.c.b16 %v1725_v23, %v1724_v41  ;;  %v1716_v41 = vunpack.c.l.b16 %v8786_v34 }
 0x50d   :  { %v1727_v57 = vunpack.c.l.b16 %v1599_v60  ;;  %v1907_v3 = vunpack.c.l.bf16 %v1599_v60  ;;  %v1721_v60 = vunpack.c.l.b16 %v1593_v62  ;;  %v1713_v62 = vunpack.c.l.b16 %v8743_v33 }
 0x50f   :  { %v8879_v47 = vmul.f32 %v1907_v3, %v1907_v3  ;;  %1527 = vmatmul.bf16.gmra.mxu3 %v8545_v8  ;;  %v1775_v20 = vpack.c.b16 %v1727_v57, %v1726_v4  ;;  %v1719_v8 = vunpack.c.l.b16 %v8814_v26  ;;  %v1772_v57 = vpack.c.b16 %v1721_v60, %v1720_v50 }
 0x510   :  { %v1712_v26 = vunpack.c.l.b16 %v8735_v7 }
 0x511   :  { %1837 = vmatpush.bf16.msrb.mxu2 %v1775_v20  ;;  %v1717_v20 = vunpack.c.l.b16 %v8793_v25  ;;  %v1771_v21 = vpack.c.b16 %v1719_v8, %v1718_v15 }
 0x512   :  { %v8884_v30 = vpop.f32.mrf.mxu3 }
 0x513   :  { %v1770_v35 = vpack.c.b16 %v1717_v20, %v1716_v41 }
 0x515   :  { %1838 = vmatpush.bf16.msrb.mxu2 %v1774_v38 }
 0x519   :  { %1839 = vmatpush.bf16.msrb.mxu2 %v1773_v48 }
 0x51a   :  { %v8886_v3 = vpop.f32.mrf.mxu3 }
 0x51d   :  { %1840 = vmatpush.bf16.msrb.mxu2 %v1772_v57 }
 0x51f   :  { %1532 = vmatmul.bf16.gmra.mxu3 %v8551_v40  ;;  %v1768_v40 = vpack.c.b16 %v1713_v62, %v1712_v26 }
 0x521   :  { %1841 = vmatpush.bf16.msrb.mxu2 %v1771_v21 }
 0x522   :  { %v8893_v38 = vpop.f32.mrf.mxu3 }
 0x525   :  { %1842 = vmatpush.bf16.msrb.mxu2 %v1770_v35 }
 0x529   :  { %1843 = vmatpush.bf16.msrb.mxu2 %v1769_v39 }
 0x52a   :  { %v8899_v25 = vpop.f32.mrf.mxu3 }
 0x52d   :  { %1844 = vmatpush.bf16.msrb.mxu2 %v1768_v40 }
 0x52f   :  { %1537 = vmatmul.bf16.gmra.mxu3 %v8557_v22 }
 0x530   :  { %1845 = vmatmul.bf16.vlgmr.msrb.gmra.mxu2 %v12837_v63 }
 0x532   :  { %v8903_v34 = vpop.f32.mrf.mxu3 }
 0x53a   :  { %v8905_v45 = vpop.f32.mrf.mxu3 }
 0x53b   :  { %v8986_v6 = vpack.c.bf16 %v8905_v45, %v8905_v45 }
 0x53f   :  { %1542 = vmatmul.bf16.gmra.mxu3 %v8563_v13 }
 0x542   :  { %v8908_v54 = vpop.f32.mrf.mxu3 }
 0x543   :  { %12850 = vst [vmem:[#allocation21_spill] sm:$0xff] %v8908_v54 }
 0x54a   :  { %v8910_v33 = vpop.f32.mrf.mxu3 }
 0x54b   :  { %12851 = vst [vmem:[#allocation22_spill] sm:$0xff] %v8910_v33  ;;  %v8974_v40 = vpack.c.bf16 %v8910_v33, %v8910_v33 }
 0x54f   :  { %1547 = vmatmul.bf16.gmra.mxu3 %v8569_v14 }
 0x552   :  { %v8913_v7 = vpop.f32.mrf.mxu3 }
 0x553   :  { %12852 = vst [vmem:[#allocation23_spill] sm:$0xff] %v8913_v7  ;;  %v8969_v39 = vpack.c.bf16 %v8913_v7, %v8913_v7 }
 0x55a   :  { %v8915_v4 = vpop.f32.mrf.mxu3 }
 0x55b   :  { %12853 = vst [vmem:[#allocation24_spill] sm:$0xff] %v8915_v4  ;;  %v8964_v35 = vpack.c.bf16 %v8915_v4, %v8915_v4  ;;  %v9013_v4 = vpack.c.bf16 %v8884_v30, %v8884_v30 }
 0x55f   :  { %1552 = vmatmul.bf16.gmra.mxu3 %v8575_v2 }
 0x562   :  { %v8918_v22 = vpop.f32.mrf.mxu3 }
 0x563   :  { %12854 = vst [vmem:[#allocation25_spill] sm:$0xff] %v8918_v22  ;;  %v8957_v21 = vpack.c.bf16 %v8918_v22, %v8918_v22 }
 0x565   :  { %v1738_v26 = vunpack.c.l.b16 %v8957_v21 }
 0x56a   :  { %v8920_v23 = vpop.f32.mrf.mxu3 }
 0x56b   :  { %12855 = vst [vmem:[#allocation26_spill] sm:$0xff] %v8920_v23  ;;  %v8952_v57 = vpack.c.bf16 %v8920_v23, %v8920_v23  ;;  %v9008_v23 = vpack.c.bf16 %v8886_v3, %v8886_v3 }
 0x56d   :  { %v1739_v42 = vunpack.c.l.b16 %v8952_v57 }
 0x56f   :  { %1557 = vmatmul.bf16.gmra.mxu3 %v8581_v18 }
 0x572   :  { %v8923_v36 = vpop.f32.mrf.mxu3 }
 0x573   :  { %12856 = vst [vmem:[#allocation27_spill] sm:$0xff] %v8923_v36  ;;  %v8946_v50 = vpack.c.bf16 %v8923_v36, %v8923_v36  ;;  %v9001_v36 = vpack.c.bf16 %v8893_v38, %v8893_v38 }
 0x575   :  { %v1740_v41 = vunpack.c.l.b16 %v8946_v50 }
 0x57a   :  { %v8925_v13 = vpop.f32.mrf.mxu3 }
 0x57b   :  { %12857 = vst [vmem:[#allocation28_spill] sm:$0xff] %v8925_v13  ;;  %v8938_v2 = vpack.c.bf16 %v8925_v13, %v8925_v13 }
 0x57d   :  { %v1741_v15 = vunpack.c.l.b16 %v8938_v2 }
 0x57f   :  { %1562 = vmatmul.bf16.gmra.mxu3 %v8587_v31  ;;  %v1782_v62 = vpack.c.b16 %v1741_v15, %v1740_v41  ;;  %v1736_v15 = vunpack.c.l.b16 %v8969_v39 }
 0x582   :  { %v8928_v60 = vpop.f32.mrf.mxu3 }
 0x583   :  { %12858 = vst [vmem:[#allocation29_spill] sm:$0xff] %v8928_v60  ;;  %v8932_v14 = vpack.c.bf16 %v8928_v60, %v8928_v60  ;;  %v8991_v60 = vpack.c.bf16 %v8903_v34, %v8903_v34 }
 0x585   :  { %v1742_v31 = vunpack.c.l.b16 %v8932_v14 }
 0x58a   :  { %v8934_v48 = vpop.f32.mrf.mxu3 }
 0x58b   :  { %12859 = vst [vmem:[#allocation54_spill] sm:$0xff] %v8934_v48  ;;  %v8942_v18 = vpack.c.bf16 %v8934_v48, %v8934_v48 }
 0x58d   :  { %v1743_v8 = vunpack.c.l.b16 %v8942_v18 }
 0x58f   :  { %v1783_v20 = vpack.c.b16 %v1743_v8, %v1742_v31  ;;  %v1737_v31 = vunpack.c.l.b16 %v8964_v35  ;;  %v1781_v8 = vpack.c.b16 %v1739_v42, %v1738_v26  ;;  %v8996_v26 = vpack.c.bf16 %v8899_v25, %v8899_v25 }
 0x591   :  { %1850 = vmatpush.bf16.msra.mxu1 %v1783_v20  ;;  %v8979_v20 = vpack.c.bf16 %v8908_v54, %v8908_v54  ;;  %v1780_v48 = vpack.c.b16 %v1737_v31, %v1736_v15  ;;  %v1732_v31 = vunpack.c.l.b16 %v8991_v60 }
 0x592   :  { %v8960_v10 = vpop.f32.mrf.mxu3 }
 0x593   :  { %v1734_v42 = vunpack.c.l.b16 %v8979_v20 }
 0x595   :  { %1851 = vmatpush.bf16.msra.mxu1 %v1782_v62  ;;  %v1735_v62 = vunpack.c.l.b16 %v8974_v40 }
 0x597   :  { %v1779_v13 = vpack.c.b16 %v1735_v62, %v1734_v42  ;;  %v1730_v62 = vunpack.c.l.b16 %v9001_v36  ;;  %v1729_v42 = vunpack.c.l.b16 %v9008_v23 }
 0x599   :  { %1852 = vmatpush.bf16.msra.mxu1 %v1781_v8  ;;  %v1733_v8 = vunpack.c.l.b16 %v8986_v6 }
 0x59a   :  { %v8982_v41 = vpop.f32.mrf.mxu3 }
 0x59b   :  { %v1778_v22 = vpack.c.b16 %v1733_v8, %v1732_v31  ;;  %v12860_v8 = vpack.c.bf16 %v8726_v52, %v8724_v43  ;;  %v12864_v52 = vpack.c.bf16 %v8667_v17, %v8664_v9  ;;  %v1923_v43 = vunpack.c.l.bf16 %v8942_v18 }
 0x59c   :  { %v1920_v9 = vunpack.c.l.bf16 %v8946_v50  ;;  %v1916_v50 = vunpack.c.l.bf16 %v8969_v39  ;;  %v1911_v39 = vunpack.c.l.bf16 %v8996_v26 }
 0x59d   :  { %1853 = vmatpush.bf16.msra.mxu1 %v1780_v48  ;;  %v1731_v48 = vunpack.c.l.b16 %v8996_v26 }
 0x59f   :  { %v1777_v7 = vpack.c.b16 %v1731_v48, %v1730_v62  ;;  %v12862_v48 = vpack.c.bf16 %v8697_v5, %v8694_v49  ;;  %v1922_v49 = vunpack.c.l.bf16 %v8932_v14  ;;  %v1921_v5 = vunpack.c.l.bf16 %v8938_v2 }
 0x5a0   :  { %v1984_v14 = vmul.f32 %v1920_v9, %v1920_v9 }
 0x5a1   :  { %1854 = vmatpush.bf16.msra.mxu1 %v1779_v13  ;;  %v1728_v13 = vunpack.c.l.b16 %v9013_v4  ;;  %v1986_v17 = vmul.f32 %v1922_v49, %v1922_v49  ;;  %v1985_v18 = vmul.f32 %v1921_v5, %v1921_v5 }
 0x5a2   :  { %v9004_v15 = vpop.f32.mrf.mxu3 }
 0x5a3   :  { %v1776_v54 = vpack.c.b16 %v1729_v42, %v1728_v13  ;;  %v2026_v2 = vpack.c.bf16 %v1985_v18, %v1984_v14 }
 0x5a5   :  { %1855 = vmatpush.bf16.msra.mxu1 %v1778_v22  ;;  %v12861_v22 = vpack.c.bf16 %v8712_v51, %v8709_v61  ;;  %v12865_v61 = vpack.c.bf16 %v8646_v28, %v8643_v19  ;;  %v1987_v51 = vmul.f32 %v1923_v43, %v1923_v43  ;;  %v12867_v19 = vpack.c.bf16 %v8605_v56, %v8603_v0 }
 0x5a6   :  { %v1918_v28 = vunpack.c.l.bf16 %v8957_v21  ;;  %v1914_v56 = vunpack.c.l.bf16 %v8979_v20  ;;  %v1980_v21 = vmul.f32 %v1916_v50, %v1916_v50  ;;  %v1912_v43 = vunpack.c.l.bf16 %v8991_v60 }
 0x5a7   :  { %v2027_v42 = vpack.c.bf16 %v1987_v51, %v1986_v17  ;;  %v1910_v51 = vunpack.c.l.bf16 %v9001_v36  ;;  %v1909_v20 = vunpack.c.l.bf16 %v9008_v23  ;;  %v1908_v17 = vunpack.c.l.bf16 %v9013_v4 }
 0x5a9   :  { %1856 = vmatpush.bf16.msra.mxu1 %v1777_v7  ;;  %v1973_v18 = vmul.f32 %v1909_v20, %v1909_v20  ;;  %v1972_v26 = vmul.f32 %v1908_v17, %v1908_v17 }
 0x5aa   :  { %v9018_v33 = vpop.f32.mrf.mxu3 }
 0x5ad   :  { %1857 = vmatpush.bf16.msra.mxu1 %v1776_v54  ;;  %v12863_v54 = vpack.c.bf16 %v8682_v44, %v8679_v46  ;;  %v12866_v46 = vpack.c.bf16 %v8625_v53, %v8623_v24  ;;  %v1919_v44 = vunpack.c.l.bf16 %v8952_v57  ;;  %v1917_v24 = vunpack.c.l.bf16 %v8964_v35 }
 0x5ae   :  { %v1982_v57 = vmul.f32 %v1918_v28, %v1918_v28  ;;  %v1913_v35 = vunpack.c.l.bf16 %v8986_v6  ;;  %v1975_v6 = vmul.f32 %v1911_v39, %v1911_v39 }
 0x5af   :  { %v1983_v53 = vmul.f32 %v1919_v44, %v1919_v44  ;;  %v1974_v44 = vmul.f32 %v1910_v51, %v1910_v51 }
 0x5b0   :  { %1858 = vmatmul.bf16.vlgmr.msra.gmra.mxu1 %v12837_v63 }
 0x5b1   :  { %2036 = vmatpush.bf16.msrb.mxu1 %v12860_v8  ;;  %v1915_v8 = vunpack.c.l.bf16 %v8974_v40  ;;  %v1977_v40 = vmul.f32 %v1913_v35, %v1913_v35  ;;  %v2021_v60 = vpack.c.bf16 %v1975_v6, %v1974_v44 }
 0x5b2   :  { %v9024_v31 = vpop.f32.mrf.mxu3 }
 0x5b3   :  { %v9139_v44 = vpack.c.bf16 %v9024_v31, %v9024_v31 }
 0x5b5   :  { %2037 = vmatpush.bf16.msrb.mxu1 %v12861_v22  ;;  %v1981_v22 = vmul.f32 %v1917_v24, %v1917_v24 }
 0x5b9   :  { %2038 = vmatpush.bf16.msrb.mxu1 %v12862_v48  ;;  %v2025_v48 = vpack.c.bf16 %v1983_v53, %v1982_v57 }
 0x5ba   :  { %v9032_v7 = vpop.f32.mrf.mxu3 }
 0x5bd   :  { %2039 = vmatpush.bf16.msrb.mxu1 %v12863_v54  ;;  %v2024_v54 = vpack.c.bf16 %v1981_v22, %v1980_v21 }
 0x5c1   :  { %2040 = vmatpush.bf16.msrb.mxu1 %v12864_v52  ;;  %v1979_v52 = vmul.f32 %v1915_v8, %v1915_v8 }
 0x5c2   :  { %v9041_v62 = vpop.f32.mrf.mxu3 }
 0x5c5   :  { %2041 = vmatpush.bf16.msrb.mxu1 %v12865_v61  ;;  %v1978_v61 = vmul.f32 %v1914_v56, %v1914_v56 }
 0x5c7   :  { %v2023_v49 = vpack.c.bf16 %v1979_v52, %v1978_v61 }
 0x5c9   :  { %2042 = vmatpush.bf16.msrb.mxu1 %v12866_v46  ;;  %v1976_v46 = vmul.f32 %v1912_v43, %v1912_v43 }
 0x5ca   :  { %v9053_v13 = vpop.f32.mrf.mxu3 }
 0x5cb   :  { %v2022_v9 = vpack.c.bf16 %v1977_v40, %v1976_v46  ;;  %v9129_v46 = vpack.c.bf16 %v9041_v62, %v9041_v62 }
 0x5cd   :  { %2043 = vmatpush.bf16.msrb.mxu1 %v12867_v19  ;;  %v2020_v19 = vpack.c.bf16 %v1973_v18, %v1972_v26  ;;  %v9144_v18 = vpack.c.bf16 %v9018_v33, %v9018_v33 }
 0x5d0   :  { %2044 = vmatmul.bf16.vlgmr.msrb.gmra.mxu1 %v12837_v63 }
 0x5d1   :  { %2062 = vmatpush.bf16.msra.mxu1 %v2027_v42 }
 0x5d2   :  { %v9063_v0 = vpop.f32.mrf.mxu3 }
 0x5d3   :  { %v9119_v61 = vpack.c.bf16 %v9063_v0, %v9063_v0 }
 0x5d5   :  { %2063 = vmatpush.bf16.msra.mxu1 %v2026_v2  ;;  %v1752_v20 = vunpack.c.l.b16 %v9119_v61 }
 0x5d9   :  { %2064 = vmatpush.bf16.msra.mxu1 %v2025_v48 }
 0x5da   :  { %v9069_v5 = vpop.f32.mrf.mxu3 }
 0x5dd   :  { %2065 = vmatpush.bf16.msra.mxu1 %v2024_v54  ;;  %v9114_v54 = vpack.c.bf16 %v9069_v5, %v9069_v5 }
 0x5df   :  { %v1753_v40 = vunpack.c.l.b16 %v9114_v54 }
 0x5e1   :  { %2066 = vmatpush.bf16.msra.mxu1 %v2023_v49  ;;  %v9124_v49 = vpack.c.bf16 %v9053_v13, %v9053_v13  ;;  %v1788_v17 = vpack.c.b16 %v1753_v40, %v1752_v20 }
 0x5e2   :  { %v9074_v42 = vpop.f32.mrf.mxu3 }
 0x5e3   :  { %v9109_v21 = vpack.c.bf16 %v9074_v42, %v9074_v42  ;;  %v1751_v6 = vunpack.c.l.b16 %v9124_v49 }
 0x5e5   :  { %2067 = vmatpush.bf16.msra.mxu1 %v2022_v9  ;;  %v1754_v39 = vunpack.c.l.b16 %v9109_v21  ;;  %v9134_v9 = vpack.c.bf16 %v9032_v7, %v9032_v7 }
 0x5e7   :  { %v1749_v26 = vunpack.c.l.b16 %v9134_v9 }
 0x5e9   :  { %2068 = vmatpush.bf16.msra.mxu1 %v2021_v60  ;;  %v1750_v60 = vunpack.c.l.b16 %v9129_v46 }
 0x5ea   :  { %v9076_v28 = vpop.f32.mrf.mxu3 }
 0x5eb   :  { %v9104_v22 = vpack.c.bf16 %v9076_v28, %v9076_v28 }
 0x5ed   :  { %2069 = vmatpush.bf16.msra.mxu1 %v2020_v19  ;;  %v1755_v52 = vunpack.c.l.b16 %v9104_v22  ;;  %v1787_v19 = vpack.c.b16 %v1751_v6, %v1750_v60  ;;  %v12868_v6 = vpack.c.bf16 %v8879_v47, %v8877_v29  ;;  %v12870_v60 = vpack.c.bf16 %v8850_v37, %v8847_v12  ;;  %v12874_v12 = vld [vmem:[#allocation53_spill] sm:$0xff]  ;;  %v12875_v37 = vld [vmem:[#allocation52_spill] sm:$0xff] }
 0x5ee   :  { %v12873_v29 = vpack.c.bf16 %v8799_v16, %v8796_v1  ;;  %v1833_v16 = vpop.f32.mrf.mxu1 }
 0x5ef   :  { %v1789_v51 = vpack.c.b16 %v1755_v52, %v1754_v39  ;;  %v9159_v52 = vpack.c.bf16 %v8960_v10, %v8960_v10 }
 0x5f0   :  { %2070 = vmatmul.bf16.vlgmr.msra.gmra.mxu1 %v12837_v63 }
 0x5f2   :  { %v9079_v36 = vpop.f32.mrf.mxu3 }
 0x5f3   :  { %v9099_v50 = vpack.c.bf16 %v9079_v36, %v9079_v36 }
 0x5f5   :  { %v1756_v35 = vunpack.c.l.b16 %v9099_v50 }
 0x5fa   :  { %v9081_v23 = vpop.f32.mrf.mxu3 }
 0x5fb   :  { %v9093_v53 = vpack.c.bf16 %v9081_v23, %v9081_v23 }
 0x5fd   :  { %v1757_v48 = vunpack.c.l.b16 %v9093_v53 }
 0x5ff   :  { %v1790_v43 = vpack.c.b16 %v1757_v48, %v1756_v35  ;;  %v9154_v48 = vpack.c.bf16 %v8982_v41, %v8982_v41 }
 0x601   :  { %v1745_v39 = vunpack.c.l.b16 %v9154_v48 }
 0x602   :  { %v9083_v14 = vpop.f32.mrf.mxu3 }
 0x603   :  { %v9087_v4 = vpack.c.bf16 %v9083_v14, %v9083_v14 }
 0x605   :  { %v1758_v57 = vunpack.c.l.b16 %v9087_v4 }
 0x60a   :  { %v9089_v24 = vpop.f32.mrf.mxu3 }
 0x60b   :  { %v1631_v2 = vpack.c.bf16 %v9089_v24, %v9089_v24 }
 0x60d   :  { %v1759_v8 = vunpack.c.l.b16 %v1631_v2  ;;  %v1939_v47 = vunpack.c.l.bf16 %v1631_v2 }
 0x60f   :  { %v1791_v56 = vpack.c.b16 %v1759_v8, %v1758_v57  ;;  %v9149_v57 = vpack.c.bf16 %v9004_v15, %v9004_v15  ;;  %v1748_v8 = vunpack.c.l.b16 %v9139_v44 }
 0x611   :  { %1863 = vmatpush.bf16.msra.mxu2 %v1791_v56  ;;  %v1747_v56 = vunpack.c.l.b16 %v9144_v18  ;;  %v1786_v35 = vpack.c.b16 %v1749_v26, %v1748_v8  ;;  %v12871_v26 = vpack.c.bf16 %v8835_v32, %v8832_v58  ;;  %v2003_v8 = vmul.f32 %v1939_v47, %v1939_v47 }
 0x612   :  { %v1936_v58 = vunpack.c.l.bf16 %v9099_v50 }
 0x615   :  { %1864 = vmatpush.bf16.msra.mxu2 %v1790_v43  ;;  %v1746_v43 = vunpack.c.l.b16 %v9149_v57 }
 0x617   :  { %v1785_v40 = vpack.c.b16 %v1747_v56, %v1746_v43  ;;  %v12876_v56 = vpack.c.bf16 %v12874_v12, %v12875_v37  ;;  %v12878_v43 = vld [vmem:[#allocation48_spill] sm:$0xff] }
 0x619   :  { %1865 = vmatpush.bf16.msra.mxu2 %v1789_v51  ;;  %v1744_v51 = vunpack.c.l.b16 %v9159_v52 }
 0x61b   :  { %v1784_v20 = vpack.c.b16 %v1745_v39, %v1744_v51  ;;  %v2000_v39 = vmul.f32 %v1936_v58, %v1936_v58  ;;  %v1933_v51 = vunpack.c.l.bf16 %v9114_v54  ;;  %v1929_v54 = vunpack.c.l.bf16 %v9134_v9 }
 0x61c   :  { %v1926_v58 = vunpack.c.l.bf16 %v9149_v57 }
 0x61d   :  { %1866 = vmatpush.bf16.msra.mxu2 %v1788_v17  ;;  %v12869_v17 = vpack.c.bf16 %v8865_v11, %v8862_v59  ;;  %v1938_v59 = vunpack.c.l.bf16 %v9087_v4  ;;  %v1937_v11 = vunpack.c.l.bf16 %v9093_v53  ;;  %v1846_v4 = vpop.f32.mrf.mxu2  ;;  %v1934_v53 = vunpack.c.l.bf16 %v9109_v21 }
 0x61e   :  { %v1930_v21 = vunpack.c.l.bf16 %v9129_v46  ;;  %v1993_v37 = vmul.f32 %v1929_v54, %v1929_v54 }
 0x61f   :  { %v2002_v32 = vmul.f32 %v1938_v59, %v1938_v59 }
 0x620   :  { %v1994_v12 = vmul.f32 %v1930_v21, %v1930_v21 }
 0x621   :  { %1867 = vmatpush.bf16.msra.mxu2 %v1787_v19  ;;  %v12872_v19 = vpack.c.bf16 %v8820_v55, %v8817_v27  ;;  %v1935_v27 = vunpack.c.l.bf16 %v9104_v22  ;;  %v2001_v55 = vmul.f32 %v1937_v11, %v1937_v11  ;;  %v2035_v2 = vpack.c.bf16 %v2003_v8, %v2002_v32 }
 0x622   :  { %v1932_v22 = vunpack.c.l.bf16 %v9119_v61  ;;  %v1928_v8 = vunpack.c.l.bf16 %v9139_v44  ;;  %v1927_v61 = vunpack.c.l.bf16 %v9144_v18 }
 0x623   :  { %v2034_v50 = vpack.c.bf16 %v2001_v55, %v2000_v39 }
 0x624   :  { %v1992_v32 = vmul.f32 %v1928_v8, %v1928_v8  ;;  %v1991_v55 = vmul.f32 %v1927_v61, %v1927_v61 }
 0x625   :  { %1868 = vmatpush.bf16.msra.mxu2 %v1786_v35  ;;  %v12877_v35 = vld [vmem:[#allocation49_spill] sm:$0xff]  ;;  %v1848_v47 = vpop.f32.mrf.mxu2 }
 0x626   :  { %v12879_v1 = vpack.c.bf16 %v12877_v35, %v12878_v43  ;;  %v2030_v9 = vpack.c.bf16 %v1993_v37, %v1992_v32  ;;  %v1990_v35 = vmul.f32 %v1926_v58, %v1926_v58  ;;  %v150_v37 = vld [vmem:[%s12425_s5] sm:$0x1] }
 0x627   :  { %v9212_v32 = vld [vmem:[%s12426_s6] sm:$0x1] }
 0x628   :  { %v2029_v43 = vpack.c.bf16 %v1991_v55, %v1990_v35  ;;  %v12881_v35 = vld [vmem:[#allocation31_spill] sm:$0xff] }
 0x629   :  { %1869 = vmatpush.bf16.msra.mxu2 %v1785_v40  ;;  %v1847_v40 = vadd.f32 %v1846_v4, %v1833_v16 }
 0x62d   :  { %1870 = vmatpush.bf16.msra.mxu2 %v1784_v20  ;;  %v1999_v20 = vmul.f32 %v1935_v27, %v1935_v27  ;;  %v1925_v27 = vunpack.c.l.bf16 %v9154_v48 }
 0x62f   :  { %v1989_v44 = vmul.f32 %v1925_v27, %v1925_v27 }
 0x630   :  { %1871 = vmatmul.bf16.vlgmr.msra.gmra.mxu2 %v12837_v63 }
 0x631   :  { %2049 = vmatpush.bf16.msrb.mxu2 %v12868_v6  ;;  %v1998_v6 = vmul.f32 %v1934_v53, %v1934_v53 }
 0x635   :  { %2050 = vmatpush.bf16.msrb.mxu2 %v12869_v17  ;;  %v1931_v17 = vunpack.c.l.bf16 %v9124_v49 }
 0x637   :  { %v1995_v59 = vmul.f32 %v1931_v17, %v1931_v17 }
 0x639   :  { %2051 = vmatpush.bf16.msrb.mxu2 %v12870_v60  ;;  %v1997_v60 = vmul.f32 %v1933_v51, %v1933_v51  ;;  %v2031_v49 = vpack.c.bf16 %v1995_v59, %v1994_v12 }
 0x63d   :  { %2052 = vmatpush.bf16.msrb.mxu2 %v12871_v26  ;;  %v2033_v26 = vpack.c.bf16 %v1999_v20, %v1998_v6 }
 0x641   :  { %2053 = vmatpush.bf16.msrb.mxu2 %v12872_v19  ;;  %v1835_v19 = vpop.f32.mrf.mxu1 }
 0x645   :  { %2054 = vmatpush.bf16.msrb.mxu2 %v12873_v29  ;;  %v1996_v29 = vmul.f32 %v1932_v22, %v1932_v22 }
 0x647   :  { %v2032_v11 = vpack.c.bf16 %v1997_v60, %v1996_v29 }
 0x649   :  { %2055 = vmatpush.bf16.msrb.mxu2 %v12876_v56  ;;  %v1859_v56 = vpop.f32.mrf.mxu1 }
 0x64a   :  { %v1860_v46 = vadd.f32 %v1859_v56, %v1847_v40 }
 0x64d   :  { %2056 = vmatpush.bf16.msrb.mxu2 %v12879_v1 }
 0x650   :  { %2057 = vmatmul.bf16.vlgmr.msrb.gmra.mxu2 %v12837_v63 }
 0x651   :  { %2075 = vmatpush.bf16.msra.mxu2 %v2035_v2  ;;  %v1924_v2 = vunpack.c.l.bf16 %v9159_v52  ;;  %v1861_v1 = vpop.f32.mrf.mxu1 }
 0x653   :  { %v1988_v18 = vmul.f32 %v1924_v2, %v1924_v2 }
 0x655   :  { %2076 = vmatpush.bf16.msra.mxu2 %v2034_v50  ;;  %v2028_v16 = vpack.c.bf16 %v1989_v44, %v1988_v18  ;;  %v12883_v18 = vld [vmem:[#allocation33_spill] sm:$0xff] }
 0x659   :  { %2077 = vmatpush.bf16.msra.mxu2 %v2033_v26  ;;  %v2045_v57 = vpop.f32.mrf.mxu1 }
 0x65d   :  { %2078 = vmatpush.bf16.msra.mxu2 %v2032_v11 }
 0x661   :  { %2079 = vmatpush.bf16.msra.mxu2 %v2031_v49  ;;  %v2047_v4 = vpop.f32.mrf.mxu1 }
 0x665   :  { %2080 = vmatpush.bf16.msra.mxu2 %v2030_v9  ;;  %v12880_v9 = vld [vmem:[#allocation30_spill] sm:$0xff] }
 0x669   :  { %2081 = vmatpush.bf16.msra.mxu2 %v2029_v43  ;;  %v12882_v43 = vld [vmem:[#allocation32_spill] sm:$0xff] }
 0x66d   :  { %2082 = vmatpush.bf16.msra.mxu2 %v2028_v16  ;;  %v2071_v48 = vpop.f32.mrf.mxu1 }
 0x670   :  { %2083 = vmatmul.bf16.vlgmr.msra.gmra.mxu2 %v12837_v63  ;;  %v12919_v63 = vld [vmem:[#allocation23_spill] sm:$0xff] }
 0x675   :  { %v2073_v51 = vpop.f32.mrf.mxu1 }
 0x676   :  { %v12887_v51 = vld [vmem:[#allocation37_spill] sm:$0xff] }
 0x6b3   :  { %v1872_v53 = vpop.f32.mrf.mxu2 }
 0x6b4   :  { %v1873_v39 = vadd.f32 %v1872_v53, %v1860_v46  ;;  %v12885_v53 = vld [vmem:[#allocation35_spill] sm:$0xff] }
 0x6b6   :  { %v2088_v6 = vmul.f32 0.001953125, %v1873_v39 }
 0x6b8   :  { %v2090_v26 = vmul.f32 %v2088_v6, %v2088_v6 }
 0x6bb   :  { %v1874_v40 = vpop.f32.mrf.mxu2 }
 0x6d3   :  { %v2058_v20 = vpop.f32.mrf.mxu2 }
 0x6d4   :  { %v2059_v52 = vadd.f32 %v2058_v20, %v2045_v57  ;;  %v12884_v57 = vld [vmem:[#allocation34_spill] sm:$0xff] }
 0x6d6   :  { %v2072_v50 = vadd.f32 %v2071_v48, %v2059_v52  ;;  %v12886_v48 = vld [vmem:[#allocation36_spill] sm:$0xff]  ;;  %v12888_v52 = vld [vmem:[#allocation38_spill] sm:$0xff] }
 0x6db   :  { %v2060_v22 = vpop.f32.mrf.mxu2 }
 0x6dc   :  { %v12889_v22 = vld [vmem:[#allocation39_spill] sm:$0xff] }
 0x6f3   :  { %v2084_v17 = vpop.f32.mrf.mxu2 }
 0x6f4   :  { %v2085_v60 = vadd.f32 %v2084_v17, %v2072_v50  ;;  %v12890_v17 = vld [vmem:[#allocation40_spill] sm:$0xff] }
 0x6f6   :  { %v2089_v19 = vmul.f32 0.001953125, %v2085_v60 }
 0x6f8   :  { %v2091_v47 = vsub.f32 %v2089_v19, %v2090_v26  ;;  %v12891_v26 = vld [vmem:[#allocation41_spill] sm:$0xff] }
 0x6fa   :  { %v2092_v21 = vmax.f32 %v2091_v47, 0.0  ;;  %v12892_v47 = vld [vmem:[#allocation42_spill] sm:$0xff] }
 0x6fb   :  { %v2086_v29 = vpop.f32.mrf.mxu2 }
 0x6fc   :  { %v2093_v54 = vadd.f32 1e-05, %v2092_v21  ;;  %v12893_v29 = vld [vmem:[#allocation43_spill] sm:$0xff] }
 0x6fe   :  { %7187 = vrsqrt.f32 %v2093_v54  ;;  %vm2100_vm6 = vweird.f32 %v2093_v54 }
 0x704   :  { %v7188_v59 = vpop.eup %7187 }
 0x705   :  { %v2095_v11 = vmul.f32 %v7188_v59, %v2093_v54  ;;  %vm2101_vm5 = vweird.f32 %v7188_v59 }
 0x706   :  { %vm2102_vm7 = vmor %vm2100_vm6, %vm2101_vm5 }
 0x707   :  { %v2096_v8 = vmul.f32 %v7188_v59, %v2095_v11 }
 0x709   :  { %v2097_v12 = vmul.f32 0.5, %v2096_v8  ;;  %v12895_v8 = vld [vmem:[#allocation45_spill] sm:$0xff] }
 0x70b   :  { %v2098_v61 = vsub.f32 1.5, %v2097_v12 }
 0x70d   :  { %v2099_v49 = vmul.f32 %v7188_v59, %v2098_v61  ;;  %v12896_v61 = vld [vmem:[#allocation46_spill] sm:$0xff] }
 0x70f   :  { %v2103_v56 = vsel %vm2102_vm7, %v7188_v59, %v2099_v49  ;;  %v12894_v59 = vld [vmem:[#allocation44_spill] sm:$0xff]  ;;  %v12897_v49 = vld [vmem:[#allocation47_spill] sm:$0xff] }
 0x710   :  { %v2104_v58 = vmul.f32 %v2103_v56, %v150_v37 }
 0x712   :  { %v9214_v46 = vmul.f32 %v2104_v58, %v2088_v6  ;;  %v9216_v27 = vperm.slane %v2104_v58, 0  ;;  %v12898_v58 = vld [vmem:[#allocation50_spill] sm:$0xff] }
 0x714   :  { %v2106_v55 = vsub.f32 %v9212_v32, %v9214_v46  ;;  %v9222_v2 = vmul.f32 %v9216_v27, %v12880_v9  ;;  %v9226_v44 = vmul.f32 %v9216_v27, %v12881_v35  ;;  %v9230_v1 = vmul.f32 %v9216_v27, %v12882_v43  ;;  %v12899_v46 = vld [vmem:[#allocation51_spill] sm:$0xff]  ;;  %v12900_v35 = vld [vmem:[#allocation9_spill] sm:$0xff] }
 0x715   :  { %v9234_v16 = vmul.f32 %v9216_v27, %v12883_v18  ;;  %v9238_v4 = vmul.f32 %v9216_v27, %v12884_v57  ;;  %v9242_v39 = vmul.f32 %v9216_v27, %v12885_v53  ;;  %v9246_v40 = vmul.f32 %v9216_v27, %v12886_v48  ;;  %v12901_v18 = vld [vmem:[#allocation10_spill] sm:$0xff]  ;;  %v12902_v53 = vld [vmem:[#allocation11_spill] sm:$0xff] }
 0x716   :  { %v9250_v20 = vmul.f32 %v9216_v27, %v12887_v51  ;;  %v9254_v50 = vmul.f32 %v9216_v27, %v12888_v52  ;;  %v9258_v6 = vmul.f32 %v9216_v27, %v12889_v22  ;;  %v9262_v60 = vmul.f32 %v9216_v27, %v12890_v17  ;;  %v12903_v51 = vld [vmem:[#allocation12_spill] sm:$0xff]  ;;  %v12904_v22 = vld [vmem:[#allocation13_spill] sm:$0xff] }
 0x717   :  { %v9266_v19 = vmul.f32 %v9216_v27, %v12891_v26  ;;  %v9270_v21 = vmul.f32 %v9216_v27, %v12892_v47  ;;  %v9274_v54 = vmul.f32 %v9216_v27, %v12893_v29  ;;  %v9278_v11 = vmul.f32 %v9216_v27, %v12894_v59  ;;  %v12905_v26 = vld [vmem:[#allocation14_spill] sm:$0xff]  ;;  %v12906_v29 = vld [vmem:[#allocation15_spill] sm:$0xff] }
 0x718   :  { %v9282_v12 = vmul.f32 %v9216_v27, %v12895_v8  ;;  %v9286_v37 = vmul.f32 %v9216_v27, %v12896_v61  ;;  %v9290_v56 = vmul.f32 %v9216_v27, %v12897_v49  ;;  %v9294_v32 = vmul.f32 %v9216_v27, %v12898_v58  ;;  %v12907_v8 = vld [vmem:[#allocation16_spill] sm:$0xff]  ;;  %v12908_v49 = vld [vmem:[#allocation17_spill] sm:$0xff] }
 0x719   :  { %v9298_v9 = vmul.f32 %v9216_v27, %v12899_v46  ;;  %v9302_v43 = vmul.f32 %v9216_v27, %v12900_v35  ;;  %v9306_v57 = vmul.f32 %v9216_v27, %v12901_v18  ;;  %v9310_v48 = vmul.f32 %v9216_v27, %v12902_v53  ;;  %v12909_v46 = vld [vmem:[#allocation18_spill] sm:$0xff]  ;;  %v12910_v18 = vld [vmem:[#allocation19_spill] sm:$0xff] }
 0x71a   :  { %v9314_v52 = vmul.f32 %v9216_v27, %v12903_v51  ;;  %v9318_v17 = vmul.f32 %v9216_v27, %v12904_v22  ;;  %v9322_v47 = vmul.f32 %v9216_v27, %v12905_v26  ;;  %v9326_v59 = vmul.f32 %v9216_v27, %v12906_v29  ;;  %v12911_v51 = vld [vmem:[#allocation20_spill] sm:$0xff] }
 0x71b   :  { %v9330_v61 = vmul.f32 %v9216_v27, %v12907_v8  ;;  %v9334_v58 = vmul.f32 %v9216_v27, %v12908_v49  ;;  %v9338_v35 = vmul.f32 %v9216_v27, %v12909_v46  ;;  %v9342_v53 = vmul.f32 %v9216_v27, %v12910_v18  ;;  %v12915_v18 = vld [vmem:[#allocation21_spill] sm:$0xff] }
 0x71c   :  { %v9346_v22 = vmul.f32 %v9216_v27, %v12911_v51  ;;  %v9350_v26 = vmul.f32 %v9216_v27, %v8884_v30  ;;  %v9354_v29 = vmul.f32 %v9216_v27, %v8886_v3  ;;  %v9358_v8 = vmul.f32 %v9216_v27, %v8893_v38  ;;  %v12917_v51 = vld [vmem:[#allocation22_spill] sm:$0xff] }
 0x71d   :  { %v9362_v49 = vmul.f32 %v9216_v27, %v8899_v25  ;;  %v9366_v46 = vmul.f32 %v9216_v27, %v8903_v34  ;;  %v9370_v30 = vmul.f32 %v9216_v27, %v8905_v45  ;;  %v9374_v3 = vmul.f32 %v9216_v27, %v12915_v18 }
 0x71e   :  { %v9378_v38 = vmul.f32 %v9216_v27, %v12917_v51  ;;  %v9382_v25 = vmul.f32 %v9216_v27, %v12919_v63 }
 0x71f   :  { %12912 = vst [vmem:[#allocation53_spill] sm:$0xff] %v9362_v49  ;;  %v12921_v49 = vld [vmem:[#allocation24_spill] sm:$0xff] }
 0x720   :  { %12913 = vst [vmem:[#allocation52_spill] sm:$0xff] %v9366_v46  ;;  %v9386_v34 = vmul.f32 %v9216_v27, %v12921_v49  ;;  %v12923_v46 = vld [vmem:[#allocation25_spill] sm:$0xff] }
 0x721   :  { %12914 = vst [vmem:[#allocation49_spill] sm:$0xff] %v9370_v30  ;;  %v9390_v45 = vmul.f32 %v9216_v27, %v12923_v46  ;;  %v12924_v30 = vld [vmem:[#allocation26_spill] sm:$0xff] }
 0x722   :  { %12916 = vst [vmem:[#allocation48_spill] sm:$0xff] %v9374_v3  ;;  %v9394_v18 = vmul.f32 %v9216_v27, %v12924_v30  ;;  %v12925_v3 = vld [vmem:[#allocation27_spill] sm:$0xff]  ;;  %v9414_v30 = vmul.f32 %v9216_v27, %v8960_v10  ;;  %v9434_v10 = vmul.f32 %v9216_v27, %v9032_v7  ;;  %v9454_v7 = vmul.f32 %v9216_v27, %v9074_v42 }
 0x723   :  { %12918 = vst [vmem:[#allocation30_spill] sm:$0xff] %v9378_v38  ;;  %v9398_v51 = vmul.f32 %v9216_v27, %v12925_v3  ;;  %v12926_v38 = vld [vmem:[#allocation28_spill] sm:$0xff]  ;;  %v9418_v3 = vmul.f32 %v9216_v27, %v8982_v41  ;;  %v9438_v41 = vmul.f32 %v9216_v27, %v9041_v62  ;;  %v9458_v62 = vmul.f32 %v9216_v27, %v9076_v28 }
 0x724   :  { %12920 = vst [vmem:[#allocation31_spill] sm:$0xff] %v9382_v25  ;;  %v9402_v63 = vmul.f32 %v9216_v27, %v12926_v38  ;;  %v12927_v25 = vld [vmem:[#allocation29_spill] sm:$0xff]  ;;  %v9422_v38 = vmul.f32 %v9216_v27, %v9004_v15  ;;  %v9442_v15 = vmul.f32 %v9216_v27, %v9053_v13  ;;  %v9464_v13 = vmul.f32 %v9216_v27, %v9079_v36 }
 0x725   :  { %12922 = vst [vmem:[#allocation32_spill] sm:$0xff] %v9386_v34  ;;  %v9406_v49 = vmul.f32 %v9216_v27, %v12927_v25  ;;  %v12928_v34 = vld [vmem:[#allocation54_spill] sm:$0xff]  ;;  %v9426_v25 = vmul.f32 %v9216_v27, %v9018_v33  ;;  %v9446_v33 = vmul.f32 %v9216_v27, %v9063_v0  ;;  %v9468_v0 = vmul.f32 %v9216_v27, %v9081_v23 }
 0x726   :  { %v9410_v46 = vmul.f32 %v9216_v27, %v12928_v34  ;;  %v9430_v34 = vmul.f32 %v9216_v27, %v9024_v31  ;;  %12929 = vst [vmem:[#allocation33_spill] sm:$0xff] %v9438_v41  ;;  %v9450_v31 = vmul.f32 %v9216_v27, %v9069_v5  ;;  %v9460_v41 = vperm.slane %v2106_v55, 0 }
 0x727   :  { %v9472_v5 = vmul.f32 %v9216_v27, %v9083_v14  ;;  %v9476_v42 = vmul.f32 %v9216_v27, %v9089_v24 }
 0x728   :  { %v9480_v28 = vadd.f32 %v9460_v41, %v9222_v2  ;;  %v9484_v36 = vadd.f32 %v9460_v41, %v9226_v44  ;;  %v9488_v23 = vadd.f32 %v9460_v41, %v9230_v1  ;;  %v9492_v14 = vadd.f32 %v9460_v41, %v9234_v16 }
 0x729   :  { %v9496_v24 = vadd.f32 %v9460_v41, %v9238_v4  ;;  %v9500_v27 = vadd.f32 %v9460_v41, %v9242_v39  ;;  %v9504_v55 = vadd.f32 %v9460_v41, %v9246_v40  ;;  %v9508_v2 = vadd.f32 %v9460_v41, %v9250_v20 }
 0x72a   :  { %12930 = vst [vmem:[#allocation34_spill] sm:$0xff] %v9480_v28  ;;  %v9512_v44 = vadd.f32 %v9460_v41, %v9254_v50  ;;  %v9516_v1 = vadd.f32 %v9460_v41, %v9258_v6  ;;  %v9520_v16 = vadd.f32 %v9460_v41, %v9262_v60  ;;  %v9524_v4 = vadd.f32 %v9460_v41, %v9266_v19 }
 0x72b   :  { %12931 = vst [vmem:[#allocation35_spill] sm:$0xff] %v9484_v36  ;;  %v9528_v39 = vadd.f32 %v9460_v41, %v9270_v21  ;;  %v9532_v40 = vadd.f32 %v9460_v41, %v9274_v54  ;;  %v9536_v20 = vadd.f32 %v9460_v41, %v9278_v11  ;;  %v9540_v50 = vadd.f32 %v9460_v41, %v9282_v12 }
 0x72c   :  { %12932 = vst [vmem:[#allocation36_spill] sm:$0xff] %v9492_v14  ;;  %v9544_v6 = vadd.f32 %v9460_v41, %v9286_v37  ;;  %v9548_v60 = vadd.f32 %v9460_v41, %v9290_v56  ;;  %v9552_v19 = vadd.f32 %v9460_v41, %v9294_v32  ;;  %v9556_v21 = vadd.f32 %v9460_v41, %v9298_v9 }
 0x72d   :  { %12933 = vst [vmem:[#allocation37_spill] sm:$0xff] %v9500_v27  ;;  %v9560_v54 = vadd.f32 %v9460_v41, %v9302_v43  ;;  %v9564_v11 = vadd.f32 %v9460_v41, %v9306_v57  ;;  %v9568_v12 = vadd.f32 %v9460_v41, %v9310_v48  ;;  %v9572_v37 = vadd.f32 %v9460_v41, %v9314_v52 }
 0x72e   :  { %12934 = vst [vmem:[#allocation38_spill] sm:$0xff] %v9504_v55  ;;  %v9576_v56 = vadd.f32 %v9460_v41, %v9318_v17  ;;  %v9580_v32 = vadd.f32 %v9460_v41, %v9322_v47  ;;  %v9584_v9 = vadd.f32 %v9460_v41, %v9326_v59  ;;  %v9588_v43 = vadd.f32 %v9460_v41, %v9330_v61 }
 0x72f   :  { %12935 = vst [vmem:[#allocation39_spill] sm:$0xff] %v9508_v2  ;;  %v9592_v57 = vadd.f32 %v9460_v41, %v9334_v58  ;;  %v9596_v48 = vadd.f32 %v9460_v41, %v9338_v35  ;;  %v9600_v52 = vadd.f32 %v9460_v41, %v9342_v53  ;;  %v9604_v17 = vadd.f32 %v9460_v41, %v9346_v22  ;;  %v12958_v58 = vld [vmem:[#allocation53_spill] sm:$0xff]  ;;  %v12960_v53 = vld [vmem:[#allocation52_spill] sm:$0xff] }
 0x730   :  { %12936 = vst [vmem:[#allocation40_spill] sm:$0xff] %v9512_v44  ;;  %v9608_v47 = vadd.f32 %v9460_v41, %v9350_v26  ;;  %v9612_v59 = vadd.f32 %v9460_v41, %v9354_v29  ;;  %v9616_v61 = vadd.f32 %v9460_v41, %v9358_v8  ;;  %v9620_v35 = vadd.f32 %v9460_v41, %v12958_v58 }
 0x731   :  { %12937 = vst [vmem:[#allocation41_spill] sm:$0xff] %v9516_v1  ;;  %v9624_v22 = vadd.f32 %v9460_v41, %v12960_v53 }
 0x732   :  { %12938 = vst [vmem:[#allocation42_spill] sm:$0xff] %v9520_v16 }
 0x733   :  { %12939 = vst [vmem:[#allocation43_spill] sm:$0xff] %v9524_v4 }
 0x734   :  { %12940 = vst [vmem:[#allocation44_spill] sm:$0xff] %v9528_v39 }
 0x735   :  { %12941 = vst [vmem:[#allocation45_spill] sm:$0xff] %v9532_v40 }
 0x736   :  { %12942 = vst [vmem:[#allocation46_spill] sm:$0xff] %v9536_v20 }
 0x737   :  { %12943 = vst [vmem:[#allocation47_spill] sm:$0xff] %v9540_v50 }
 0x738   :  { %12944 = vst [vmem:[#allocation50_spill] sm:$0xff] %v9564_v11 }
 0x739   :  { %12945 = vst [vmem:[#allocation51_spill] sm:$0xff] %v9568_v12 }
 0x73a   :  { %12946 = vst [vmem:[#allocation9_spill] sm:$0xff] %v9572_v37 }
 0x73b   :  { %12947 = vst [vmem:[#allocation10_spill] sm:$0xff] %v9576_v56 }
 0x73c   :  { %12948 = vst [vmem:[#allocation11_spill] sm:$0xff] %v9580_v32 }
 0x73d   :  { %12949 = vst [vmem:[#allocation12_spill] sm:$0xff] %v9584_v9 }
 0x73e   :  { %12950 = vst [vmem:[#allocation13_spill] sm:$0xff] %v9588_v43 }
 0x73f   :  { %12951 = vst [vmem:[#allocation14_spill] sm:$0xff] %v9592_v57 }
 0x740   :  { %12952 = vst [vmem:[#allocation15_spill] sm:$0xff] %v9596_v48 }
 0x741   :  { %12953 = vst [vmem:[#allocation16_spill] sm:$0xff] %v9600_v52 }
 0x742   :  { %12954 = vst [vmem:[#allocation17_spill] sm:$0xff] %v9604_v17  ;;  %v12961_v17 = vld [vmem:[#allocation49_spill] sm:$0xff] }
 0x743   :  { %12955 = vst [vmem:[#allocation18_spill] sm:$0xff] %v9608_v47  ;;  %v9628_v26 = vadd.f32 %v9460_v41, %v12961_v17  ;;  %v12963_v47 = vld [vmem:[#allocation48_spill] sm:$0xff]  ;;  %v9648_v17 = vadd.f32 %v9460_v41, %v9390_v45  ;;  %v9668_v45 = vadd.f32 %v9460_v41, %v9410_v46  ;;  %v9688_v46 = vadd.f32 %v9460_v41, %v9430_v34 }
 0x744   :  { %12956 = vst [vmem:[#allocation19_spill] sm:$0xff] %v9612_v59  ;;  %v9632_v29 = vadd.f32 %v9460_v41, %v12963_v47  ;;  %v12965_v59 = vld [vmem:[#allocation30_spill] sm:$0xff]  ;;  %v9652_v47 = vadd.f32 %v9460_v41, %v9394_v18  ;;  %v9672_v18 = vadd.f32 %v9460_v41, %v9414_v30  ;;  %v9692_v30 = vadd.f32 %v9460_v41, %v9434_v10 }
 0x745   :  { %12957 = vst [vmem:[#allocation20_spill] sm:$0xff] %v9616_v61  ;;  %v9636_v8 = vadd.f32 %v9460_v41, %v12965_v59  ;;  %v12967_v61 = vld [vmem:[#allocation31_spill] sm:$0xff]  ;;  %v9656_v59 = vadd.f32 %v9460_v41, %v9398_v51  ;;  %v9676_v51 = vadd.f32 %v9460_v41, %v9418_v3  ;;  %v9708_v34 = vadd.f32 %v9460_v41, %v9450_v31 }
 0x746   :  { %12959 = vst [vmem:[#allocation21_spill] sm:$0xff] %v9620_v35  ;;  %v9640_v58 = vadd.f32 %v9460_v41, %v12967_v61  ;;  %v12969_v35 = vld [vmem:[#allocation32_spill] sm:$0xff]  ;;  %v9660_v61 = vadd.f32 %v9460_v41, %v9402_v63  ;;  %v9680_v63 = vadd.f32 %v9460_v41, %v9422_v38  ;;  %v9700_v38 = vadd.f32 %v9460_v41, %v9442_v15 }
 0x747   :  { %12962 = vst [vmem:[#allocation22_spill] sm:$0xff] %v9628_v26  ;;  %v9644_v53 = vadd.f32 %v9460_v41, %v12969_v35  ;;  %v9664_v35 = vadd.f32 %v9460_v41, %v9406_v49  ;;  %v9684_v49 = vadd.f32 %v9460_v41, %v9426_v25  ;;  %v9704_v25 = vadd.f32 %v9460_v41, %v9446_v33 }
 0x748   :  { %12964 = vst [vmem:[#allocation23_spill] sm:$0xff] %v9632_v29  ;;  %v9712_v10 = vadd.f32 %v9460_v41, %v9454_v7  ;;  %v9720_v15 = vadd.f32 %v9460_v41, %v9464_v13  ;;  %v9724_v33 = vadd.f32 %v9460_v41, %v9468_v0  ;;  %v9728_v31 = vadd.f32 %v9460_v41, %v9472_v5 }
 0x749   :  { %12966 = vst [vmem:[#allocation24_spill] sm:$0xff] %v9636_v8  ;;  %v9732_v7 = vadd.f32 %v9460_v41, %v9476_v42  ;;  %v13001_v0 = vmax.f32 %v9484_v36, 0.0  ;;  %v13003_v5 = vmax.f32 %v9492_v14, 0.0  ;;  %v13005_v42 = vmax.f32 %v9500_v27, 0.0 }
 0x74a   :  { %12968 = vst [vmem:[#allocation25_spill] sm:$0xff] %v9640_v58  ;;  %v12990_v11 = vld [vmem:[#allocation18_spill] sm:$0xff]  ;;  %v13009_v36 = vmax.f32 %v9516_v1, 0.0  ;;  %v13011_v14 = vmax.f32 %v9524_v4, 0.0  ;;  %v13013_v27 = vmax.f32 %v9532_v40, 0.0  ;;  %v13017_v1 = vmax.f32 %v9548_v60, 0.0 }
 0x74b   :  { %12970 = vst [vmem:[#allocation26_spill] sm:$0xff] %v9644_v53  ;;  %v12991_v12 = vld [vmem:[#allocation19_spill] sm:$0xff]  ;;  %v13019_v4 = vmax.f32 %v9556_v21, 0.0 }
 0x74c   :  { %12971 = vst [vmem:[#allocation27_spill] sm:$0xff] %v9648_v17  ;;  %v12992_v37 = vld [vmem:[#allocation20_spill] sm:$0xff] }
 0x74d   :  { %12972 = vst [vmem:[#allocation28_spill] sm:$0xff] %v9652_v47  ;;  %v12993_v56 = vld [vmem:[#allocation21_spill] sm:$0xff] }
 0x74e   :  { %12973 = vst [vmem:[#allocation29_spill] sm:$0xff] %v9656_v59 }
 0x74f   :  { %12974 = vst [vmem:[#allocation54_spill] sm:$0xff] %v9660_v61 }
 0x750   :  { %12975 = vst [vmem:[#allocation53_spill] sm:$0xff] %v9664_v35 }
 0x751   :  { %12976 = vst [vmem:[#allocation52_spill] sm:$0xff] %v9668_v45 }
 0x752   :  { %12977 = vst [vmem:[#allocation49_spill] sm:$0xff] %v9672_v18  ;;  %v12981_v18 = vld [vmem:[#allocation33_spill] sm:$0xff] }
 0x753   :  { %12978 = vst [vmem:[#allocation48_spill] sm:$0xff] %v9676_v51  ;;  %v9696_v3 = vadd.f32 %v9460_v41, %v12981_v18  ;;  %v9716_v18 = vadd.f32 %v9460_v41, %v9458_v62  ;;  %v13004_v41 = vmax.f32 %v9496_v24, 0.0  ;;  %v13006_v62 = vmax.f32 %v9504_v55, 0.0 }
 0x754   :  { %12979 = vst [vmem:[#allocation30_spill] sm:$0xff] %v9680_v63  ;;  %v12998_v63 = vmov %v9724_v33 }
 0x755   :  { %12980 = vst [vmem:[#allocation31_spill] sm:$0xff] %v9684_v49  ;;  %v12996_v26 = vmov %v9716_v18  ;;  %v12999_v49 = vmov %v9728_v31  ;;  %v7006_v51 = vpack.c.bf16 %v13005_v42, %v13004_v41  ;;  %v13014_v42 = vmax.f32 %v9536_v20, 0.0 }
 0x756   :  { %12982 = vst [vmem:[#allocation32_spill] sm:$0xff] %v9696_v3 }
 0x757   :  { %12983 = vst [vmem:[#allocation33_spill] sm:$0xff] %v9700_v38 }
 0x758   :  { %12984 = vst [vmem:[#allocation55_spill] sm:$0xff] %v9712_v10  ;;  %v12989_v10 = vld [vmem:[#allocation17_spill] sm:$0xff] }
 0x759   :  { %12985 = vst [vmem:[#allocation56_spill] sm:$0xff] %v9716_v18  ;;  %v13007_v18 = vmax.f32 %v9508_v2, 0.0  ;;  %v13015_v2 = vmax.f32 %v9540_v50, 0.0 }
 0x75a   :  { %12986 = vst [vmem:[#allocation57_spill] sm:$0xff] %v9720_v15  ;;  %v13000_v15 = vmax.f32 %v9480_v28, 0.0  ;;  %v13008_v28 = vmax.f32 %v9512_v44, 0.0 }
 0x75b   :  { %12987 = vst [vmem:[#allocation58_spill] sm:$0xff] %v9724_v33  ;;  %v13002_v33 = vmax.f32 %v9488_v23, 0.0  ;;  %v7011_v13 = vpack.c.bf16 %v13007_v18, %v13006_v62  ;;  %v7031_v18 = vpack.c.bf16 %v13015_v2, %v13014_v42  ;;  %v13016_v62 = vmax.f32 %v9544_v6, 0.0 }
 0x75c   :  { %12988 = vst [vmem:[#allocation59_spill] sm:$0xff] %v9728_v31  ;;  %v6996_v38 = vpack.c.bf16 %v13001_v0, %v13000_v15  ;;  %v7016_v15 = vpack.c.bf16 %v13009_v36, %v13008_v28  ;;  %v13010_v0 = vmax.f32 %v9520_v16, 0.0  ;;  %v13018_v36 = vmax.f32 %v9552_v19, 0.0  ;;  %v13025_v16 = vld [vmem:[#allocation9_spill] sm:$0xff] }
 0x75d   :  { %v7001_v31 = vpack.c.bf16 %v13003_v5, %v13002_v33  ;;  %v13012_v5 = vmax.f32 %v9528_v39, 0.0  ;;  %v7036_v28 = vpack.c.bf16 %v13017_v1, %v13016_v62  ;;  %v13021_v39 = vld [vmem:[#allocation50_spill] sm:$0xff]  ;;  %v13026_v50 = vmax.f32 %v13025_v16, 0.0  ;;  %2448 = vst [vmem:[%s12427_s19 + $0x10] sm:$0xff] %v7006_v51 }
 0x75e   :  { %v7021_v33 = vpack.c.bf16 %v13011_v14, %v13010_v0  ;;  %v7041_v14 = vpack.c.bf16 %v13019_v4, %v13018_v36  ;;  %v13020_v0 = vmax.f32 %v9560_v54, 0.0  ;;  %v13022_v40 = vmax.f32 %v13021_v39, 0.0  ;;  %2444 = vst [vmem:[%s12427_s19] sm:$0xff] %v6996_v38  ;;  %v13027_v1 = vld [vmem:[#allocation10_spill] sm:$0xff] }
 0x75f   :  { %v12995_v45 = vld [vmem:[#allocation55_spill] sm:$0xff]  ;;  %v7026_v41 = vpack.c.bf16 %v13013_v27, %v13012_v5  ;;  %v13028_v42 = vmax.f32 %v13027_v1, 0.0  ;;  %v13029_v62 = vmax.f32 %v9580_v32, 0.0  ;;  %v13030_v4 = vmax.f32 %v9584_v9, 0.0  ;;  %2446 = vst [vmem:[%s12427_s19 + $0x8] sm:$0xff] %v7001_v31 }
 0x760   :  { %v7046_v27 = vpack.c.bf16 %v13022_v40, %v13020_v0  ;;  %v13023_v5 = vld [vmem:[#allocation51_spill] sm:$0xff]  ;;  %v13031_v36 = vmax.f32 %v9588_v43, 0.0  ;;  %v13032_v40 = vmax.f32 %v9592_v57, 0.0  ;;  %v13033_v0 = vmax.f32 %v9596_v48, 0.0  ;;  %2450 = vst [vmem:[%s12427_s19 + $0x18] sm:$0xff] %v7011_v13 }
 0x761   :  { %v13024_v20 = vmax.f32 %v13023_v5, 0.0  ;;  %v7056_v44 = vpack.c.bf16 %v13029_v62, %v13028_v42  ;;  %v13036_v42 = vmax.f32 %v12990_v11, 0.0  ;;  %v13037_v62 = vmax.f32 %v12991_v12, 0.0  ;;  %2452 = vst [vmem:[%s12427_s19 + $0x20] sm:$0xff] %v7016_v15 }
 0x762   :  { %v7061_v55 = vpack.c.bf16 %v13031_v36, %v13030_v4  ;;  %v7066_v16 = vpack.c.bf16 %v13033_v0, %v13032_v40  ;;  %v13038_v4 = vmax.f32 %v12992_v37, 0.0  ;;  %v13039_v36 = vmax.f32 %v12993_v56, 0.0  ;;  %v13041_v0 = vld [vmem:[#allocation22_spill] sm:$0xff]  ;;  %2454 = vst [vmem:[%s12427_s19 + $0x28] sm:$0xff] %v7021_v33 }
 0x763   :  { %v7051_v2 = vpack.c.bf16 %v13026_v50, %v13024_v20  ;;  %v13034_v20 = vmax.f32 %v9600_v52, 0.0  ;;  %v13035_v50 = vmax.f32 %v12989_v10, 0.0  ;;  %v7076_v43 = vpack.c.bf16 %v13037_v62, %v13036_v42  ;;  %2456 = vst [vmem:[%s12427_s19 + $0x30] sm:$0xff] %v7026_v41 }
 0x764   :  { %v7081_v48 = vpack.c.bf16 %v13039_v36, %v13038_v4  ;;  %v13040_v40 = vmax.f32 %v9624_v22, 0.0  ;;  %v13042_v52 = vmax.f32 %v13041_v0, 0.0  ;;  %v13045_v42 = vmax.f32 %v9640_v58, 0.0  ;;  %2458 = vst [vmem:[%s12427_s19 + $0x38] sm:$0xff] %v7031_v18 }
 0x765   :  { %v7071_v38 = vpack.c.bf16 %v13035_v50, %v13034_v20  ;;  %v13043_v20 = vmax.f32 %v9632_v29, 0.0  ;;  %v13044_v50 = vmax.f32 %v9636_v8, 0.0  ;;  %v13046_v62 = vmax.f32 %v9644_v53, 0.0  ;;  %2460 = vst [vmem:[%s12427_s19 + $0x40] sm:$0xff] %v7036_v28 }
 0x766   :  { %v7086_v10 = vpack.c.bf16 %v13042_v52, %v13040_v40  ;;  %v13047_v4 = vmax.f32 %v9648_v17, 0.0  ;;  %v13048_v36 = vmax.f32 %v9652_v47, 0.0  ;;  %v13049_v52 = vmax.f32 %v9656_v59, 0.0  ;;  %v13056_v17 = vld [vmem:[#allocation48_spill] sm:$0xff]  ;;  %v13060_v59 = vld [vmem:[#allocation31_spill] sm:$0xff]  ;;  %2462 = vst [vmem:[%s12427_s19 + $0x48] sm:$0xff] %v7041_v14 }
 0x767   :  { %v7091_v31 = vpack.c.bf16 %v13044_v50, %v13043_v20  ;;  %v7096_v57 = vpack.c.bf16 %v13046_v62, %v13045_v42  ;;  %v13050_v40 = vmax.f32 %v9660_v61, 0.0  ;;  %v13051_v20 = vmax.f32 %v9664_v35, 0.0  ;;  %v13052_v50 = vld [vmem:[#allocation52_spill] sm:$0xff]  ;;  %v13054_v42 = vld [vmem:[#allocation49_spill] sm:$0xff]  ;;  %2464 = vst [vmem:[%s12427_s19 + $0x50] sm:$0xff] %v7046_v27 }
 0x768   :  { %v7101_v9 = vpack.c.bf16 %v13048_v36, %v13047_v4  ;;  %v13053_v1 = vmax.f32 %v13052_v50, 0.0  ;;  %v13055_v62 = vmax.f32 %v13054_v42, 0.0  ;;  %v13057_v53 = vmax.f32 %v13056_v17, 0.0  ;;  %v13058_v4 = vld [vmem:[#allocation30_spill] sm:$0xff]  ;;  %2466 = vst [vmem:[%s12427_s19 + $0x58] sm:$0xff] %v7051_v2 }
 0x769   :  { %v7106_v32 = vpack.c.bf16 %v13050_v40, %v13049_v52  ;;  %v13059_v36 = vmax.f32 %v13058_v4, 0.0  ;;  %v13061_v58 = vmax.f32 %v13060_v59, 0.0  ;;  %v13062_v52 = vmax.f32 %v9688_v46, 0.0  ;;  %2468 = vst [vmem:[%s12427_s19 + $0x60] sm:$0xff] %v7056_v44 }
 0x76a   :  { %v7111_v51 = vpack.c.bf16 %v13053_v1, %v13051_v20  ;;  %v7116_v47 = vpack.c.bf16 %v13057_v53, %v13055_v62  ;;  %v13063_v40 = vmax.f32 %v9692_v30, 0.0  ;;  %v13064_v1 = vmax.f32 %v9696_v3, 0.0  ;;  %v13065_v20 = vld [vmem:[#allocation33_spill] sm:$0xff]  ;;  %2470 = vst [vmem:[%s12427_s19 + $0x68] sm:$0xff] %v7061_v55 }
 0x76b   :  { %v7121_v61 = vpack.c.bf16 %v13061_v58, %v13059_v36  ;;  %v13066_v35 = vmax.f32 %v13065_v20, 0.0  ;;  %v13067_v53 = vmax.f32 %v9704_v25, 0.0  ;;  %v13068_v62 = vmax.f32 %v9708_v34, 0.0  ;;  %2472 = vst [vmem:[%s12427_s19 + $0x70] sm:$0xff] %v7066_v16 }
 0x76c   :  { %v7126_v50 = vpack.c.bf16 %v13063_v40, %v13062_v52  ;;  %v13069_v58 = vmax.f32 %v12995_v45, 0.0  ;;  %v13070_v36 = vmax.f32 %v12996_v26, 0.0  ;;  %v13071_v52 = vld [vmem:[#allocation57_spill] sm:$0xff]  ;;  %v13073_v3 = vmax.f32 %v12998_v63, 0.0  ;;  %2474 = vst [vmem:[%s12427_s19 + $0x78] sm:$0xff] %v7071_v38 }
 0x76d   :  { %v7131_v13 = vpack.c.bf16 %v13066_v35, %v13064_v1  ;;  %v7136_v8 = vpack.c.bf16 %v13068_v62, %v13067_v53  ;;  %v13072_v40 = vmax.f32 %v13071_v52, 0.0  ;;  %v13074_v35 = vmax.f32 %v12999_v49, 0.0  ;;  %2476 = vst [vmem:[%s12427_s19 + $0x80] sm:$0xff] %v7076_v43 }
 0x76e   :  { %v7141_v29 = vpack.c.bf16 %v13070_v36, %v13069_v58  ;;  %v13075_v1 = vmax.f32 %v9732_v7, 0.0  ;;  %2478 = vst [vmem:[%s12427_s19 + $0x88] sm:$0xff] %v7081_v48 }
 0x76f   :  { %v7146_v20 = vpack.c.bf16 %v13073_v3, %v13072_v40  ;;  %2480 = vst [vmem:[%s12427_s19 + $0x90] sm:$0xff] %v7086_v10 }
 0x770   :  { %v7151_v15 = vpack.c.bf16 %v13075_v1, %v13074_v35  ;;  %2482 = vst [vmem:[%s12427_s19 + $0x98] sm:$0xff] %v7091_v31 }
 0x771   :  { %2484 = vst [vmem:[%s12427_s19 + $0xa0] sm:$0xff] %v7096_v57 }
 0x772   :  { %2486 = vst [vmem:[%s12427_s19 + $0xa8] sm:$0xff] %v7101_v9 }
 0x773   :  { %2488 = vst [vmem:[%s12427_s19 + $0xb0] sm:$0xff] %v7106_v32 }
 0x774   :  { %2490 = vst [vmem:[%s12427_s19 + $0xb8] sm:$0xff] %v7111_v51 }
 0x775   :  { %2492 = vst [vmem:[%s12427_s19 + $0xc0] sm:$0xff] %v7116_v47 }
 0x776   :  { %2494 = vst [vmem:[%s12427_s19 + $0xc8] sm:$0xff] %v7121_v61 }
 0x777   :  { %2496 = vst [vmem:[%s12427_s19 + $0xd0] sm:$0xff] %v7126_v50 }
 0x778   :  { %2498 = vst [vmem:[%s12427_s19 + $0xd8] sm:$0xff] %v7131_v13 }
 0x779   :  { %2500 = vst [vmem:[%s12427_s19 + $0xe0] sm:$0xff] %v7136_v8 }
 0x77a   :  { %2502 = vst [vmem:[%s12427_s19 + $0xe8] sm:$0xff] %v7141_v29 }
 0x77b   :  { %2504 = vst [vmem:[%s12427_s19 + $0xf0] sm:$0xff] %v7146_v20 }
 0x77c   :  { %2506 = vst [vmem:[%s12427_s19 + $0xf8] sm:$0xff] %v7151_v15 }
 0x77d   :  { %2512 = vsyncadd [#allocation4], 4096  ;;  %s13076_s23 = sld [smem:[#allocation61_spill]]  ;;  %vm3190_vm13 = vcmask 1040384  }
 0x77e   :  { %s13181_s7 = sld [smem:[#allocation64_spill]] }
 0x77f   :  { %s13182_s1 = sld [smem:[#allocation62_spill]] }
 0x780   :  { %s13183_s30 = sld [smem:[#allocation63_spill]] }
 0x781   :  { %s13191_s28 = sld [smem:[#allocation65_spill]] }
 0x783   :  { %v6157_v55 = vld [vmem:[%s13076_s23 + $0x70] sm:$0xf]  ;;  %v6840_v44 = vld [vmem:[%s13076_s23 + $0x74] sm:$0xf0]  ;;  %v6839_v32 = vld [vmem:[%s13076_s23 + $0x74] sm:$0xf] }
 0x784   :  { %v6158_v16 = vor.u32 %v6840_v44, %v6157_v55  ;;  %v6159_v9 = vld [vmem:[%s13076_s23 + $0x78] sm:$0xf0]  ;;  %v6149_v43 = vld [vmem:[%s13076_s23 + $0x60] sm:$0xf]  ;;  %v6838_v48 = vld [vmem:[%s13076_s23 + $0x64] sm:$0xf0] }
 0x785   :  { %v6162_v57 = vor.u32 %v6839_v32, %v6159_v9  ;;  %v6837_v29 = vld [vmem:[%s13076_s23 + $0x64] sm:$0xf]  ;;  %v6151_v8 = vld [vmem:[%s13076_s23 + $0x68] sm:$0xf0]  ;;  %v6150_v47 = vor.u32 %v6838_v48, %v6149_v43  ;;  %v6141_v3 = vld [vmem:[%s13076_s23 + $0x50] sm:$0xf] }
 0x786   :  { %2829 = vmatpush.bf16.msrb.mxu1 %v6158_v16  ;;  %v6154_v61 = vor.u32 %v6837_v29, %v6151_v8  ;;  %v6836_v10 = vld [vmem:[%s13076_s23 + $0x54] sm:$0xf0]  ;;  %v6835_v33 = vld [vmem:[%s13076_s23 + $0x54] sm:$0xf]  ;;  %v6143_v41 = vld [vmem:[%s13076_s23 + $0x58] sm:$0xf0] }
 0x787   :  { %2878 = vmatpush.bf16.msrb.mxu2 %v6162_v57  ;;  %v6142_v18 = vor.u32 %v6836_v10, %v6141_v3  ;;  %v6146_v28 = vor.u32 %v6835_v33, %v6143_v41  ;;  %v6133_v14 = vld [vmem:[%s13076_s23 + $0x40] sm:$0xf]  ;;  %v6834_v27 = vld [vmem:[%s13076_s23 + $0x44] sm:$0xf0]  ;;  %v6833_v2 = vld [vmem:[%s13076_s23 + $0x44] sm:$0xf] }
 0x788   :  { %v6135_v38 = vld [vmem:[%s13076_s23 + $0x48] sm:$0xf0]  ;;  %v6134_v31 = vor.u32 %v6834_v27, %v6133_v14  ;;  %v6125_v51 = vld [vmem:[%s13076_s23 + $0x30] sm:$0xf]  ;;  %v6832_v20 = vld [vmem:[%s13076_s23 + $0x34] sm:$0xf0] }
 0x789   :  { %v6138_v50 = vor.u32 %v6833_v2, %v6135_v38  ;;  %v6831_v13 = vld [vmem:[%s13076_s23 + $0x34] sm:$0xf]  ;;  %v6127_v53 = vld [vmem:[%s13076_s23 + $0x38] sm:$0xf0]  ;;  %v6126_v62 = vor.u32 %v6832_v20, %v6125_v51  ;;  %v6117_v36 = vld [vmem:[%s13076_s23 + $0x20] sm:$0xf] }
 0x78a   :  { %2830 = vmatpush.bf16.msrb.mxu1 %v6150_v47  ;;  %v6130_v58 = vor.u32 %v6831_v13, %v6127_v53  ;;  %v6830_v40 = vld [vmem:[%s13076_s23 + $0x24] sm:$0xf0]  ;;  %v6829_v35 = vld [vmem:[%s13076_s23 + $0x24] sm:$0xf]  ;;  %v6119_v1 = vld [vmem:[%s13076_s23 + $0x28] sm:$0xf0] }
 0x78b   :  { %2879 = vmatpush.bf16.msrb.mxu2 %v6154_v61  ;;  %v6118_v15 = vor.u32 %v6830_v40, %v6117_v36  ;;  %v6122_v55 = vor.u32 %v6829_v35, %v6119_v1  ;;  %v6109_v44 = vld [vmem:[%s13076_s23 + $0x10] sm:$0xf]  ;;  %v6828_v16 = vld [vmem:[%s13076_s23 + $0x14] sm:$0xf0]  ;;  %v6827_v32 = vld [vmem:[%s13076_s23 + $0x14] sm:$0xf] }
 0x78c   :  { %v6111_v9 = vld [vmem:[%s13076_s23 + $0x18] sm:$0xf0]  ;;  %v13077_v43 = vmax.f32 %v9544_v6, 0.0  ;;  %v13078_v57 = vld [vmem:[#allocation34_spill] sm:$0xff]  ;;  %v13080_v8 = vmax.f32 %v9548_v60, 0.0  ;;  %v13081_v47 = vld [vmem:[#allocation35_spill] sm:$0xff]  ;;  %v6110_v6 = vor.u32 %v6828_v16, %v6109_v44 }
 0x78d   :  { %v13079_v48 = vmax.f32 %v13078_v57, 0.0  ;;  %v13082_v61 = vmax.f32 %v13081_v47, 0.0  ;;  %v13083_v10 = vmax.f32 %v13054_v42, 0.0  ;;  %v13084_v33 = vmax.f32 %v12990_v11, 0.0  ;;  %v6101_v60 = vld [vmem:[%s13076_s23] sm:$0xf] }
 0x78e   :  { %2831 = vmatpush.bf16.msrb.mxu1 %v6142_v18  ;;  %v13085_v18 = vmax.f32 %v13056_v17, 0.0  ;;  %v6114_v27 = vor.u32 %v6827_v32, %v6111_v9  ;;  %v6826_v42 = vld [vmem:[%s13076_s23 + $0x4] sm:$0xf0]  ;;  %v6825_v11 = vld [vmem:[%s13076_s23 + $0x4] sm:$0xf]  ;;  %v13087_v51 = vmax.f32 %v9552_v19, 0.0 }
 0x78f   :  { %2880 = vmatpush.bf16.msrb.mxu2 %v6146_v28  ;;  %v2545_v29 = vmax.f32 %v13079_v48, %v13077_v43  ;;  %v2546_v3 = vmax.f32 %v13082_v61, %v13080_v8  ;;  %v2609_v41 = vmax.f32 %v13084_v33, %v13083_v10  ;;  %v13086_v28 = vmax.f32 %v12991_v12, 0.0  ;;  %v6103_v12 = vld [vmem:[%s13076_s23 + $0x8] sm:$0xf0]  ;;  %v13099_v43 = vld [vmem:[#allocation37_spill] sm:$0xff] }
 0x790   :  { %v6102_v38 = vor.u32 %v6826_v42, %v6101_v60  ;;  %v13088_v20 = vmax.f32 %v9488_v23, 0.0  ;;  %v13089_v53 = vmax.f32 %v9556_v21, 0.0  ;;  %v13092_v40 = vmax.f32 %v13058_v4, 0.0  ;;  %v13116_v60 = vld [vmem:[#allocation33_spill] sm:$0xff] }
 0x791   :  { %v2610_v14 = vmax.f32 %v13086_v28, %v13085_v18  ;;  %v2673_v17 = vmax.f32 %v2545_v29, %v2609_v41  ;;  %v13093_v35 = vmax.f32 %v12992_v37, 0.0  ;;  %v13096_v23 = vmax.f32 %v9560_v54, 0.0  ;;  %v13108_v41 = vld [vmem:[#allocation9_spill] sm:$0xff]  ;;  %v13110_v18 = vld [vmem:[#allocation39_spill] sm:$0xff] }
 0x792   :  { %2832 = vmatpush.bf16.msrb.mxu1 %v6134_v31  ;;  %v6106_v31 = vor.u32 %v6825_v11, %v6103_v12  ;;  %v2547_v13 = vmax.f32 %v13088_v20, %v13087_v51  ;;  %v13097_v21 = vmax.f32 %v9496_v24, 0.0  ;;  %v13098_v4 = vmax.f32 %v13021_v39, 0.0  ;;  %v13106_v39 = vld [vmem:[#allocation38_spill] sm:$0xff]  ;;  %v13118_v11 = vld [vmem:[#allocation24_spill] sm:$0xff] }
 0x793   :  { %2881 = vmatpush.bf16.msrb.mxu2 %v6138_v50  ;;  %v2674_v2 = vmax.f32 %v2546_v3, %v2610_v14  ;;  %v2611_v1 = vmax.f32 %v13093_v35, %v13092_v40  ;;  %v13100_v37 = vmax.f32 %v13099_v43, 0.0  ;;  %v13103_v29 = vmax.f32 %v9692_v30, 0.0  ;;  %v13112_v14 = vld [vmem:[#allocation32_spill] sm:$0xff] }
 0x794   :  { %v2549_v9 = vmax.f32 %v13097_v21, %v13096_v23  ;;  %v13104_v8 = vmax.f32 %v13041_v0, 0.0  ;;  %v13105_v24 = vmax.f32 %v13023_v5, 0.0  ;;  %v13107_v10 = vmax.f32 %v13106_v39, 0.0  ;;  %v13122_v51 = vld [vmem:[#allocation40_spill] sm:$0xff] }
 0x795   :  { %v2689_v50 = vpack.c.bf16 %v2674_v2, %v2673_v17  ;;  %v2675_v16 = vmax.f32 %v2547_v13, %v2611_v1  ;;  %v2550_v57 = vmax.f32 %v13100_v37, %v13098_v4  ;;  %v13113_v30 = vmax.f32 %v13112_v14, 0.0  ;;  %v13129_v1 = vld [vmem:[#allocation25_spill] sm:$0xff]  ;;  %v13134_v4 = vld [vmem:[#allocation12_spill] sm:$0xff]  ;;  %v13136_v37 = vld [vmem:[#allocation42_spill] sm:$0xff] }
 0x796   :  { %2833 = vmatpush.bf16.msrb.mxu1 %v6126_v62  ;;  %v13090_v62 = vld [vmem:[#allocation36_spill] sm:$0xff]  ;;  %v2614_v47 = vmax.f32 %v13104_v8, %v13103_v29  ;;  %v2551_v33 = vmax.f32 %v13107_v10, %v13105_v24  ;;  %v13117_v42 = vmax.f32 %v13116_v60, 0.0  ;;  %v13119_v12 = vmax.f32 %v13118_v11, 0.0 }
 0x797   :  { %2882 = vmatpush.bf16.msrb.mxu2 %v6130_v58  ;;  %v13091_v58 = vmax.f32 %v13090_v62, 0.0  ;;  %v13123_v20 = vmax.f32 %v13122_v51, 0.0  ;;  %v13128_v35 = vmax.f32 %v9704_v25, 0.0  ;;  %v13135_v43 = vmax.f32 %v13134_v4, 0.0  ;;  %v13146_v24 = vld [vmem:[#allocation28_spill] sm:$0xff] }
 0x798   :  { %v2678_v54 = vmax.f32 %v2550_v57, %v2614_v47  ;;  %v2616_v17 = vmax.f32 %v13119_v12, %v13117_v42  ;;  %v13137_v57 = vmax.f32 %v13136_v37, 0.0  ;;  %v13143_v47 = vld [vmem:[#allocation27_spill] sm:$0xff]  ;;  %v13147_v39 = vmax.f32 %v13146_v24, 0.0  ;;  %v13157_v42 = vld [vmem:[#allocation29_spill] sm:$0xff] }
 0x799   :  { %v2548_v36 = vmax.f32 %v13091_v58, %v13089_v53  ;;  %v13124_v53 = vld [vmem:[#allocation11_spill] sm:$0xff]  ;;  %v13126_v58 = vld [vmem:[#allocation41_spill] sm:$0xff]  ;;  %v13158_v11 = vmax.f32 %v13157_v42, 0.0 }
 0x79a   :  { %2834 = vmatpush.bf16.msrb.mxu1 %v6118_v15  ;;  %v13094_v15 = vmax.f32 %v13060_v59, 0.0  ;;  %v13101_v59 = vmax.f32 %v9688_v46, 0.0  ;;  %v13109_v46 = vmax.f32 %v13108_v41, 0.0  ;;  %v13125_v62 = vmax.f32 %v13124_v53, 0.0  ;;  %v13164_v53 = vld [vmem:[#allocation46_spill] sm:$0xff] }
 0x79b   :  { %2883 = vmatpush.bf16.msrb.mxu2 %v6122_v55  ;;  %v13095_v55 = vmax.f32 %v12993_v56, 0.0  ;;  %v13102_v56 = vmax.f32 %v9624_v22, 0.0  ;;  %v13111_v22 = vmax.f32 %v13110_v18, 0.0  ;;  %v13148_v18 = vld [vmem:[#allocation14_spill] sm:$0xff] }
 0x79d   :  { %v2612_v44 = vmax.f32 %v13095_v55, %v13094_v15  ;;  %v2613_v48 = vmax.f32 %v13102_v56, %v13101_v59  ;;  %v2552_v28 = vmax.f32 %v13111_v22, %v13109_v46  ;;  %v13130_v15 = vmax.f32 %v13129_v1, 0.0  ;;  %v13138_v56 = vld [vmem:[#allocation13_spill] sm:$0xff] }
 0x79e   :  { %2835 = vmatpush.bf16.msrb.mxu1 %v6110_v6  ;;  %v13114_v6 = vld [vmem:[#allocation23_spill] sm:$0xff]  ;;  %v2555_v59 = vmax.f32 %v13137_v57, %v13135_v43  ;;  %v13139_v25 = vmax.f32 %v13138_v56, 0.0  ;;  %v13149_v22 = vmax.f32 %v13148_v18, 0.0 }
 0x79f   :  { %2884 = vmatpush.bf16.msrb.mxu2 %v6114_v27  ;;  %v2676_v19 = vmax.f32 %v2548_v36, %v2612_v44  ;;  %v2677_v61 = vmax.f32 %v2549_v9, %v2613_v48  ;;  %v13115_v0 = vmax.f32 %v13114_v6, 0.0  ;;  %v2680_v5 = vmax.f32 %v2552_v28, %v2616_v17  ;;  %v13140_v48 = vld [vmem:[#allocation43_spill] sm:$0xff]  ;;  %v13150_v28 = vld [vmem:[#allocation44_spill] sm:$0xff] }
 0x7a0   :  { %v13127_v36 = vmax.f32 %v13126_v58, 0.0  ;;  %v2617_v55 = vmax.f32 %v13130_v15, %v13128_v35  ;;  %v13131_v44 = vmax.f32 %v9708_v34, 0.0  ;;  %v13141_v29 = vmax.f32 %v13140_v48, 0.0  ;;  %v13152_v6 = vld [vmem:[#allocation15_spill] sm:$0xff]  ;;  %v13171_v15 = vld [vmem:[#allocation53_spill] sm:$0xff] }
 0x7a1   :  { %v2690_v32 = vpack.c.bf16 %v2676_v19, %v2675_v16  ;;  %v2691_v3 = vpack.c.bf16 %v2678_v54, %v2677_v61  ;;  %v2615_v27 = vmax.f32 %v13115_v0, %v13113_v30  ;;  %v13132_v16 = vld [vmem:[#allocation26_spill] sm:$0xff]  ;;  %v13142_v34 = vmax.f32 %v12995_v45, 0.0  ;;  %v13154_v0 = vld [vmem:[#allocation45_spill] sm:$0xff] }
 0x7a2   :  { %2836 = vmatpush.bf16.msrb.mxu1 %v6102_v38  ;;  %v2554_v40 = vmax.f32 %v13127_v36, %v13125_v62  ;;  %v13133_v19 = vmax.f32 %v13132_v16, 0.0  ;;  %v2556_v8 = vmax.f32 %v13141_v29, %v13139_v25  ;;  %v13144_v61 = vmax.f32 %v13143_v47, 0.0  ;;  %v13166_v36 = vld [vmem:[#allocation17_spill] sm:$0xff] }
 0x7a3   :  { %2885 = vmatpush.bf16.msrb.mxu2 %v6106_v31  ;;  %v2679_v2 = vmax.f32 %v2551_v33, %v2615_v27  ;;  %v13120_v31 = vld [vmem:[#allocation10_spill] sm:$0xff]  ;;  %v13151_v14 = vmax.f32 %v13150_v28, 0.0  ;;  %v13153_v45 = vmax.f32 %v13152_v6, 0.0  ;;  %v13155_v27 = vmax.f32 %v13154_v0, 0.0 }
 0x7a4   :  { %v2619_v54 = vmax.f32 %v13144_v61, %v13142_v34  ;;  %v13159_v17 = vmax.f32 %v12998_v63, 0.0  ;;  %v13165_v62 = vmax.f32 %v13164_v53, 0.0  ;;  %v13170_v63 = vmax.f32 %v12999_v49, 0.0 }
 0x7a5   :  { %2837 = vmatmul.bf16.vlgmr.msrb.gmra.mxu1 %v2689_v50  ;;  %v2692_v38 = vpack.c.bf16 %v2680_v5, %v2679_v2  ;;  %v2557_v30 = vmax.f32 %v13151_v14, %v13149_v22  ;;  %v2558_v60 = vmax.f32 %v13155_v27, %v13153_v45  ;;  %v13160_v2 = vld [vmem:[#allocation54_spill] sm:$0xff]  ;;  %v13173_v16 = vmax.f32 %v9732_v7, 0.0 }
 0x7a6   :  { %2886 = vmatmul.bf16.vlgmr.msrb.gmra.mxu2 %v2689_v50  ;;  %v13121_v50 = vmax.f32 %v13120_v31, 0.0  ;;  %v2683_v33 = vmax.f32 %v2555_v59, %v2619_v54  ;;  %v13161_v5 = vmax.f32 %v13160_v2, 0.0 }
 0x7a8   :  { %v2553_v13 = vmax.f32 %v13123_v20, %v13121_v50  ;;  %v13162_v20 = vld [vmem:[#allocation16_spill] sm:$0xff] }
 0x7aa   :  { %v2681_v23 = vmax.f32 %v2553_v13, %v2617_v55  ;;  %v13163_v13 = vmax.f32 %v13162_v20, 0.0  ;;  %v13172_v55 = vmax.f32 %v13171_v15, 0.0 }
 0x7ac   :  { %v2559_v58 = vmax.f32 %v13165_v62, %v13163_v13 }
 0x7b5   :  { %2842 = vmatmul.bf16.gmra.mxu1 %v2690_v32 }
 0x7b6   :  { %2891 = vmatmul.bf16.gmra.mxu2 %v2690_v32  ;;  %v2618_v32 = vmax.f32 %v13133_v19, %v13131_v44  ;;  %v2623_v44 = vmax.f32 %v13172_v55, %v13170_v63  ;;  %v13174_v19 = vld [vmem:[#allocation52_spill] sm:$0xff] }
 0x7b8   :  { %v2682_v21 = vmax.f32 %v2554_v40, %v2618_v32  ;;  %v13168_v40 = vld [vmem:[#allocation47_spill] sm:$0xff]  ;;  %v13175_v32 = vmax.f32 %v13174_v19, 0.0 }
 0x7b9   :  { %v13169_v35 = vmax.f32 %v13168_v40, 0.0 }
 0x7ba   :  { %v2693_v9 = vpack.c.bf16 %v2682_v21, %v2681_v23  ;;  %v2624_v23 = vmax.f32 %v13175_v32, %v13173_v16  ;;  %v2687_v21 = vmax.f32 %v2559_v58, %v2623_v44 }
 0x7c5   :  { %2847 = vmatmul.bf16.gmra.mxu1 %v2691_v3 }
 0x7c6   :  { %2896 = vmatmul.bf16.gmra.mxu2 %v2691_v3  ;;  %v13145_v3 = vmax.f32 %v12996_v26, 0.0  ;;  %v13156_v26 = vmax.f32 %v13071_v52, 0.0  ;;  %v13167_v52 = vmax.f32 %v13166_v36, 0.0 }
 0x7c8   :  { %v2620_v10 = vmax.f32 %v13147_v39, %v13145_v3  ;;  %v2621_v12 = vmax.f32 %v13158_v11, %v13156_v26  ;;  %v2560_v1 = vmax.f32 %v13169_v35, %v13167_v52 }
 0x7ca   :  { %v2684_v41 = vmax.f32 %v2556_v8, %v2620_v10  ;;  %v2685_v31 = vmax.f32 %v2557_v30, %v2621_v12 }
 0x7cc   :  { %v2694_v46 = vpack.c.bf16 %v2684_v41, %v2683_v33 }
 0x7d5   :  { %2852 = vmatmul.bf16.gmra.mxu1 %v2692_v38 }
 0x7d6   :  { %2901 = vmatmul.bf16.gmra.mxu2 %v2692_v38  ;;  %v2622_v38 = vmax.f32 %v13161_v5, %v13159_v17 }
 0x7d8   :  { %v2686_v50 = vmax.f32 %v2558_v60, %v2622_v38 }
 0x7da   :  { %v2695_v51 = vpack.c.bf16 %v2686_v50, %v2685_v31 }
 0x7e5   :  { %2857 = vmatmul.bf16.gmra.mxu1 %v2693_v9 }
 0x7e6   :  { %2906 = vmatmul.bf16.gmra.mxu2 %v2693_v9  ;;  %v2688_v9 = vmax.f32 %v2560_v1, %v2624_v23 }
 0x7e8   :  { %v2696_v4 = vpack.c.bf16 %v2688_v9, %v2687_v21 }
 0x7f5   :  { %2862 = vmatmul.bf16.gmra.mxu1 %v2694_v46 }
 0x7f6   :  { %2911 = vmatmul.bf16.gmra.mxu2 %v2694_v46 }
 0x805   :  { %2867 = vmatmul.bf16.gmra.mxu1 %v2695_v51 }
 0x806   :  { %2916 = vmatmul.bf16.gmra.mxu2 %v2695_v51 }
 0x815   :  { %2872 = vmatmul.bf16.gmra.mxu1 %v2696_v4 }
 0x816   :  { %2921 = vmatmul.bf16.gmra.mxu2 %v2696_v4 }
 0x822   :  { %v10246_v43 = vpop.f32.mrf.mxu1 }
 0x829   :  { %v10248_v37 = vpop.f32.mrf.mxu2 }
 0x82a   :  { %v10250_v57 = vpop.f32.mrf.mxu1 }
 0x831   :  { %v10252_v49 = vpop.f32.mrf.mxu2 }
 0x832   :  { %v10254_v59 = vpop.f32.mrf.mxu1 }
 0x839   :  { %v10256_v56 = vpop.f32.mrf.mxu2 }
 0x83a   :  { %v10258_v7 = vpop.f32.mrf.mxu1 }
 0x841   :  { %v10260_v25 = vpop.f32.mrf.mxu2 }
 0x842   :  { %v10262_v48 = vpop.f32.mrf.mxu1 }
 0x849   :  { %v10264_v29 = vpop.f32.mrf.mxu2 }
 0x84a   :  { %v10266_v8 = vpop.f32.mrf.mxu1 }
 0x851   :  { %v10268_v34 = vpop.f32.mrf.mxu2 }
 0x852   :  { %v10270_v47 = vpop.f32.mrf.mxu1 }
 0x853   :  { %13176 = vst [vmem:[#allocation18_spill] sm:$0xff] %v10270_v47 }
 0x859   :  { %v10272_v61 = vpop.f32.mrf.mxu2 }
 0x85a   :  { %13177 = vst [vmem:[#allocation19_spill] sm:$0xff] %v10272_v61  ;;  %v10274_v54 = vpop.f32.mrf.mxu1  ;;  %v10362_v21 = vpack.c.bf16 %v10272_v61, %v10270_v47 }
 0x85b   :  { %13178 = vst [vmem:[#allocation20_spill] sm:$0xff] %v10274_v54 }
 0x861   :  { %v10276_v3 = vpop.f32.mrf.mxu2 }
 0x862   :  { %13179 = vst [vmem:[#allocation21_spill] sm:$0xff] %v10276_v3  ;;  %v10278_v24 = vpop.f32.mrf.mxu1  ;;  %v10356_v44 = vpack.c.bf16 %v10276_v3, %v10274_v54 }
 0x869   :  { %v10280_v39 = vpop.f32.mrf.mxu2 }
 0x86a   :  { %v10282_v10 = vpop.f32.mrf.mxu1  ;;  %v10350_v63 = vpack.c.bf16 %v10280_v39, %v10278_v24 }
 0x86c   :  { %v2975_v9 = vunpack.c.l.b16 %v10350_v63  ;;  %v2976_v4 = vunpack.c.h.b16 %v10350_v63 }
 0x871   :  { %v10284_v33 = vpop.f32.mrf.mxu2 }
 0x872   :  { %v10286_v41 = vpop.f32.mrf.mxu1  ;;  %v10344_v36 = vpack.c.bf16 %v10284_v33, %v10282_v10 }
 0x874   :  { %v2977_v32 = vunpack.c.l.b16 %v10344_v36  ;;  %v2978_v23 = vunpack.c.h.b16 %v10344_v36 }
 0x879   :  { %v10288_v46 = vpop.f32.mrf.mxu2 }
 0x87a   :  { %v10290_v18 = vpop.f32.mrf.mxu1  ;;  %v10338_v53 = vpack.c.bf16 %v10288_v46, %v10286_v41 }
 0x87c   :  { %v2979_v15 = vunpack.c.l.b16 %v10338_v53  ;;  %v2980_v55 = vunpack.c.h.b16 %v10338_v53  ;;  %v3069_v47 = vunpack.c.l.bf16 %v10338_v53 }
 0x881   :  { %v10292_v22 = vpop.f32.mrf.mxu2 }
 0x882   :  { %v10294_v28 = vpop.f32.mrf.mxu1  ;;  %v10332_v31 = vpack.c.bf16 %v10292_v22, %v10290_v18 }
 0x884   :  { %v2981_v35 = vunpack.c.l.b16 %v10332_v31  ;;  %v2982_v1 = vunpack.c.h.b16 %v10332_v31 }
 0x886   :  { %v3001_v16 = vpack.c.b16 %v2981_v35, %v2979_v15  ;;  %v3002_v19 = vpack.c.b16 %v2982_v1, %v2980_v55  ;;  %v10386_v1 = vpack.c.bf16 %v10256_v56, %v10254_v59 }
 0x889   :  { %v10296_v14 = vpop.f32.mrf.mxu2 }
 0x88a   :  { %v10298_v30 = vpop.f32.mrf.mxu1  ;;  %v10324_v12 = vpack.c.bf16 %v10296_v14, %v10294_v28 }
 0x88c   :  { %v2983_v62 = vunpack.c.l.b16 %v10324_v12  ;;  %v2984_v58 = vunpack.c.h.b16 %v10324_v12 }
 0x891   :  { %v10300_v6 = vpop.f32.mrf.mxu2 }
 0x892   :  { %v10302_v45 = vpop.f32.mrf.mxu1  ;;  %v10316_v42 = vpack.c.bf16 %v10300_v6, %v10298_v30 }
 0x894   :  { %v2985_v20 = vunpack.c.l.b16 %v10316_v42  ;;  %v2986_v13 = vunpack.c.h.b16 %v10316_v42 }
 0x896   :  { %v3003_v52 = vpack.c.b16 %v2985_v20, %v2983_v62  ;;  %v3004_v40 = vpack.c.b16 %v2986_v13, %v2984_v58  ;;  %v2971_v20 = vunpack.c.l.b16 %v10362_v21  ;;  %v2972_v13 = vunpack.c.h.b16 %v10362_v21 }
 0x897   :  { %v10380_v62 = vpack.c.bf16 %v10260_v25, %v10258_v7 }
 0x899   :  { %v10304_v0 = vpop.f32.mrf.mxu2 }
 0x89a   :  { %v10308_v27 = vpack.c.bf16 %v10304_v0, %v10302_v45  ;;  %v10310_v60 = vpop.f32.mrf.mxu1 }
 0x89c   :  { %v2987_v17 = vunpack.c.l.b16 %v10308_v27  ;;  %v2988_v5 = vunpack.c.h.b16 %v10308_v27 }
 0x8a1   :  { %v10312_v26 = vpop.f32.mrf.mxu2 }
 0x8a2   :  { %v10320_v11 = vpack.c.bf16 %v10312_v26, %v10310_v60 }
 0x8a4   :  { %v2989_v2 = vunpack.c.l.b16 %v10320_v11  ;;  %v2990_v38 = vunpack.c.h.b16 %v10320_v11 }
 0x8a6   :  { %v3005_v50 = vpack.c.b16 %v2989_v2, %v2987_v17  ;;  %v3006_v51 = vpack.c.b16 %v2990_v38, %v2988_v5  ;;  %v10368_v17 = vpack.c.bf16 %v10268_v34, %v10266_v8  ;;  %v2999_v2 = vpack.c.b16 %v2977_v32, %v2975_v9 }
 0x8a7   :  { %v3000_v5 = vpack.c.b16 %v2978_v23, %v2976_v4  ;;  %v2973_v38 = vunpack.c.l.b16 %v10356_v44  ;;  %v2965_v23 = vunpack.c.l.b16 %v10380_v62  ;;  %v2966_v9 = vunpack.c.h.b16 %v10380_v62 }
 0x8a8   :  { %3023 = vmatpush.bf16.msra.mxu1 %v3005_v50  ;;  %3036 = vmatpush.bf16.msra.mxu2 %v3006_v51  ;;  %v2974_v50 = vunpack.c.h.b16 %v10356_v44  ;;  %v10374_v51 = vpack.c.bf16 %v10264_v29, %v10262_v48  ;;  %v2970_v35 = vunpack.c.h.b16 %v10368_v17  ;;  %v3079_v4 = vunpack.c.l.bf16 %v10320_v11 }
 0x8a9   :  { %v2997_v58 = vpack.c.b16 %v2973_v38, %v2971_v20  ;;  %v2963_v38 = vunpack.c.l.b16 %v10386_v1  ;;  %v3077_v20 = vunpack.c.l.bf16 %v10308_v27 }
 0x8aa   :  { %v2967_v15 = vunpack.c.l.b16 %v10374_v51  ;;  %v2968_v55 = vunpack.c.h.b16 %v10374_v51 }
 0x8ab   :  { %v3109_v61 = vmul.f32 %v3077_v20, %v3077_v20 }
 0x8ac   :  { %3024 = vmatpush.bf16.msra.mxu1 %v3003_v52  ;;  %3037 = vmatpush.bf16.msra.mxu2 %v3004_v40  ;;  %v2998_v52 = vpack.c.b16 %v2974_v50, %v2972_v13  ;;  %v2969_v40 = vunpack.c.l.b16 %v10368_v17  ;;  %v2996_v32 = vpack.c.b16 %v2970_v35, %v2968_v55  ;;  %v2964_v50 = vunpack.c.h.b16 %v10386_v1 }
 0x8ad   :  { %v3078_v13 = vunpack.c.h.bf16 %v10308_v27  ;;  %v3111_v35 = vmul.f32 %v3079_v4, %v3079_v4  ;;  %v3075_v55 = vunpack.c.l.bf16 %v10316_v42  ;;  %v3071_v4 = vunpack.c.l.bf16 %v10332_v31 }
 0x8af   :  { %v3110_v27 = vmul.f32 %v3078_v13, %v3078_v13  ;;  %v3127_v54 = vpack.c.bf16 %v3111_v35, %v3109_v61  ;;  %v3068_v35 = vunpack.c.h.bf16 %v10344_v36 }
 0x8b0   :  { %3025 = vmatpush.bf16.msra.mxu1 %v3001_v16  ;;  %3038 = vmatpush.bf16.msra.mxu2 %v3002_v19  ;;  %v10392_v16 = vpack.c.bf16 %v10252_v49, %v10250_v57  ;;  %v2995_v19 = vpack.c.b16 %v2969_v40, %v2967_v15 }
 0x8b2   :  { %v2961_v40 = vunpack.c.l.b16 %v10392_v16 }
 0x8b4   :  { %3026 = vmatpush.bf16.msra.mxu1 %v2999_v2  ;;  %3039 = vmatpush.bf16.msra.mxu2 %v3000_v5  ;;  %v3080_v2 = vunpack.c.h.bf16 %v10320_v11  ;;  %v10400_v5 = vpack.c.bf16 %v10248_v37, %v10246_v43  ;;  %v2962_v11 = vunpack.c.h.b16 %v10392_v16 }
 0x8b6   :  { %v3112_v15 = vmul.f32 %v3080_v2, %v3080_v2  ;;  %v2960_v3 = vunpack.c.h.b16 %v10400_v5  ;;  %v3072_v2 = vunpack.c.h.bf16 %v10332_v31  ;;  %v13180_v31 = vmov 1065369472  }
 0x8b8   :  { %3027 = vmatpush.bf16.msra.mxu1 %v2997_v58  ;;  %3040 = vmatpush.bf16.msra.mxu2 %v2998_v52  ;;  %v2993_v58 = vpack.c.b16 %v2965_v23, %v2963_v38  ;;  %v2994_v52 = vpack.c.b16 %v2966_v9, %v2964_v50  ;;  %v3073_v23 = vunpack.c.l.bf16 %v10324_v12  ;;  %v3074_v9 = vunpack.c.h.bf16 %v10324_v12 }
 0x8b9   :  { %v2992_v50 = vpack.c.b16 %v2962_v11, %v2960_v3  ;;  %v3070_v12 = vunpack.c.h.bf16 %v10338_v53  ;;  %v3067_v3 = vunpack.c.l.bf16 %v10344_v36  ;;  %v3104_v61 = vmul.f32 %v3072_v2, %v3072_v2 }
 0x8ba   :  { %v3105_v20 = vmul.f32 %v3073_v23, %v3073_v23  ;;  %v3106_v13 = vmul.f32 %v3074_v9, %v3074_v9  ;;  %v3066_v53 = vunpack.c.h.bf16 %v10350_v63  ;;  %v3061_v2 = vunpack.c.l.bf16 %v10362_v21 }
 0x8bc   :  { %3028 = vmatpush.bf16.msra.mxu1 %v2995_v19  ;;  %3041 = vmatpush.bf16.msra.mxu2 %v2996_v32  ;;  %v3076_v19 = vunpack.c.h.bf16 %v10316_v42  ;;  %v2959_v32 = vunpack.c.l.b16 %v10400_v5  ;;  %v3128_v42 = vpack.c.bf16 %v3112_v15, %v3110_v27  ;;  %v3102_v15 = vmul.f32 %v3070_v12, %v3070_v12 }
 0x8bd   :  { %v3064_v27 = vunpack.c.h.bf16 %v10356_v44 }
 0x8be   :  { %v2991_v38 = vpack.c.b16 %v2961_v40, %v2959_v32  ;;  %v3103_v40 = vmul.f32 %v3071_v4, %v3071_v4  ;;  %v3124_v9 = vpack.c.bf16 %v3104_v61, %v3102_v15  ;;  %v3098_v4 = vmul.f32 %v3066_v53, %v3066_v53 }
 0x8bf   :  { %v3054_v53 = vunpack.c.h.bf16 %v10386_v1 }
 0x8c0   :  { %3029 = vmatpush.bf16.msra.mxu1 %v2993_v58  ;;  %3042 = vmatpush.bf16.msra.mxu2 %v2994_v52  ;;  %v3107_v58 = vmul.f32 %v3075_v55, %v3075_v55  ;;  %v3108_v52 = vmul.f32 %v3076_v19, %v3076_v19  ;;  %v3065_v55 = vunpack.c.l.bf16 %v10350_v63  ;;  %v3063_v19 = vunpack.c.l.bf16 %v10356_v44 }
 0x8c1   :  { %v3060_v63 = vunpack.c.h.bf16 %v10368_v17  ;;  %v3096_v44 = vmul.f32 %v3064_v27, %v3064_v27 }
 0x8c2   :  { %v3125_v11 = vpack.c.bf16 %v3107_v58, %v3105_v20  ;;  %v3126_v32 = vpack.c.bf16 %v3108_v52, %v3106_v13  ;;  %v3097_v36 = vmul.f32 %v3065_v55, %v3065_v55  ;;  %v3095_v20 = vmul.f32 %v3063_v19, %v3063_v19 }
 0x8c3   :  { %v3093_v13 = vmul.f32 %v3061_v2, %v3061_v2  ;;  %v3053_v55 = vunpack.c.l.bf16 %v10386_v1  ;;  %v3051_v19 = vunpack.c.l.bf16 %v10392_v16 }
 0x8c4   :  { %3030 = vmatpush.bf16.msra.mxu1 %v2991_v38  ;;  %3043 = vmatpush.bf16.msra.mxu2 %v2992_v50  ;;  %v3099_v38 = vmul.f32 %v3067_v3, %v3067_v3  ;;  %v3100_v50 = vmul.f32 %v3068_v35, %v3068_v35  ;;  %v3058_v3 = vunpack.c.h.bf16 %v10374_v51 }
 0x8c6   :  { %v3121_v58 = vpack.c.bf16 %v3099_v38, %v3097_v36  ;;  %v3122_v52 = vpack.c.bf16 %v3100_v50, %v3098_v4  ;;  %v3090_v15 = vmul.f32 %v3058_v3, %v3058_v3  ;;  %v3085_v38 = vmul.f32 %v3053_v55, %v3053_v55  ;;  %v6285_v3 = vld [vmem:[%s13181_s7 + $0xf0] sm:$0xf]  ;;  %v6277_v55 = vld [vmem:[%s13181_s7 + $0xe0] sm:$0xf] }
 0x8c7   :  { %3044 = vmatmul.bf16.vlgmr.msra.gmra.mxu2 %v13180_v31  ;;  %3031 = vmatmul.bf16.vlgmr.msra.gmra.mxu1 %v13180_v31  ;;  %v3086_v50 = vmul.f32 %v3054_v53, %v3054_v53  ;;  %v3049_v36 = vunpack.c.l.bf16 %v10400_v5  ;;  %v3050_v4 = vunpack.c.h.bf16 %v10400_v5 }
 0x8c8   :  { %3129 = vmatpush.bf16.msrb.mxu1 %v3127_v54  ;;  %3142 = vmatpush.bf16.msrb.mxu2 %v3128_v42  ;;  %v3101_v54 = vmul.f32 %v3069_v47, %v3069_v47  ;;  %v3062_v47 = vunpack.c.h.bf16 %v10362_v21  ;;  %v3059_v42 = vunpack.c.l.bf16 %v10368_v17  ;;  %v3056_v21 = vunpack.c.h.bf16 %v10380_v62 }
 0x8c9   :  { %v3092_v17 = vmul.f32 %v3060_v63, %v3060_v63  ;;  %v3081_v63 = vmul.f32 %v3049_v36, %v3049_v36  ;;  %v6269_v36 = vld [vmem:[%s13181_s7 + $0xd0] sm:$0xf] }
 0x8ca   :  { %v3123_v23 = vpack.c.bf16 %v3103_v40, %v3101_v54  ;;  %v3094_v12 = vmul.f32 %v3062_v47, %v3062_v47  ;;  %v3057_v40 = vunpack.c.l.bf16 %v10374_v51  ;;  %v3091_v35 = vmul.f32 %v3059_v42, %v3059_v42 }
 0x8cb   :  { %v3052_v51 = vunpack.c.h.bf16 %v10392_v16  ;;  %v3083_v42 = vmul.f32 %v3051_v19, %v3051_v19  ;;  %v3082_v16 = vmul.f32 %v3050_v4, %v3050_v4  ;;  %v6870_v19 = vld [vmem:[%s13181_s7 + $0xe4] sm:$0xf0] }
 0x8cc   :  { %3130 = vmatpush.bf16.msrb.mxu1 %v3125_v11  ;;  %3143 = vmatpush.bf16.msrb.mxu2 %v3126_v32  ;;  %v3055_v11 = vunpack.c.l.bf16 %v10380_v62  ;;  %v3119_v32 = vpack.c.bf16 %v3095_v20, %v3093_v13  ;;  %v3120_v61 = vpack.c.bf16 %v3096_v44, %v3094_v12  ;;  %v3089_v54 = vmul.f32 %v3057_v40, %v3057_v40  ;;  %v6221_v12 = vld [vmem:[%s13181_s7 + $0x70] sm:$0xf]  ;;  %v6856_v40 = vld [vmem:[%s13181_s7 + $0x74] sm:$0xf0] }
 0x8cd   :  { %v3088_v62 = vmul.f32 %v3056_v21, %v3056_v21  ;;  %v3084_v1 = vmul.f32 %v3052_v51, %v3052_v51  ;;  %v6872_v21 = vld [vmem:[%s13181_s7 + $0xf4] sm:$0xf0]  ;;  %v6278_v51 = vor.u32 %v6870_v19, %v6277_v55 }
 0x8ce   :  { %v3117_v27 = vpack.c.bf16 %v3091_v35, %v3089_v54  ;;  %v6286_v35 = vor.u32 %v6872_v21, %v6285_v3  ;;  %v6213_v54 = vld [vmem:[%s13181_s7 + $0x60] sm:$0xf]  ;;  %v6849_v3 = vld [vmem:[%s13181_s7 + $0x44] sm:$0xf]  ;;  %v6864_v19 = vld [vmem:[%s13181_s7 + $0xb4] sm:$0xf0] }
 0x8cf   :  { %v3116_v47 = vpack.c.bf16 %v3088_v62, %v3086_v50  ;;  %v6852_v50 = vld [vmem:[%s13181_s7 + $0x54] sm:$0xf0] }
 0x8d0   :  { %3131 = vmatpush.bf16.msrb.mxu1 %v3123_v23  ;;  %3144 = vmatpush.bf16.msrb.mxu2 %v3124_v9  ;;  %v3118_v23 = vpack.c.bf16 %v3092_v17, %v3090_v15  ;;  %v3087_v9 = vmul.f32 %v3055_v11, %v3055_v11  ;;  %v6222_v11 = vor.u32 %v6856_v40, %v6221_v12  ;;  %v6854_v15 = vld [vmem:[%s13181_s7 + $0x64] sm:$0xf0]  ;;  %v6261_v12 = vld [vmem:[%s13181_s7 + $0xc0] sm:$0xf] }
 0x8d1   :  { %v6214_v53 = vor.u32 %v6854_v15, %v6213_v54  ;;  %v6866_v40 = vld [vmem:[%s13181_s7 + $0xc4] sm:$0xf0]  ;;  %v6189_v54 = vld [vmem:[%s13181_s7 + $0x30] sm:$0xf]  ;;  %v6848_v15 = vld [vmem:[%s13181_s7 + $0x34] sm:$0xf0] }
 0x8d2   :  { %v3115_v2 = vpack.c.bf16 %v3087_v9, %v3085_v38  ;;  %v6205_v38 = vld [vmem:[%s13181_s7 + $0x50] sm:$0xf]  ;;  %v6190_v55 = vor.u32 %v6848_v15, %v6189_v54 }
 0x8d3   :  { %v6206_v4 = vor.u32 %v6852_v50, %v6205_v38  ;;  %v6191_v50 = vld [vmem:[%s13181_s7 + $0x38] sm:$0xf0] }
 0x8d4   :  { %3132 = vmatpush.bf16.msrb.mxu1 %v3121_v58  ;;  %3145 = vmatpush.bf16.msrb.mxu2 %v3122_v52  ;;  %v3113_v58 = vpack.c.bf16 %v3083_v42, %v3081_v63  ;;  %v3114_v52 = vpack.c.bf16 %v3084_v1, %v3082_v16  ;;  %v6207_v42 = vld [vmem:[%s13181_s7 + $0x58] sm:$0xf0] }
 0x8d8   :  { %3133 = vmatpush.bf16.msrb.mxu1 %v3119_v32  ;;  %3146 = vmatpush.bf16.msrb.mxu2 %v3120_v61  ;;  %v6855_v32 = vld [vmem:[%s13181_s7 + $0x74] sm:$0xf]  ;;  %v6223_v61 = vld [vmem:[%s13181_s7 + $0x78] sm:$0xf0] }
 0x8d9   :  { %v6226_v17 = vor.u32 %v6855_v32, %v6223_v61  ;;  %v6262_v32 = vor.u32 %v6866_v40, %v6261_v12  ;;  %v6199_v61 = vld [vmem:[%s13181_s7 + $0x48] sm:$0xf0]  ;;  %v6173_v40 = vld [vmem:[%s13181_s7 + $0x10] sm:$0xf] }
 0x8db   :  { %3582 = vmatpush.bf16.msrb.mxu0 %v6226_v17 }
 0x8dc   :  { %3134 = vmatpush.bf16.msrb.mxu1 %v3117_v27  ;;  %3147 = vmatpush.bf16.msrb.mxu2 %v3118_v23  ;;  %v6853_v27 = vld [vmem:[%s13181_s7 + $0x64] sm:$0xf]  ;;  %v6215_v23 = vld [vmem:[%s13181_s7 + $0x68] sm:$0xf0] }
 0x8dd   :  { %v6218_v62 = vor.u32 %v6853_v27, %v6215_v23 }
 0x8df   :  { %3583 = vmatpush.bf16.msrb.mxu0 %v6218_v62 }
 0x8e0   :  { %3135 = vmatpush.bf16.msrb.mxu1 %v3115_v2  ;;  %3148 = vmatpush.bf16.msrb.mxu2 %v3116_v47  ;;  %v6868_v2 = vld [vmem:[%s13181_s7 + $0xd4] sm:$0xf0]  ;;  %v6851_v47 = vld [vmem:[%s13181_s7 + $0x54] sm:$0xf] }
 0x8e1   :  { %v6270_v1 = vor.u32 %v6868_v2, %v6269_v36  ;;  %v6210_v63 = vor.u32 %v6851_v47, %v6207_v42  ;;  %v6181_v47 = vld [vmem:[%s13181_s7 + $0x20] sm:$0xf]  ;;  %v6846_v42 = vld [vmem:[%s13181_s7 + $0x24] sm:$0xf0] }
 0x8e3   :  { %3584 = vmatpush.bf16.msrb.mxu0 %v6210_v63  ;;  %v6182_v63 = vor.u32 %v6846_v42, %v6181_v47 }
 0x8e4   :  { %3136 = vmatpush.bf16.msrb.mxu1 %v3113_v58  ;;  %3149 = vmatpush.bf16.msrb.mxu2 %v3114_v52 }
 0x8e7   :  { %3137 = vmatmul.bf16.vlgmr.msrb.gmra.mxu1 %v13180_v31  ;;  %3150 = vmatmul.bf16.vlgmr.msrb.gmra.mxu2 %v13180_v31 }
 0x8e8   :  { %3484 = vmatpush.bf16.msra.mxu1 %v6222_v11  ;;  %3533 = vmatpush.bf16.msra.mxu2 %v6286_v35  ;;  %v6202_v35 = vor.u32 %v6849_v3, %v6199_v61  ;;  %v6844_v3 = vld [vmem:[%s13181_s7 + $0x14] sm:$0xf0]  ;;  %v6237_v61 = vld [vmem:[%s13181_s7 + $0x90] sm:$0xf] }
 0x8ea   :  { %3585 = vmatpush.bf16.msrb.mxu0 %v6202_v35  ;;  %v6860_v35 = vld [vmem:[%s13181_s7 + $0x94] sm:$0xf0] }
 0x8eb   :  { %v6238_v15 = vor.u32 %v6860_v35, %v6237_v61 }
 0x8ec   :  { %3485 = vmatpush.bf16.msra.mxu1 %v6214_v53  ;;  %3534 = vmatpush.bf16.msra.mxu2 %v6278_v51  ;;  %v6253_v53 = vld [vmem:[%s13181_s7 + $0xb0] sm:$0xf]  ;;  %v6847_v51 = vld [vmem:[%s13181_s7 + $0x34] sm:$0xf] }
 0x8ed   :  { %v6254_v38 = vor.u32 %v6864_v19, %v6253_v53  ;;  %v6842_v53 = vld [vmem:[%s13181_s7 + $0x4] sm:$0xf0] }
 0x8f0   :  { %3486 = vmatpush.bf16.msra.mxu1 %v6206_v4  ;;  %3535 = vmatpush.bf16.msra.mxu2 %v6270_v1  ;;  %v6194_v4 = vor.u32 %v6847_v51, %v6191_v50  ;;  %v6245_v1 = vld [vmem:[%s13181_s7 + $0xa0] sm:$0xf]  ;;  %v6841_v50 = vld [vmem:[%s13181_s7 + $0x4] sm:$0xf] }
 0x8f2   :  { %3586 = vmatpush.bf16.msrb.mxu0 %v6194_v4  ;;  %v6167_v4 = vld [vmem:[%s13181_s7 + $0x8] sm:$0xf0] }
 0x8f3   :  { %v6170_v47 = vor.u32 %v6841_v50, %v6167_v4 }
 0x8f4   :  { %3536 = vmatpush.bf16.msra.mxu2 %v6262_v32  ;;  %v6174_v32 = vor.u32 %v6844_v3, %v6173_v40  ;;  %v2713_v3 = vld [vmem:[%s13182_s1] sm:$0x3] }
 0x8f8   :  { %3537 = vmatpush.bf16.msra.mxu2 %v6254_v38  ;;  %v6858_v38 = vld [vmem:[%s13181_s7 + $0x84] sm:$0xf0] }
 0x944   :  { %v3032_v20 = vpop.f32.mrf.mxu1 }
 0x945   :  { %v10478_v9 = vmul.f32 0.0078125, %v3032_v20  ;;  %v6197_v20 = vld [vmem:[%s13181_s7 + $0x40] sm:$0xf] }
 0x947   :  { %v3159_v58 = vmul.f32 %v10478_v9, %v10478_v9 }
 0x94a   :  { %v3045_v44 = vpop.f32.mrf.mxu2 }
 0x94b   :  { %v10515_v11 = vmul.f32 0.0078125, %v3045_v44 }
 0x94c   :  { %v3034_v13 = vpop.f32.mrf.mxu1 }
 0x94d   :  { %v6850_v13 = vld [vmem:[%s13181_s7 + $0x44] sm:$0xf0]  ;;  %v3160_v27 = vmul.f32 %v10515_v11, %v10515_v11 }
 0x952   :  { %v3047_v5 = vpop.f32.mrf.mxu2 }
 0x953   :  { %v6198_v5 = vor.u32 %v6850_v13, %v6197_v20 }
 0x955   :  { %3487 = vmatpush.bf16.msra.mxu1 %v6198_v5 }
 0x959   :  { %3488 = vmatpush.bf16.msra.mxu1 %v6190_v55  ;;  %v6165_v55 = vld [vmem:[%s13181_s7] sm:$0xf] }
 0x95d   :  { %3489 = vmatpush.bf16.msra.mxu1 %v6182_v63 }
 0x961   :  { %3490 = vmatpush.bf16.msra.mxu1 %v6174_v32 }
 0x964   :  { %v3138_v16 = vpop.f32.mrf.mxu1 }
 0x965   :  { %v3157_v52 = vmul.f32 0.0078125, %v3138_v16  ;;  %v6862_v16 = vld [vmem:[%s13181_s7 + $0xa4] sm:$0xf0] }
 0x966   :  { %v6246_v13 = vor.u32 %v6862_v16, %v6245_v1 }
 0x967   :  { %v3161_v21 = vsub.f32 %v3157_v52, %v3159_v58  ;;  %v6845_v58 = vld [vmem:[%s13181_s7 + $0x24] sm:$0xf]  ;;  %v6183_v52 = vld [vmem:[%s13181_s7 + $0x28] sm:$0xf0] }
 0x968   :  { %v6186_v5 = vor.u32 %v6845_v58, %v6183_v52  ;;  %3538 = vmatpush.bf16.msra.mxu2 %v6246_v13 }
 0x969   :  { %v3163_v17 = vmax.f32 %v3161_v21, 0.0 }
 0x96a   :  { %v3151_v44 = vpop.f32.mrf.mxu2  ;;  %3587 = vmatpush.bf16.msrb.mxu0 %v6186_v5 }
 0x96b   :  { %v10537_v23 = vadd.f32 1e-05, %v3163_v17  ;;  %v3158_v62 = vmul.f32 0.0078125, %v3151_v44  ;;  %v6843_v17 = vld [vmem:[%s13181_s7 + $0x14] sm:$0xf] }
 0x96c   :  { %v3140_v36 = vpop.f32.mrf.mxu1  ;;  %v6175_v44 = vld [vmem:[%s13181_s7 + $0x18] sm:$0xf0]  ;;  %3539 = vmatpush.bf16.msra.mxu2 %v6238_v15 }
 0x96d   :  { %7189 = vrsqrt.f32 %v10537_v23  ;;  %v3162_v2 = vsub.f32 %v3158_v62, %v3160_v27  ;;  %v6178_v51 = vor.u32 %v6843_v17, %v6175_v44  ;;  %v6166_v27 = vor.u32 %v6842_v53, %v6165_v55  ;;  %v6229_v62 = vld [vmem:[%s13181_s7 + $0x80] sm:$0xf] }
 0x96e   :  { %v6230_v36 = vor.u32 %v6858_v38, %v6229_v62  ;;  %vm3173_vm12 = vweird.f32 %v10537_v23 }
 0x96f   :  { %v3164_v20 = vmax.f32 %v3162_v2, 0.0  ;;  %3588 = vmatpush.bf16.msrb.mxu0 %v6178_v51  ;;  %3491 = vmatpush.bf16.msra.mxu1 %v6166_v27 }
 0x970   :  { %3540 = vmatpush.bf16.msra.mxu2 %v6230_v36 }
 0x971   :  { %v3166_v12 = vadd.f32 1e-05, %v3164_v20 }
 0x972   :  { %v3153_v21 = vpop.f32.mrf.mxu2 }
 0x973   :  { %v7190_v54 = vpop.eup %7189  ;;  %7191 = vrsqrt.f32 %v3166_v12  ;;  %3589 = vmatpush.bf16.msrb.mxu0 %v6170_v47  ;;  %vm3183_vm10 = vweird.f32 %v3166_v12 }
 0x974   :  { %v3168_v19 = vmul.f32 %v7190_v54, %v10537_v23  ;;  %vm3174_vm9 = vweird.f32 %v7190_v54  ;;  %v2714_v23 = vld [vmem:[%s13183_s30] sm:$0x3] }
 0x975   :  { %vm3175_vm14 = vmor %vm3173_vm12, %vm3174_vm9 }
 0x976   :  { %v3169_v2 = vmul.f32 %v7190_v54, %v3168_v19 }
 0x978   :  { %v3170_v1 = vmul.f32 0.5, %v3169_v2 }
 0x979   :  { %v7192_v42 = vpop.eup %7191 }
 0x97a   :  { %v3178_v63 = vmul.f32 %v7192_v42, %v3166_v12  ;;  %v3171_v58 = vsub.f32 1.5, %v3170_v1  ;;  %vm3184_vm8 = vweird.f32 %v7192_v42 }
 0x97b   :  { %vm3185_vm11 = vmor %vm3183_vm10, %vm3184_vm8 }
 0x97c   :  { %v3179_v16 = vmul.f32 %v7192_v42, %v3178_v63  ;;  %v3172_v13 = vmul.f32 %v7190_v54, %v3171_v58 }
 0x97e   :  { %v3180_v52 = vmul.f32 0.5, %v3179_v16  ;;  %v3176_v32 = vsel %vm3175_vm14, %v7190_v54, %v3172_v13 }
 0x980   :  { %v3181_v20 = vsub.f32 1.5, %v3180_v52 }
 0x982   :  { %v3182_v5 = vmul.f32 %v7192_v42, %v3181_v20 }
 0x984   :  { %v3186_v40 = vsel %vm3185_vm11, %v7192_v42, %v3182_v5 }
 0x985   :  { %v3189_v21 = vrot.slane %v3186_v40, 7 }
 0x987   :  { %v3191_v61 = vsel %vm3190_vm13, %v3176_v32, %v3189_v21 }
 0x988   :  { %v3193_v35 = vmul.f32 %v3191_v61, %v2713_v3 }
 0x98a   :  { %v10603_v17 = vperm.slane %v3193_v35, 0  ;;  %v10605_v15 = vperm.slane %v3193_v35, 1 }
 0x98c   :  { %v3200_v12 = vmul.f32 %v10605_v15, %v10515_v11  ;;  %v3199_v44 = vmul.f32 %v10603_v17, %v10478_v9  ;;  %v3207_v19 = vmul.f32 %v10603_v17, %v10246_v43  ;;  %v3209_v51 = vmul.f32 %v10603_v17, %v10250_v57 }
 0x98d   :  { %v3208_v62 = vmul.f32 %v10605_v15, %v10248_v37  ;;  %v3210_v9 = vmul.f32 %v10605_v15, %v10252_v49  ;;  %v3211_v42 = vmul.f32 %v10603_v17, %v10254_v59  ;;  %v3213_v37 = vmul.f32 %v10603_v17, %v10258_v7 }
 0x98e   :  { %v3203_v55 = vrot.slane %v3200_v12, 7  ;;  %v3212_v49 = vmul.f32 %v10605_v15, %v10256_v56  ;;  %v3214_v1 = vmul.f32 %v10605_v15, %v10260_v25  ;;  %v3223_v58 = vmul.f32 %v10603_v17, %v10278_v24 }
 0x98f   :  { %v3225_v52 = vmul.f32 %v10603_v17, %v10282_v10  ;;  %v3224_v7 = vmul.f32 %v10605_v15, %v10280_v39  ;;  %v3226_v56 = vmul.f32 %v10605_v15, %v10284_v33  ;;  %v3227_v24 = vmul.f32 %v10603_v17, %v10286_v41 }
 0x990   :  { %v3204_v54 = vsel %vm3190_vm13, %v3199_v44, %v3203_v55  ;;  %v3229_v10 = vmul.f32 %v10603_v17, %v10290_v18  ;;  %v3228_v39 = vmul.f32 %v10605_v15, %v10288_v46  ;;  %v3230_v33 = vmul.f32 %v10605_v15, %v10292_v22 }
 0x991   :  { %v3206_v53 = vsub.f32 %v2714_v23, %v3204_v54  ;;  %v3231_v5 = vmul.f32 %v10603_v17, %v10294_v28  ;;  %v3233_v41 = vmul.f32 %v10603_v17, %v10298_v30  ;;  %v3232_v18 = vmul.f32 %v10605_v15, %v10296_v14 }
 0x992   :  { %v3234_v3 = vmul.f32 %v10605_v15, %v10300_v6  ;;  %v3235_v22 = vmul.f32 %v10603_v17, %v10302_v45 }
 0x993   :  { %v10619_v27 = vperm.slane %v3206_v53, 0  ;;  %v10621_v11 = vperm.slane %v3206_v53, 1 }
 0x995   :  { %v3244_v38 = vadd.f32 %v10619_v27, %v3207_v19  ;;  %v3246_v50 = vadd.f32 %v10619_v27, %v3209_v51  ;;  %v3245_v36 = vadd.f32 %v10621_v11, %v3208_v62  ;;  %v3247_v43 = vadd.f32 %v10621_v11, %v3210_v9 }
 0x996   :  { %v3248_v59 = vadd.f32 %v10619_v27, %v3211_v42  ;;  %v3250_v20 = vadd.f32 %v10619_v27, %v3213_v37  ;;  %v3249_v25 = vadd.f32 %v10621_v11, %v3212_v49  ;;  %v3251_v13 = vadd.f32 %v10621_v11, %v3214_v1 }
 0x997   :  { %v3276_v4 = vmax.f32 %v3244_v38, 0.0  ;;  %v3278_v57 = vmax.f32 %v3246_v50, 0.0  ;;  %v3277_v2 = vmax.f32 %v3245_v36, 0.0  ;;  %v3279_v47 = vmax.f32 %v3247_v43, 0.0 }
 0x998   :  { %v3260_v40 = vadd.f32 %v10619_v27, %v3223_v58  ;;  %v3280_v21 = vmax.f32 %v3248_v59, 0.0  ;;  %v3282_v32 = vmax.f32 %v3250_v20, 0.0  ;;  %v3262_v46 = vadd.f32 %v10619_v27, %v3225_v52 }
 0x999   :  { %v3308_v63 = vpack.c.bf16 %v3278_v57, %v3276_v4  ;;  %v10639_v16 = vpack.c.bf16 %v3279_v47, %v3277_v2  ;;  %v3281_v61 = vmax.f32 %v3249_v25, 0.0  ;;  %v3261_v35 = vadd.f32 %v10621_v11, %v3224_v7 }
 0x99a   :  { %v3292_v28 = vmax.f32 %v3260_v40, 0.0  ;;  %v3263_v12 = vadd.f32 %v10621_v11, %v3226_v56  ;;  %v3283_v30 = vmax.f32 %v3251_v13, 0.0  ;;  %v3294_v23 = vmax.f32 %v3262_v46, 0.0 }
 0x99b   :  { %3492 = vmatmul.bf16.vlgmr.msra.gmra.mxu1 %v3308_v63  ;;  %3541 = vmatmul.bf16.vlgmr.msra.gmra.mxu2 %v10639_v16  ;;  %v3264_v14 = vadd.f32 %v10619_v27, %v3227_v24  ;;  %v3266_v44 = vadd.f32 %v10619_v27, %v3229_v10  ;;  %v3293_v6 = vmax.f32 %v3261_v35, 0.0  ;;  %v3265_v54 = vadd.f32 %v10621_v11, %v3228_v39 }
 0x99c   :  { %3590 = vmatmul.bf16.vlgmr.msrb.gmra.mxu0 %v3308_v63  ;;  %v3295_v55 = vmax.f32 %v3263_v12, 0.0  ;;  %v3267_v53 = vadd.f32 %v10621_v11, %v3230_v33  ;;  %v10680_v19 = vpack.c.bf16 %v3294_v23, %v3292_v28  ;;  %v3268_v62 = vadd.f32 %v10619_v27, %v3231_v5  ;;  %v13185_v12 = vld [vmem:[#allocation20_spill] sm:$0xff]  ;;  %v13186_v23 = vld [vmem:[#allocation19_spill] sm:$0xff] }
 0x99d   :  { %v3296_v45 = vmax.f32 %v3264_v14, 0.0  ;;  %v3298_v51 = vmax.f32 %v3266_v44, 0.0  ;;  %v3297_v38 = vmax.f32 %v3265_v54, 0.0  ;;  %v3270_v36 = vadd.f32 %v10619_v27, %v3233_v41  ;;  %v13187_v44 = vld [vmem:[#allocation21_spill] sm:$0xff] }
 0x99e   :  { %v10683_v9 = vpack.c.bf16 %v3295_v55, %v3293_v6  ;;  %v3299_v50 = vmax.f32 %v3267_v53, 0.0  ;;  %v3300_v4 = vmax.f32 %v3268_v62, 0.0  ;;  %v3269_v57 = vadd.f32 %v10621_v11, %v3232_v18 }
 0x99f   :  { %v10686_v43 = vpack.c.bf16 %v3298_v51, %v3296_v45  ;;  %v3271_v2 = vadd.f32 %v10621_v11, %v3234_v3  ;;  %v3302_v42 = vmax.f32 %v3270_v36, 0.0  ;;  %v3237_v37 = vmul.f32 %v10603_v17, %v10310_v60 }
 0x9a0   :  { %v10690_v47 = vpack.c.bf16 %v3299_v50, %v3297_v38  ;;  %v3272_v49 = vadd.f32 %v10619_v27, %v3235_v22  ;;  %v3301_v1 = vmax.f32 %v3269_v57, 0.0  ;;  %v3236_v58 = vmul.f32 %v10605_v15, %v10304_v0  ;;  %v6279_v57 = vld [vmem:[%s13181_s7 + $0xe8] sm:$0xf0] }
 0x9a1   :  { %v3303_v63 = vmax.f32 %v3271_v2, 0.0  ;;  %v3238_v52 = vmul.f32 %v10605_v15, %v10312_v26  ;;  %v10699_v59 = vpack.c.bf16 %v3302_v42, %v3300_v4  ;;  %v3274_v20 = vadd.f32 %v10619_v27, %v3237_v37  ;;  %v6271_v42 = vld [vmem:[%s13181_s7 + $0xd8] sm:$0xf0] }
 0x9a2   :  { %v3304_v7 = vmax.f32 %v3272_v49, 0.0  ;;  %v3273_v25 = vadd.f32 %v10621_v11, %v3236_v58  ;;  %v3310_v24 = vpack.c.bf16 %v3282_v32, %v3280_v21  ;;  %v10706_v10 = vpack.c.bf16 %v3283_v30, %v3281_v61  ;;  %v6865_v49 = vld [vmem:[%s13181_s7 + $0xc4] sm:$0xf]  ;;  %v6863_v58 = vld [vmem:[%s13181_s7 + $0xb4] sm:$0xf] }
 0x9a3   :  { %v10702_v56 = vpack.c.bf16 %v3303_v63, %v3301_v1  ;;  %v3275_v60 = vadd.f32 %v10621_v11, %v3238_v52  ;;  %v3306_v13 = vmax.f32 %v3274_v20, 0.0  ;;  %v3215_v5 = vmul.f32 %v10603_v17, %v10262_v48  ;;  %v6263_v1 = vld [vmem:[%s13181_s7 + $0xc8] sm:$0xf0]  ;;  %v6255_v52 = vld [vmem:[%s13181_s7 + $0xb8] sm:$0xf0] }
 0x9a4   :  { %v3305_v39 = vmax.f32 %v3273_v25, 0.0  ;;  %v3217_v40 = vmul.f32 %v10603_v17, %v10266_v8  ;;  %v3216_v41 = vmul.f32 %v10605_v15, %v10264_v29  ;;  %v3218_v18 = vmul.f32 %v10605_v15, %v10268_v34  ;;  %v13184_v29 = vld [vmem:[#allocation18_spill] sm:$0xff] }
 0x9a5   :  { %v3307_v0 = vmax.f32 %v3275_v60, 0.0  ;;  %v10709_v26 = vpack.c.bf16 %v3306_v13, %v3304_v7  ;;  %v3252_v3 = vadd.f32 %v10619_v27, %v3215_v5  ;;  %v3219_v34 = vmul.f32 %v10603_v17, %v13184_v29  ;;  %v6861_v7 = vld [vmem:[%s13181_s7 + $0xa4] sm:$0xf]  ;;  %v6247_v25 = vld [vmem:[%s13181_s7 + $0xa8] sm:$0xf0] }
 0x9a6   :  { %v3254_v21 = vadd.f32 %v10619_v27, %v3217_v40  ;;  %v3253_v32 = vadd.f32 %v10621_v11, %v3216_v41  ;;  %v3255_v46 = vadd.f32 %v10621_v11, %v3218_v18  ;;  %v3221_v30 = vmul.f32 %v10603_v17, %v13185_v12  ;;  %v6859_v60 = vld [vmem:[%s13181_s7 + $0x94] sm:$0xf] }
 0x9a7   :  { %v10711_v33 = vpack.c.bf16 %v3307_v0, %v3305_v39  ;;  %v3284_v22 = vmax.f32 %v3252_v3, 0.0  ;;  %v3220_v14 = vmul.f32 %v10605_v15, %v13186_v23  ;;  %v3222_v6 = vmul.f32 %v10605_v15, %v13187_v44  ;;  %v6871_v15 = vld [vmem:[%s13181_s7 + $0xf4] sm:$0xf]  ;;  %v6857_v39 = vld [vmem:[%s13181_s7 + $0x84] sm:$0xf] }
 0x9a8   :  { %v3286_v61 = vmax.f32 %v3254_v21, 0.0  ;;  %v3285_v48 = vmax.f32 %v3253_v32, 0.0  ;;  %v3287_v28 = vmax.f32 %v3255_v46, 0.0  ;;  %v3256_v55 = vadd.f32 %v10619_v27, %v3219_v34  ;;  %v6231_v0 = vld [vmem:[%s13181_s7 + $0x88] sm:$0xf0] }
 0x9a9   :  { %v3258_v54 = vadd.f32 %v10619_v27, %v3221_v30  ;;  %v3257_v53 = vadd.f32 %v10621_v11, %v3220_v14  ;;  %v3259_v45 = vadd.f32 %v10621_v11, %v3222_v6  ;;  %v6287_v27 = vld [vmem:[%s13181_s7 + $0xf8] sm:$0xf0]  ;;  %v6869_v11 = vld [vmem:[%s13181_s7 + $0xe4] sm:$0xf]  ;;  %v6266_v63 = vor.u32 %v6865_v49, %v6263_v1 }
 0x9aa   :  { %v3312_v35 = vpack.c.bf16 %v3286_v61, %v3284_v22  ;;  %v10725_v8 = vpack.c.bf16 %v3287_v28, %v3285_v48  ;;  %v3288_v51 = vmax.f32 %v3256_v55, 0.0  ;;  %v6290_v4 = vor.u32 %v6871_v15, %v6287_v27 }
 0x9ab   :  { %3497 = vmatmul.bf16.gmra.mxu1 %v3310_v24  ;;  %3546 = vmatmul.bf16.gmra.mxu2 %v10706_v10  ;;  %v3290_v62 = vmax.f32 %v3258_v54, 0.0  ;;  %v3289_v38 = vmax.f32 %v3257_v53, 0.0  ;;  %v3291_v50 = vmax.f32 %v3259_v45, 0.0  ;;  %v6282_v2 = vor.u32 %v6869_v11, %v6279_v57 }
 0x9ac   :  { %3595 = vmatmul.bf16.gmra.mxu0 %v3310_v24  ;;  %3631 = vmatpush.bf16.msrb.mxu1 %v6290_v4  ;;  %v6258_v20 = vor.u32 %v6863_v58, %v6255_v52  ;;  %v6239_v24 = vld [vmem:[%s13181_s7 + $0x98] sm:$0xf0]  ;;  %v6234_v5 = vor.u32 %v6857_v39, %v6231_v0 }
 0x9ad   :  { %v3314_v36 = vpack.c.bf16 %v3290_v62, %v3288_v51  ;;  %v10740_v17 = vpack.c.bf16 %v3291_v50, %v3289_v38  ;;  %v6242_v13 = vor.u32 %v6859_v60, %v6239_v24 }
 0x9b0   :  { %3632 = vmatpush.bf16.msrb.mxu1 %v6282_v2 }
 0x9bb   :  { %3502 = vmatmul.bf16.gmra.mxu1 %v3312_v35  ;;  %3551 = vmatmul.bf16.gmra.mxu2 %v10725_v8 }
 0x9bc   :  { %3600 = vmatmul.bf16.gmra.mxu0 %v3312_v35 }
 0x9cb   :  { %3507 = vmatmul.bf16.gmra.mxu1 %v3314_v36  ;;  %3556 = vmatmul.bf16.gmra.mxu2 %v10740_v17 }
 0x9cc   :  { %3605 = vmatmul.bf16.gmra.mxu0 %v3314_v36 }
 0x9db   :  { %3512 = vmatmul.bf16.gmra.mxu1 %v10680_v19  ;;  %3561 = vmatmul.bf16.gmra.mxu2 %v10683_v9 }
 0x9dc   :  { %3610 = vmatmul.bf16.gmra.mxu0 %v10680_v19  ;;  %v6867_v19 = vld [vmem:[%s13181_s7 + $0xd4] sm:$0xf] }
 0x9dd   :  { %v6274_v37 = vor.u32 %v6867_v19, %v6271_v42 }
 0x9df   :  { %3633 = vmatpush.bf16.msrb.mxu1 %v6274_v37 }
 0x9e3   :  { %3634 = vmatpush.bf16.msrb.mxu1 %v6266_v63 }
 0x9e7   :  { %3635 = vmatpush.bf16.msrb.mxu1 %v6258_v20 }
 0x9eb   :  { %3517 = vmatmul.bf16.gmra.mxu1 %v10686_v43  ;;  %3566 = vmatmul.bf16.gmra.mxu2 %v10690_v47 }
 0x9ec   :  { %3615 = vmatmul.bf16.gmra.mxu0 %v10686_v43  ;;  %v6250_v43 = vor.u32 %v6861_v7, %v6247_v25 }
 0x9ee   :  { %3636 = vmatpush.bf16.msrb.mxu1 %v6250_v43 }
 0x9f2   :  { %3637 = vmatpush.bf16.msrb.mxu1 %v6242_v13 }
 0x9f6   :  { %3638 = vmatpush.bf16.msrb.mxu1 %v6234_v5 }
 0x9fb   :  { %3522 = vmatmul.bf16.gmra.mxu1 %v10699_v59  ;;  %3571 = vmatmul.bf16.gmra.mxu2 %v10702_v56 }
 0x9fc   :  { %3620 = vmatmul.bf16.gmra.mxu0 %v10699_v59 }
 0xa0b   :  { %3527 = vmatmul.bf16.gmra.mxu1 %v10709_v26  ;;  %3576 = vmatmul.bf16.gmra.mxu2 %v10711_v33 }
 0xa0c   :  { %3625 = vmatmul.bf16.gmra.mxu0 %v10709_v26 }
 0xa18   :  { %v3493_v40 = vpop.f32.mrf.mxu1 }
 0xa19   :  { %v10831_v38 = vpop.f32.mrf.mxu0 }
 0xa1b   :  { %3639 = vmatmul.bf16.vlgmr.msrb.gmra.mxu1 %v10639_v16 }
 0xa1e   :  { %v3542_v41 = vpop.f32.mrf.mxu2 }
 0xa1f   :  { %v10804_v18 = vadd.f32 %v3542_v41, %v3493_v40 }
 0xa20   :  { %v3495_v3 = vpop.f32.mrf.mxu1 }
 0xa21   :  { %v10834_v36 = vpop.f32.mrf.mxu0 }
 0xa26   :  { %v3544_v21 = vpop.f32.mrf.mxu2 }
 0xa27   :  { %v10806_v32 = vadd.f32 %v3544_v21, %v3495_v3 }
 0xa28   :  { %v3498_v46 = vpop.f32.mrf.mxu1 }
 0xa2b   :  { %3644 = vmatmul.bf16.gmra.mxu1 %v10706_v10 }
 0xa2e   :  { %v3547_v59 = vpop.f32.mrf.mxu2 }
 0xa2f   :  { %v10809_v22 = vadd.f32 %v3547_v59, %v3498_v46 }
 0xa30   :  { %v3500_v61 = vpop.f32.mrf.mxu1 }
 0xa36   :  { %v3549_v48 = vpop.f32.mrf.mxu2 }
 0xa37   :  { %v10811_v28 = vadd.f32 %v3549_v48, %v3500_v61 }
 0xa38   :  { %v3503_v26 = vpop.f32.mrf.mxu1 }
 0xa3b   :  { %3649 = vmatmul.bf16.gmra.mxu1 %v10725_v8 }
 0xa3e   :  { %v3552_v16 = vpop.f32.mrf.mxu2 }
 0xa3f   :  { %v10814_v35 = vadd.f32 %v3552_v16, %v3503_v26 }
 0xa40   :  { %v3505_v29 = vpop.f32.mrf.mxu1 }
 0xa46   :  { %v3554_v34 = vpop.f32.mrf.mxu2 }
 0xa47   :  { %v10816_v12 = vadd.f32 %v3554_v34, %v3505_v29 }
 0xa48   :  { %v3508_v30 = vpop.f32.mrf.mxu1 }
 0xa4b   :  { %3654 = vmatmul.bf16.gmra.mxu1 %v10740_v17 }
 0xa4e   :  { %v3557_v10 = vpop.f32.mrf.mxu2 }
 0xa4f   :  { %v10819_v23 = vadd.f32 %v3557_v10, %v3508_v30 }
 0xa50   :  { %v3510_v14 = vpop.f32.mrf.mxu1 }
 0xa56   :  { %v3559_v44 = vpop.f32.mrf.mxu2 }
 0xa57   :  { %v10821_v6 = vadd.f32 %v3559_v44, %v3510_v14 }
 0xa58   :  { %v3513_v55 = vpop.f32.mrf.mxu1 }
 0xa5b   :  { %3659 = vmatmul.bf16.gmra.mxu1 %v10683_v9  ;;  %v10837_v9 = vpop.f32.mrf.mxu0 }
 0xa5e   :  { %v3562_v8 = vpop.f32.mrf.mxu2 }
 0xa5f   :  { %v10824_v54 = vadd.f32 %v3562_v8, %v3513_v55 }
 0xa60   :  { %v10826_v53 = vpop.f32.mrf.mxu1 }
 0xa63   :  { %v10839_v27 = vpop.f32.mrf.mxu0 }
 0xa66   :  { %v3564_v58 = vpop.f32.mrf.mxu2 }
 0xa68   :  { %v10828_v45 = vpop.f32.mrf.mxu1 }
 0xa6b   :  { %3664 = vmatmul.bf16.gmra.mxu1 %v10690_v47  ;;  %v10845_v4 = vpop.f32.mrf.mxu0 }
 0xa6e   :  { %v3567_v25 = vpop.f32.mrf.mxu2 }
 0xa70   :  { %v3520_v51 = vpop.f32.mrf.mxu1 }
 0xa76   :  { %v3569_v24 = vpop.f32.mrf.mxu2 }
 0xa78   :  { %v3523_v62 = vpop.f32.mrf.mxu1 }
 0xa7b   :  { %3669 = vmatmul.bf16.gmra.mxu1 %v10702_v56  ;;  %v10849_v56 = vpop.f32.mrf.mxu0 }
 0xa7e   :  { %v3572_v0 = vpop.f32.mrf.mxu2 }
 0xa7f   :  { %v10877_v44 = vadd.f32 %v3572_v0, %v3523_v62  ;;  %v10903_v0 = vadd.f32 %v3567_v25, %v10828_v45 }
 0xa80   :  { %v3525_v50 = vpop.f32.mrf.mxu1 }
 0xa83   :  { %v10853_v19 = vpop.f32.mrf.mxu0 }
 0xa86   :  { %v3574_v3 = vpop.f32.mrf.mxu2 }
 0xa87   :  { %v10871_v10 = vadd.f32 %v3574_v3, %v3525_v50  ;;  %v10889_v50 = vadd.f32 %v3569_v24, %v3520_v51 }
 0xa88   :  { %v3528_v17 = vpop.f32.mrf.mxu1 }
 0xa8b   :  { %3674 = vmatmul.bf16.gmra.mxu1 %v10711_v33  ;;  %v3608_v42 = vpop.f32.mrf.mxu0 }
 0xa8e   :  { %v3577_v59 = vpop.f32.mrf.mxu2 }
 0xa8f   :  { %v10865_v16 = vadd.f32 %v3577_v59, %v3528_v17 }
 0xa90   :  { %v3530_v15 = vpop.f32.mrf.mxu1 }
 0xa93   :  { %v3611_v1 = vpop.f32.mrf.mxu0 }
 0xa96   :  { %v3579_v34 = vpop.f32.mrf.mxu2 }
 0xa98   :  { %v10841_v11 = vpop.f32.mrf.mxu1 }
 0xa9b   :  { %v3613_v52 = vpop.f32.mrf.mxu0 }
 0xaa0   :  { %v10843_v47 = vpop.f32.mrf.mxu1 }
 0xaa3   :  { %v3616_v43 = vpop.f32.mrf.mxu0 }
 0xaa8   :  { %v10847_v57 = vpop.f32.mrf.mxu1 }
 0xaab   :  { %v3618_v13 = vpop.f32.mrf.mxu0 }
 0xab0   :  { %v10851_v2 = vpop.f32.mrf.mxu1 }
 0xab3   :  { %v3621_v40 = vpop.f32.mrf.mxu0 }
 0xab8   :  { %v10855_v33 = vpop.f32.mrf.mxu1 }
 0xabb   :  { %v3623_v21 = vpop.f32.mrf.mxu0 }
 0xac0   :  { %v10857_v37 = vpop.f32.mrf.mxu1 }
 0xac3   :  { %v3626_v61 = vpop.f32.mrf.mxu0 }
 0xac8   :  { %v10859_v49 = vpop.f32.mrf.mxu1 }
 0xacb   :  { %v3628_v55 = vpop.f32.mrf.mxu0 }
 0xad0   :  { %v3657_v63 = vpop.f32.mrf.mxu1 }
 0xad8   :  { %v3660_v20 = vpop.f32.mrf.mxu1 }
 0xad9   :  { %v10861_v7 = vadd.f32 %v3660_v20, %v3611_v1  ;;  %v10881_v20 = vadd.f32 %v3579_v34, %v3530_v15 }
 0xadb   :  { %13189 = vst [vmem:[#allocation56_spill] sm:$0xff] %v10881_v20 }
 0xae0   :  { %v3662_v60 = vpop.f32.mrf.mxu1 }
 0xae8   :  { %v3665_v39 = vpop.f32.mrf.mxu1 }
 0xaf0   :  { %v3667_v5 = vpop.f32.mrf.mxu1 }
 0xaf1   :  { %v10879_v8 = vadd.f32 %v3667_v5, %v3618_v13  ;;  %v10905_v5 = vadd.f32 %v3662_v60, %v3613_v52 }
 0xaf3   :  { %v10909_v51 = vpack.c.bf16 %v10879_v8, %v10889_v50 }
 0xaf8   :  { %v3670_v41 = vpop.f32.mrf.mxu1 }
 0xaf9   :  { %v10869_v30 = vadd.f32 %v3670_v41, %v3621_v40  ;;  %v10891_v41 = vadd.f32 %v3665_v39, %v3616_v43 }
 0xafb   :  { %v10895_v62 = vpack.c.bf16 %v10869_v30, %v10877_v44  ;;  %v10920_v45 = vpack.c.bf16 %v10891_v41, %v10903_v0 }
 0xafd   :  { %v3826_v52 = vunpack.c.l.bf16 %v10895_v62 }
 0xb00   :  { %v3672_v46 = vpop.f32.mrf.mxu1 }
 0xb01   :  { %v10867_v29 = vadd.f32 %v3672_v46, %v3623_v21  ;;  %v10916_v21 = vadd.f32 %v3564_v58, %v10826_v53  ;;  %v3736_v58 = vunpack.c.l.b16 %v10895_v62 }
 0xb03   :  { %v10885_v17 = vpack.c.bf16 %v10867_v29, %v10871_v10 }
 0xb05   :  { %v3828_v3 = vunpack.c.l.bf16 %v10885_v17  ;;  %v3738_v59 = vunpack.c.l.b16 %v10885_v17 }
 0xb07   :  { %v3860_v34 = vmul.f32 %v3828_v3, %v3828_v3 }
 0xb08   :  { %v3675_v48 = vpop.f32.mrf.mxu1 }
 0xb09   :  { %v10863_v26 = vadd.f32 %v3675_v48, %v3626_v61  ;;  %v10924_v61 = vadd.f32 %v3657_v63, %v3608_v42  ;;  %v10928_v48 = vpack.c.bf16 %v10905_v5, %v10916_v21  ;;  %v3756_v42 = vpack.c.b16 %v3738_v59, %v3736_v58 }
 0xb0a   :  { %v3858_v63 = vmul.f32 %v3826_v52, %v3826_v52  ;;  %v10954_v52 = vadd.f32 %v10855_v33, %v10845_v4  ;;  %v10964_v58 = vadd.f32 %v10851_v2, %v10839_v27 }
 0xb0b   :  { %13188 = vst [vmem:[#allocation55_spill] sm:$0xff] %v10863_v26  ;;  %v10875_v14 = vpack.c.bf16 %v10863_v26, %v10865_v16  ;;  %v10948_v3 = vpack.c.bf16 %v10924_v61, %v10821_v6  ;;  %v3730_v59 = vunpack.c.l.b16 %v10928_v48 }
 0xb0d   :  { %v3830_v15 = vunpack.c.l.bf16 %v10875_v14  ;;  %v3740_v43 = vunpack.c.l.b16 %v10875_v14 }
 0xb0f   :  { %v3862_v60 = vmul.f32 %v3830_v15, %v3830_v15  ;;  %v10938_v15 = vpack.c.bf16 %v10861_v7, %v10824_v54 }
 0xb10   :  { %v3677_v1 = vpop.f32.mrf.mxu1 }
 0xb11   :  { %v10887_v40 = vadd.f32 %v3677_v1, %v3628_v55  ;;  %v3824_v55 = vunpack.c.l.bf16 %v10909_v51  ;;  %v10934_v1 = vadd.f32 %v10859_v49, %v10853_v19  ;;  %v3878_v19 = vpack.c.bf16 %v3860_v34, %v3858_v63 }
 0xb12   :  { %v3732_v49 = vunpack.c.l.b16 %v10920_v45  ;;  %v3728_v33 = vunpack.c.l.b16 %v10938_v15  ;;  %v10974_v63 = vadd.f32 %v10847_v57, %v10837_v9 }
 0xb13   :  { %13190 = vst [vmem:[#allocation58_spill] sm:$0xff] %v10887_v40  ;;  %v10899_v13 = vpack.c.bf16 %v10887_v40, %v10881_v20 }
 0xb14   :  { %v3752_v27 = vpack.c.b16 %v3730_v59, %v3728_v33  ;;  %v10998_v59 = vpack.c.bf16 %v10974_v63, %v10809_v22 }
 0xb15   :  { %v3742_v24 = vunpack.c.l.b16 %v10899_v13  ;;  %v3832_v39 = vunpack.c.l.bf16 %v10899_v13 }
 0xb17   :  { %v3758_v25 = vpack.c.b16 %v3742_v24, %v3740_v43  ;;  %v3864_v46 = vmul.f32 %v3832_v39, %v3832_v39  ;;  %v3734_v43 = vunpack.c.l.b16 %v10909_v51  ;;  %v3822_v24 = vunpack.c.l.bf16 %v10920_v45 }
 0xb18   :  { %v10944_v39 = vadd.f32 %v10857_v37, %v10849_v56 }
 0xb19   :  { %3776 = vmatpush.bf16.msrb.mxu2 %v3758_v25  ;;  %v3880_v53 = vpack.c.bf16 %v3864_v46, %v3862_v60  ;;  %v3856_v25 = vmul.f32 %v3824_v55, %v3824_v55  ;;  %v3820_v60 = vunpack.c.l.bf16 %v10928_v48  ;;  %v10958_v46 = vpack.c.bf16 %v10934_v1, %v10819_v23 }
 0xb1a   :  { %v3754_v56 = vpack.c.b16 %v3734_v43, %v3732_v49  ;;  %v3854_v37 = vmul.f32 %v3822_v24, %v3822_v24  ;;  %v10968_v34 = vpack.c.bf16 %v10944_v39, %v10816_v12  ;;  %v10978_v43 = vpack.c.bf16 %v10954_v52, %v10814_v35 }
 0xb1b   :  { %3882 = vmatpush.bf16.msrb.mxu3 %v3880_v53  ;;  %v3818_v53 = vunpack.c.l.bf16 %v10938_v15  ;;  %v3852_v55 = vmul.f32 %v3820_v60, %v3820_v60  ;;  %v3726_v24 = vunpack.c.l.b16 %v10948_v3  ;;  %v10984_v49 = vadd.f32 %v10843_v47, %v10834_v36 }
 0xb1c   :  { %v3876_v4 = vpack.c.bf16 %v3856_v25, %v3854_v37  ;;  %v10988_v25 = vpack.c.bf16 %v10964_v58, %v10811_v28  ;;  %v3724_v57 = vunpack.c.l.b16 %v10958_v46  ;;  %v10994_v37 = vadd.f32 %v10841_v11, %v10831_v38 }
 0xb1d   :  { %3777 = vmatpush.bf16.msrb.mxu2 %v3756_v42  ;;  %v3816_v42 = vunpack.c.l.bf16 %v10948_v3  ;;  %v3850_v2 = vmul.f32 %v3818_v53, %v3818_v53  ;;  %v3722_v53 = vunpack.c.l.b16 %v10968_v34  ;;  %v11004_v33 = vpack.c.bf16 %v10984_v49, %v10806_v32 }
 0xb1e   :  { %v3750_v36 = vpack.c.b16 %v3726_v24, %v3724_v57  ;;  %v3720_v38 = vunpack.c.l.b16 %v10978_v43 }
 0xb1f   :  { %3883 = vmatpush.bf16.msrb.mxu3 %v3878_v19  ;;  %v3814_v19 = vunpack.c.l.bf16 %v10958_v46  ;;  %v3874_v9 = vpack.c.bf16 %v3852_v55, %v3850_v2  ;;  %v3848_v60 = vmul.f32 %v3816_v42, %v3816_v42  ;;  %v3808_v42 = vunpack.c.l.bf16 %v10988_v25 }
 0xb20   :  { %v3748_v2 = vpack.c.b16 %v3722_v53, %v3720_v38  ;;  %v3714_v20 = vunpack.c.l.b16 %v11004_v33  ;;  %v3743_v53 = vunpack.c.h.b16 %v10899_v13 }
 0xb21   :  { %3778 = vmatpush.bf16.msrb.mxu2 %v3754_v56  ;;  %v3812_v56 = vunpack.c.l.bf16 %v10968_v34  ;;  %v3846_v47 = vmul.f32 %v3814_v19, %v3814_v19  ;;  %v3718_v19 = vunpack.c.l.b16 %v10988_v25 }
 0xb23   :  { %3884 = vmatpush.bf16.msrb.mxu3 %v3876_v4  ;;  %v3810_v4 = vunpack.c.l.bf16 %v10978_v43  ;;  %v3872_v55 = vpack.c.bf16 %v3848_v60, %v3846_v47  ;;  %v3844_v11 = vmul.f32 %v3812_v56, %v3812_v56  ;;  %v3716_v60 = vunpack.c.l.b16 %v10998_v59 }
 0xb24   :  { %v3804_v56 = vunpack.c.l.bf16 %v11004_v33 }
 0xb25   :  { %3779 = vmatpush.bf16.msrb.mxu2 %v3752_v27  ;;  %v11010_v27 = vpack.c.bf16 %v10994_v37, %v10804_v18  ;;  %v3842_v24 = vmul.f32 %v3810_v4, %v3810_v4  ;;  %v3746_v47 = vpack.c.b16 %v3718_v19, %v3716_v60  ;;  %v3739_v19 = vunpack.c.h.b16 %v10885_v17 }
 0xb27   :  { %3885 = vmatpush.bf16.msrb.mxu3 %v3874_v9  ;;  %v3806_v9 = vunpack.c.l.bf16 %v10998_v59  ;;  %v3870_v57 = vpack.c.bf16 %v3844_v11, %v3842_v24  ;;  %v3712_v38 = vunpack.c.l.b16 %v11010_v27  ;;  %v3741_v11 = vunpack.c.h.b16 %v10875_v14 }
 0xb29   :  { %3780 = vmatpush.bf16.msrb.mxu2 %v3750_v36  ;;  %v3840_v36 = vmul.f32 %v3808_v42, %v3808_v42  ;;  %v3838_v40 = vmul.f32 %v3806_v9, %v3806_v9  ;;  %v3744_v42 = vpack.c.b16 %v3714_v20, %v3712_v38  ;;  %v3759_v26 = vpack.c.b16 %v3743_v53, %v3741_v11 }
 0xb2a   :  { %v3725_v53 = vunpack.c.h.b16 %v10958_v46  ;;  %v3723_v38 = vunpack.c.h.b16 %v10968_v34 }
 0xb2b   :  { %3886 = vmatpush.bf16.msrb.mxu3 %v3872_v55  ;;  %v3802_v55 = vunpack.c.l.bf16 %v11010_v27  ;;  %v3868_v4 = vpack.c.bf16 %v3840_v36, %v3838_v40  ;;  %v3735_v40 = vunpack.c.h.b16 %v10909_v51  ;;  %v3733_v36 = vunpack.c.h.b16 %v10920_v45 }
 0xb2d   :  { %3781 = vmatpush.bf16.msrb.mxu2 %v3748_v2  ;;  %v3836_v2 = vmul.f32 %v3804_v56, %v3804_v56  ;;  %v3834_v24 = vmul.f32 %v3802_v55, %v3802_v55  ;;  %v3755_v20 = vpack.c.b16 %v3735_v40, %v3733_v36  ;;  %v3731_v56 = vunpack.c.h.b16 %v10928_v48 }
 0xb2e   :  { %v3727_v55 = vunpack.c.h.b16 %v10948_v3  ;;  %v3829_v36 = vunpack.c.h.bf16 %v10885_v17  ;;  %v3821_v17 = vunpack.c.h.bf16 %v10928_v48 }
 0xb2f   :  { %3887 = vmatpush.bf16.msrb.mxu3 %v3870_v57  ;;  %v3866_v9 = vpack.c.bf16 %v3836_v2, %v3834_v24  ;;  %v3737_v57 = vunpack.c.h.b16 %v10895_v62  ;;  %v3721_v2 = vunpack.c.h.b16 %v10978_v43  ;;  %v3833_v24 = vunpack.c.h.bf16 %v10899_v13 }
 0xb30   :  { %v3861_v13 = vmul.f32 %v3829_v36, %v3829_v36 }
 0xb31   :  { %3782 = vmatpush.bf16.msrb.mxu2 %v3746_v47  ;;  %v3757_v60 = vpack.c.b16 %v3739_v19, %v3737_v57  ;;  %v3729_v47 = vunpack.c.h.b16 %v10938_v15  ;;  %v3749_v11 = vpack.c.b16 %v3723_v38, %v3721_v2  ;;  %v3717_v19 = vunpack.c.h.b16 %v10998_v59 }
 0xb32   :  { %v3865_v40 = vmul.f32 %v3833_v24, %v3833_v24  ;;  %v3853_v24 = vmul.f32 %v3821_v17, %v3821_v17 }
 0xb33   :  { %3888 = vmatpush.bf16.msrb.mxu3 %v3868_v4  ;;  %v3751_v4 = vpack.c.b16 %v3727_v55, %v3725_v53  ;;  %v3825_v53 = vunpack.c.h.bf16 %v10909_v51 }
 0xb35   :  { %3783 = vmatpush.bf16.msrb.mxu2 %v3744_v42  ;;  %v3719_v42 = vunpack.c.h.b16 %v10988_v25  ;;  %v3857_v2 = vmul.f32 %v3825_v53, %v3825_v53 }
 0xb37   :  { %3889 = vmatpush.bf16.msrb.mxu3 %v3866_v9  ;;  %v3831_v9 = vunpack.c.h.bf16 %v10875_v14  ;;  %v3747_v57 = vpack.c.b16 %v3719_v42, %v3717_v19  ;;  %v3817_v19 = vunpack.c.h.bf16 %v10948_v3  ;;  %v3807_v3 = vunpack.c.h.bf16 %v10998_v59 }
 0xb38   :  { %3784 = vmatmul.bf16.vlgmr.msrb.gmra.mxu2 %v13180_v31 }
 0xb39   :  { %3789 = vmatpush.bf16.msra.mxu2 %v3759_v26  ;;  %v3753_v26 = vpack.c.b16 %v3731_v56, %v3729_v47  ;;  %v3863_v56 = vmul.f32 %v3831_v9, %v3831_v9  ;;  %v3827_v47 = vunpack.c.h.bf16 %v10895_v62  ;;  %v3819_v62 = vunpack.c.h.bf16 %v10938_v15 }
 0xb3a   :  { %3890 = vmatmul.bf16.vlgmr.msrb.gmra.mxu3 %v13180_v31  ;;  %v3815_v9 = vunpack.c.h.bf16 %v10958_v46  ;;  %v3809_v15 = vunpack.c.h.bf16 %v10988_v25  ;;  %v3805_v46 = vunpack.c.h.bf16 %v11004_v33 }
 0xb3b   :  { %v3881_v55 = vpack.c.bf16 %v3865_v40, %v3863_v56  ;;  %v3859_v14 = vmul.f32 %v3827_v47, %v3827_v47  ;;  %v3851_v51 = vmul.f32 %v3819_v62, %v3819_v62  ;;  %v3811_v40 = vunpack.c.h.bf16 %v10978_v43 }
 0xb3c   :  { %v3847_v48 = vmul.f32 %v3815_v9, %v3815_v9  ;;  %v3837_v53 = vmul.f32 %v3805_v46, %v3805_v46 }
 0xb3d   :  { %3790 = vmatpush.bf16.msra.mxu2 %v3757_v60  ;;  %v3715_v60 = vunpack.c.h.b16 %v11004_v33  ;;  %v3879_v38 = vpack.c.bf16 %v3861_v13, %v3859_v14  ;;  %v3843_v56 = vmul.f32 %v3811_v40, %v3811_v40 }
 0xb41   :  { %3791 = vmatpush.bf16.msra.mxu2 %v3755_v20  ;;  %v3713_v20 = vunpack.c.h.b16 %v11010_v27 }
 0xb45   :  { %3792 = vmatpush.bf16.msra.mxu2 %v3753_v26  ;;  %v3745_v26 = vpack.c.b16 %v3715_v60, %v3713_v20  ;;  %v3813_v60 = vunpack.c.h.bf16 %v10968_v34  ;;  %v3803_v34 = vunpack.c.h.bf16 %v11010_v27 }
 0xb47   :  { %v3845_v20 = vmul.f32 %v3813_v60, %v3813_v60  ;;  %v3835_v43 = vmul.f32 %v3803_v34, %v3803_v34 }
 0xb49   :  { %3793 = vmatpush.bf16.msra.mxu2 %v3751_v4  ;;  %v3823_v4 = vunpack.c.h.bf16 %v10920_v45  ;;  %v3849_v45 = vmul.f32 %v3817_v19, %v3817_v19  ;;  %v3871_v47 = vpack.c.bf16 %v3845_v20, %v3843_v56  ;;  %v3867_v14 = vpack.c.bf16 %v3837_v53, %v3835_v43 }
 0xb4b   :  { %v3873_v36 = vpack.c.bf16 %v3849_v45, %v3847_v48 }
 0xb4d   :  { %3794 = vmatpush.bf16.msra.mxu2 %v3749_v11  ;;  %v3855_v11 = vmul.f32 %v3823_v4, %v3823_v4 }
 0xb4f   :  { %v3877_v42 = vpack.c.bf16 %v3857_v2, %v3855_v11 }
 0xb51   :  { %3795 = vmatpush.bf16.msra.mxu2 %v3747_v57  ;;  %v3875_v57 = vpack.c.bf16 %v3853_v24, %v3851_v51 }
 0xb55   :  { %3796 = vmatpush.bf16.msra.mxu2 %v3745_v26  ;;  %v3841_v26 = vmul.f32 %v3809_v15, %v3809_v15 }
 0xb58   :  { %3797 = vmatmul.bf16.vlgmr.msra.gmra.mxu2 %v13180_v31 }
 0xb59   :  { %3895 = vmatpush.bf16.msrb.mxu2 %v3881_v55  ;;  %v3839_v55 = vmul.f32 %v3807_v3, %v3807_v3 }
 0xb5b   :  { %v3869_v13 = vpack.c.bf16 %v3841_v26, %v3839_v55 }
 0xb5d   :  { %3896 = vmatpush.bf16.msrb.mxu2 %v3879_v38 }
 0xb61   :  { %3897 = vmatpush.bf16.msrb.mxu2 %v3877_v42 }
 0xb65   :  { %3898 = vmatpush.bf16.msrb.mxu2 %v3875_v57 }
 0xb69   :  { %3899 = vmatpush.bf16.msrb.mxu2 %v3873_v36 }
 0xb6d   :  { %3900 = vmatpush.bf16.msrb.mxu2 %v3871_v47 }
 0xb71   :  { %3901 = vmatpush.bf16.msrb.mxu2 %v3869_v13 }
 0xb75   :  { %3902 = vmatpush.bf16.msrb.mxu2 %v3867_v14 }
 0xb78   :  { %3903 = vmatmul.bf16.vlgmr.msrb.gmra.mxu2 %v13180_v31 }
 0xbbb   :  { %v3785_v25 = vpop.f32.mrf.mxu2 }
 0xbbc   :  { %v3908_v4 = vmul.f32 0.0078125, %v3785_v25  ;;  %v2747_v25 = vld [vmem:[%s13191_s28] sm:$0x3] }
 0xbbd   :  { %v3891_v59 = vpop.f32.mrf.mxu3 }
 0xbbe   :  { %v3912_v38 = vmul.f32 %v3908_v4, %v3908_v4  ;;  %v3910_v17 = vmul.f32 0.0078125, %v3891_v59 }
 0xbc0   :  { %v3914_v11 = vsub.f32 %v3910_v17, %v3912_v38 }
 0xbc2   :  { %v3916_v24 = vmax.f32 %v3914_v11, 0.0 }
 0xbc3   :  { %v3787_v2 = vpop.f32.mrf.mxu2 }
 0xbc4   :  { %v3918_v27 = vadd.f32 1e-05, %v3916_v24  ;;  %v2748_v24 = vld [vmem:[%s12412_s12] sm:$0x3] }
 0xbc5   :  { %v3893_v33 = vpop.f32.mrf.mxu3 }
 0xbc6   :  { %7193 = vrsqrt.f32 %v3918_v27  ;;  %vm3926_vm15 = vweird.f32 %v3918_v27 }
 0xbcc   :  { %v7194_v60 = vpop.eup %7193 }
 0xbcd   :  { %v3921_v36 = vmul.f32 %v7194_v60, %v3918_v27  ;;  %vm3927_vm1 = vweird.f32 %v7194_v60 }
 0xbce   :  { %vm3928_vm4 = vmor %vm3926_vm15, %vm3927_vm1 }
 0xbcf   :  { %v3922_v15 = vmul.f32 %v7194_v60, %v3921_v36 }
 0xbd1   :  { %v3923_v47 = vmul.f32 0.5, %v3922_v15 }
 0xbd3   :  { %v3924_v55 = vsub.f32 1.5, %v3923_v47  ;;  %v13194_v47 = vld [vmem:[#allocation58_spill] sm:$0xff] }
 0xbd5   :  { %v3925_v53 = vmul.f32 %v7194_v60, %v3924_v55 }
 0xbd7   :  { %v3929_v38 = vsel %vm3928_vm4, %v7194_v60, %v3925_v53 }
 0xbdb   :  { %v3798_v62 = vpop.f32.mrf.mxu2 }
 0xbdc   :  { %v3909_v19 = vmul.f32 0.0078125, %v3798_v62 }
 0xbde   :  { %v3913_v9 = vmul.f32 %v3909_v19, %v3909_v19 }
 0xbe3   :  { %v3800_v42 = vpop.f32.mrf.mxu2 }
 0xbfb   :  { %v3904_v51 = vpop.f32.mrf.mxu2 }
 0xbfc   :  { %v3911_v57 = vmul.f32 0.0078125, %v3904_v51 }
 0xbfe   :  { %v3915_v45 = vsub.f32 %v3911_v57, %v3913_v9 }
 0xc00   :  { %v3917_v48 = vmax.f32 %v3915_v45, 0.0 }
 0xc02   :  { %v3919_v40 = vadd.f32 1e-05, %v3917_v48 }
 0xc03   :  { %v3906_v20 = vpop.f32.mrf.mxu2 }
 0xc04   :  { %7195 = vrsqrt.f32 %v3919_v40  ;;  %vm3936_vm3 = vweird.f32 %v3919_v40 }
 0xc0a   :  { %v7196_v56 = vpop.eup %7195 }
 0xc0b   :  { %v3931_v3 = vmul.f32 %v7196_v56, %v3919_v40  ;;  %vm3937_vm2 = vweird.f32 %v7196_v56 }
 0xc0c   :  { %vm3938_vm5 = vmor %vm3936_vm3, %vm3937_vm2 }
 0xc0d   :  { %v3932_v26 = vmul.f32 %v7196_v56, %v3931_v3  ;;  %v13193_v3 = vld [vmem:[#allocation56_spill] sm:$0xff] }
 0xc0f   :  { %v3933_v46 = vmul.f32 0.5, %v3932_v26 }
 0xc11   :  { %v3934_v34 = vsub.f32 1.5, %v3933_v46 }
 0xc13   :  { %v3935_v13 = vmul.f32 %v7196_v56, %v3934_v34 }
 0xc15   :  { %v3939_v43 = vsel %vm3938_vm5, %v7196_v56, %v3935_v13  ;;  %v13192_v56 = vld [vmem:[#allocation55_spill] sm:$0xff] }
 0xc16   :  { %v3942_v14 = vrot.slane %v3939_v43, 7 }
 0xc18   :  { %v3943_v59 = vsel %vm3190_vm13, %v3929_v38, %v3942_v14 }
 0xc19   :  { %v3945_v2 = vmul.f32 %v3943_v59, %v2747_v25 }
 0xc1b   :  { %v3947_v17 = vperm.slane %v3945_v2, 0  ;;  %v3948_v11 = vperm.slane %v3945_v2, 1 }
 0xc1d   :  { %v3951_v33 = vmul.f32 %v3947_v17, %v3908_v4  ;;  %v3952_v62 = vmul.f32 %v3948_v11, %v3909_v19  ;;  %v3959_v42 = vmul.f32 %v3947_v17, %v10804_v18  ;;  %v3960_v51 = vmul.f32 %v3948_v11, %v10994_v37 }
 0xc1e   :  { %v3961_v9 = vmul.f32 %v3947_v17, %v10806_v32  ;;  %v3962_v57 = vmul.f32 %v3948_v11, %v10984_v49  ;;  %v3963_v45 = vmul.f32 %v3947_v17, %v10809_v22  ;;  %v3964_v60 = vmul.f32 %v3948_v11, %v10974_v63 }
 0xc1f   :  { %v3955_v27 = vrot.slane %v3952_v62, 7  ;;  %v3965_v4 = vmul.f32 %v3947_v17, %v10811_v28  ;;  %v3966_v19 = vmul.f32 %v3948_v11, %v10964_v58  ;;  %v3967_v48 = vmul.f32 %v3947_v17, %v10814_v35 }
 0xc20   :  { %v3968_v40 = vmul.f32 %v3948_v11, %v10954_v52  ;;  %v3969_v37 = vmul.f32 %v3947_v17, %v10816_v12  ;;  %v3970_v32 = vmul.f32 %v3948_v11, %v10944_v39  ;;  %v3971_v49 = vmul.f32 %v3947_v17, %v10819_v23 }
 0xc21   :  { %v3956_v18 = vsel %vm3190_vm13, %v3951_v33, %v3955_v27  ;;  %v3972_v22 = vmul.f32 %v3948_v11, %v10934_v1  ;;  %v3973_v63 = vmul.f32 %v3947_v17, %v10821_v6  ;;  %v3974_v28 = vmul.f32 %v3948_v11, %v10924_v61 }
 0xc22   :  { %v3958_v36 = vsub.f32 %v2748_v24, %v3956_v18  ;;  %v3975_v58 = vmul.f32 %v3947_v17, %v10824_v54  ;;  %v3976_v20 = vmul.f32 %v3948_v11, %v10861_v7  ;;  %v3977_v35 = vmul.f32 %v3947_v17, %v10916_v21 }
 0xc23   :  { %v3978_v52 = vmul.f32 %v3948_v11, %v10905_v5  ;;  %v3979_v12 = vmul.f32 %v3947_v17, %v10903_v0  ;;  %v3980_v39 = vmul.f32 %v3948_v11, %v10891_v41  ;;  %v3981_v23 = vmul.f32 %v3947_v17, %v10889_v50 }
 0xc24   :  { %v3982_v1 = vmul.f32 %v3948_v11, %v10879_v8  ;;  %v3983_v6 = vmul.f32 %v3947_v17, %v10877_v44  ;;  %v3984_v61 = vmul.f32 %v3948_v11, %v10869_v30  ;;  %v3985_v54 = vmul.f32 %v3947_v17, %v10871_v10 }
 0xc25   :  { %v3986_v7 = vmul.f32 %v3948_v11, %v10867_v29  ;;  %v3992_v15 = vperm.slane %v3958_v36, 0  ;;  %v3993_v21 = vperm.slane %v3958_v36, 1  ;;  %v3987_v5 = vmul.f32 %v3947_v17, %v10865_v16 }
 0xc26   :  { %v3988_v0 = vmul.f32 %v3948_v11, %v13192_v56  ;;  %v3989_v41 = vmul.f32 %v3947_v17, %v13193_v3  ;;  %v3990_v50 = vmul.f32 %v3948_v11, %v13194_v47 }
 0xc27   :  { %v11095_v26 = vadd.f32 %v3992_v15, %v3959_v42  ;;  %v11097_v8 = vadd.f32 %v3993_v21, %v3960_v51  ;;  %v11099_v44 = vadd.f32 %v3992_v15, %v3961_v9  ;;  %v11101_v30 = vadd.f32 %v3993_v21, %v3962_v57 }
 0xc28   :  { %v11103_v10 = vadd.f32 %v3992_v15, %v3963_v45  ;;  %v11105_v29 = vadd.f32 %v3993_v21, %v3964_v60  ;;  %v11107_v46 = vadd.f32 %v3992_v15, %v3965_v4  ;;  %v11109_v16 = vadd.f32 %v3993_v21, %v3966_v19 }
 0xc29   :  { %v11111_v55 = vadd.f32 %v3992_v15, %v3967_v48  ;;  %v11113_v34 = vadd.f32 %v3993_v21, %v3968_v40  ;;  %v11115_v13 = vadd.f32 %v3992_v15, %v3969_v37  ;;  %v11117_v53 = vadd.f32 %v3993_v21, %v3970_v32 }
 0xc2a   :  { %v11119_v43 = vadd.f32 %v3992_v15, %v3971_v49  ;;  %v11121_v14 = vadd.f32 %v3993_v21, %v3972_v22  ;;  %v11123_v25 = vadd.f32 %v3992_v15, %v3973_v63  ;;  %v11125_v38 = vadd.f32 %v3993_v21, %v3974_v28 }
 0xc2b   :  { %v11127_v59 = vadd.f32 %v3992_v15, %v3975_v58  ;;  %v11129_v2 = vadd.f32 %v3993_v21, %v3976_v20  ;;  %v11131_v17 = vadd.f32 %v3992_v15, %v3977_v35  ;;  %v11133_v11 = vadd.f32 %v3993_v21, %v3978_v52 }
 0xc2c   :  { %v11135_v33 = vadd.f32 %v3992_v15, %v3979_v12  ;;  %v11137_v62 = vadd.f32 %v3993_v21, %v3980_v39  ;;  %v11139_v42 = vadd.f32 %v3992_v15, %v3981_v23  ;;  %v11141_v24 = vadd.f32 %v3993_v21, %v3982_v1 }
 0xc2d   :  { %v11143_v27 = vadd.f32 %v3992_v15, %v3983_v6  ;;  %v11145_v51 = vadd.f32 %v3993_v21, %v3984_v61  ;;  %v11147_v9 = vadd.f32 %v3992_v15, %v3985_v54  ;;  %v11149_v57 = vadd.f32 %v3993_v21, %v3986_v7 }
 0xc2e   :  { %v11151_v45 = vadd.f32 %v3992_v15, %v3987_v5  ;;  %v11153_v60 = vadd.f32 %v3993_v21, %v3988_v0  ;;  %v11155_v4 = vadd.f32 %v3992_v15, %v3989_v41  ;;  %v11157_v19 = vadd.f32 %v3993_v21, %v3990_v50 }
 0xc2f   :  { %v4028_v18 = vmax.f32 %v11095_v26, 0.0  ;;  %v12603_v48 = vmax.f32 %v11097_v8, 0.0  ;;  %v4030_v40 = vmax.f32 %v11099_v44, 0.0  ;;  %v12604_v37 = vmax.f32 %v11101_v30, 0.0 }
 0xc30   :  { %v12608_v36 = vmax.f32 %v11103_v10, 0.0  ;;  %v12605_v32 = vmax.f32 %v11105_v29, 0.0  ;;  %v12607_v49 = vmax.f32 %v11107_v46, 0.0  ;;  %v12606_v22 = vmax.f32 %v11109_v16, 0.0 }
 0xc31   :  { %v4036_v63 = vmax.f32 %v11111_v55, 0.0  ;;  %v4037_v28 = vmax.f32 %v11113_v34, 0.0  ;;  %v4038_v58 = vmax.f32 %v11115_v13, 0.0  ;;  %v12609_v20 = vmax.f32 %v11117_v53, 0.0 }
 0xc32   :  { %v12611_v35 = vmax.f32 %v11119_v43, 0.0  ;;  %v12610_v52 = vmax.f32 %v11121_v14, 0.0  ;;  %v12613_v12 = vmax.f32 %v11123_v25, 0.0  ;;  %v12612_v39 = vmax.f32 %v11125_v38, 0.0 }
 0xc33   :  { %v4044_v23 = vmax.f32 %v11127_v59, 0.0  ;;  %v12615_v1 = vmax.f32 %v11129_v2, 0.0  ;;  %v4046_v6 = vmax.f32 %v11131_v17, 0.0  ;;  %v12614_v61 = vmax.f32 %v11133_v11, 0.0 }
 0xc34   :  { %v12616_v54 = vmax.f32 %v11135_v33, 0.0  ;;  %v4050_v15 = vmax.f32 %v11139_v42, 0.0  ;;  %v4052_v5 = vmax.f32 %v11143_v27, 0.0  ;;  %v4053_v56 = vmax.f32 %v11145_v51, 0.0 }
 0xc35   :  { %v4055_v3 = vmax.f32 %v11149_v57, 0.0  ;;  %v4057_v47 = vmax.f32 %v11153_v60, 0.0  ;;  %v4058_v50 = vmax.f32 %v11155_v4, 0.0  ;;  %v4060_v21 = vpack.c.bf16 %v12603_v48, %v4028_v18 }
 0xc36   :  { %v4061_v0 = vpack.c.bf16 %v12604_v37, %v4030_v40  ;;  %v4062_v41 = vpack.c.bf16 %v12605_v32, %v12608_v36  ;;  %v4063_v7 = vpack.c.bf16 %v12606_v22, %v12607_v49  ;;  %v4064_v48 = vpack.c.bf16 %v4037_v28, %v4036_v63 }
 0xc37   :  { %v4065_v37 = vpack.c.bf16 %v12609_v20, %v4038_v58  ;;  %v4066_v32 = vpack.c.bf16 %v12610_v52, %v12611_v35  ;;  %v4067_v22 = vpack.c.bf16 %v12612_v39, %v12613_v12  ;;  %v4068_v49 = vpack.c.bf16 %v12615_v1, %v4044_v23  ;;  %4104 = vst [vmem:[%s12419_s20] sm:$0xff] %v4060_v21 }
 0xc38   :  { %v4069_v36 = vpack.c.bf16 %v12614_v61, %v4046_v6  ;;  %v13195_v20 = vmax.f32 %v11137_v62, 0.0  ;;  %v13196_v35 = vmax.f32 %v11141_v24, 0.0  ;;  %v4072_v12 = vpack.c.bf16 %v4053_v56, %v4052_v5  ;;  %4106 = vst [vmem:[%s12419_s20 + $0x8] sm:$0xff] %v4061_v0 }
 0xc39   :  { %v13197_v61 = vmax.f32 %v11147_v9, 0.0  ;;  %4108 = vst [vmem:[%s12419_s20 + $0x10] sm:$0xff] %v4062_v41 }
 0xc3a   :  { %v4070_v52 = vpack.c.bf16 %v13195_v20, %v12616_v54  ;;  %v4071_v39 = vpack.c.bf16 %v13196_v35, %v4050_v15  ;;  %v13198_v20 = vmax.f32 %v11151_v45, 0.0  ;;  %v13199_v35 = vmax.f32 %v11157_v19, 0.0  ;;  %4110 = vst [vmem:[%s12419_s20 + $0x18] sm:$0xff] %v4063_v7 }
 0xc3b   :  { %v4073_v1 = vpack.c.bf16 %v4055_v3, %v13197_v61  ;;  %4112 = vst [vmem:[%s12419_s20 + $0x20] sm:$0xff] %v4064_v48 }
 0xc3c   :  { %v4074_v54 = vpack.c.bf16 %v4057_v47, %v13198_v20  ;;  %v4075_v21 = vpack.c.bf16 %v13199_v35, %v4058_v50  ;;  %4114 = vst [vmem:[%s12419_s20 + $0x28] sm:$0xff] %v4065_v37 }
 0xc3d   :  { %4116 = vst [vmem:[%s12419_s20 + $0x30] sm:$0xff] %v4066_v32 }
 0xc3e   :  { %4118 = vst [vmem:[%s12419_s20 + $0x38] sm:$0xff] %v4067_v22 }
 0xc3f   :  { %4120 = vst [vmem:[%s12419_s20 + $0x40] sm:$0xff] %v4068_v49 }
 0xc40   :  { %4122 = vst [vmem:[%s12419_s20 + $0x48] sm:$0xff] %v4069_v36 }
 0xc41   :  { %4124 = vst [vmem:[%s12419_s20 + $0x50] sm:$0xff] %v4070_v52 }
 0xc42   :  { %4126 = vst [vmem:[%s12419_s20 + $0x58] sm:$0xff] %v4071_v39 }
 0xc43   :  { %4128 = vst [vmem:[%s12419_s20 + $0x60] sm:$0xff] %v4072_v12 }
 0xc44   :  { %4130 = vst [vmem:[%s12419_s20 + $0x68] sm:$0xff] %v4073_v1 }
 0xc45   :  { %4132 = vst [vmem:[%s12419_s20 + $0x70] sm:$0xff] %v4074_v54 }
 0xc46   :  { %4134 = vst [vmem:[%s12419_s20 + $0x78] sm:$0xff] %v4075_v21 }
 0xc47   :  { %4140 = vsyncadd [#allocation4 + $0x1], 2048  ;;  %v6377_v48 = vld [vmem:[%s12413_s13 + $0xa8] sm:$0xf]  ;;  %v6895_v37 = vld [vmem:[%s12413_s13 + $0xb0] sm:$0xf0]  ;;  %v4185_v55 = vmax.f32 %v4044_v23, %v4052_v5 }
 0xc48   :  { %v6378_v36 = vor.u32 %v6895_v37, %v6377_v48  ;;  %v6473_v32 = vld [vmem:[%s12413_s13 + $0x168] sm:$0xf]  ;;  %v6919_v49 = vld [vmem:[%s12413_s13 + $0x170] sm:$0xf0]  ;;  %v6365_v22 = vld [vmem:[%s12413_s13 + $0x90] sm:$0xf] }
 0xc49   :  { %v6474_v52 = vor.u32 %v6919_v49, %v6473_v32  ;;  %v6892_v12 = vld [vmem:[%s12413_s13 + $0x98] sm:$0xf0]  ;;  %v6461_v39 = vld [vmem:[%s12413_s13 + $0x150] sm:$0xf]  ;;  %v6353_v7 = vld [vmem:[%s12413_s13 + $0x78] sm:$0xf] }
 0xc4a   :  { %v6916_v1 = vld [vmem:[%s12413_s13 + $0x158] sm:$0xf0]  ;;  %4645 = vmatpush.bf16.msra.mxu3 %v6378_v36  ;;  %v6366_v61 = vor.u32 %v6892_v12, %v6365_v22  ;;  %v6889_v0 = vld [vmem:[%s12413_s13 + $0x80] sm:$0xf0]  ;;  %v6449_v41 = vld [vmem:[%s12413_s13 + $0x138] sm:$0xf] }
 0xc4b   :  { %4664 = vmatpush.bf16.msra.mxu0 %v6474_v52  ;;  %v6462_v54 = vor.u32 %v6916_v1, %v6461_v39  ;;  %v6913_v20 = vld [vmem:[%s12413_s13 + $0x140] sm:$0xf0]  ;;  %v6354_v35 = vor.u32 %v6889_v0, %v6353_v7  ;;  %v6341_v48 = vld [vmem:[%s12413_s13 + $0x60] sm:$0xf]  ;;  %v6886_v37 = vld [vmem:[%s12413_s13 + $0x68] sm:$0xf0] }
 0xc4c   :  { %v6450_v21 = vor.u32 %v6913_v20, %v6449_v41  ;;  %v6437_v36 = vld [vmem:[%s12413_s13 + $0x120] sm:$0xf]  ;;  %v6910_v32 = vld [vmem:[%s12413_s13 + $0x128] sm:$0xf0]  ;;  %v6379_v22 = vld [vmem:[%s12413_s13 + $0xb4] sm:$0xf0]  ;;  %v6342_v52 = vor.u32 %v6886_v37, %v6341_v48 }
 0xc4d   :  { %v6894_v49 = vld [vmem:[%s12413_s13 + $0xac] sm:$0xf]  ;;  %v6891_v39 = vld [vmem:[%s12413_s13 + $0x94] sm:$0xf]  ;;  %v6438_v1 = vor.u32 %v6910_v32, %v6437_v36  ;;  %v6367_v7 = vld [vmem:[%s12413_s13 + $0x9c] sm:$0xf0] }
 0xc4e   :  { %4646 = vmatpush.bf16.msra.mxu3 %v6366_v61  ;;  %v6382_v12 = vor.u32 %v6894_v49, %v6379_v22  ;;  %v6329_v61 = vld [vmem:[%s12413_s13 + $0x48] sm:$0xf]  ;;  %v6907_v41 = vld [vmem:[%s12413_s13 + $0x110] sm:$0xf0]  ;;  %v6370_v20 = vor.u32 %v6891_v39, %v6367_v7  ;;  %v6481_v48 = vld [vmem:[%s12413_s13 + $0x170] sm:$0xf] }
 0xc4f   :  { %4665 = vmatpush.bf16.msra.mxu0 %v6462_v54  ;;  %v6883_v54 = vld [vmem:[%s12413_s13 + $0x50] sm:$0xf0]  ;;  %v6425_v0 = vld [vmem:[%s12413_s13 + $0x108] sm:$0xf]  ;;  %v6920_v37 = vld [vmem:[%s12413_s13 + $0x178] sm:$0xf0] }
 0xc50   :  { %4683 = vmatpush.bf16.msra.mxu2 %v6382_v12  ;;  %v6330_v36 = vor.u32 %v6883_v54, %v6329_v61  ;;  %v6482_v32 = vor.u32 %v6920_v37, %v6481_v48  ;;  %v6426_v49 = vor.u32 %v6907_v41, %v6425_v0  ;;  %v6317_v22 = vld [vmem:[%s12413_s13 + $0x30] sm:$0xf]  ;;  %v6880_v12 = vld [vmem:[%s12413_s13 + $0x38] sm:$0xf0]  ;;  %v6917_v54 = vld [vmem:[%s12413_s13 + $0x160] sm:$0xf0] }
 0xc51   :  { %v6413_v39 = vld [vmem:[%s12413_s13 + $0xf0] sm:$0xf]  ;;  %v6885_v7 = vld [vmem:[%s12413_s13 + $0x64] sm:$0xf]  ;;  %v6305_v48 = vld [vmem:[%s12413_s13 + $0x18] sm:$0xf] }
 0xc52   :  { %4647 = vmatpush.bf16.msra.mxu3 %v6354_v35  ;;  %v6888_v35 = vld [vmem:[%s12413_s13 + $0x7c] sm:$0xf]  ;;  %4740 = vmatpush.bf16.msra.mxu1 %v6482_v32  ;;  %v6343_v0 = vld [vmem:[%s12413_s13 + $0x6c] sm:$0xf0]  ;;  %v6877_v37 = vld [vmem:[%s12413_s13 + $0x20] sm:$0xf0] }
 0xc53   :  { %4666 = vmatpush.bf16.msra.mxu0 %v6450_v21  ;;  %v6355_v21 = vld [vmem:[%s12413_s13 + $0x84] sm:$0xf0]  ;;  %v6914_v32 = vld [vmem:[%s12413_s13 + $0x148] sm:$0xf0]  ;;  %v13200_v26 = vmax.f32 %v11147_v9, 0.0  ;;  %v6306_v17 = vor.u32 %v6877_v37, %v6305_v48  ;;  %v13203_v27 = vmax.f32 %v11101_v30, 0.0 }
 0xc54   :  { %4684 = vmatpush.bf16.msra.mxu2 %v6370_v20  ;;  %v6358_v61 = vor.u32 %v6888_v35, %v6355_v21  ;;  %v6318_v20 = vor.u32 %v6880_v12, %v6317_v22  ;;  %v6457_v35 = vld [vmem:[%s12413_s13 + $0x140] sm:$0xf]  ;;  %v4157_v22 = vmax.f32 %v4028_v18, %v4036_v63  ;;  %v6346_v12 = vor.u32 %v6885_v7, %v6343_v0  ;;  %v6331_v44 = vld [vmem:[%s12413_s13 + $0x54] sm:$0xf0]  ;;  %v6445_v13 = vld [vmem:[%s12413_s13 + $0x128] sm:$0xf] }
 0xc55   :  { %v4187_v18 = vmax.f32 %v4046_v6, %v13200_v26  ;;  %v13201_v63 = vmax.f32 %v11097_v8, 0.0  ;;  %v6911_v59 = vld [vmem:[%s12413_s13 + $0x130] sm:$0xf0]  ;;  %v6293_v34 = vld [vmem:[%s12413_s13] sm:$0xf]  ;;  %v13202_v8 = vmax.f32 %v11117_v53, 0.0 }
 0xc56   :  { %4648 = vmatpush.bf16.msra.mxu3 %v6342_v52  ;;  %v6904_v52 = vld [vmem:[%s12413_s13 + $0xf8] sm:$0xf0]  ;;  %v6874_v5 = vld [vmem:[%s12413_s13 + $0x8] sm:$0xf0]  ;;  %v6389_v30 = vld [vmem:[%s12413_s13 + $0xc0] sm:$0xf] }
 0xc57   :  { %4667 = vmatpush.bf16.msra.mxu0 %v6438_v1  ;;  %v6469_v1 = vld [vmem:[%s12413_s13 + $0x158] sm:$0xf]  ;;  %v6414_v21 = vor.u32 %v6904_v52, %v6413_v39  ;;  %v6882_v39 = vld [vmem:[%s12413_s13 + $0x4c] sm:$0xf]  ;;  %v6458_v52 = vor.u32 %v6914_v32, %v6457_v35  ;;  %v4160_v9 = vmax.f32 %v13203_v27, %v13202_v8  ;;  %v6385_v51 = vld [vmem:[%s12413_s13 + $0xb0] sm:$0xf] }
 0xc58   :  { %v6470_v41 = vor.u32 %v6917_v54, %v6469_v1  ;;  %4685 = vmatpush.bf16.msra.mxu2 %v6358_v61  ;;  %v4159_v1 = vmax.f32 %v4030_v40, %v4038_v58  ;;  %v4158_v61 = vmax.f32 %v13201_v63, %v4037_v28  ;;  %v13204_v40 = vmax.f32 %v11129_v2, 0.0  ;;  %v6898_v53 = vld [vmem:[%s12413_s13 + $0xc8] sm:$0xf0]  ;;  %v6896_v7 = vld [vmem:[%s12413_s13 + $0xb8] sm:$0xf0] }
 0xc59   :  { %v13205_v58 = vmax.f32 %v11133_v11, 0.0  ;;  %v6918_v2 = vld [vmem:[%s12413_s13 + $0x16c] sm:$0xf]  ;;  %v6475_v11 = vld [vmem:[%s12413_s13 + $0x174] sm:$0xf0]  ;;  %v6334_v57 = vor.u32 %v6882_v39, %v6331_v44  ;;  %v6390_v32 = vor.u32 %v6898_v53, %v6389_v30  ;;  %v13217_v42 = vmax.f32 %v11157_v19, 0.0 }
 0xc5a   :  { %4649 = vmatpush.bf16.msra.mxu3 %v6330_v36  ;;  %v6401_v36 = vld [vmem:[%s12413_s13 + $0xd8] sm:$0xf]  ;;  %4741 = vmatpush.bf16.msra.mxu1 %v6470_v41  ;;  %v4186_v28 = vmax.f32 %v13204_v40, %v4053_v56  ;;  %v6446_v56 = vor.u32 %v6911_v59, %v6445_v13  ;;  %v4215_v54 = vmax.f32 %v4159_v1, %v4187_v18  ;;  %v6879_v0 = vld [vmem:[%s12413_s13 + $0x34] sm:$0xf]  ;;  %v6319_v41 = vld [vmem:[%s12413_s13 + $0x3c] sm:$0xf0] }
 0xc5b   :  { %4668 = vmatpush.bf16.msra.mxu0 %v6426_v49  ;;  %v6901_v49 = vld [vmem:[%s12413_s13 + $0xe0] sm:$0xf0]  ;;  %v4188_v23 = vmax.f32 %v13205_v58, %v4055_v3  ;;  %v4213_v3 = vmax.f32 %v4157_v22, %v4185_v55  ;;  %v6433_v48 = vld [vmem:[%s12413_s13 + $0x110] sm:$0xf]  ;;  %v6908_v37 = vld [vmem:[%s12413_s13 + $0x118] sm:$0xf0] }
 0xc5c   :  { %v6402_v6 = vor.u32 %v6901_v49, %v6401_v36  ;;  %4686 = vmatpush.bf16.msra.mxu2 %v6346_v12  ;;  %v4214_v35 = vmax.f32 %v4158_v61, %v4186_v28  ;;  %v6478_v36 = vor.u32 %v6918_v2, %v6475_v11  ;;  %v6386_v49 = vor.u32 %v6896_v7, %v6385_v51  ;;  %v6915_v22 = vld [vmem:[%s12413_s13 + $0x154] sm:$0xf]  ;;  %v6463_v12 = vld [vmem:[%s12413_s13 + $0x15c] sm:$0xf0]  ;;  %v6373_v39 = vld [vmem:[%s12413_s13 + $0x98] sm:$0xf] }
 0xc5d   :  { %v11518_v1 = vpack.c.bf16 %v4215_v54, %v4213_v3  ;;  %v6893_v55 = vld [vmem:[%s12413_s13 + $0xa0] sm:$0xf0]  ;;  %v6876_v26 = vld [vmem:[%s12413_s13 + $0x1c] sm:$0xf]  ;;  %v6307_v18 = vld [vmem:[%s12413_s13 + $0x24] sm:$0xf0]  ;;  %v6434_v63 = vor.u32 %v6908_v37, %v6433_v48  ;;  %v6466_v59 = vor.u32 %v6915_v22, %v6463_v12 }
 0xc5e   :  { %4650 = vmatpush.bf16.msra.mxu3 %v6318_v20  ;;  %4742 = vmatpush.bf16.msra.mxu1 %v6458_v52  ;;  %v6294_v20 = vor.u32 %v6874_v5, %v6293_v34  ;;  %v6322_v52 = vor.u32 %v6879_v0, %v6319_v41  ;;  %v6421_v44 = vld [vmem:[%s12413_s13 + $0xf8] sm:$0xf]  ;;  %v6905_v13 = vld [vmem:[%s12413_s13 + $0x100] sm:$0xf0]  ;;  %v6912_v34 = vld [vmem:[%s12413_s13 + $0x13c] sm:$0xf] }
 0xc5f   :  { %4669 = vmatpush.bf16.msra.mxu0 %v6414_v21  ;;  %v4216_v21 = vmax.f32 %v4160_v9, %v4188_v23  ;;  %v6451_v8 = vld [vmem:[%s12413_s13 + $0x144] sm:$0xf0]  ;;  %v6361_v27 = vld [vmem:[%s12413_s13 + $0x80] sm:$0xf]  ;;  %v6310_v9 = vor.u32 %v6876_v26, %v6307_v18  ;;  %v6890_v40 = vld [vmem:[%s12413_s13 + $0x88] sm:$0xf0]  ;;  %v6422_v23 = vor.u32 %v6905_v13, %v6421_v44 }
 0xc60   :  { %4687 = vmatpush.bf16.msra.mxu2 %v6334_v57  ;;  %v6873_v28 = vld [vmem:[%s12413_s13 + $0x4] sm:$0xf]  ;;  %v6295_v58 = vld [vmem:[%s12413_s13 + $0xc] sm:$0xf0]  ;;  %v6902_v5 = vld [vmem:[%s12413_s13 + $0xe8] sm:$0xf0]  ;;  %v6454_v30 = vor.u32 %v6912_v34, %v6451_v8  ;;  %v6362_v53 = vor.u32 %v6890_v40, %v6361_v27 }
 0xc61   :  { %v11529_v61 = vpack.c.bf16 %v4216_v21, %v4214_v35  ;;  %v6909_v2 = vld [vmem:[%s12413_s13 + $0x124] sm:$0xf]  ;;  %v6439_v11 = vld [vmem:[%s12413_s13 + $0x12c] sm:$0xf0]  ;;  %v13206_v51 = vmax.f32 %v11119_v43, 0.0  ;;  %v13207_v57 = vmax.f32 %v11103_v10, 0.0  ;;  %v6298_v3 = vor.u32 %v6873_v28, %v6295_v58 }
 0xc62   :  { %4651 = vmatpush.bf16.msra.mxu3 %v6306_v17  ;;  %4743 = vmatpush.bf16.msra.mxu1 %v6446_v56  ;;  %v6374_v17 = vor.u32 %v6893_v55, %v6373_v39  ;;  %v6349_v54 = vld [vmem:[%s12413_s13 + $0x68] sm:$0xf]  ;;  %v6887_v7 = vld [vmem:[%s12413_s13 + $0x70] sm:$0xf0]  ;;  %v13208_v0 = vmax.f32 %v11123_v25, 0.0  ;;  %v13209_v41 = vmax.f32 %v11107_v46, 0.0  ;;  %v4191_v21 = vmax.f32 %v4050_v15, %v4058_v50 }
 0xc63   :  { %4670 = vmatpush.bf16.msra.mxu0 %v6402_v6  ;;  %v6409_v6 = vld [vmem:[%s12413_s13 + $0xe0] sm:$0xf]  ;;  %v4161_v56 = vmax.f32 %v13207_v57, %v13206_v51  ;;  %v13210_v43 = vmax.f32 %v11151_v45, 0.0  ;;  %v13211_v10 = vmax.f32 %v11135_v33, 0.0  ;;  %v13212_v37 = vmax.f32 %v11121_v14, 0.0 }
 0xc64   :  { %4688 = vmatpush.bf16.msra.mxu2 %v6322_v52  ;;  %v6410_v48 = vor.u32 %v6902_v5, %v6409_v6  ;;  %v13214_v46 = vmax.f32 %v11125_v38, 0.0  ;;  %v13216_v33 = vmax.f32 %v11137_v62, 0.0  ;;  %v13218_v15 = vmax.f32 %v11141_v24, 0.0  ;;  %v6899_v14 = vld [vmem:[%s12413_s13 + $0xd0] sm:$0xf0] }
 0xc65   :  { %v4189_v35 = vmax.f32 %v13211_v10, %v13210_v43  ;;  %v6350_v38 = vor.u32 %v6887_v7, %v6349_v54  ;;  %v6906_v62 = vld [vmem:[%s12413_s13 + $0x10c] sm:$0xf]  ;;  %v6427_v24 = vld [vmem:[%s12413_s13 + $0x114] sm:$0xf0]  ;;  %v6903_v26 = vld [vmem:[%s12413_s13 + $0xf4] sm:$0xf] }
 0xc66   :  { %4652 = vmatpush.bf16.msra.mxu3 %v6294_v20  ;;  %4744 = vmatpush.bf16.msra.mxu1 %v6434_v63  ;;  %v4163_v20 = vmax.f32 %v13209_v41, %v13208_v0  ;;  %v4190_v4 = vmax.f32 %v13216_v33, %v4057_v47  ;;  %v4192_v50 = vmax.f32 %v13218_v15, %v13217_v42  ;;  %v6337_v47 = vld [vmem:[%s12413_s13 + $0x50] sm:$0xf]  ;;  %v6415_v18 = vld [vmem:[%s12413_s13 + $0xfc] sm:$0xf0]  ;;  %v6325_v44 = vld [vmem:[%s12413_s13 + $0x38] sm:$0xf] }
 0xc67   :  { %4671 = vmatpush.bf16.msra.mxu0 %v6390_v32  ;;  %v13213_v32 = vmax.f32 %v11105_v29, 0.0  ;;  %v6397_v29 = vld [vmem:[%s12413_s13 + $0xc8] sm:$0xf]  ;;  %v4217_v60 = vmax.f32 %v4161_v56, %v4189_v35  ;;  %v6430_v52 = vor.u32 %v6906_v62, %v6427_v24  ;;  %v6881_v13 = vld [vmem:[%s12413_s13 + $0x40] sm:$0xf0]  ;;  %vm4799_vm6 = vcmask 261120  }
 0xc68   :  { %4689 = vmatpush.bf16.msra.mxu2 %v6310_v9  ;;  %v4219_v19 = vmax.f32 %v4163_v20, %v4191_v21  ;;  %v6398_v22 = vor.u32 %v6899_v14, %v6397_v29  ;;  %v6326_v34 = vor.u32 %v6881_v13, %v6325_v44  ;;  %v6900_v8 = vld [vmem:[%s12413_s13 + $0xdc] sm:$0xf]  ;;  %v6403_v27 = vld [vmem:[%s12413_s13 + $0xe4] sm:$0xf0]  ;;  %v6313_v9 = vld [vmem:[%s12413_s13 + $0x20] sm:$0xf] }
 0xc69   :  { %4653 = vmatmul.bf16.vlgmr.msra.gmra.mxu3 %v11518_v1  ;;  %v4162_v25 = vmax.f32 %v13213_v32, %v13212_v37  ;;  %v6878_v40 = vld [vmem:[%s12413_s13 + $0x28] sm:$0xf0]  ;;  %v6406_v28 = vor.u32 %v6900_v8, %v6403_v27  ;;  %v6391_v6 = vld [vmem:[%s12413_s13 + $0xcc] sm:$0xf0]  ;;  %v6301_v5 = vld [vmem:[%s12413_s13 + $0x8] sm:$0xf] }
 0xc6a   :  { %4702 = vmatpush.bf16.msrb.mxu3 %v6478_v36  ;;  %4672 = vmatmul.bf16.vlgmr.msra.gmra.mxu0 %v11529_v61  ;;  %v13215_v36 = vmax.f32 %v11109_v16, 0.0  ;;  %v6442_v16 = vor.u32 %v6909_v2, %v6439_v11  ;;  %v4223_v63 = vpack.c.bf16 %v4219_v19, %v4217_v60  ;;  %v6314_v58 = vor.u32 %v6878_v40, %v6313_v9 }
 0xc6b   :  { %4721 = vmatpush.bf16.msrb.mxu0 %v6386_v49  ;;  %4745 = vmatpush.bf16.msra.mxu1 %v6422_v23  ;;  %v6884_v49 = vld [vmem:[%s12413_s13 + $0x58] sm:$0xf0]  ;;  %v4218_v12 = vmax.f32 %v4162_v25, %v4190_v4  ;;  %v6897_v23 = vld [vmem:[%s12413_s13 + $0xc4] sm:$0xf] }
 0xc6c   :  { %v4164_v45 = vmax.f32 %v13215_v36, %v13214_v46  ;;  %4690 = vmatpush.bf16.msra.mxu2 %v6298_v3  ;;  %v6338_v55 = vor.u32 %v6884_v49, %v6337_v47 }
 0xc6e   :  { %4703 = vmatpush.bf16.msrb.mxu3 %v6466_v59  ;;  %v4220_v39 = vmax.f32 %v4164_v45, %v4192_v50 }
 0xc6f   :  { %4722 = vmatpush.bf16.msrb.mxu0 %v6374_v17  ;;  %4746 = vmatpush.bf16.msra.mxu1 %v6410_v48  ;;  %v6418_v17 = vor.u32 %v6903_v26, %v6415_v18 }
 0xc70   :  { %4691 = vmatmul.bf16.vlgmr.msra.gmra.mxu2 %v11518_v1  ;;  %v4224_v59 = vpack.c.bf16 %v4220_v39, %v4218_v12 }
 0xc72   :  { %4704 = vmatpush.bf16.msrb.mxu3 %v6454_v30  ;;  %v6875_v30 = vld [vmem:[%s12413_s13 + $0x10] sm:$0xf0] }
 0xc73   :  { %4723 = vmatpush.bf16.msrb.mxu0 %v6362_v53  ;;  %4747 = vmatpush.bf16.msra.mxu1 %v6398_v22  ;;  %v6394_v53 = vor.u32 %v6897_v23, %v6391_v6  ;;  %v6302_v2 = vor.u32 %v6875_v30, %v6301_v5 }
 0xc76   :  { %4705 = vmatpush.bf16.msrb.mxu3 %v6442_v16  ;;  %4748 = vmatmul.bf16.vlgmr.msra.gmra.mxu1 %v11529_v61 }
 0xc77   :  { %4724 = vmatpush.bf16.msrb.mxu0 %v6350_v38 }
 0xc79   :  { %4658 = vmatmul.bf16.gmra.mxu3 %v4223_v63 }
 0xc7a   :  { %4706 = vmatpush.bf16.msrb.mxu3 %v6430_v52  ;;  %4677 = vmatmul.bf16.gmra.mxu0 %v4224_v59 }
 0xc7b   :  { %4725 = vmatpush.bf16.msrb.mxu0 %v6338_v55 }
 0xc7e   :  { %4707 = vmatpush.bf16.msrb.mxu3 %v6418_v17 }
 0xc7f   :  { %4726 = vmatpush.bf16.msrb.mxu0 %v6326_v34 }
 0xc80   :  { %4696 = vmatmul.bf16.gmra.mxu2 %v4223_v63 }
 0xc82   :  { %4708 = vmatpush.bf16.msrb.mxu3 %v6406_v28 }
 0xc83   :  { %4727 = vmatpush.bf16.msrb.mxu0 %v6314_v58 }
 0xc86   :  { %4709 = vmatpush.bf16.msrb.mxu3 %v6394_v53  ;;  %4753 = vmatmul.bf16.gmra.mxu1 %v4224_v59 }
 0xc87   :  { %4728 = vmatpush.bf16.msrb.mxu0 %v6302_v2 }
 0xc89   :  { %4710 = vmatmul.bf16.vlgmr.msrb.gmra.mxu3 %v11529_v61 }
 0xc8a   :  { %4729 = vmatmul.bf16.vlgmr.msrb.gmra.mxu0 %v11518_v1 }
 0xc99   :  { %4715 = vmatmul.bf16.gmra.mxu3 %v4224_v59 }
 0xc9a   :  { %4734 = vmatmul.bf16.gmra.mxu0 %v4223_v63 }
 0xce7   :  { %v4673_v11 = vpop.f32.mrf.mxu0 }
 0xcec   :  { %v4654_v51 = vpop.f32.mrf.mxu3 }
 0xced   :  { %v11685_v60 = vadd.f32 %v4673_v11, %v4654_v51 }
 0xcef   :  { %v4675_v57 = vpop.f32.mrf.mxu0 }
 0xcf3   :  { %v4749_v0 = vpop.f32.mrf.mxu1  ;;  %v4692_v20 = vpop.f32.mrf.mxu2 }
 0xcf4   :  { %v4656_v56 = vpop.f32.mrf.mxu3 }
 0xcf5   :  { %v11687_v19 = vadd.f32 %v4675_v57, %v4656_v56 }
 0xcf7   :  { %v4678_v3 = vpop.f32.mrf.mxu0 }
 0xcfb   :  { %v4751_v10 = vpop.f32.mrf.mxu1  ;;  %v4694_v48 = vpop.f32.mrf.mxu2 }
 0xcfc   :  { %v4659_v54 = vpop.f32.mrf.mxu3 }
 0xcfd   :  { %v11679_v16 = vadd.f32 %v4678_v3, %v4659_v54 }
 0xcff   :  { %v4680_v7 = vpop.f32.mrf.mxu0 }
 0xd03   :  { %v4754_v61 = vpop.f32.mrf.mxu1  ;;  %v4697_v32 = vpop.f32.mrf.mxu2 }
 0xd04   :  { %v4661_v41 = vpop.f32.mrf.mxu3 }
 0xd05   :  { %v11695_v18 = vadd.f32 %v4680_v7, %v4661_v41 }
 0xd07   :  { %v4730_v43 = vpop.f32.mrf.mxu0 }
 0xd08   :  { %v11667_v36 = vadd.f32 %v4749_v0, %v4730_v43 }
 0xd0a   :  { %v4760_v14 = vpack.c.bf16 %v11667_v36, %v11667_v36 }
 0xd0b   :  { %v4756_v45 = vpop.f32.mrf.mxu1  ;;  %v4699_v12 = vpop.f32.mrf.mxu2 }
 0xd0c   :  { %v4711_v35 = vpop.f32.mrf.mxu3  ;;  %v4777_v63 = vunpack.c.l.b16 %v4760_v14  ;;  %v4844_v44 = vunpack.c.l.bf16 %v4760_v14 }
 0xd0d   :  { %v11689_v47 = vadd.f32 %v4711_v35, %v4692_v20 }
 0xd0e   :  { %v4856_v2 = vmul.f32 %v4844_v44, %v4844_v44  ;;  %v6943_v44 = vld [vmem:[%s12416_s16 + $0xb0] sm:$0xf0] }
 0xd0f   :  { %v4732_v21 = vpop.f32.mrf.mxu0  ;;  %v4759_v40 = vpack.c.bf16 %v11689_v47, %v11685_v60 }
 0xd10   :  { %v11669_v33 = vadd.f32 %v4751_v10, %v4732_v21 }
 0xd11   :  { %v4775_v43 = vunpack.c.l.b16 %v4759_v40  ;;  %v4776_v21 = vunpack.c.h.b16 %v4759_v40 }
 0xd12   :  { %v4762_v38 = vpack.c.bf16 %v11669_v33, %v11669_v33 }
 0xd14   :  { %v4713_v37 = vpop.f32.mrf.mxu3  ;;  %v4780_v59 = vunpack.c.l.b16 %v4762_v38  ;;  %v4847_v17 = vunpack.c.l.bf16 %v4762_v38 }
 0xd15   :  { %v11691_v49 = vadd.f32 %v4713_v37, %v4694_v48 }
 0xd16   :  { %v4859_v11 = vmul.f32 %v4847_v17, %v4847_v17  ;;  %v4789_v51 = vpack.c.b16 %v4780_v59, %v4777_v63  ;;  %v6575_v63 = vld [vmem:[%s12416_s16 + $0xa8] sm:$0xf] }
 0xd17   :  { %v4735_v1 = vpop.f32.mrf.mxu0  ;;  %v4761_v27 = vpack.c.bf16 %v11691_v49, %v11687_v19  ;;  %v6576_v59 = vor.u32 %v6943_v44, %v6575_v63  ;;  %v6671_v17 = vld [vmem:[%s12416_s16 + $0x168] sm:$0xf]  ;;  %v6958_v44 = vld [vmem:[%s12416_s16 + $0x128] sm:$0xf0] }
 0xd18   :  { %v11665_v25 = vadd.f32 %v4754_v61, %v4735_v1  ;;  %v4842_v61 = vunpack.c.l.bf16 %v4759_v40  ;;  %v4868_v37 = vpack.c.bf16 %v4859_v11, %v4856_v2  ;;  %v6940_v2 = vld [vmem:[%s12416_s16 + $0x98] sm:$0xf0] }
 0xd19   :  { %v4778_v54 = vunpack.c.l.b16 %v4761_v27  ;;  %v4779_v0 = vunpack.c.h.b16 %v4761_v27  ;;  %v4845_v20 = vunpack.c.l.bf16 %v4761_v27  ;;  %v4846_v35 = vunpack.c.h.bf16 %v4761_v27  ;;  %5420 = vmatpush.bf16.msrb.mxu1 %v6576_v59  ;;  %v6731_v59 = vld [vmem:[%s12416_s16 + $0x1e0] sm:$0xf] }
 0xd1a   :  { %v4764_v4 = vpack.c.bf16 %v11665_v25, %v11665_v25  ;;  %v4854_v38 = vmul.f32 %v4842_v61, %v4842_v61  ;;  %v6937_v61 = vld [vmem:[%s12416_s16 + $0x80] sm:$0xf0] }
 0xd1b   :  { %v4787_v1 = vpack.c.b16 %v4778_v54, %v4775_v43  ;;  %v4858_v14 = vmul.f32 %v4846_v35, %v4846_v35 }
 0xd1c   :  { %v4716_v46 = vpop.f32.mrf.mxu3  ;;  %v4850_v15 = vunpack.c.l.bf16 %v4764_v4  ;;  %v4783_v62 = vunpack.c.l.b16 %v4764_v4 }
 0xd1d   :  { %v11673_v50 = vadd.f32 %v4716_v46, %v4697_v32  ;;  %v4843_v46 = vunpack.c.h.bf16 %v4759_v40  ;;  %v6991_v40 = vld [vmem:[%s12416_s16 + $0x230] sm:$0xf0] }
 0xd1e   :  { %v4862_v22 = vmul.f32 %v4850_v15, %v4850_v15 }
 0xd1f   :  { %v4737_v42 = vpop.f32.mrf.mxu0  ;;  %v4763_v39 = vpack.c.bf16 %v11673_v50, %v11679_v16 }
 0xd20   :  { %v11675_v29 = vadd.f32 %v4756_v45, %v4737_v42  ;;  %v4788_v45 = vpack.c.b16 %v4779_v0, %v4776_v21  ;;  %v4857_v42 = vmul.f32 %v4845_v20, %v4845_v20  ;;  %v6988_v0 = vld [vmem:[%s12416_s16 + $0x218] sm:$0xf0]  ;;  %v6565_v20 = vld [vmem:[%s12416_s16 + $0x9c] sm:$0xf0] }
 0xd21   :  { %v4781_v58 = vunpack.c.l.b16 %v4763_v39  ;;  %v4782_v23 = vunpack.c.h.b16 %v4763_v39  ;;  %v4848_v57 = vunpack.c.l.bf16 %v4763_v39  ;;  %v4849_v7 = vunpack.c.h.bf16 %v4763_v39 }
 0xd22   :  { %v4766_v24 = vpack.c.bf16 %v11675_v29, %v11675_v29 }
 0xd23   :  { %v4860_v48 = vmul.f32 %v4848_v57, %v4848_v57  ;;  %v4861_v32 = vmul.f32 %v4849_v7, %v4849_v7  ;;  %v6964_v57 = vld [vmem:[%s12416_s16 + $0x158] sm:$0xf0] }
 0xd24   :  { %v4786_v52 = vunpack.c.l.b16 %v4766_v24  ;;  %v4853_v55 = vunpack.c.l.bf16 %v4766_v24  ;;  %v4718_v26 = vpop.f32.mrf.mxu3  ;;  %v4866_v24 = vpack.c.bf16 %v4857_v42, %v4854_v38  ;;  %v6985_v42 = vld [vmem:[%s12416_s16 + $0x200] sm:$0xf0] }
 0xd25   :  { %v11697_v13 = vadd.f32 %v4718_v26, %v4699_v12 }
 0xd26   :  { %v4792_v34 = vpack.c.b16 %v4786_v52, %v4783_v62  ;;  %v4865_v8 = vmul.f32 %v4853_v55, %v4853_v55  ;;  %v4855_v62 = vmul.f32 %v4843_v46, %v4843_v46 }
 0xd27   :  { %v4765_v9 = vpack.c.bf16 %v11697_v13, %v11695_v18 }
 0xd28   :  { %v4871_v28 = vpack.c.bf16 %v4865_v8, %v4862_v22  ;;  %4835 = vmatpush.bf16.msra.mxu0 %v4792_v34  ;;  %v4867_v22 = vpack.c.bf16 %v4858_v14, %v4855_v62  ;;  %v6967_v34 = vld [vmem:[%s12416_s16 + $0x170] sm:$0xf0]  ;;  %v6767_v8 = vld [vmem:[%s12416_s16 + $0x228] sm:$0xf] }
 0xd29   :  { %v4784_v6 = vunpack.c.l.b16 %v4765_v9  ;;  %v4785_v5 = vunpack.c.h.b16 %v4765_v9  ;;  %v4851_v30 = vunpack.c.l.bf16 %v4765_v9  ;;  %v4852_v53 = vunpack.c.h.bf16 %v4765_v9 }
 0xd2a   :  { %v6672_v9 = vor.u32 %v6967_v34, %v6671_v17  ;;  %v6982_v17 = vld [vmem:[%s12416_s16 + $0x1e8] sm:$0xf0] }
 0xd2b   :  { %v4790_v56 = vpack.c.b16 %v4784_v6, %v4781_v58  ;;  %v4791_v3 = vpack.c.b16 %v4785_v5, %v4782_v23  ;;  %v4863_v41 = vmul.f32 %v4851_v30, %v4851_v30  ;;  %v4864_v10 = vmul.f32 %v4852_v53, %v4852_v53  ;;  %v6577_v58 = vld [vmem:[%s12416_s16 + $0xb4] sm:$0xf0]  ;;  %v6563_v53 = vld [vmem:[%s12416_s16 + $0x90] sm:$0xf] }
 0xd2c   :  { %4836 = vmatpush.bf16.msra.mxu0 %v4789_v51  ;;  %v6768_v6 = vor.u32 %v6991_v40, %v6767_v8  ;;  %v6564_v11 = vor.u32 %v6940_v2, %v6563_v53  ;;  %v6659_v51 = vld [vmem:[%s12416_s16 + $0x150] sm:$0xf]  ;;  %v6527_v53 = vld [vmem:[%s12416_s16 + $0x48] sm:$0xf]  ;;  %v6931_v2 = vld [vmem:[%s12416_s16 + $0x50] sm:$0xf0] }
 0xd2d   :  { %4809 = vmatpush.bf16.msrb.mxu2 %v4790_v56  ;;  %4822 = vmatpush.bf16.msra.mxu3 %v4791_v3  ;;  %v4869_v4 = vpack.c.bf16 %v4863_v41, %v4860_v48  ;;  %v4870_v15 = vpack.c.bf16 %v4864_v10, %v4861_v32  ;;  %v6755_v56 = vld [vmem:[%s12416_s16 + $0x210] sm:$0xf]  ;;  %v6660_v7 = vor.u32 %v6964_v57, %v6659_v51  ;;  %v6939_v41 = vld [vmem:[%s12416_s16 + $0x94] sm:$0xf]  ;;  %v6551_v48 = vld [vmem:[%s12416_s16 + $0x78] sm:$0xf] }
 0xd2e   :  { %5421 = vmatpush.bf16.msrb.mxu1 %v6564_v11  ;;  %v6756_v10 = vor.u32 %v6988_v0, %v6755_v56  ;;  %v6568_v35 = vor.u32 %v6939_v41, %v6565_v20  ;;  %v6552_v46 = vor.u32 %v6937_v61, %v6551_v48  ;;  %v6541_v40 = vld [vmem:[%s12416_s16 + $0x6c] sm:$0xf0]  ;;  %v6528_v51 = vor.u32 %v6931_v2, %v6527_v53  ;;  %v6623_v57 = vld [vmem:[%s12416_s16 + $0x108] sm:$0xf]  ;;  %v6955_v56 = vld [vmem:[%s12416_s16 + $0x110] sm:$0xf0] }
 0xd2f   :  { %6485 = vmatmul.msk.bf16.vlgmr.msra.gmra.mxu0 %vm4799_vm6, %v13180_v31  ;;  %v6624_v0 = vor.u32 %v6955_v56, %v6623_v57  ;;  %v6979_v41 = vld [vmem:[%s12416_s16 + $0x1d0] sm:$0xf0]  ;;  %v6930_v20 = vld [vmem:[%s12416_s16 + $0x4c] sm:$0xf]  ;;  %v6515_v48 = vld [vmem:[%s12416_s16 + $0x30] sm:$0xf] }
 0xd30   :  { %4904 = vmatpush.bf16.msrb.mxu0 %v4871_v28  ;;  %v6942_v28 = vld [vmem:[%s12416_s16 + $0xac] sm:$0xf]  ;;  %v6928_v61 = vld [vmem:[%s12416_s16 + $0x38] sm:$0xf0]  ;;  %v6491_v53 = vld [vmem:[%s12416_s16] sm:$0xf] }
 0xd31   :  { %4810 = vmatpush.bf16.msrb.mxu2 %v4787_v1  ;;  %4823 = vmatpush.bf16.msra.mxu3 %v4788_v45  ;;  %v6580_v5 = vor.u32 %v6942_v28, %v6577_v58  ;;  %v6961_v1 = vld [vmem:[%s12416_s16 + $0x140] sm:$0xf0]  ;;  %v6922_v2 = vld [vmem:[%s12416_s16 + $0x8] sm:$0xf0]  ;;  %v6683_v56 = vld [vmem:[%s12416_s16 + $0x180] sm:$0xf] }
 0xd32   :  { %5422 = vmatpush.bf16.msrb.mxu1 %v6552_v46  ;;  %v6516_v46 = vor.u32 %v6928_v61, %v6515_v48  ;;  %v6946_v57 = vld [vmem:[%s12416_s16 + $0xc8] sm:$0xf0] }
 0xd34   :  { %4905 = vmatpush.bf16.msrb.mxu0 %v4868_v37  ;;  %6483 = vmatmul.msk.bf16.vlgmr.msrb.gmra.mxu2 %vm4799_vm6, %v13180_v31  ;;  %v6647_v37 = vld [vmem:[%s12416_s16 + $0x138] sm:$0xf] }
 0xd35   :  { %4878 = vmatpush.bf16.msra.mxu2 %v4869_v4  ;;  %4891 = vmatpush.bf16.msrb.mxu3 %v4870_v15  ;;  %v6648_v45 = vor.u32 %v6961_v1, %v6647_v37  ;;  %v6743_v4 = vld [vmem:[%s12416_s16 + $0x1f8] sm:$0xf] }
 0xd36   :  { %6484 = vmatmul.msk.bf16.vlgmr.msra.gmra.mxu3 %vm4799_vm6, %v13180_v31  ;;  %v6744_v62 = vor.u32 %v6985_v42, %v6743_v4  ;;  %v6952_v4 = vld [vmem:[%s12416_s16 + $0xf8] sm:$0xf0] }
 0xd38   :  { %5477 = vmatpush.bf16.msra.mxu0 %v6580_v5 }
 0xd39   :  { %4879 = vmatpush.bf16.msra.mxu2 %v4866_v24  ;;  %4892 = vmatpush.bf16.msrb.mxu3 %v4867_v22  ;;  %v6936_v24 = vld [vmem:[%s12416_s16 + $0x7c] sm:$0xf]  ;;  %v6553_v22 = vld [vmem:[%s12416_s16 + $0x84] sm:$0xf0] }
 0xd3c   :  { %5478 = vmatpush.bf16.msra.mxu0 %v6568_v35 }
 0xd3d   :  { %5439 = vmatpush.bf16.msrb.mxu2 %v6672_v9  ;;  %5458 = vmatpush.bf16.msra.mxu3 %v6768_v6  ;;  %v6933_v9 = vld [vmem:[%s12416_s16 + $0x64] sm:$0xf] }
 0xd3e   :  { %v6544_v6 = vor.u32 %v6933_v9, %v6541_v40  ;;  %v6949_v9 = vld [vmem:[%s12416_s16 + $0xe0] sm:$0xf0]  ;;  %v6695_v40 = vld [vmem:[%s12416_s16 + $0x198] sm:$0xf] }
 0xd3f   :  { %6488 = vmatmul.msk.bf16.vlgmr.msrb.gmra.mxu0 %vm4799_vm6, %v13180_v31 }
 0xd41   :  { %5440 = vmatpush.bf16.msrb.mxu2 %v6660_v7  ;;  %5459 = vmatpush.bf16.msra.mxu3 %v6756_v10 }
 0xd44   :  { %6486 = vmatmul.msk.bf16.vlgmr.msra.gmra.mxu2 %vm4799_vm6, %v13180_v31 }
 0xd45   :  { %5441 = vmatpush.bf16.msrb.mxu2 %v6648_v45  ;;  %5460 = vmatpush.bf16.msra.mxu3 %v6744_v62  ;;  %v6611_v45 = vld [vmem:[%s12416_s16 + $0xf0] sm:$0xf] }
 0xd46   :  { %6487 = vmatmul.msk.bf16.vlgmr.msrb.gmra.mxu3 %vm4799_vm6, %v13180_v31  ;;  %v6612_v62 = vor.u32 %v6952_v4, %v6611_v45 }
 0xdac   :  { %v4838_v12 = vpop.f32.mrf.mxu0 }
 0xdad   :  { %v11717_v52 = vmul.f32 0.03125, %v4838_v12  ;;  %v6556_v12 = vor.u32 %v6936_v24, %v6553_v22  ;;  %v6707_v24 = vld [vmem:[%s12416_s16 + $0x1b0] sm:$0xf]  ;;  %v6976_v22 = vld [vmem:[%s12416_s16 + $0x1b8] sm:$0xf0] }
 0xdaf   :  { %v4919_v27 = vmul.f32 %v11717_v52, %v11717_v52  ;;  %5479 = vmatpush.bf16.msra.mxu0 %v6556_v12 }
 0xdb3   :  { %5480 = vmatpush.bf16.msra.mxu0 %v6544_v6  ;;  %v6924_v6 = vld [vmem:[%s12416_s16 + $0x1c] sm:$0xf] }
 0xdb4   :  { %v4840_v39 = vpop.f32.mrf.mxu0 }
 0xdb5   :  { %v6539_v39 = vld [vmem:[%s12416_s16 + $0x60] sm:$0xf] }
 0xdb7   :  { %v4812_v55 = vpop.f32.mrf.mxu2 }
 0xdb8   :  { %v11789_v15 = vmul.f32 0.03125, %v4812_v55  ;;  %v6934_v55 = vld [vmem:[%s12416_s16 + $0x68] sm:$0xf0] }
 0xdb9   :  { %v4825_v26 = vpop.f32.mrf.mxu3  ;;  %v6540_v63 = vor.u32 %v6934_v55, %v6539_v39  ;;  %v6708_v55 = vor.u32 %v6976_v22, %v6707_v24 }
 0xdba   :  { %v11791_v14 = vmul.f32 0.03125, %v4825_v26  ;;  %v6635_v26 = vld [vmem:[%s12416_s16 + $0x120] sm:$0xf]  ;;  %v4917_v28 = vmul.f32 %v11789_v15, %v11789_v15 }
 0xdbb   :  { %v6636_v8 = vor.u32 %v6958_v44, %v6635_v26  ;;  %5423 = vmatpush.bf16.msrb.mxu1 %v6540_v63  ;;  %v6927_v26 = vld [vmem:[%s12416_s16 + $0x34] sm:$0xf]  ;;  %v6517_v63 = vld [vmem:[%s12416_s16 + $0x3c] sm:$0xf0] }
 0xdbc   :  { %v4907_v23 = vpop.f32.mrf.mxu0  ;;  %v4918_v5 = vmul.f32 %v11791_v14, %v11791_v14 }
 0xdbd   :  { %v4916_v30 = vmul.f32 0.03125, %v4907_v23  ;;  %5442 = vmatpush.bf16.msrb.mxu2 %v6636_v8 }
 0xdbf   :  { %v4922_v3 = vsub.f32 %v4916_v30, %v4919_v27  ;;  %v4814_v54 = vpop.f32.mrf.mxu2  ;;  %v6732_v27 = vor.u32 %v6982_v17, %v6731_v59  ;;  %5424 = vmatpush.bf16.msrb.mxu1 %v6528_v51  ;;  %v6520_v59 = vor.u32 %v6927_v26, %v6517_v63  ;;  %v6503_v17 = vld [vmem:[%s12416_s16 + $0x18] sm:$0xf]  ;;  %v6587_v51 = vld [vmem:[%s12416_s16 + $0xc0] sm:$0xf] }
 0xdc1   :  { %v4827_v43 = vpop.f32.mrf.mxu3  ;;  %v4925_v21 = vmax.f32 %v4922_v3, 0.0  ;;  %5461 = vmatpush.bf16.msra.mxu3 %v6732_v27  ;;  %v6719_v3 = vld [vmem:[%s12416_s16 + $0x1c8] sm:$0xf]  ;;  %5443 = vmatpush.bf16.msrb.mxu2 %v6624_v0  ;;  %v6599_v27 = vld [vmem:[%s12416_s16 + $0xd8] sm:$0xf] }
 0xdc2   :  { %v6529_v43 = vld [vmem:[%s12416_s16 + $0x54] sm:$0xf0]  ;;  %v6970_v0 = vld [vmem:[%s12416_s16 + $0x188] sm:$0xf0] }
 0xdc3   :  { %v11781_v32 = vadd.f32 1e-05, %v4925_v21  ;;  %v6720_v21 = vor.u32 %v6979_v41, %v6719_v3  ;;  %v6532_v1 = vor.u32 %v6930_v20, %v6529_v43  ;;  %5425 = vmatpush.bf16.msrb.mxu1 %v6516_v46  ;;  %v6492_v3 = vor.u32 %v6922_v2, %v6491_v53  ;;  %v6921_v41 = vld [vmem:[%s12416_s16 + $0x4] sm:$0xf]  ;;  %v6493_v20 = vld [vmem:[%s12416_s16 + $0xc] sm:$0xf0] }
 0xdc4   :  { %v4909_v38 = vpop.f32.mrf.mxu0  ;;  %v6496_v61 = vor.u32 %v6921_v41, %v6493_v20  ;;  %v6571_v53 = vld [vmem:[%s12416_s16 + $0x98] sm:$0xf]  ;;  %v6941_v2 = vld [vmem:[%s12416_s16 + $0xa0] sm:$0xf0]  ;;  %v6649_v20 = vld [vmem:[%s12416_s16 + $0x144] sm:$0xf0] }
 0xdc5   :  { %7197 = vrsqrt.f32 %v11781_v32  ;;  %5462 = vmatpush.bf16.msra.mxu3 %v6720_v21  ;;  %5481 = vmatpush.bf16.msra.mxu0 %v6532_v1  ;;  %vm4955_vm9 = vweird.f32 %v11781_v32 }
 0xdc6   :  { %5444 = vmatpush.bf16.msrb.mxu2 %v6612_v62  ;;  %v6673_v62 = vld [vmem:[%s12416_s16 + $0x174] sm:$0xf0] }
 0xdc7   :  { %v4881_v34 = vpop.f32.mrf.mxu2 }
 0xdc8   :  { %v4914_v58 = vmul.f32 0.03125, %v4881_v34  ;;  %v6925_v34 = vld [vmem:[%s12416_s16 + $0x20] sm:$0xf0] }
 0xdc9   :  { %v4894_v23 = vpop.f32.mrf.mxu3  ;;  %v6504_v8 = vor.u32 %v6925_v34, %v6503_v17  ;;  %5463 = vmatpush.bf16.msra.mxu3 %v6708_v55  ;;  %5482 = vmatpush.bf16.msra.mxu0 %v6520_v59  ;;  %v6769_v55 = vld [vmem:[%s12416_s16 + $0x234] sm:$0xf0]  ;;  %v6944_v59 = vld [vmem:[%s12416_s16 + $0xb8] sm:$0xf0] }
 0xdca   :  { %v4915_v30 = vmul.f32 0.03125, %v4894_v23  ;;  %v4920_v11 = vsub.f32 %v4914_v58, %v4917_v28  ;;  %v6600_v58 = vor.u32 %v6949_v9, %v6599_v27  ;;  %v6973_v23 = vld [vmem:[%s12416_s16 + $0x1a0] sm:$0xf0]  ;;  %v6968_v27 = vld [vmem:[%s12416_s16 + $0x178] sm:$0xf0] }
 0xdcb   :  { %v11843_v54 = vpop.eup %7197  ;;  %5426 = vmatpush.bf16.msrb.mxu1 %v6504_v8 }
 0xdcc   :  { %v4921_v7 = vsub.f32 %v4915_v30, %v4918_v5  ;;  %v4950_v10 = vmul.f32 %v11843_v54, %v11781_v32  ;;  %v4923_v35 = vmax.f32 %v4920_v11, 0.0  ;;  %v6696_v5 = vor.u32 %v6973_v23, %v6695_v40  ;;  %v6505_v30 = vld [vmem:[%s12416_s16 + $0x24] sm:$0xf0]  ;;  %5445 = vmatpush.bf16.msrb.mxu2 %v6600_v58  ;;  %v6583_v32 = vld [vmem:[%s12416_s16 + $0xb0] sm:$0xf] }
 0xdcd   :  { %v6508_v11 = vor.u32 %v6924_v6, %v6505_v30  ;;  %vm4956_vm7 = vweird.f32 %v11843_v54  ;;  %v6584_v8 = vor.u32 %v6944_v59, %v6583_v32  ;;  %v6661_v58 = vld [vmem:[%s12416_s16 + $0x15c] sm:$0xf0]  ;;  %v6987_v23 = vld [vmem:[%s12416_s16 + $0x214] sm:$0xf]  ;;  %v6643_v59 = vld [vmem:[%s12416_s16 + $0x128] sm:$0xf] }
 0xdce   :  { %v4924_v37 = vmax.f32 %v4921_v7, 0.0  ;;  %v4951_v42 = vmul.f32 %v11843_v54, %v4950_v10  ;;  %v11869_v38 = vadd.f32 1e-05, %v4923_v35  ;;  %v6588_v7 = vor.u32 %v6946_v57, %v6587_v51  ;;  %5464 = vmatpush.bf16.msra.mxu3 %v6696_v5  ;;  %vm11961_vm10 = vmor %vm4955_vm9, %vm4956_vm7  ;;  %v6757_v30 = vld [vmem:[%s12416_s16 + $0x21c] sm:$0xf0] }
 0xdcf   :  { %v4883_v39 = vpop.f32.mrf.mxu2  ;;  %v6684_v10 = vor.u32 %v6970_v0, %v6683_v56  ;;  %5483 = vmatpush.bf16.msra.mxu0 %v6508_v11  ;;  %5427 = vmatpush.bf16.msrb.mxu1 %v6492_v3  ;;  %v6760_v11 = vor.u32 %v6987_v23, %v6757_v30  ;;  %v6572_v51 = vor.u32 %v6941_v2, %v6571_v53  ;;  %v6667_v57 = vld [vmem:[%s12416_s16 + $0x158] sm:$0xf]  ;;  %v6965_v56 = vld [vmem:[%s12416_s16 + $0x160] sm:$0xf0]  ;;  %v6960_v3 = vld [vmem:[%s12416_s16 + $0x13c] sm:$0xf] }
 0xdd0   :  { %v11877_v12 = vadd.f32 1e-05, %v4924_v37  ;;  %7199 = vrsqrt.f32 %v11869_v38  ;;  %v4952_v28 = vmul.f32 0.5, %v4951_v42  ;;  %5446 = vmatpush.bf16.msrb.mxu2 %v6588_v7  ;;  %v6966_v42 = vld [vmem:[%s12416_s16 + $0x16c] sm:$0xf]  ;;  %vm4935_vm15 = vweird.f32 %v11869_v38 }
 0xdd1   :  { %v4896_v44 = vpop.f32.mrf.mxu3  ;;  %v6676_v22 = vor.u32 %v6966_v42, %v6673_v62  ;;  %v6990_v39 = vld [vmem:[%s12416_s16 + $0x22c] sm:$0xf]  ;;  %v4289_v7 = vld [vmem:[%s12414_s14] sm:$0x7]  ;;  %v6668_v41 = vor.u32 %v6965_v56, %v6667_v57  ;;  %v6957_v62 = vld [vmem:[%s12416_s16 + $0x124] sm:$0xf] }
 0xdd2   :  { %7201 = vrsqrt.f32 %v11877_v12  ;;  %v4953_v21 = vsub.f32 1.5, %v4952_v28  ;;  %5465 = vmatpush.bf16.msra.mxu3 %v6684_v10  ;;  %vm4945_vm11 = vweird.f32 %v11877_v12  ;;  %v6772_v44 = vor.u32 %v6990_v39, %v6769_v55  ;;  %v6963_v28 = vld [vmem:[%s12416_s16 + $0x154] sm:$0xf]  ;;  %v6984_v10 = vld [vmem:[%s12416_s16 + $0x1fc] sm:$0xf] }
 0xdd3   :  { %5484 = vmatpush.bf16.msra.mxu0 %v6496_v61  ;;  %5496 = vmatpush.bf16.msra.mxu1 %v6676_v22  ;;  %v6664_v5 = vor.u32 %v6963_v28, %v6661_v58  ;;  %v6962_v42 = vld [vmem:[%s12416_s16 + $0x148] sm:$0xf0]  ;;  %v6981_v39 = vld [vmem:[%s12416_s16 + $0x1e4] sm:$0xf]  ;;  %v6733_v55 = vld [vmem:[%s12416_s16 + $0x1ec] sm:$0xf0] }
 0xdd4   :  { %v4954_v45 = vmul.f32 %v11843_v54, %v4953_v21  ;;  %5515 = vmatpush.bf16.msra.mxu2 %v6772_v44  ;;  %v6547_v44 = vld [vmem:[%s12416_s16 + $0x68] sm:$0xf]  ;;  %v6935_v32 = vld [vmem:[%s12416_s16 + $0x70] sm:$0xf0]  ;;  %v6736_v34 = vor.u32 %v6981_v39, %v6733_v55  ;;  %v6721_v2 = vld [vmem:[%s12416_s16 + $0x1d4] sm:$0xf0] }
 0xdd5   :  { %v6631_v57 = vld [vmem:[%s12416_s16 + $0x110] sm:$0xf] }
 0xdd6   :  { %v11935_v43 = vpop.eup %7199  ;;  %v4958_v9 = vsel %vm11961_vm10, %v11843_v54, %v4954_v45  ;;  %5534 = vmatpush.bf16.msrb.mxu3 %v6584_v8  ;;  %v6959_v8 = vld [vmem:[%s12416_s16 + $0x130] sm:$0xf0] }
 0xdd7   :  { %v4930_v48 = vmul.f32 %v11935_v43, %v11869_v38  ;;  %vm4936_vm14 = vweird.f32 %v11935_v43  ;;  %5497 = vmatpush.bf16.msra.mxu1 %v6664_v5  ;;  %v6745_v38 = vld [vmem:[%s12416_s16 + $0x204] sm:$0xf0]  ;;  %v4963_v21 = vrot.slane %v4958_v9, 6  ;;  %v6644_v28 = vor.u32 %v6959_v8, %v6643_v59  ;;  %v6625_v5 = vld [vmem:[%s12416_s16 + $0x114] sm:$0xf0] }
 0xdd8   :  { %v11937_v35 = vpop.eup %7201  ;;  %vm4937_vm1 = vmor %vm4935_vm15, %vm4936_vm14  ;;  %5516 = vmatpush.bf16.msra.mxu2 %v6760_v11  ;;  %v6748_v61 = vor.u32 %v6984_v10, %v6745_v38  ;;  %v6535_v11 = vld [vmem:[%s12416_s16 + $0x50] sm:$0xf]  ;;  %v6975_v10 = vld [vmem:[%s12416_s16 + $0x1b4] sm:$0xf] }
 0xdd9   :  { %v4940_v37 = vmul.f32 %v11937_v35, %v11877_v12  ;;  %v4931_v1 = vmul.f32 %v11935_v43, %v4930_v48  ;;  %vm4946_vm8 = vweird.f32 %v11937_v35  ;;  %v6679_v12 = vld [vmem:[%s12416_s16 + $0x170] sm:$0xf] }
 0xdda   :  { %vm11974_vm12 = vmor %vm4945_vm11, %vm4946_vm8  ;;  %v6680_v40 = vor.u32 %v6968_v27, %v6679_v12  ;;  %5535 = vmatpush.bf16.msrb.mxu3 %v6572_v51  ;;  %v6548_v12 = vor.u32 %v6935_v32, %v6547_v44  ;;  %v6932_v51 = vld [vmem:[%s12416_s16 + $0x58] sm:$0xf0] }
 0xddb   :  { %v4941_v46 = vmul.f32 %v11937_v35, %v4940_v37  ;;  %v4932_v4 = vmul.f32 0.5, %v4931_v1  ;;  %v6559_v37 = vld [vmem:[%s12416_s16 + $0x80] sm:$0xf]  ;;  %v6938_v1 = vld [vmem:[%s12416_s16 + $0x88] sm:$0xf0] }
 0xddc   :  { %5553 = vmatpush.bf16.msrb.mxu0 %v6680_v40  ;;  %v6560_v45 = vor.u32 %v6938_v1, %v6559_v37  ;;  %5517 = vmatpush.bf16.msra.mxu2 %v6748_v61  ;;  %v6523_v61 = vld [vmem:[%s12416_s16 + $0x38] sm:$0xf]  ;;  %v6929_v37 = vld [vmem:[%s12416_s16 + $0x40] sm:$0xf0] }
 0xddd   :  { %v4942_v24 = vmul.f32 0.5, %v4941_v46  ;;  %v4933_v63 = vsub.f32 1.5, %v4932_v4  ;;  %v6655_v4 = vld [vmem:[%s12416_s16 + $0x140] sm:$0xf] }
 0xdde   :  { %v6656_v22 = vor.u32 %v6962_v42, %v6655_v4  ;;  %5536 = vmatpush.bf16.msrb.mxu3 %v6560_v45  ;;  %v6619_v45 = vld [vmem:[%s12416_s16 + $0xf8] sm:$0xf]  ;;  %v6953_v4 = vld [vmem:[%s12416_s16 + $0x100] sm:$0xf0]  ;;  %v6948_v42 = vld [vmem:[%s12416_s16 + $0xdc] sm:$0xf] }
 0xddf   :  { %v4943_v17 = vsub.f32 1.5, %v4942_v24  ;;  %v4934_v6 = vmul.f32 %v11935_v43, %v4933_v63 }
 0xde0   :  { %5554 = vmatpush.bf16.msrb.mxu0 %v6668_v41  ;;  %5518 = vmatpush.bf16.msra.mxu2 %v6736_v34  ;;  %v6951_v41 = vld [vmem:[%s12416_s16 + $0xf4] sm:$0xf] }
 0xde1   :  { %v4944_v54 = vmul.f32 %v11937_v35, %v4943_v17  ;;  %v4938_v46 = vsel %vm4937_vm1, %v11935_v43, %v4934_v6  ;;  %v6637_v43 = vld [vmem:[%s12416_s16 + $0x12c] sm:$0xf0]  ;;  %v4290_v6 = vld [vmem:[%s12415_s15] sm:$0x7] }
 0xde2   :  { %v6640_v63 = vor.u32 %v6957_v62, %v6637_v43  ;;  %5537 = vmatpush.bf16.msrb.mxu3 %v6548_v12  ;;  %v6972_v43 = vld [vmem:[%s12416_s16 + $0x19c] sm:$0xf] }
 0xde3   :  { %v4948_v0 = vsel %vm11974_vm12, %v11937_v35, %v4944_v54  ;;  %v6652_v35 = vor.u32 %v6960_v3, %v6649_v20  ;;  %v6954_v54 = vld [vmem:[%s12416_s16 + $0x10c] sm:$0xf]  ;;  %v6613_v20 = vld [vmem:[%s12416_s16 + $0xfc] sm:$0xf0] }
 0xde4   :  { %v4962_v48 = vrot.slane %v4948_v0, 7  ;;  %5555 = vmatpush.bf16.msrb.mxu0 %v6656_v22  ;;  %v6601_v22 = vld [vmem:[%s12416_s16 + $0xe4] sm:$0xf0] }
 0xde5   :  { %5498 = vmatpush.bf16.msra.mxu1 %v6652_v35  ;;  %v6709_v35 = vld [vmem:[%s12416_s16 + $0x1bc] sm:$0xf0]  ;;  %v6604_v59 = vor.u32 %v6948_v42, %v6601_v22 }
 0xde6   :  { %v4964_v24 = vsel %vm3190_vm13, %v4938_v46, %v4962_v48 }
 0xde7   :  { %v4965_v26 = vsel %vm409_vm0, %v4964_v24, %v4963_v21  ;;  %v6524_v24 = vor.u32 %v6929_v37, %v6523_v61  ;;  %v6992_v61 = vld [vmem:[%s12416_s16 + $0x238] sm:$0xf0] }
 0xde8   :  { %v4967_v17 = vmul.f32 %v4965_v26, %v4289_v7  ;;  %5556 = vmatpush.bf16.msrb.mxu0 %v6644_v28  ;;  %v6628_v7 = vor.u32 %v6954_v54, %v6625_v5 }
 0xde9   :  { %5499 = vmatpush.bf16.msra.mxu1 %v6640_v63  ;;  %v6620_v63 = vor.u32 %v6953_v4, %v6619_v45 }
 0xdea   :  { %v12074_v27 = vperm.slane %v4967_v17, 0  ;;  %v12076_v9 = vperm.slane %v4967_v17, 1  ;;  %v12078_v40 = vperm.slane %v4967_v17, 2 }
 0xdec   :  { %v4976_v58 = vmul.f32 %v12076_v9, %v11791_v14  ;;  %v4977_v23 = vmul.f32 %v12078_v40, %v11717_v52  ;;  %v6978_v14 = vld [vmem:[%s12416_s16 + $0x1cc] sm:$0xf]  ;;  %v4975_v52 = vmul.f32 %v12074_v27, %v11789_v15  ;;  %v6956_v15 = vld [vmem:[%s12416_s16 + $0x118] sm:$0xf0]  ;;  %v4987_v3 = vmul.f32 %v12074_v27, %v11685_v60 }
 0xded   :  { %v6724_v0 = vor.u32 %v6978_v14, %v6721_v2  ;;  %v4990_v21 = vmul.f32 %v12074_v27, %v11687_v19  ;;  %v6536_v60 = vor.u32 %v6932_v51, %v6535_v11  ;;  %v6632_v48 = vor.u32 %v6956_v15, %v6631_v57  ;;  %5500 = vmatpush.bf16.msra.mxu1 %v6628_v7  ;;  %v6945_v11 = vld [vmem:[%s12416_s16 + $0xc4] sm:$0xf]  ;;  %v6589_v51 = vld [vmem:[%s12416_s16 + $0xcc] sm:$0xf0]  ;;  %v6499_v7 = vld [vmem:[%s12416_s16 + $0x8] sm:$0xf] }
 0xdee   :  { %v4981_v30 = vrot.slane %v4976_v58, 7  ;;  %v4982_v53 = vrot.slane %v4977_v23, 6  ;;  %v4988_v46 = vmul.f32 %v12076_v9, %v11689_v47  ;;  %v6616_v19 = vor.u32 %v6951_v41, %v6613_v20  ;;  %v6923_v41 = vld [vmem:[%s12416_s16 + $0x10] sm:$0xf0]  ;;  %v6595_v20 = vld [vmem:[%s12416_s16 + $0xc8] sm:$0xf] }
 0xdef   :  { %5519 = vmatpush.bf16.msra.mxu2 %v6724_v0  ;;  %v4991_v62 = vmul.f32 %v12076_v9, %v11691_v49  ;;  %5538 = vmatpush.bf16.msrb.mxu3 %v6536_v60  ;;  %v6712_v47 = vor.u32 %v6975_v10, %v6709_v35  ;;  %v6697_v49 = vld [vmem:[%s12416_s16 + $0x1a4] sm:$0xf0]  ;;  %v4989_v44 = vmul.f32 %v12078_v40, %v11667_v36  ;;  %v6511_v36 = vld [vmem:[%s12416_s16 + $0x20] sm:$0xf]  ;;  %v6947_v10 = vld [vmem:[%s12416_s16 + $0xd0] sm:$0xf0] }
 0xdf0   :  { %v4983_v56 = vsel %vm3190_vm13, %v4975_v52, %v4981_v30  ;;  %5557 = vmatpush.bf16.msrb.mxu0 %v6632_v48  ;;  %v4992_v32 = vmul.f32 %v12078_v40, %v11669_v33  ;;  %v6700_v23 = vor.u32 %v6972_v43, %v6697_v49  ;;  %v6926_v33 = vld [vmem:[%s12416_s16 + $0x28] sm:$0xf0]  ;;  %v6592_v60 = vor.u32 %v6945_v11, %v6589_v51  ;;  %v6775_v35 = vld [vmem:[%s12416_s16 + $0x230] sm:$0xf] }
 0xdf1   :  { %v4984_v38 = vsel %vm409_vm0, %v4983_v56, %v4982_v53  ;;  %5501 = vmatpush.bf16.msra.mxu1 %v6616_v19  ;;  %v6950_v30 = vld [vmem:[%s12416_s16 + $0xe8] sm:$0xf0]  ;;  %v6969_v56 = vld [vmem:[%s12416_s16 + $0x184] sm:$0xf]  ;;  %v6500_v37 = vor.u32 %v6923_v41, %v6499_v7  ;;  %v4993_v45 = vmul.f32 %v12074_v27, %v11679_v16  ;;  %v6776_v4 = vor.u32 %v6992_v61, %v6775_v35 }
 0xdf2   :  { %v4986_v1 = vsub.f32 %v4290_v6, %v4984_v38  ;;  %v6607_v6 = vld [vmem:[%s12416_s16 + $0xe0] sm:$0xf]  ;;  %v6512_v38 = vor.u32 %v6926_v33, %v6511_v36  ;;  %v6989_v19 = vld [vmem:[%s12416_s16 + $0x220] sm:$0xf0]  ;;  %v4996_v42 = vmul.f32 %v12074_v27, %v11695_v18  ;;  %v4995_v22 = vmul.f32 %v12078_v40, %v11665_v25  ;;  %v6986_v25 = vld [vmem:[%s12416_s16 + $0x208] sm:$0xf0] }
 0xdf3   :  { %5520 = vmatpush.bf16.msra.mxu2 %v6712_v47  ;;  %5539 = vmatpush.bf16.msrb.mxu3 %v6524_v24  ;;  %v4997_v47 = vmul.f32 %v12076_v9, %v11697_v13  ;;  %v4998_v16 = vmul.f32 %v12078_v40, %v11675_v29  ;;  %v6715_v36 = vld [vmem:[%s12416_s16 + $0x1b8] sm:$0xf]  ;;  %v6977_v33 = vld [vmem:[%s12416_s16 + $0x1c0] sm:$0xf0] }
 0xdf4   :  { %v12156_v39 = vperm.slane %v4986_v1, 0  ;;  %v12158_v55 = vperm.slane %v4986_v1, 1  ;;  %v12160_v26 = vperm.slane %v4986_v1, 2  ;;  %5558 = vmatpush.bf16.msrb.mxu0 %v6620_v63  ;;  %v6596_v1 = vor.u32 %v6947_v10, %v6595_v20 }
 0xdf5   :  { %5502 = vmatpush.bf16.msra.mxu1 %v6604_v59  ;;  %v6739_v59 = vld [vmem:[%s12416_s16 + $0x1e8] sm:$0xf] }
 0xdf6   :  { %v5006_v17 = vadd.f32 %v12156_v39, %v4987_v3  ;;  %v5009_v34 = vadd.f32 %v12156_v39, %v4990_v21  ;;  %v5007_v8 = vadd.f32 %v12158_v55, %v4988_v46  ;;  %v5010_v12 = vadd.f32 %v12158_v55, %v4991_v62  ;;  %v6685_v3 = vld [vmem:[%s12416_s16 + $0x18c] sm:$0xf0]  ;;  %v6763_v46 = vld [vmem:[%s12416_s16 + $0x218] sm:$0xf] }
 0xdf7   :  { %v5008_v28 = vadd.f32 %v12160_v26, %v4989_v44  ;;  %v5011_v58 = vadd.f32 %v12160_v26, %v4992_v32  ;;  %5521 = vmatpush.bf16.msra.mxu2 %v6700_v23  ;;  %v6608_v21 = vor.u32 %v6950_v30, %v6607_v6  ;;  %v6688_v48 = vor.u32 %v6969_v56, %v6685_v3  ;;  %v6971_v30 = vld [vmem:[%s12416_s16 + $0x190] sm:$0xf0] }
 0xdf8   :  { %v5018_v54 = vmax.f32 %v5006_v17, 0.0  ;;  %v5021_v5 = vmax.f32 %v5009_v34, 0.0  ;;  %v5019_v14 = vmax.f32 %v5007_v8, 0.0  ;;  %v5022_v52 = vmax.f32 %v5010_v12, 0.0  ;;  %5540 = vmatpush.bf16.msrb.mxu3 %v6512_v38  ;;  %v6983_v17 = vld [vmem:[%s12416_s16 + $0x1f0] sm:$0xf0] }
 0xdf9   :  { %v5020_v53 = vmax.f32 %v5008_v28, 0.0  ;;  %v5023_v2 = vmax.f32 %v5011_v58, 0.0  ;;  %5559 = vmatpush.bf16.msrb.mxu0 %v6608_v21  ;;  %5503 = vmatpush.bf16.msra.mxu1 %v6592_v60  ;;  %v4994_v62 = vmul.f32 %v12076_v9, %v11673_v50  ;;  %v5012_v24 = vadd.f32 %v12156_v39, %v4993_v45  ;;  %v6751_v50 = vld [vmem:[%s12416_s16 + $0x200] sm:$0xf]  ;;  %v6727_v28 = vld [vmem:[%s12416_s16 + $0x1d0] sm:$0xf] }
 0xdfa   :  { %v12193_v57 = vpack.c.bf16 %v5021_v5, %v5018_v54  ;;  %v12195_v15 = vpack.c.bf16 %v5022_v52, %v5019_v14  ;;  %v6764_v43 = vor.u32 %v6989_v19, %v6763_v46  ;;  %v5015_v63 = vadd.f32 %v12156_v39, %v4996_v42  ;;  %v6980_v58 = vld [vmem:[%s12416_s16 + $0x1d8] sm:$0xf0]  ;;  %v6703_v54 = vld [vmem:[%s12416_s16 + $0x1a0] sm:$0xf]  ;;  %v6974_v5 = vld [vmem:[%s12416_s16 + $0x1a8] sm:$0xf0] }
 0xdfb   :  { %v12206_v0 = vpack.c.bf16 %v5023_v2, %v5020_v53  ;;  %5522 = vmatpush.bf16.msra.mxu2 %v6688_v48  ;;  %v5013_v18 = vadd.f32 %v12158_v55, %v4994_v62  ;;  %v5016_v27 = vadd.f32 %v12158_v55, %v4997_v47  ;;  %v5014_v29 = vadd.f32 %v12160_v26, %v4995_v22  ;;  %v6691_v52 = vld [vmem:[%s12416_s16 + $0x188] sm:$0xf] }
 0xdfc   :  { %5428 = vmatmul.bf16.vlgmr.msrb.gmra.mxu1 %v12193_v57  ;;  %5447 = vmatmul.bf16.vlgmr.msrb.gmra.mxu2 %v12195_v15  ;;  %v5017_v13 = vadd.f32 %v12160_v26, %v4998_v16  ;;  %v6752_v9 = vor.u32 %v6986_v25, %v6751_v50  ;;  %v5024_v40 = vmax.f32 %v5012_v24, 0.0  ;;  %v5027_v39 = vmax.f32 %v5015_v63, 0.0 }
 0xdfd   :  { %5466 = vmatmul.bf16.vlgmr.msra.gmra.mxu3 %v12206_v0  ;;  %5485 = vmatmul.bf16.vlgmr.msra.gmra.mxu0 %v12193_v57  ;;  %v5025_v49 = vmax.f32 %v5013_v18, 0.0  ;;  %v5028_v55 = vmax.f32 %v5016_v27, 0.0  ;;  %v5026_v44 = vmax.f32 %v5014_v29, 0.0  ;;  %v6740_v26 = vor.u32 %v6983_v17, %v6739_v59 }
 0xdfe   :  { %5572 = vmatpush.bf16.msrb.mxu1 %v6776_v4  ;;  %5541 = vmatpush.bf16.msrb.mxu3 %v6500_v37  ;;  %v5029_v32 = vmax.f32 %v5017_v13, 0.0  ;;  %v5033_v34 = vpack.c.bf16 %v5027_v39, %v5024_v40  ;;  %v6728_v23 = vor.u32 %v6980_v58, %v6727_v28  ;;  %v6716_v6 = vor.u32 %v6977_v33, %v6715_v36 }
 0xdff   :  { %5560 = vmatpush.bf16.msrb.mxu0 %v6596_v1  ;;  %v5034_v8 = vpack.c.bf16 %v5028_v55, %v5025_v49  ;;  %v6704_v14 = vor.u32 %v6974_v5, %v6703_v54  ;;  %v6692_v53 = vor.u32 %v6971_v30, %v6691_v52 }
 0xe00   :  { %v5035_v12 = vpack.c.bf16 %v5029_v32, %v5026_v44 }
 0xe02   :  { %5573 = vmatpush.bf16.msrb.mxu1 %v6764_v43 }
 0xe06   :  { %5574 = vmatpush.bf16.msrb.mxu1 %v6752_v9 }
 0xe0a   :  { %5575 = vmatpush.bf16.msrb.mxu1 %v6740_v26 }
 0xe0c   :  { %5433 = vmatmul.bf16.gmra.mxu1 %v5033_v34  ;;  %5452 = vmatmul.bf16.gmra.mxu2 %v5034_v8 }
 0xe0d   :  { %5471 = vmatmul.bf16.gmra.mxu3 %v5035_v12  ;;  %5490 = vmatmul.bf16.gmra.mxu0 %v5033_v34 }
 0xe0e   :  { %5576 = vmatpush.bf16.msrb.mxu1 %v6728_v23 }
 0xe12   :  { %5577 = vmatpush.bf16.msrb.mxu1 %v6716_v6 }
 0xe16   :  { %5578 = vmatpush.bf16.msrb.mxu1 %v6704_v14 }
 0xe1a   :  { %5579 = vmatpush.bf16.msrb.mxu1 %v6692_v53 }
 0xe1c   :  { %5504 = vmatmul.bf16.vlgmr.msra.gmra.mxu1 %v12195_v15  ;;  %5523 = vmatmul.bf16.vlgmr.msra.gmra.mxu2 %v12206_v0 }
 0xe1d   :  { %5542 = vmatmul.bf16.vlgmr.msrb.gmra.mxu3 %v12193_v57  ;;  %5561 = vmatmul.bf16.vlgmr.msrb.gmra.mxu0 %v12195_v15 }
 0xe2c   :  { %5509 = vmatmul.bf16.gmra.mxu1 %v5034_v8  ;;  %5528 = vmatmul.bf16.gmra.mxu2 %v5035_v12 }
 0xe2d   :  { %5547 = vmatmul.bf16.gmra.mxu3 %v5033_v34  ;;  %5566 = vmatmul.bf16.gmra.mxu0 %v5034_v8 }
 0xe3c   :  { %5580 = vmatmul.bf16.vlgmr.msrb.gmra.mxu1 %v12206_v0 }
 0xe4c   :  { %5585 = vmatmul.bf16.gmra.mxu1 %v5035_v12 }
 0xe79   :  { %v5429_v2 = vpop.f32.mrf.mxu1 }
 0xe7a   :  { %v5486_v7 = vpop.f32.mrf.mxu0 }
 0xe7f   :  { %v5448_v11 = vpop.f32.mrf.mxu2 }
 0xe80   :  { %v5467_v56 = vpop.f32.mrf.mxu3  ;;  %v5449_v24 = vadd.f32 %v5448_v11, %v5429_v2 }
 0xe81   :  { %v5431_v51 = vpop.f32.mrf.mxu1 }
 0xe82   :  { %v5488_v38 = vpop.f32.mrf.mxu0  ;;  %v12304_v13 = vadd.f32 %v5467_v56, %v5449_v24 }
 0xe87   :  { %v5450_v3 = vpop.f32.mrf.mxu2 }
 0xe88   :  { %v5469_v10 = vpop.f32.mrf.mxu3  ;;  %v5451_v22 = vadd.f32 %v5450_v3, %v5431_v51 }
 0xe89   :  { %v5434_v41 = vpop.f32.mrf.mxu1 }
 0xe8a   :  { %v5491_v48 = vpop.f32.mrf.mxu0  ;;  %v12306_v9 = vadd.f32 %v5469_v10, %v5451_v22 }
 0xe8f   :  { %v5453_v20 = vpop.f32.mrf.mxu2 }
 0xe90   :  { %v5472_v60 = vpop.f32.mrf.mxu3  ;;  %v5454_v4 = vadd.f32 %v5453_v20, %v5434_v41 }
 0xe91   :  { %v5436_v57 = vpop.f32.mrf.mxu1 }
 0xe92   :  { %v5493_v0 = vpop.f32.mrf.mxu0  ;;  %v12298_v27 = vadd.f32 %v5472_v60, %v5454_v4 }
 0xe97   :  { %v5455_v15 = vpop.f32.mrf.mxu2 }
 0xe98   :  { %v5474_v37 = vpop.f32.mrf.mxu3  ;;  %v5456_v18 = vadd.f32 %v5455_v15, %v5436_v57 }
 0xe99   :  { %v5505_v21 = vpop.f32.mrf.mxu1 }
 0xe9a   :  { %v12294_v42 = vpop.f32.mrf.mxu0  ;;  %v5506_v16 = vadd.f32 %v5505_v21, %v5486_v7  ;;  %v12310_v49 = vadd.f32 %v5474_v37, %v5456_v18 }
 0xe9f   :  { %v5524_v35 = vpop.f32.mrf.mxu2 }
 0xea0   :  { %v12292_v19 = vpop.f32.mrf.mxu3  ;;  %v12300_v50 = vadd.f32 %v5524_v35, %v5506_v16 }
 0xea1   :  { %v5507_v61 = vpop.f32.mrf.mxu1  ;;  %v5563_v24 = vadd.f32 %v12294_v42, %v12292_v19 }
 0xea2   :  { %v5508_v43 = vadd.f32 %v5507_v61, %v5488_v38  ;;  %v5591_v44 = vpack.c.bf16 %v12300_v50, %v12304_v13  ;;  %v5564_v8 = vpop.f32.mrf.mxu0 }
 0xea4   :  { %v5670_v54 = vunpack.c.l.bf16 %v5591_v44  ;;  %v5607_v3 = vunpack.c.l.b16 %v5591_v44  ;;  %v5608_v7 = vunpack.c.h.b16 %v5591_v44  ;;  %v5671_v38 = vunpack.c.h.bf16 %v5591_v44 }
 0xea6   :  { %v5682_v35 = vmul.f32 %v5670_v54, %v5670_v54 }
 0xea7   :  { %v5526_v1 = vpop.f32.mrf.mxu2 }
 0xea8   :  { %v12302_v25 = vadd.f32 %v5526_v1, %v5508_v43  ;;  %v5545_v59 = vpop.f32.mrf.mxu3  ;;  %v5683_v1 = vmul.f32 %v5671_v38, %v5671_v38 }
 0xea9   :  { %v5510_v46 = vpop.f32.mrf.mxu1 }
 0xeaa   :  { %v5511_v62 = vadd.f32 %v5510_v46, %v5491_v48  ;;  %v5593_v32 = vpack.c.bf16 %v12302_v25, %v12306_v9  ;;  %v5567_v37 = vpop.f32.mrf.mxu0 }
 0xeac   :  { %v5673_v5 = vunpack.c.l.bf16 %v5593_v32  ;;  %v5610_v30 = vunpack.c.l.b16 %v5593_v32  ;;  %v5611_v53 = vunpack.c.h.b16 %v5593_v32  ;;  %v5674_v56 = vunpack.c.h.bf16 %v5593_v32 }
 0xeae   :  { %v5685_v57 = vmul.f32 %v5673_v5, %v5673_v5  ;;  %v5619_v15 = vpack.c.b16 %v5610_v30, %v5607_v3  ;;  %v5620_v21 = vpack.c.b16 %v5611_v53, %v5608_v7  ;;  %v5686_v61 = vmul.f32 %v5674_v56, %v5674_v56 }
 0xeaf   :  { %v5529_v45 = vpop.f32.mrf.mxu2 }
 0xeb0   :  { %v12296_v63 = vadd.f32 %v5529_v45, %v5511_v62  ;;  %v5548_v60 = vpop.f32.mrf.mxu3  ;;  %v5695_v46 = vpack.c.bf16 %v5686_v61, %v5683_v1  ;;  %v5565_v62 = vadd.f32 %v5564_v8, %v5545_v59 }
 0xeb1   :  { %v5512_v47 = vpop.f32.mrf.mxu1  ;;  %v5568_v4 = vadd.f32 %v5567_v37, %v5548_v60 }
 0xeb2   :  { %v5513_v29 = vadd.f32 %v5512_v47, %v5493_v0  ;;  %v5595_v40 = vpack.c.bf16 %v12296_v63, %v12298_v27  ;;  %v5694_v0 = vpack.c.bf16 %v5685_v57, %v5682_v35  ;;  %v5569_v43 = vpop.f32.mrf.mxu0 }
 0xeb4   :  { %v5613_v26 = vunpack.c.l.b16 %v5595_v40  ;;  %v5676_v12 = vunpack.c.l.bf16 %v5595_v40  ;;  %v5614_v58 = vunpack.c.h.b16 %v5595_v40  ;;  %v5677_v33 = vunpack.c.h.bf16 %v5595_v40 }
 0xeb6   :  { %v5688_v2 = vmul.f32 %v5676_v12, %v5676_v12  ;;  %v5689_v10 = vmul.f32 %v5677_v33, %v5677_v33 }
 0xeb7   :  { %v5531_v39 = vpop.f32.mrf.mxu2 }
 0xeb8   :  { %v12312_v55 = vadd.f32 %v5531_v39, %v5513_v29  ;;  %v5550_v22 = vpop.f32.mrf.mxu3 }
 0xeb9   :  { %v5581_v17 = vpop.f32.mrf.mxu1  ;;  %v5570_v29 = vadd.f32 %v5569_v43, %v5550_v22 }
 0xeba   :  { %v5597_v34 = vpack.c.bf16 %v12312_v55, %v12310_v49  ;;  %v12332_v18 = vadd.f32 %v5581_v17, %v5563_v24 }
 0xebc   :  { %v5616_v28 = vunpack.c.l.b16 %v5597_v34  ;;  %v5617_v23 = vunpack.c.h.b16 %v5597_v34  ;;  %v5679_v36 = vunpack.c.l.bf16 %v5597_v34  ;;  %v5680_v6 = vunpack.c.h.bf16 %v5597_v34 }
 0xebd   :  { %v5592_v59 = vpack.c.bf16 %v12332_v18, %v12332_v18 }
 0xebe   :  { %v5622_v14 = vpack.c.b16 %v5616_v28, %v5613_v26  ;;  %v5623_v52 = vpack.c.b16 %v5617_v23, %v5614_v58  ;;  %v5691_v11 = vmul.f32 %v5679_v36, %v5679_v36  ;;  %v5692_v51 = vmul.f32 %v5680_v6, %v5680_v6 }
 0xebf   :  { %v5672_v12 = vunpack.c.l.bf16 %v5592_v59  ;;  %v5609_v33 = vunpack.c.l.b16 %v5592_v59 }
 0xec0   :  { %5637 = vmatpush.bf16.msrb.mxu2 %v5622_v14  ;;  %5650 = vmatpush.bf16.msra.mxu3 %v5623_v52  ;;  %v5697_v20 = vpack.c.bf16 %v5691_v11, %v5688_v2  ;;  %v5698_v48 = vpack.c.bf16 %v5692_v51, %v5689_v10 }
 0xec1   :  { %v5583_v41 = vpop.f32.mrf.mxu1  ;;  %v5684_v5 = vmul.f32 %v5672_v12, %v5672_v12 }
 0xec2   :  { %5706 = vmatpush.bf16.msra.mxu1 %v5697_v20  ;;  %v12330_v16 = vadd.f32 %v5583_v41, %v5565_v62 }
 0xec4   :  { %5638 = vmatpush.bf16.msrb.mxu2 %v5619_v15  ;;  %5651 = vmatpush.bf16.msra.mxu3 %v5620_v21  ;;  %v5594_v44 = vpack.c.bf16 %v12330_v16, %v12330_v16 }
 0xec6   :  { %5707 = vmatpush.bf16.msra.mxu1 %v5694_v0  ;;  %v5675_v34 = vunpack.c.l.bf16 %v5594_v44  ;;  %v5612_v28 = vunpack.c.l.b16 %v5594_v44 }
 0xec7   :  { %6777 = vmatmul.msk.bf16.vlgmr.msrb.gmra.mxu2 %vm4799_vm6, %v13180_v31  ;;  %6778 = vmatmul.msk.bf16.vlgmr.msra.gmra.mxu3 %vm4799_vm6, %v13180_v31 }
 0xec8   :  { %5719 = vmatpush.bf16.msra.mxu2 %v5698_v48  ;;  %v5687_v6 = vmul.f32 %v5675_v34, %v5675_v34  ;;  %v5621_v14 = vpack.c.b16 %v5612_v28, %v5609_v33 }
 0xec9   :  { %v5586_v45 = vpop.f32.mrf.mxu1  ;;  %6780 = vmatmul.msk.bf16.vlgmr.msra.gmra.mxu1 %vm4799_vm6, %v13180_v31 }
 0xeca   :  { %v12326_v47 = vadd.f32 %v5586_v45, %v5568_v4  ;;  %v5696_v52 = vpack.c.bf16 %v5687_v6, %v5684_v5 }
 0xecc   :  { %5720 = vmatpush.bf16.msra.mxu2 %v5695_v46  ;;  %v5596_v40 = vpack.c.bf16 %v12326_v47, %v12326_v47 }
 0xece   :  { %v5678_v19 = vunpack.c.l.bf16 %v5596_v40  ;;  %v5615_v17 = vunpack.c.l.b16 %v5596_v40 }
 0xed0   :  { %v5690_v58 = vmul.f32 %v5678_v19, %v5678_v19 }
 0xed1   :  { %v5588_v39 = vpop.f32.mrf.mxu1 }
 0xed2   :  { %v12338_v32 = vadd.f32 %v5588_v39, %v5570_v29 }
 0xed4   :  { %v5598_v42 = vpack.c.bf16 %v12338_v32, %v12338_v32 }
 0xed6   :  { %v5618_v8 = vunpack.c.l.b16 %v5598_v42  ;;  %v5681_v26 = vunpack.c.l.bf16 %v5598_v42 }
 0xed7   :  { %6781 = vmatmul.msk.bf16.vlgmr.msra.gmra.mxu2 %vm4799_vm6, %v13180_v31 }
 0xed8   :  { %v5624_v23 = vpack.c.b16 %v5618_v8, %v5615_v17  ;;  %v5693_v36 = vmul.f32 %v5681_v26, %v5681_v26 }
 0xeda   :  { %v5699_v54 = vpack.c.bf16 %v5693_v36, %v5690_v58  ;;  %5663 = vmatpush.bf16.msra.mxu0 %v5624_v23 }
 0xedc   :  { %5732 = vmatpush.bf16.msrb.mxu3 %v5699_v54 }
 0xede   :  { %5664 = vmatpush.bf16.msra.mxu0 %v5621_v14 }
 0xee0   :  { %5733 = vmatpush.bf16.msrb.mxu3 %v5696_v52 }
 0xee1   :  { %6779 = vmatmul.msk.bf16.vlgmr.msra.gmra.mxu0 %vm4799_vm6, %v13180_v31 }
 0xee3   :  { %6782 = vmatmul.msk.bf16.vlgmr.msrb.gmra.mxu3 %vm4799_vm6, %v13180_v31 }
 0xf46   :  { %v5709_v30 = vpop.f32.mrf.mxu1 }
 0xf47   :  { %v5742_v41 = vmul.f32 0.03125, %v5709_v30  ;;  %v4387_v30 = vld [vmem:[%s12417_s17] sm:$0x7] }
 0xf4a   :  { %v5640_v53 = vpop.f32.mrf.mxu2  ;;  %v5653_v2 = vpop.f32.mrf.mxu3 }
 0xf4b   :  { %v12350_v51 = vmul.f32 0.03125, %v5640_v53  ;;  %v12354_v20 = vmul.f32 0.03125, %v5653_v2 }
 0xf4d   :  { %v5745_v7 = vmul.f32 %v12350_v51, %v12350_v51  ;;  %v5746_v38 = vmul.f32 %v12354_v20, %v12354_v20 }
 0xf4e   :  { %v5711_v11 = vpop.f32.mrf.mxu1 }
 0xf4f   :  { %v5748_v10 = vsub.f32 %v5742_v41, %v5745_v7 }
 0xf51   :  { %v5751_v15 = vmax.f32 %v5748_v10, 0.0 }
 0xf52   :  { %v5642_v56 = vpop.f32.mrf.mxu2  ;;  %v5655_v3 = vpop.f32.mrf.mxu3 }
 0xf53   :  { %v5754_v35 = vadd.f32 1e-05, %v5751_v15 }
 0xf55   :  { %vm5763_vm6 = vweird.f32 %v5754_v35 }
 0xf5a   :  { %v5722_v57 = vpop.f32.mrf.mxu2 }
 0xf5b   :  { %v5743_v31 = vmul.f32 0.03125, %v5722_v57 }
 0xf5d   :  { %v5749_v21 = vsub.f32 %v5743_v31, %v5746_v38 }
 0xf5e   :  { %v5666_v60 = vpop.f32.mrf.mxu0 }
 0xf5f   :  { %v5752_v48 = vmax.f32 %v5749_v21, 0.0  ;;  %v5741_v37 = vmul.f32 0.03125, %v5666_v60  ;;  %v4388_v21 = vld [vmem:[%s12418_s18] sm:$0x7] }
 0xf61   :  { %v5755_v61 = vadd.f32 1e-05, %v5752_v48  ;;  %v5747_v1 = vmul.f32 %v5741_v37, %v5741_v37 }
 0xf62   :  { %v5724_v0 = vpop.f32.mrf.mxu2 }
 0xf63   :  { %7203 = vrsqrt.f32 %v5755_v61  ;;  %vm5773_vm3 = vweird.f32 %v5755_v61 }
 0xf64   :  { %7205 = vrsqrt.f32 %v5754_v35 }
 0xf66   :  { %v5735_v46 = vpop.f32.mrf.mxu3  ;;  %v5668_v45 = vpop.f32.mrf.mxu0 }
 0xf67   :  { %v5744_v4 = vmul.f32 0.03125, %v5735_v46 }
 0xf69   :  { %v7204_v62 = vpop.eup %7203  ;;  %v5750_v24 = vsub.f32 %v5744_v4, %v5747_v1 }
 0xf6a   :  { %v7206_v22 = vpop.eup %7205  ;;  %v5768_v43 = vmul.f32 %v7204_v62, %v5755_v61  ;;  %vm5774_vm2 = vweird.f32 %v7204_v62 }
 0xf6b   :  { %v5753_v29 = vmax.f32 %v5750_v24, 0.0  ;;  %v5758_v39 = vmul.f32 %v7206_v22, %v5754_v35  ;;  %vm5775_vm4 = vmor %vm5773_vm3, %vm5774_vm2  ;;  %vm5764_vm7 = vweird.f32 %v7206_v22 }
 0xf6c   :  { %v5769_v40 = vmul.f32 %v7204_v62, %v5768_v43  ;;  %vm5765_vm10 = vmor %vm5763_vm6, %vm5764_vm7 }
 0xf6d   :  { %v5756_v44 = vadd.f32 1e-05, %v5753_v29  ;;  %v5759_v42 = vmul.f32 %v7206_v22, %v5758_v39 }
 0xf6e   :  { %v5737_v59 = vpop.f32.mrf.mxu3  ;;  %v5770_v19 = vmul.f32 0.5, %v5769_v40 }
 0xf6f   :  { %7207 = vrsqrt.f32 %v5756_v44  ;;  %v5760_v8 = vmul.f32 0.5, %v5759_v42  ;;  %vm5783_vm8 = vweird.f32 %v5756_v44 }
 0xf70   :  { %v5771_v34 = vsub.f32 1.5, %v5770_v19 }
 0xf71   :  { %v5761_v58 = vsub.f32 1.5, %v5760_v8 }
 0xf72   :  { %v5772_v12 = vmul.f32 %v7204_v62, %v5771_v34 }
 0xf73   :  { %v5762_v6 = vmul.f32 %v7206_v22, %v5761_v58 }
 0xf74   :  { %v5776_v36 = vsel %vm5775_vm4, %v7204_v62, %v5772_v12 }
 0xf75   :  { %v7208_v17 = vpop.eup %7207  ;;  %v5790_v54 = vrot.slane %v5776_v36, 7  ;;  %v5766_v52 = vsel %vm5765_vm10, %v7206_v22, %v5762_v6 }
 0xf76   :  { %v5778_v26 = vmul.f32 %v7208_v17, %v5756_v44  ;;  %vm5784_vm5 = vweird.f32 %v7208_v17 }
 0xf77   :  { %vm5785_vm9 = vmor %vm5783_vm8, %vm5784_vm5  ;;  %v5792_v2 = vsel %vm3190_vm13, %v5766_v52, %v5790_v54 }
 0xf78   :  { %v5779_v28 = vmul.f32 %v7208_v17, %v5778_v26 }
 0xf7a   :  { %v5780_v23 = vmul.f32 0.5, %v5779_v28 }
 0xf7c   :  { %v5781_v33 = vsub.f32 1.5, %v5780_v23 }
 0xf7e   :  { %v5782_v5 = vmul.f32 %v7208_v17, %v5781_v33 }
 0xf80   :  { %v5786_v14 = vsel %vm5785_vm9, %v7208_v17, %v5782_v5 }
 0xf81   :  { %v5791_v53 = vrot.slane %v5786_v14, 6 }
 0xf83   :  { %v5793_v11 = vsel %vm409_vm0, %v5792_v2, %v5791_v53 }
 0xf84   :  { %v5795_v56 = vmul.f32 %v5793_v11, %v4387_v30 }
 0xf86   :  { %v5797_v3 = vperm.slane %v5795_v56, 0  ;;  %v5798_v7 = vperm.slane %v5795_v56, 1  ;;  %v5799_v41 = vperm.slane %v5795_v56, 2 }
 0xf88   :  { %v5804_v10 = vmul.f32 %v5798_v7, %v12354_v20  ;;  %v5805_v57 = vmul.f32 %v5799_v41, %v5741_v37  ;;  %v5803_v38 = vmul.f32 %v5797_v3, %v12350_v51  ;;  %v5815_v61 = vmul.f32 %v5797_v3, %v12304_v13 }
 0xf89   :  { %v5816_v0 = vmul.f32 %v5798_v7, %v12300_v50  ;;  %v5817_v20 = vmul.f32 %v5799_v41, %v12332_v18  ;;  %v5818_v37 = vmul.f32 %v5797_v3, %v12306_v9  ;;  %v5819_v51 = vmul.f32 %v5798_v7, %v12302_v25 }
 0xf8a   :  { %v5809_v31 = vrot.slane %v5804_v10, 7  ;;  %v5810_v15 = vrot.slane %v5805_v57, 6  ;;  %v5820_v1 = vmul.f32 %v5799_v41, %v12330_v16  ;;  %v5821_v46 = vmul.f32 %v5797_v3, %v12298_v27 }
 0xf8b   :  { %v5822_v45 = vmul.f32 %v5798_v7, %v12296_v63  ;;  %v5823_v22 = vmul.f32 %v5799_v41, %v12326_v47  ;;  %v5824_v13 = vmul.f32 %v5797_v3, %v12310_v49  ;;  %v5825_v50 = vmul.f32 %v5798_v7, %v12312_v55 }
 0xf8c   :  { %v5811_v60 = vsel %vm3190_vm13, %v5803_v38, %v5809_v31  ;;  %v5826_v18 = vmul.f32 %v5799_v41, %v12338_v32 }
 0xf8d   :  { %v5812_v48 = vsel %vm409_vm0, %v5811_v60, %v5810_v15 }
 0xf8e   :  { %v5814_v35 = vsub.f32 %v4388_v21, %v5812_v48 }
 0xf90   :  { %v5828_v4 = vperm.slane %v5814_v35, 0  ;;  %v5829_v62 = vperm.slane %v5814_v35, 1  ;;  %v5830_v24 = vperm.slane %v5814_v35, 2 }
 0xf92   :  { %v5834_v9 = vadd.f32 %v5828_v4, %v5815_v61  ;;  %v5835_v43 = vadd.f32 %v5829_v62, %v5816_v0  ;;  %v5836_v25 = vadd.f32 %v5830_v24, %v5817_v20  ;;  %v5837_v29 = vadd.f32 %v5828_v4, %v5818_v37 }
 0xf93   :  { %v5838_v16 = vadd.f32 %v5829_v62, %v5819_v51  ;;  %v5839_v40 = vadd.f32 %v5830_v24, %v5820_v1  ;;  %v5840_v27 = vadd.f32 %v5828_v4, %v5821_v46  ;;  %v5841_v39 = vadd.f32 %v5829_v62, %v5822_v45 }
 0xf94   :  { %v5842_v63 = vadd.f32 %v5830_v24, %v5823_v22  ;;  %v5843_v44 = vadd.f32 %v5828_v4, %v5824_v13  ;;  %v5844_v59 = vadd.f32 %v5829_v62, %v5825_v50  ;;  %v5845_v19 = vadd.f32 %v5830_v24, %v5826_v18 }
 0xf95   :  { %v5846_v42 = vmax.f32 %v5834_v9, 0.0  ;;  %v5847_v47 = vmax.f32 %v5835_v43, 0.0  ;;  %v5848_v34 = vmax.f32 %v5836_v25, 0.0  ;;  %v5849_v49 = vmax.f32 %v5837_v29, 0.0 }
 0xf96   :  { %v5850_v17 = vmax.f32 %v5838_v16, 0.0  ;;  %v5851_v55 = vmax.f32 %v5839_v40, 0.0  ;;  %v5852_v8 = vmax.f32 %v5840_v27, 0.0  ;;  %v5853_v32 = vmax.f32 %v5841_v39, 0.0 }
 0xf97   :  { %v5854_v26 = vmax.f32 %v5842_v63, 0.0  ;;  %v5855_v12 = vmax.f32 %v5843_v44, 0.0  ;;  %v5856_v28 = vmax.f32 %v5844_v59, 0.0  ;;  %v5858_v58 = vpack.c.bf16 %v5847_v47, %v5846_v42 }
 0xf98   :  { %v5859_v23 = vpack.c.bf16 %v5848_v34, %v5848_v34  ;;  %v5860_v36 = vpack.c.bf16 %v5850_v17, %v5849_v49  ;;  %v5857_v33 = vmax.f32 %v5845_v19, 0.0  ;;  %v5861_v6 = vpack.c.bf16 %v5851_v55, %v5851_v55 }
 0xf99   :  { %v5862_v54 = vpack.c.bf16 %v5853_v32, %v5852_v8  ;;  %5866 = vst [vmem:[%s12420_s21] sm:$0xff] %v5858_v58  ;;  %v5863_v5 = vpack.c.bf16 %v5854_v26, %v5854_v26  ;;  %v5864_v14 = vpack.c.bf16 %v5856_v28, %v5855_v12 }
 0xf9a   :  { %5867 = vst [vmem:[%s12420_s21 + $0x8] sm:$0xf] %v5859_v23  ;;  %v5865_v52 = vpack.c.bf16 %v5857_v33, %v5857_v33 }
 0xf9b   :  { %5868 = vst [vmem:[%s12420_s21 + $0xc] sm:$0xff] %v5860_v36 }
 0xf9c   :  { %5869 = vst [vmem:[%s12420_s21 + $0x14] sm:$0xf] %v5861_v6 }
 0xf9d   :  { %5870 = vst [vmem:[%s12420_s21 + $0x18] sm:$0xff] %v5862_v54 }
 0xf9e   :  { %5871 = vst [vmem:[%s12420_s21 + $0x20] sm:$0xf] %v5863_v5 }
 0xf9f   :  { %5872 = vst [vmem:[%s12420_s21 + $0x24] sm:$0xff] %v5864_v14 }
 0xfa0   :  { %5873 = vst [vmem:[%s12420_s21 + $0x2c] sm:$0xf] %v5865_v52 }
 0xfa1   :  { %7209 = dma.done.wait [#allocation4], 4096 }
 0xfa2   :  { %7210 = vsyncadd [#allocation4], 4294963200 }
 0xfa3   :  { %7211 = dma.done.wait [#allocation4 + $0x1], 2048 }
 0xfa4   :  { %7212 = vsyncadd [#allocation4 + $0x1], 4294965248 }
 0xfa5   :  { %5886 = vsyncmov [#allocation4] }
 0xfa8   :  { %s5887_s5 = vpop.sfrf %5886 }
 0xfa9   :  { %p6783_p0 = scmp.ne.s32.totalorder %s5887_s5, 0 }
 0xfab   :  { %5891 = shalt.err (%p6783_p0)  }
 0xfac   :  { %5893 = vsyncmov [#allocation4 + $0x1] }
 0xfaf   :  { %s5894_s15 = vpop.sfrf %5893 }
 0xfb0   :  { %p6784_p1 = scmp.ne.s32.totalorder %s5894_s15, 0 }
 0xfb2   :  { %5898 = shalt.err (%p6784_p1)  }

</bundles_post_ra>
